<compile_context>
chip_gen: v5e
topology: v5e:2x2
jax: 0.10.0
libtpu: 0.0.40
codegen_flags: <defaults>
</compile_context>

<pallas_src>
import numpy as np
import jax
import jax.numpy as jnp
from jax.experimental import pallas as pl
from jax.experimental.pallas import tpu as pltpu

N_ANCHOR = 9  # len(ratios)=3 * len(anchor_scales)=3  (generate_anchor_base)


def _cdiv(a, b):
    return -(-a // b)


def _round_up(a, b):
    return _cdiv(a, b) * b


def _pick_tiling(n_rows, halo, tm_target=512):
    """Pick (tile_rows, n_tiles, halo_block).

    tile_rows is a multiple of the halo block (keeps the halo index_map an
    exact block index) and, when possible, the tile count is even so both v7x
    TensorCores get the same number of tiles.
    """
    hb = _round_up(halo, 8)
    tm = max(hb, _round_up(tm_target, hb))
    n = _cdiv(n_rows, tm)
    if n > 1 and n % 2:
        tm2 = max(hb, _round_up(_cdiv(n_rows, n + 1), hb))
        if _cdiv(n_rows, tm2) % 2 == 0:
            tm = tm2
            n = _cdiv(n_rows, tm)
    return tm, n, hb


def _softmax_lastdim_kernel(x_ref, o_ref):
    x = x_ref[...].astype(jnp.float32)
    m = jnp.max(x, axis=-1, keepdims=True)
    e = jnp.exp(x - m)
    o_ref[...] = (e / jnp.sum(e, axis=-1, keepdims=True)).astype(o_ref.dtype)


def rpn_forward(x_nchw, params, tm_target=512):
    """Pallas version of RegionProposalNetwork.forward (conv head + softmax).

    Returns (rpn_locs, rpn_scores, rpn_fg_scores) matching the PyTorch
    intermediates.
    """
    w1, b1, wloc, bloc, wsc, bsc = params
    N, C, H, W = x_nchw.shape
    Cmid = w1.shape[0]
    A4 = wloc.shape[0]          # n_anchor * 4
    A2 = wsc.shape[0]           # n_anchor * 2
    Hp = H + 2                  # zero-padded height for the 3x3 conv
    Wr = _round_up(W + 2, 8)    # padded width, rounded so dh*Wr is 8-aligned
    Cp = _round_up(C, 128)      # lane-padded channels (no-op at C=512)
    NH = 128                    # fused loc+score head width (lane-dense)
    assert A4 + A2 <= NH

    # ---- flatten the zero-padded NHWC input to (rows, Cp), bf16 ----
    x = jnp.transpose(x_nchw, (0, 2, 3, 1)).astype(jnp.bfloat16)       # NHWC
    xp = jnp.pad(x, ((0, 0), (1, 1), (1, Wr - W - 1), (0, Cp - C)))    # (N,Hp,Wr,Cp)
    P = N * Hp * Wr
    XP = xp.reshape(P, Cp)

    halo = 2 * Wr + 2                       # largest row offset of the 9 taps
    tm, n_tiles, hb = _pick_tiling(P, halo, tm_target)
    assert tm % hb == 0 and hb >= halo
    M_out = n_tiles * tm
    # The halo block of tile i reads rows [(i+1)*tm, (i+1)*tm + hb).  Pad XP so
    # the last tile's halo stays in bounds: Pallas/VMEM windows have NO runtime
    # bounds check, so this padding is load-bearing.  Bottom-of-image rows tap
    # into the next image's rows; those conv outputs are discarded below.
    M_pad = M_out + hb
    XP = jnp.pad(XP, ((0, M_pad - P), (0, 0)))

    # ---- weights in matmul layout: bf16 operands, f32 biases ----
    w1_p = jnp.pad(w1, ((0, 0), (0, Cp - C), (0, 0), (0, 0)))          # (Cmid,Cp,3,3)
    w1_mat = jnp.transpose(w1_p, (2, 3, 1, 0)).reshape(9 * Cp, Cmid)   # (9Cp, Cmid)
    w1_mat = w1_mat.astype(jnp.bfloat16)
    wh = jnp.zeros((Cmid, NH), jnp.float32)                            # fused head
    wh = wh.at[:, :A4].set(wloc.reshape(A4, Cmid).T)
    wh = wh.at[:, A4:A4 + A2].set(wsc.reshape(A2, Cmid).T)
    wh = wh.astype(jnp.bfloat16)
    b1_r = b1.reshape(1, Cmid).astype(jnp.float32)
    bh = jnp.zeros((1, NH), jnp.float32)
    bh = bh.at[0, :A4].set(bloc).at[0, A4:A4 + A2].set(bsc)

    # tap offsets: dh*Wr components are 8-aligned, only dw in {1,2} shift rows
    offs = tuple(dh * Wr + dw for dh in range(3) for dw in range(3))

    def head_kernel(xc_ref, xh_ref, w1_ref, b1_ref, wh_ref, bh_ref,
                    out_ref, win_ref, col_ref):
        # window = current tile + small halo block (f32 scratch so the +1/+2
        # row shifts below stay at 32-bit sublane granularity)
        win_ref[pl.ds(0, tm), :] = xc_ref[...].astype(jnp.float32)
        win_ref[pl.ds(tm, hb), :] = xh_ref[...].astype(jnp.float32)
        # im2col: nine shifted (tm, Cp) row views packed side by side along
        # lanes; every destination offset is a multiple of 128 -> unmasked vst
        for k, off in enumerate(offs):
            col_ref[:, k * Cp:(k + 1) * Cp] = (
                win_ref[pl.ds(off, tm), :].astype(jnp.bfloat16))
        # 3x3 conv as ONE long-K bf16 MXU matmul, f32 accumulation
        h = jnp.dot(col_ref[...], w1_ref[...],
                    preferred_element_type=jnp.float32)
        h = jnp.maximum(h + b1_ref[...], 0.0).astype(jnp.bfloat16)
        # fused loc+score 1x1 convs: single lane-dense (tm, 128) matmul
        out = jnp.dot(h, wh_ref[...],
                      preferred_element_type=jnp.float32) + bh_ref[...]
        out_ref[...] = out.astype(out_ref.dtype)

    flops = 2 * M_out * (9 * Cp * Cmid + Cmid * NH)
    bytes_acc = ((M_out + n_tiles * hb) * Cp * 2        # input + small halos (bf16)
                 + (9 * Cp * Cmid + Cmid * NH) * 2      # weights (bf16)
                 + (Cmid + NH) * 4                      # biases (f32)
                 + M_out * NH * 2)                      # bf16 output slab
    # right-sized VMEM: double-buffered IO blocks + the two scratch buffers
    vmem_need = (2 * ((tm + hb) * Cp + 9 * Cp * Cmid + Cmid * NH + tm * NH) * 2
                 + 2 * (Cmid + NH) * 4
                 + (tm + hb) * Cp * 4 + tm * 9 * Cp * 2)
    vmem_limit = int(min(64 * 2**20, max(16 * 2**20, 1.5 * vmem_need)))

    out = pl.pallas_call(
        head_kernel,
        out_shape=jax.ShapeDtypeStruct((M_out, NH), jnp.bfloat16),
        grid=(n_tiles,),
        in_specs=[
            pl.BlockSpec((tm, Cp), lambda i: (i, 0)),                     # tile rows
            pl.BlockSpec((hb, Cp), lambda i: ((i + 1) * (tm // hb), 0)),  # small halo
            pl.BlockSpec((9 * Cp, Cmid), lambda i: (0, 0)),               # conv1 w
            pl.BlockSpec((1, Cmid), lambda i: (0, 0)),                    # conv1 b
            pl.BlockSpec((Cmid, NH), lambda i: (0, 0)),                   # head w
            pl.BlockSpec((1, NH), lambda i: (0, 0)),                      # head b
        ],
        out_specs=pl.BlockSpec((tm, NH), lambda i: (i, 0)),
        scratch_shapes=[pltpu.VMEM((tm + hb, Cp), jnp.float32),
                        pltpu.VMEM((tm, 9 * Cp), jnp.bfloat16)],
        compiler_params=pltpu.CompilerParams(
            dimension_semantics=("parallel",),
            vmem_limit_bytes=vmem_limit),
        cost_estimate=pl.CostEstimate(flops=flops, transcendentals=0,
                                      bytes_accessed=bytes_acc),
    )(XP, XP, w1_mat, b1_r, wh, bh)

    # ---- unflatten: conv output at flat row i*Wr + j is output pixel (i,j) ----
    Hs, Ws = H + 2, W + 2
    out = out[:P].reshape(N, Hp, Wr, NH)
    valid = out[:, :H, :W, :]
    loc_nhwc = valid[..., :A4].astype(jnp.float32)          # (N, H, W, 4A)
    sc_nhwc = valid[..., A4:A4 + A2].astype(jnp.float32)    # (N, H, W, 2A)

    # rpn_locs = loc(x).permute(0,2,3,1).view(n, -1, 4)
    rpn_locs = loc_nhwc.reshape(N, H * W * (A4 // 4), 4)

    # score conv: kernel_size=1 but padding=1 -> spatial output (H+2, W+2);
    # border positions see only the zero padding, i.e. score == bias there.
    rpn_scores = jnp.broadcast_to(bsc.reshape(1, A2, 1, 1).astype(jnp.float32),
                                  (N, A2, Hs, Ws))
    rpn_scores = rpn_scores.at[:, :, 1:H + 1, 1:W + 1].set(
        jnp.transpose(sc_nhwc, (0, 3, 1, 2)))

    # F.softmax(rpn_scores, dim=-1): width-axis softmax exactly as written in
    # the reference module.  rpn_fg_scores only consumes row hp == 1, so only
    # that (N*2A, W+2) slab is softmaxed -- one single-step Pallas call.
    row1 = rpn_scores[:, :, 1, :].reshape(N * A2, Ws)
    fg = pl.pallas_call(
        _softmax_lastdim_kernel,
        out_shape=jax.ShapeDtypeStruct((N * A2, Ws), jnp.float32),
    )(row1)
    rpn_fg_scores = fg.reshape(N, A2 * Ws)

    # TODO(synk): anchor enumeration (_enumerate_shifted_anchor) and the
    # proposal_layer / feat_stride ROI loop are undefined in the reference
    # module (never set in __init__), so they are not translated.
    return rpn_locs, rpn_scores, rpn_fg_scores


def _ref_forward(x, params):
    """Pure-JAX reference of the same forward semantics (for sanity check)."""
    w1, b1, wloc, bloc, wsc, bsc = params
    N = x.shape[0]
    dn = ('NCHW', 'OIHW', 'NCHW')
    hp = jax.lax.Precision.HIGHEST
    h = jax.lax.conv_general_dilated(x, w1, (1, 1), ((1, 1), (1, 1)),
                                     dimension_numbers=dn, precision=hp)
    h = jnp.maximum(h + b1[None, :, None, None], 0.0)
    loc = jax.lax.conv_general_dilated(h, wloc, (1, 1), ((0, 0), (0, 0)),
                                       dimension_numbers=dn, precision=hp)
    loc = loc + bloc[None, :, None, None]
    sc = jax.lax.conv_general_dilated(h, wsc, (1, 1), ((1, 1), (1, 1)),
                                      dimension_numbers=dn, precision=hp)
    sc = sc + bsc[None, :, None, None]
    rpn_locs = jnp.transpose(loc, (0, 2, 3, 1)).reshape(N, -1, 4)
    soft = jax.nn.softmax(sc, axis=-1)
    fg = soft[:, :, 1, :].reshape(N, -1)
    return rpn_locs, sc, fg


if __name__ == "__main__":
    # small shapes consistent with the module (in/out channels shrunk from 512)
    N, C_in, H, W = 2, 32, 16, 16
    C_mid = 32
    A = N_ANCHOR

    key = jax.random.PRNGKey(0)
    k1, k2, k3, kx = jax.random.split(key, 4)
    # normal_init(m, 0, 0.01): weights ~ N(0, 0.01^2), biases zero
    w1 = 0.01 * jax.random.normal(k1, (C_mid, C_in, 3, 3), jnp.float32)
    b1 = jnp.zeros((C_mid,), jnp.float32)
    wloc = 0.01 * jax.random.normal(k2, (A * 4, C_mid, 1, 1), jnp.float32)
    bloc = jnp.zeros((A * 4,), jnp.float32)
    wsc = 0.01 * jax.random.normal(k3, (A * 2, C_mid, 1, 1), jnp.float32)
    bsc = jnp.zeros((A * 2,), jnp.float32)
    params = (w1, b1, wloc, bloc, wsc, bsc)

    x = jax.random.normal(kx, (N, C_in, H, W), jnp.float32)

    rpn_locs, rpn_scores, rpn_fg = jax.jit(rpn_forward)(x, params)
    jax.block_until_ready((rpn_locs, rpn_scores, rpn_fg))

    # shape checks (match PyTorch semantics)
    assert rpn_locs.shape == (N, H * W * A, 4)
    assert rpn_scores.shape == (N, A * 2, H + 2, W + 2)
    assert rpn_fg.shape == (N, A * 2 * (W + 2))

    # numerical check vs pure-JAX reference (tolerances absorb bf16 MXU ops)
    ref_locs, ref_scores, ref_fg = _ref_forward(x, params)
    np.testing.assert_allclose(np.asarray(rpn_locs), np.asarray(ref_locs),
                               rtol=5e-2, atol=2e-3)
    np.testing.assert_allclose(np.asarray(rpn_scores), np.asarray(ref_scores),
                               rtol=5e-2, atol=2e-3)
    np.testing.assert_allclose(np.asarray(rpn_fg), np.asarray(ref_fg),
                               rtol=5e-2, atol=2e-3)

    print("KERNEL_OK")
</pallas_src>

<mosaic_0001>
module attributes {stable_mosaic.version = 11 : i64} {
  func.func @head_kernel(%arg0: i32, %arg1: memref<560x128xbf16, #tpu.memory_space<vmem>>, %arg2: memref<56x128xbf16, #tpu.memory_space<vmem>>, %arg3: memref<1152x32xbf16, #tpu.memory_space<vmem>>, %arg4: memref<1x32xf32, #tpu.memory_space<vmem>>, %arg5: memref<32x128xbf16, #tpu.memory_space<vmem>>, %arg6: memref<1x128xf32, #tpu.memory_space<vmem>>, %arg7: memref<560x128xbf16, #tpu.memory_space<vmem>>, %arg8: memref<616x128xf32, #tpu.memory_space<vmem>>, %arg9: memref<560x1152xbf16, #tpu.memory_space<vmem>>) attributes {dimension_semantics = [#tpu.dimension_semantics<parallel>], iteration_bounds = array<i64: 2>, scalar_prefetch = 0 : i64, scratch_operands = 2 : i64, tpu.core_type = #tpu.core_type<tc>, window_params = [{transform_indices = @transform_0, window_bounds = array<i64: 560, 128>}, {transform_indices = @transform_1, window_bounds = array<i64: 56, 128>}, {pipeline_mode = #tpu.pipeline_mode<synchronous>, transform_indices = @transform_2, window_bounds = array<i64: 1152, 32>}, {pipeline_mode = #tpu.pipeline_mode<synchronous>, transform_indices = @transform_3, window_bounds = array<i64: 1, 32>}, {pipeline_mode = #tpu.pipeline_mode<synchronous>, transform_indices = @transform_4, window_bounds = array<i64: 32, 128>}, {pipeline_mode = #tpu.pipeline_mode<synchronous>, transform_indices = @transform_5, window_bounds = array<i64: 1, 128>}, {transform_indices = @transform_6, window_bounds = array<i64: 560, 128>}]} {
    %c0 = arith.constant 0 : index
    %c0_0 = arith.constant 0 : index
    %0 = vector.load %arg1[%c0, %c0_0] : memref<560x128xbf16, #tpu.memory_space<vmem>>, vector<560x128xbf16>
    %1 = arith.extf %0 : vector<560x128xbf16> to vector<560x128xf32>
    %c0_1 = arith.constant 0 : index
    %c0_2 = arith.constant 0 : index
    %2 = vector.load %arg8[%c0_1, %c0_2] : memref<616x128xf32, #tpu.memory_space<vmem>>, vector<560x128xf32>
    tpu.vector_store %arg8[%c0_1, %c0_2], %1 {strides = array<i32>} : memref<616x128xf32, #tpu.memory_space<vmem>>, vector<560x128xf32>,
    %c0_3 = arith.constant 0 : index
    %c0_4 = arith.constant 0 : index
    %3 = vector.load %arg2[%c0_3, %c0_4] : memref<56x128xbf16, #tpu.memory_space<vmem>>, vector<56x128xbf16>
    %4 = arith.extf %3 : vector<56x128xbf16> to vector<56x128xf32>
    %c560 = arith.constant 560 : index
    %c0_5 = arith.constant 0 : index
    %5 = vector.load %arg8[%c560, %c0_5] : memref<616x128xf32, #tpu.memory_space<vmem>>, vector<56x128xf32>
    tpu.vector_store %arg8[%c560, %c0_5], %4 {strides = array<i32>} : memref<616x128xf32, #tpu.memory_space<vmem>>, vector<56x128xf32>,
    %c0_6 = arith.constant 0 : index
    %c0_7 = arith.constant 0 : index
    %6 = vector.load %arg8[%c0_6, %c0_7] : memref<616x128xf32, #tpu.memory_space<vmem>>, vector<560x128xf32>
    %7 = arith.truncf %6 : vector<560x128xf32> to vector<560x128xbf16>
    %c0_8 = arith.constant 0 : index
    %c0_9 = arith.constant 0 : index
    %8 = vector.load %arg9[%c0_8, %c0_9] : memref<560x1152xbf16, #tpu.memory_space<vmem>>, vector<560x128xbf16>
    tpu.vector_store %arg9[%c0_8, %c0_9], %7 {strides = array<i32>} : memref<560x1152xbf16, #tpu.memory_space<vmem>>, vector<560x128xbf16>,
    %c1 = arith.constant 1 : index
    %c0_10 = arith.constant 0 : index
    %9 = vector.load %arg8[%c1, %c0_10] : memref<616x128xf32, #tpu.memory_space<vmem>>, vector<560x128xf32>
    %10 = arith.truncf %9 : vector<560x128xf32> to vector<560x128xbf16>
    %c0_11 = arith.constant 0 : index
    %c128 = arith.constant 128 : index
    %11 = vector.load %arg9[%c0_11, %c128] : memref<560x1152xbf16, #tpu.memory_space<vmem>>, vector<560x128xbf16>
    tpu.vector_store %arg9[%c0_11, %c128], %10 {strides = array<i32>} : memref<560x1152xbf16, #tpu.memory_space<vmem>>, vector<560x128xbf16>,
    %c2 = arith.constant 2 : index
    %c0_12 = arith.constant 0 : index
    %12 = vector.load %arg8[%c2, %c0_12] : memref<616x128xf32, #tpu.memory_space<vmem>>, vector<560x128xf32>
    %13 = arith.truncf %12 : vector<560x128xf32> to vector<560x128xbf16>
    %c0_13 = arith.constant 0 : index
    %c256 = arith.constant 256 : index
    %14 = vector.load %arg9[%c0_13, %c256] : memref<560x1152xbf16, #tpu.memory_space<vmem>>, vector<560x128xbf16>
    tpu.vector_store %arg9[%c0_13, %c256], %13 {strides = array<i32>} : memref<560x1152xbf16, #tpu.memory_space<vmem>>, vector<560x128xbf16>,
    %c24 = arith.constant 24 : index
    %c0_14 = arith.constant 0 : index
    %15 = vector.load %arg8[%c24, %c0_14] : memref<616x128xf32, #tpu.memory_space<vmem>>, vector<560x128xf32>
    %16 = arith.truncf %15 : vector<560x128xf32> to vector<560x128xbf16>
    %c0_15 = arith.constant 0 : index
    %c384 = arith.constant 384 : index
    %17 = vector.load %arg9[%c0_15, %c384] : memref<560x1152xbf16, #tpu.memory_space<vmem>>, vector<560x128xbf16>
    tpu.vector_store %arg9[%c0_15, %c384], %16 {strides = array<i32>} : memref<560x1152xbf16, #tpu.memory_space<vmem>>, vector<560x128xbf16>,
    %c25 = arith.constant 25 : index
    %c0_16 = arith.constant 0 : index
    %18 = vector.load %arg8[%c25, %c0_16] : memref<616x128xf32, #tpu.memory_space<vmem>>, vector<560x128xf32>
    %19 = arith.truncf %18 : vector<560x128xf32> to vector<560x128xbf16>
    %c0_17 = arith.constant 0 : index
    %c512 = arith.constant 512 : index
    %20 = vector.load %arg9[%c0_17, %c512] : memref<560x1152xbf16, #tpu.memory_space<vmem>>, vector<560x128xbf16>
    tpu.vector_store %arg9[%c0_17, %c512], %19 {strides = array<i32>} : memref<560x1152xbf16, #tpu.memory_space<vmem>>, vector<560x128xbf16>,
    %c26 = arith.constant 26 : index
    %c0_18 = arith.constant 0 : index
    %21 = vector.load %arg8[%c26, %c0_18] : memref<616x128xf32, #tpu.memory_space<vmem>>, vector<560x128xf32>
    %22 = arith.truncf %21 : vector<560x128xf32> to vector<560x128xbf16>
    %c0_19 = arith.constant 0 : index
    %c640 = arith.constant 640 : index
    %23 = vector.load %arg9[%c0_19, %c640] : memref<560x1152xbf16, #tpu.memory_space<vmem>>, vector<560x128xbf16>
    tpu.vector_store %arg9[%c0_19, %c640], %22 {strides = array<i32>} : memref<560x1152xbf16, #tpu.memory_space<vmem>>, vector<560x128xbf16>,
    %c48 = arith.constant 48 : index
    %c0_20 = arith.constant 0 : index
    %24 = vector.load %arg8[%c48, %c0_20] : memref<616x128xf32, #tpu.memory_space<vmem>>, vector<560x128xf32>
    %25 = arith.truncf %24 : vector<560x128xf32> to vector<560x128xbf16>
    %c0_21 = arith.constant 0 : index
    %c768 = arith.constant 768 : index
    %26 = vector.load %arg9[%c0_21, %c768] : memref<560x1152xbf16, #tpu.memory_space<vmem>>, vector<560x128xbf16>
    tpu.vector_store %arg9[%c0_21, %c768], %25 {strides = array<i32>} : memref<560x1152xbf16, #tpu.memory_space<vmem>>, vector<560x128xbf16>,
    %c49 = arith.constant 49 : index
    %c0_22 = arith.constant 0 : index
    %27 = vector.load %arg8[%c49, %c0_22] : memref<616x128xf32, #tpu.memory_space<vmem>>, vector<560x128xf32>
    %28 = arith.truncf %27 : vector<560x128xf32> to vector<560x128xbf16>
    %c0_23 = arith.constant 0 : index
    %c896 = arith.constant 896 : index
    %29 = vector.load %arg9[%c0_23, %c896] : memref<560x1152xbf16, #tpu.memory_space<vmem>>, vector<560x128xbf16>
    tpu.vector_store %arg9[%c0_23, %c896], %28 {strides = array<i32>} : memref<560x1152xbf16, #tpu.memory_space<vmem>>, vector<560x128xbf16>,
    %c50 = arith.constant 50 : index
    %c0_24 = arith.constant 0 : index
    %30 = vector.load %arg8[%c50, %c0_24] : memref<616x128xf32, #tpu.memory_space<vmem>>, vector<560x128xf32>
    %31 = arith.truncf %30 : vector<560x128xf32> to vector<560x128xbf16>
    %c0_25 = arith.constant 0 : index
    %c1024 = arith.constant 1024 : index
    %32 = vector.load %arg9[%c0_25, %c1024] : memref<560x1152xbf16, #tpu.memory_space<vmem>>, vector<560x128xbf16>
    tpu.vector_store %arg9[%c0_25, %c1024], %31 {strides = array<i32>} : memref<560x1152xbf16, #tpu.memory_space<vmem>>, vector<560x128xbf16>,
    %c0_26 = arith.constant 0 : index
    %c0_27 = arith.constant 0 : index
    %33 = vector.load %arg9[%c0_26, %c0_27] : memref<560x1152xbf16, #tpu.memory_space<vmem>>, vector<560x1152xbf16>
    %c0_28 = arith.constant 0 : index
    %c0_29 = arith.constant 0 : index
    %34 = vector.load %arg3[%c0_28, %c0_29] : memref<1152x32xbf16, #tpu.memory_space<vmem>>, vector<1152x32xbf16>
    %cst = arith.constant dense<0.000000e+00> : vector<560x32xf32>
    %35 = tpu.matmul %33, %34, %cst {dimension_numbers = #tpu.dot_dimension_numbers<[1], [0], [0], [1], [0, 0, 1, 1], [], []>} : vector<560x1152xbf16>, vector<1152x32xbf16>, vector<560x32xf32> -> vector<560x32xf32>
    %c0_30 = arith.constant 0 : index
    %c0_31 = arith.constant 0 : index
    %36 = vector.load %arg4[%c0_30, %c0_31] : memref<1x32xf32, #tpu.memory_space<vmem>>, vector<1x32xf32>
    %37 = vector.broadcast %36 : vector<1x32xf32> to vector<560x32xf32>
    %38 = arith.addf %35, %37 : vector<560x32xf32>
    %cst_32 = arith.constant 0.000000e+00 : f32
    %39 = vector.broadcast %cst_32 : f32 to vector<560x32xf32>
    %40 = arith.maximumf %38, %39 : vector<560x32xf32>
    %41 = arith.truncf %40 : vector<560x32xf32> to vector<560x32xbf16>
    %c0_33 = arith.constant 0 : index
    %c0_34 = arith.constant 0 : index
    %42 = vector.load %arg5[%c0_33, %c0_34] : memref<32x128xbf16, #tpu.memory_space<vmem>>, vector<32x128xbf16>
    %cst_35 = arith.constant dense<0.000000e+00> : vector<560x128xf32>
    %43 = tpu.matmul %41, %42, %cst_35 {dimension_numbers = #tpu.dot_dimension_numbers<[1], [0], [0], [1], [0, 0, 1, 1], [], []>} : vector<560x32xbf16>, vector<32x128xbf16>, vector<560x128xf32> -> vector<560x128xf32>
    %c0_36 = arith.constant 0 : index
    %c0_37 = arith.constant 0 : index
    %44 = vector.load %arg6[%c0_36, %c0_37] : memref<1x128xf32, #tpu.memory_space<vmem>>, vector<1x128xf32>
    %45 = vector.broadcast %44 : vector<1x128xf32> to vector<560x128xf32>
    %46 = arith.addf %43, %45 : vector<560x128xf32>
    %47 = arith.truncf %46 : vector<560x128xf32> to vector<560x128xbf16>
    %c0_38 = arith.constant 0 : index
    %c0_39 = arith.constant 0 : index
    %48 = vector.load %arg7[%c0_38, %c0_39] : memref<560x128xbf16, #tpu.memory_space<vmem>>, vector<560x128xbf16>
    tpu.vector_store %arg7[%c0_38, %c0_39], %47 {strides = array<i32>} : memref<560x128xbf16, #tpu.memory_space<vmem>>, vector<560x128xbf16>,
    return
  }
  func.func @transform_0(%arg0: i32) -> (i32, i32) {
    %c0_i32 = arith.constant 0 : i32
    %c0_i32_0 = arith.constant 0 : i32
    return %arg0, %c0_i32 : i32, i32
  }
  func.func @transform_1(%arg0: i32) -> (i32, i32) {
    %c1_i32 = arith.constant 1 : i32
    %0 = arith.addi %arg0, %c1_i32 : i32
    %c10_i32 = arith.constant 10 : i32
    %1 = arith.muli %0, %c10_i32 : i32
    %c0_i32 = arith.constant 0 : i32
    %c0_i32_0 = arith.constant 0 : i32
    return %1, %c0_i32 : i32, i32
  }
  func.func @transform_2(%arg0: i32) -> (i32, i32) {
    %c0_i32 = arith.constant 0 : i32
    %c0_i32_0 = arith.constant 0 : i32
    %c0_i32_1 = arith.constant 0 : i32
    return %c0_i32, %c0_i32_0 : i32, i32
  }
  func.func @transform_3(%arg0: i32) -> (i32, i32) {
    %c0_i32 = arith.constant 0 : i32
    %c0_i32_0 = arith.constant 0 : i32
    %c0_i32_1 = arith.constant 0 : i32
    return %c0_i32, %c0_i32_0 : i32, i32
  }
  func.func @transform_4(%arg0: i32) -> (i32, i32) {
    %c0_i32 = arith.constant 0 : i32
    %c0_i32_0 = arith.constant 0 : i32
    %c0_i32_1 = arith.constant 0 : i32
    return %c0_i32, %c0_i32_0 : i32, i32
  }
  func.func @transform_5(%arg0: i32) -> (i32, i32) {
    %c0_i32 = arith.constant 0 : i32
    %c0_i32_0 = arith.constant 0 : i32
    %c0_i32_1 = arith.constant 0 : i32
    return %c0_i32, %c0_i32_0 : i32, i32
  }
  func.func @transform_6(%arg0: i32) -> (i32, i32) {
    %c0_i32 = arith.constant 0 : i32
    %c0_i32_0 = arith.constant 0 : i32
    return %arg0, %c0_i32 : i32, i32
  }
}

module attributes {stable_mosaic.version = 11 : i64} {
  func.func @_softmax_lastdim_kernel(%arg0: memref<36x18xf32, #tpu.memory_space<vmem>>, %arg1: memref<36x18xf32, #tpu.memory_space<vmem>>) attributes {dimension_semantics = [], scalar_prefetch = 0 : i64, scratch_operands = 0 : i64, tpu.core_type = #tpu.core_type<tc>} {
    %c0 = arith.constant 0 : index
    %c0_0 = arith.constant 0 : index
    %0 = vector.load %arg0[%c0, %c0_0] : memref<36x18xf32, #tpu.memory_space<vmem>>, vector<36x18xf32>
    %cst = arith.constant dense<0xFF800000> : vector<36xf32>
    %1 = vector.multi_reduction <maximumf>, %0, %cst [1] : vector<36x18xf32> to vector<36xf32>
    %2 = vector.shape_cast %1 : vector<36xf32> to vector<36x1xf32>
    %3 = vector.broadcast %2 : vector<36x1xf32> to vector<36x18xf32>
    %4 = arith.subf %0, %3 : vector<36x18xf32>
    %5 = math.exp %4 : vector<36x18xf32>
    %cst_1 = arith.constant dense<0.000000e+00> : vector<36xf32>
    %6 = vector.multi_reduction <add>, %5, %cst_1 [1] : vector<36x18xf32> to vector<36xf32>
    %7 = vector.shape_cast %6 : vector<36xf32> to vector<36x1xf32>
    %8 = vector.broadcast %7 : vector<36x1xf32> to vector<36x18xf32>
    %9 = arith.divf %5, %8 : vector<36x18xf32>
    %c0_2 = arith.constant 0 : index
    %c0_3 = arith.constant 0 : index
    %10 = vector.load %arg1[%c0_2, %c0_3] : memref<36x18xf32, #tpu.memory_space<vmem>>, vector<36x18xf32>
    tpu.vector_store %arg1[%c0_2, %c0_3], %9 {strides = array<i32>} : memref<36x18xf32, #tpu.memory_space<vmem>>, vector<36x18xf32>,
    return
  }
}

</mosaic_0001>

<bundles_post_ra>
// kernel: rpn_forward.3
= control target key start
LH: loop header
LB: loop body
LE: loop exit
PB: predicated region body
PF: predicated region fallthrough
CT: control target
= control target key end

     0   :  { %vm13_vm0 = vcmask 146432   ;;  %vm26_vm1 = vcmask 142336   ;;  %s231_s0 = inlined_call_operand.vmem [shape: f32[36,18], index: 0, kind: input, shape index: {}]   ;;  %s232_s1 = inlined_call_operand.vmem [shape: f32[36,18], index: 1, kind: output, shape index: {}]  }
   0x1   :  { %v10_v0 = vld [vmem:[%s231_s0 + $0x10] sm:$0xff]  ;;  %v8_v1 = vld [vmem:[%s231_s0] sm:$0xff]  ;;  %v11_v6 = vld [vmem:[%s231_s0 + $0x18] sm:$0xff] }
   0x2   :  { %v20_v2 = vsel %vm13_vm0, %v10_v0, -inf  ;;  %v14_v3 = vsel %vm13_vm0, %v8_v1, -inf  ;;  %v12_v4 = vld [vmem:[%s231_s0 + $0x20] sm:$0xf]  ;;  %v9_v7 = vld [vmem:[%s231_s0 + $0x8] sm:$0xff]  ;;  %v23_v8 = vsel %vm13_vm0, %v11_v6, -inf }
   0x3   :  { %21 = vmax.xlane.f32.xlu1 %v20_v2  ;;  %15 = vmax.xlane.f32.xlu0 %v14_v3  ;;  %v27_v5 = vsel %vm26_vm1, %v12_v4, -inf  ;;  %v17_v9 = vsel %vm13_vm0, %v9_v7, -inf }
   0x4   :  { %28 = vmax.xlane.f32.xlu2 %v27_v5 }
   0xb   :  { %24 = vmax.xlane.f32.xlu1 %v23_v8  ;;  %18 = vmax.xlane.f32.xlu0 %v17_v9 }
  0x76   :  { %v22_v10 = vpop.xlane.xlu1 %21  ;;  %v16_v11 = vpop.xlane.xlu0 %15 }
  0x77   :  { %v32_v12 = vsub.f32 %v10_v0, %v22_v10  ;;  %v30_v13 = vsub.f32 %v8_v1, %v16_v11  ;;  %v29_v16 = vpop.xlane.xlu2 %28 }
  0x78   :  { %v34_v21 = vsub.f32 %v12_v4, %v29_v16 }
  0x79   :  { %v39_v14 = vmul.f32 1.442695, %v32_v12  ;;  %v35_v15 = vmul.f32 1.442695, %v30_v13 }
  0x7a   :  { %v43_v28 = vmul.f32 1.442695, %v34_v21 }
  0x7b   :  { %144 = vpow2.f32 %v39_v14 }
  0x7c   :  { %146 = vpow2.f32 %v35_v15 }
  0x7e   :  { %v25_v17 = vpop.xlane.xlu1 %24  ;;  %v19_v18 = vpop.xlane.xlu0 %18 }
  0x7f   :  { %v33_v19 = vsub.f32 %v11_v6, %v25_v17  ;;  %v31_v20 = vsub.f32 %v9_v7, %v19_v18 }
  0x81   :  { %v145_v22 = vpop.eup %144  ;;  %v41_v23 = vmul.f32 1.442695, %v33_v19  ;;  %v37_v24 = vmul.f32 1.442695, %v31_v20 }
  0x82   :  { %v147_v25 = vpop.eup %146  ;;  %v51_v26 = vsel %vm13_vm0, %v145_v22, 0.0 }
  0x83   :  { %148 = vpow2.f32 %v41_v23  ;;  %52 = vadd.xlane.f32.xlu1 %v51_v26  ;;  %v45_v27 = vsel %vm13_vm0, %v147_v25, 0.0 }
  0x84   :  { %150 = vpow2.f32 %v37_v24  ;;  %46 = vadd.xlane.f32.xlu2 %v45_v27 }
  0x85   :  { %152 = vpow2.f32 %v43_v28 }
  0x89   :  { %v196_v29 = vpop.eup %148 }
  0x8a   :  { %v198_v30 = vpop.eup %150  ;;  %v54_v31 = vsel %vm13_vm0, %v196_v29, 0.0 }
  0x8b   :  { %v48_v32 = vsel %vm13_vm0, %v198_v30, 0.0  ;;  %v204_v33 = vpop.eup %152 }
  0x8c   :  { %55 = vadd.xlane.f32.xlu2 %v54_v31  ;;  %49 = vadd.xlane.f32.xlu0 %v48_v32  ;;  %v57_v34 = vsel %vm26_vm1, %v204_v33, 0.0 }
  0x94   :  { %58 = vadd.xlane.f32.xlu0 %v57_v34 }
  0xf6   :  { %v53_v35 = vpop.xlane.xlu1 %52 }
  0xf7   :  { %154 = vrcp.f32 %v53_v35  ;;  %v47_v36 = vpop.xlane.xlu2 %46  ;;  %vm95_vm2 = vweird.f32 %v53_v35  ;;  %v101_v44 = vand.u32 2147483648, %v53_v35  ;;  %v99_v47 = vand.u32 2147483647, %v53_v35 }
  0xf8   :  { %156 = vrcp.f32 %v47_v36  ;;  %v71_v48 = vand.u32 2147483648, %v47_v36  ;;  %v69_v50 = vand.u32 2147483647, %v47_v36  ;;  %vm65_vm6 = vweird.f32 %v47_v36 }
  0xf9   :  { %v102_v52 = vor.u32 1.1754944e-38, %v101_v44  ;;  %vm100_vm7 = vcmp.eq.f32.partialorder %v99_v47, 8.507059e+37 }
  0xfa   :  { %v72_v56 = vor.u32 1.1754944e-38, %v71_v48  ;;  %vm70_vm9 = vcmp.eq.f32.partialorder %v69_v50, 8.507059e+37 }
  0xfd   :  { %v155_v37 = vpop.eup %154 }
  0xfe   :  { %v157_v38 = vpop.eup %156  ;;  %v91_v39 = vmul.f32 %v155_v37, %v53_v35  ;;  %vm96_vm3 = vweird.f32 %v155_v37 }
  0xff   :  { %v61_v40 = vmul.f32 %v157_v38, %v47_v36  ;;  %v56_v41 = vpop.xlane.xlu2 %55  ;;  %v50_v42 = vpop.xlane.xlu0 %49  ;;  %vm66_vm4 = vweird.f32 %v157_v38  ;;  %vm97_vm5 = vmor %vm95_vm2, %vm96_vm3 }
 0x100   :  { %v92_v43 = vsub.f32 1.0, %v91_v39  ;;  %158 = vrcp.f32 %v56_v41  ;;  %vm67_vm8 = vmor %vm65_vm6, %vm66_vm4  ;;  %vm110_vm10 = vweird.f32 %v56_v41  ;;  %v116_v3 = vand.u32 2147483648, %v56_v41 }
 0x101   :  { %v62_v45 = vsub.f32 1.0, %v61_v40  ;;  %160 = vrcp.f32 %v50_v42  ;;  %v114_v6 = vand.u32 2147483647, %v56_v41  ;;  %v86_v7 = vand.u32 2147483648, %v50_v42 }
 0x102   :  { %v93_v46 = vmul.f32 %v155_v37, %v92_v43  ;;  %v84_v9 = vand.u32 2147483647, %v50_v42  ;;  %v117_v11 = vor.u32 1.1754944e-38, %v116_v3  ;;  %vm80_vm14 = vweird.f32 %v50_v42 }
 0x103   :  { %v63_v49 = vmul.f32 %v157_v38, %v62_v45  ;;  %vm115_vm15 = vcmp.eq.f32.partialorder %v114_v6, 8.507059e+37  ;;  %v87_v15 = vor.u32 1.1754944e-38, %v86_v7 }
 0x104   :  { %v94_v51 = vadd.f32 %v155_v37, %v93_v46  ;;  %vm85_vm3 = vcmp.eq.f32.partialorder %v84_v9, 8.507059e+37 }
 0x105   :  { %v64_v53 = vadd.f32 %v157_v38, %v63_v49 }
 0x106   :  { %v159_v54 = vpop.eup %158  ;;  %v98_v55 = vsel %vm97_vm5, %v155_v37, %v94_v51 }
 0x107   :  { %v161_v57 = vpop.eup %160  ;;  %v103_v58 = vsel %vm100_vm7, %v102_v52, %v98_v55  ;;  %v68_v59 = vsel %vm67_vm8, %v157_v38, %v64_v53  ;;  %v106_v60 = vmul.f32 %v159_v54, %v56_v41  ;;  %v59_v61 = vpop.xlane.xlu0 %58  ;;  %vm111_vm11 = vweird.f32 %v159_v54 }
 0x108   :  { %v104_v62 = vmul.f32 %v145_v22, %v103_v58  ;;  %v73_v63 = vsel %vm70_vm9, %v72_v56, %v68_v59  ;;  %v76_v0 = vmul.f32 %v161_v57, %v50_v42  ;;  %162 = vrcp.f32 %v59_v61  ;;  %vm112_vm13 = vmor %vm110_vm10, %vm111_vm11 }
 0x109   :  { %v74_v1 = vmul.f32 %v147_v25, %v73_v63  ;;  %v107_v2 = vsub.f32 1.0, %v106_v60  ;;  %vm81_vm12 = vweird.f32 %v161_v57  ;;  %v131_v23 = vand.u32 2147483648, %v59_v61 }
 0x10a   :  { %137 = vst.msk [vmem:[%s232_s1 + $0x10] sm:$0xff] %vm13_vm0, %v104_v62  ;;  %v77_v4 = vsub.f32 1.0, %v76_v0  ;;  %vm82_vm2 = vmor %vm80_vm14, %vm81_vm12  ;;  %v129_v25 = vand.u32 2147483647, %v59_v61  ;;  %vm125_vm5 = vweird.f32 %v59_v61 }
 0x10b   :  { %135 = vst.msk [vmem:[%s232_s1] sm:$0xff] %vm13_vm0, %v74_v1  ;;  %v108_v5 = vmul.f32 %v159_v54, %v107_v2  ;;  %v132_v27 = vor.u32 1.1754944e-38, %v131_v23 }
 0x10c   :  { %v78_v8 = vmul.f32 %v161_v57, %v77_v4  ;;  %vm130_vm7 = vcmp.eq.f32.partialorder %v129_v25, 8.507059e+37 }
 0x10d   :  { %v109_v10 = vadd.f32 %v159_v54, %v108_v5 }
 0x10e   :  { %v79_v12 = vadd.f32 %v161_v57, %v78_v8  ;;  %v163_v13 = vpop.eup %162 }
 0x10f   :  { %v113_v14 = vsel %vm112_vm13, %v159_v54, %v109_v10  ;;  %v121_v18 = vmul.f32 %v163_v13, %v59_v61  ;;  %vm126_vm4 = vweird.f32 %v163_v13 }
 0x110   :  { %v118_v16 = vsel %vm115_vm15, %v117_v11, %v113_v14  ;;  %v83_v17 = vsel %vm82_vm2, %v161_v57, %v79_v12  ;;  %vm127_vm6 = vmor %vm125_vm5, %vm126_vm4 }
 0x111   :  { %v119_v19 = vmul.f32 %v196_v29, %v118_v16  ;;  %v88_v20 = vsel %vm85_vm3, %v87_v15, %v83_v17  ;;  %v122_v22 = vsub.f32 1.0, %v121_v18 }
 0x112   :  { %v89_v21 = vmul.f32 %v198_v30, %v88_v20 }
 0x113   :  { %138 = vst.msk [vmem:[%s232_s1 + $0x18] sm:$0xff] %vm13_vm0, %v119_v19  ;;  %v123_v24 = vmul.f32 %v163_v13, %v122_v22 }
 0x114   :  { %136 = vst.msk [vmem:[%s232_s1 + $0x8] sm:$0xff] %vm13_vm0, %v89_v21 }
 0x115   :  { %v124_v26 = vadd.f32 %v163_v13, %v123_v24 }
 0x117   :  { %v128_v28 = vsel %vm127_vm6, %v163_v13, %v124_v26 }
 0x118   :  { %v133_v29 = vsel %vm130_vm7, %v132_v27, %v128_v28 }
 0x119   :  { %v134_v30 = vmul.f32 %v204_v33, %v133_v29 }
 0x11b   :  { %139 = vst.msk [vmem:[%s232_s1 + $0x20] sm:$0xf] %vm26_vm1, %v134_v30 }

// kernel: rpn_forward.2
= control target key start
LH: loop header
LB: loop body
LE: loop exit
PB: predicated region body
PF: predicated region fallthrough
CT: control target
= control target key end

     0   :  { %11 = vsyncpa [#allocation5], 0  ;;  %s9789_s21 = smov 0   ;;  %s10918_s0 = inlined_call_operand.vmem [shape: bf16[1176,128], index: 0, kind: input, shape index: {}, may-alias: {0,1}]   ;;  %s10919_s1 = inlined_call_operand.vmem [shape: bf16[1176,128], index: 1, kind: input, shape index: {}, may-alias: {0,1}]   ;;  %s10920_s2 = inlined_call_operand.vmem [shape: bf16[1152,32], index: 2, kind: input, shape index: {}]   ;;  %s10921_s3 = inlined_call_operand.hbm [shape: f32[1,32], index: 3, kind: input, shape index: {}]   ;;  %s10922_s4 = inlined_call_operand.vmem [shape: bf16[32,128], index: 4, kind: input, shape index: {}]   ;;  %s10923_s5 = inlined_call_operand.vmem [shape: f32[1,128], index: 5, kind: input, shape index: {}]   ;;  %s10924_s6 = inlined_call_operand.vmem [shape: bf16[1120,128], index: 6, kind: output, shape index: {}]  }
   0x1 LB: > { %s9795_s22 = sadd.s32 4294967295, %s9751_s21   ;;  %p7281_p0 = scmp.ge.s32.totalorder %s9751_s21, 1  ;;  %s9751_s21 = sphi %s9789_s21, %s17_s21  }
   0x2   : > { %p188_p1 = scmp.lt.s32.totalorder %s9751_s21, 3  ;;  %s203_s25 = sshll.u32 %s10921_s3, 4  ;;  %s204_s25 = int_to_ptr.hbm [resolvable:$true] %s203_s25 }
   0x3   : > { %p9693_p3 = scmp.eq.s32.totalorder %s9795_s22, 0  ;;  %s9753_s26 = smov [#allocation4]  }
   0x4   : > { %p189_p2 = pnand %p7281_p0, %p188_p1  ;;  %s205_s27 = sshll.u32 %s9753_s26, 4  ;;  %s206_s27 = int_to_ptr.vmem [resolvable:$true] %s205_s27 }
   0x6   : > { %p9689_p4 = pneg %p189_p2  ;;  %254 = sbr.rel (%p189_p2) target bundleno = 1716 (0x6b4), region = 44 }
   0x8   : > { %p9690_p5 = pnand %p9693_p3, %p9689_p4 }
   0xa   : > { %9692 = dma.hbm_to_vmem [thread:$0]  (!%p9690_p5), %s204_s25, 16, %s206_s27, [#allocation5]  }
   0xb   : > { %9746 = dma.done.wait (%p9693_p3), [#allocation5], 16  }
   0xc   : > { %9748 = vsyncadd (%p9693_p3), [#allocation5], 4294967280  ;;  %s9804_s28 = smul.u32 70, %s9795_s22  ;;  %v9205_v0 = vld [vmem:[%s10920_s2 + $0x38] sm:$0xff]  ;;  %v9204_v2 = vld [vmem:[%s10920_s2 + $0x30] sm:$0xff]  ;;  %s310_s7 = sadd.s32 1, %s9795_s22 }
   0xd   : > { %v9213_v1 = vld [vmem:[%s10920_s2 + $0x78] sm:$0xff]  ;;  %4988 = vmatpush.bf16.msra.mxu0 %v9205_v0  ;;  %9669 = vmatpush.bf16.msra.mxu2 %v9205_v0  ;;  %v9212_v3 = vld [vmem:[%s10920_s2 + $0x70] sm:$0xff]  ;;  %v9203_v6 = vld [vmem:[%s10920_s2 + $0x28] sm:$0xff]  ;;  %s10130_s22 = smul.u32 70, %s310_s7  ;;  %vm6769_vm0 = vcmask 261120  }
   0xe   : > { %p301_p6 = scmp.lt.s32.totalorder %s9804_s28, 146  ;;  %9677 = vmatpush.bf16.msra.mxu3 %v9213_v1  ;;  %5172 = vmatpush.bf16.msra.mxu1 %v9213_v1  ;;  %v9211_v9 = vld [vmem:[%s10920_s2 + $0x68] sm:$0xff]  ;;  %v9202_v15 = vld [vmem:[%s10920_s2 + $0x20] sm:$0xff]  ;;  %v9201_v22 = vld [vmem:[%s10920_s2 + $0x18] sm:$0xff]  ;;  %p321_p8 = scmp.lt.s32.totalorder %s9804_s28, 139 }
   0xf   : > { %v9210_v18 = vld [vmem:[%s10920_s2 + $0x60] sm:$0xff]  ;;  %v9209_v24 = vld [vmem:[%s10920_s2 + $0x58] sm:$0xff]  ;;  %v9200_v29 = vld [vmem:[%s10920_s2 + $0x10] sm:$0xff]  ;;  %p313_p7 = scmp.lt.s32.totalorder %s10130_s22, 146 }
  0x10   : > { %s302_s29 = scalar_select %p301_p6, %s9804_s28, 146  ;;  %v9208_v31 = vld [vmem:[%s10920_s2 + $0x50] sm:$0xff]  ;;  %v9199_v37 = vld [vmem:[%s10920_s2 + $0x8] sm:$0xff]  ;;  %v9198_v45 = vld [vmem:[%s10920_s2] sm:$0xff] }
  0x11   : > { %4989 = vmatpush.bf16.msra.mxu0 %v9204_v2  ;;  %9670 = vmatpush.bf16.msra.mxu2 %v9204_v2  ;;  %v9207_v39 = vld [vmem:[%s10920_s2 + $0x48] sm:$0xff]  ;;  %v9206_v53 = vld [vmem:[%s10920_s2 + $0x40] sm:$0xff]  ;;  %v9237_v55 = vld [vmem:[%s10920_s2 + $0x138] sm:$0xff]  ;;  %s11070_s22 = smov (!%p313_p7, %s10130_s22), 146  ;;  %s11072_s28 = smov (!%p321_p8, %s9804_s28), 139 }
  0x12   : > { %s7286_s30 = sshll.u32 %s302_s29, 2  ;;  %9678 = vmatpush.bf16.msra.mxu3 %v9212_v3  ;;  %5173 = vmatpush.bf16.msra.mxu1 %v9212_v3  ;;  %v9221_v56 = vld [vmem:[%s10920_s2 + $0xb8] sm:$0xff]  ;;  %s7288_s10 = sshll.u32 %s11070_s22, 2 }
  0x13   : > { %s9820_s15 = scalar_lea.vmem %s10918_s0, %s7286_s30  ;;  %v9229_v61 = vld [vmem:[%s10920_s2 + $0xf8] sm:$0xff]  ;;  %s10169_s13 = scalar_lea.vmem %s10919_s1, %s7288_s10 }
  0x14   : > { %v9273_v4 = vld [vmem:[%s9820_s15] sm:$0xff]   ;;  %v9616_v5 = vld [vmem:[%s9820_s15 + $0x90] sm:$0xff]   ;;  %v9617_v14 = vld [vmem:[%s9820_s15 + $0x98] sm:$0xff]   ;;  %s7289_s23 = sshll.u32 %s11072_s28, 2 }
  0x15   : > { %v9274_v7 = vunpack.c.l.bf16 %v9273_v4  ;;  %v9275_v8 = vunpack.c.h.bf16 %v9273_v4  ;;  %v9346_v12 = vunpack.c.l.bf16 %v9616_v5  ;;  %v9347_v13 = vunpack.c.h.bf16 %v9616_v5  ;;  %4990 = vmatpush.bf16.msra.mxu0 %v9203_v6  ;;  %9671 = vmatpush.bf16.msra.mxu2 %v9203_v6  ;;  %v9599_v17 = vld [vmem:[%s9820_s15 + $0x8] sm:$0xff]   ;;  %v9618_v36 = vld [vmem:[%s9820_s15 + $0xa0] sm:$0xff]   ;;  %v9600_v38 = vld [vmem:[%s9820_s15 + $0x10] sm:$0xff]   ;;  %s10725_s26 = scalar_lea.vmem %s10924_s6, %s7289_s23 }
  0x16   : > { %9679 = vmatpush.bf16.msra.mxu3 %v9211_v9  ;;  %5174 = vmatpush.bf16.msra.mxu1 %v9211_v9  ;;  %v9350_v20 = vunpack.c.l.bf16 %v9617_v14  ;;  %v9278_v21 = vunpack.c.l.bf16 %v9599_v17  ;;  %v9279_v23 = vunpack.c.h.bf16 %v9599_v17  ;;  %v9351_v30 = vunpack.c.h.bf16 %v9617_v14  ;;  %v9619_v6 = vld [vmem:[%s9820_s15 + $0xa8] sm:$0xff]   ;;  %v9601_v9 = vld [vmem:[%s9820_s15 + $0x18] sm:$0xff]   ;;  %v9236_v17 = vld [vmem:[%s10920_s2 + $0x130] sm:$0xff] }
  0x17   : > { %467 = vst [vmem:[#allocation2] sm:$0xff] %v9274_v7  ;;  %v628_v10 = vpack.c.bf16 %v9274_v7, %v9274_v7  ;;  %v629_v11 = vpack.c.bf16 %v9275_v8, %v9275_v8  ;;  %v664_v16 = vpack.c.bf16 %v9346_v12, %v9346_v12  ;;  %v665_v19 = vpack.c.bf16 %v9347_v13, %v9347_v13 }
  0x18   : > { %468 = vst [vmem:[#allocation2 + $0x8] sm:$0xff] %v9275_v8  ;;  %v630_v26 = vpack.c.bf16 %v9278_v21, %v9278_v21  ;;  %v631_v28 = vpack.c.bf16 %v9279_v23, %v9279_v23  ;;  %v666_v33 = vpack.c.bf16 %v9350_v20, %v9350_v20  ;;  %v667_v35 = vpack.c.bf16 %v9351_v30, %v9351_v30 }
  0x19   : > { %698 = vst [vmem:[#allocation3] sm:$0xf] %v628_v10  ;;  %4991 = vmatpush.bf16.msra.mxu0 %v9202_v15  ;;  %9672 = vmatpush.bf16.msra.mxu2 %v9202_v15  ;;  %v9354_v44 = vunpack.c.l.bf16 %v9618_v36  ;;  %v9282_v48 = vunpack.c.l.bf16 %v9600_v38  ;;  %v9283_v54 = vunpack.c.h.bf16 %v9600_v38  ;;  %v9355_v1 = vunpack.c.h.bf16 %v9618_v36 }
  0x1a   : > { %699 = vst [vmem:[#allocation3 + $0x24] sm:$0xf] %v629_v11  ;;  %9680 = vmatpush.bf16.msra.mxu3 %v9210_v18  ;;  %5175 = vmatpush.bf16.msra.mxu1 %v9210_v18  ;;  %v9358_v14 = vunpack.c.l.bf16 %v9619_v6  ;;  %v9220_v18 = vld [vmem:[%s10920_s2 + $0xb0] sm:$0xff] }
  0x1b   : > { %503 = vst [vmem:[#allocation2 + $0x120] sm:$0xff] %v9346_v12  ;;  %v632_v60 = vpack.c.bf16 %v9282_v48, %v9282_v48  ;;  %v633_v63 = vpack.c.bf16 %v9283_v54, %v9283_v54  ;;  %v668_v3 = vpack.c.bf16 %v9354_v44, %v9354_v44  ;;  %v669_v5 = vpack.c.bf16 %v9355_v1, %v9355_v1 }
  0x1c   : > { %504 = vst [vmem:[#allocation2 + $0x128] sm:$0xff] %v9347_v13 }
  0x1d   : > { %734 = vst [vmem:[#allocation3 + $0x510] sm:$0xf] %v664_v16  ;;  %4992 = vmatpush.bf16.msra.mxu0 %v9201_v22  ;;  %9673 = vmatpush.bf16.msra.mxu2 %v9201_v22  ;;  %v9286_v16 = vunpack.c.l.bf16 %v9601_v9  ;;  %v9287_v22 = vunpack.c.h.bf16 %v9601_v9 }
  0x1e   : > { %735 = vst [vmem:[#allocation3 + $0x534] sm:$0xf] %v665_v19  ;;  %9681 = vmatpush.bf16.msra.mxu3 %v9209_v24  ;;  %5176 = vmatpush.bf16.msra.mxu1 %v9209_v24 }
  0x1f   : > { %505 = vst [vmem:[#allocation2 + $0x130] sm:$0xff] %v9350_v20  ;;  %v768_v25 = vld [vmem:[#allocation2 + $0x1] sm:$0xff]  ;;  %v9228_v20 = vld [vmem:[%s10920_s2 + $0xf0] sm:$0xff]  ;;  %v634_v24 = vpack.c.bf16 %v9286_v16, %v9286_v16 }
  0x20   : > { %469 = vst [vmem:[#allocation2 + $0x10] sm:$0xff] %v9278_v21  ;;  %v838_v27 = vpack.c.bf16 %v768_v25, %v768_v25  ;;  %v7292_v41 = vld [vmem:[#allocation3] sm:$0xf] }
  0x21   : > { %470 = vst [vmem:[#allocation2 + $0x18] sm:$0xff] %v9279_v23  ;;  %4993 = vmatpush.bf16.msra.mxu0 %v9200_v29  ;;  %9674 = vmatpush.bf16.msra.mxu2 %v9200_v29  ;;  %v8887_v46 = vld [vmem:[#allocation3 + $0x20] sm:$0xf0]  ;;  %v635_v29 = vpack.c.bf16 %v9287_v22, %v9287_v22 }
  0x22   : > { %908 = vst [vmem:[#allocation3 + $0x4] sm:$0xf] %v838_v27  ;;  %9682 = vmatpush.bf16.msra.mxu3 %v9208_v31  ;;  %5177 = vmatpush.bf16.msra.mxu1 %v9208_v31  ;;  %v7293_v57 = vor.u32 %v8887_v46, %v7292_v41  ;;  %v9359_v31 = vunpack.c.h.bf16 %v9619_v6 }
  0x23   : > { %v804_v32 = vld [vmem:[#allocation2 + $0x121] sm:$0xff]  ;;  %700 = vst [vmem:[#allocation3 + $0x48] sm:$0xf] %v630_v26 }
  0x24   : > { %v874_v34 = vpack.c.bf16 %v804_v32, %v804_v32  ;;  %701 = vst [vmem:[#allocation3 + $0x6c] sm:$0xf] %v631_v28  ;;  %v7940_v50 = vld [vmem:[#allocation3 + $0x510] sm:$0xf]  ;;  %v670_v32 = vpack.c.bf16 %v9358_v14, %v9358_v14 }
  0x25   : > { %506 = vst [vmem:[#allocation2 + $0x138] sm:$0xff] %v9351_v30  ;;  %4994 = vmatpush.bf16.msra.mxu0 %v9199_v37  ;;  %9675 = vmatpush.bf16.msra.mxu2 %v9199_v37  ;;  %v9049_v51 = vld [vmem:[#allocation3 + $0x530] sm:$0xf0] }
  0x26   : > { %v805_v40 = vld [vmem:[#allocation2 + $0x129] sm:$0xff]  ;;  %944 = vst [vmem:[#allocation3 + $0x514] sm:$0xf] %v874_v34  ;;  %9683 = vmatpush.bf16.msra.mxu3 %v9207_v39  ;;  %5178 = vmatpush.bf16.msra.mxu1 %v9207_v39  ;;  %v7941_v58 = vor.u32 %v9049_v51, %v7940_v50  ;;  %v9602_v34 = vld [vmem:[%s9820_s15 + $0x20] sm:$0xff]   ;;  %v671_v39 = vpack.c.bf16 %v9359_v31, %v9359_v31 }
  0x27   : > { %v875_v42 = vpack.c.bf16 %v805_v40, %v805_v40  ;;  %v769_v43 = vld [vmem:[#allocation2 + $0x9] sm:$0xff]  ;;  %736 = vst [vmem:[#allocation3 + $0x558] sm:$0xf] %v666_v33 }
  0x28   : > { %v839_v47 = vpack.c.bf16 %v769_v43, %v769_v43  ;;  %737 = vst [vmem:[#allocation3 + $0x57c] sm:$0xf] %v667_v35  ;;  %v770_v49 = vld [vmem:[#allocation2 + $0x11] sm:$0xff] }
  0x29   : > { %945 = vst [vmem:[#allocation3 + $0x538] sm:$0xf] %v875_v42  ;;  %v840_v52 = vpack.c.bf16 %v770_v49, %v770_v49  ;;  %4995 = vmatpush.bf16.msra.mxu0 %v9198_v45  ;;  %9676 = vmatpush.bf16.msra.mxu2 %v9198_v45  ;;  %v8883_v2 = vld [vmem:[#allocation3 + $0x4] sm:$0xf]  ;;  %v9620_v33 = vld [vmem:[%s9820_s15 + $0xb0] sm:$0xff]   ;;  %v9290_v49 = vunpack.c.l.bf16 %v9602_v34 }
  0x2a   : > { %909 = vst [vmem:[#allocation3 + $0x28] sm:$0xf] %v839_v47  ;;  %9684 = vmatpush.bf16.msra.mxu3 %v9206_v53  ;;  %5179 = vmatpush.bf16.msra.mxu1 %v9206_v53  ;;  %v7328_v23 = vld [vmem:[#allocation3 + $0x48] sm:$0xf]  ;;  %v9362_v46 = vunpack.c.l.bf16 %v9620_v33 }
  0x2b   : > { %507 = vst [vmem:[#allocation2 + $0x140] sm:$0xff] %v9354_v44  ;;  %v8896_v25 = vld [vmem:[#allocation3 + $0x68] sm:$0xf0]  ;;  %v636_v53 = vpack.c.bf16 %v9290_v49, %v9290_v49 }
  0x2c   : > { %v806_v59 = vld [vmem:[#allocation2 + $0x131] sm:$0xff]  ;;  %471 = vst [vmem:[#allocation2 + $0x20] sm:$0xff] %v9282_v48  ;;  %4996 = vmatmul.bf16.vlgmr.msra.gmra.mxu0 %v7293_v57  ;;  %5086 = vmatmul.bf16.vlgmr.msra.gmra.mxu2 %v7941_v58  ;;  %v7329_v35 = vor.u32 %v8896_v25, %v7328_v23  ;;  %v9363_v57 = vunpack.c.h.bf16 %v9620_v33  ;;  %v9235_v25 = vld [vmem:[%s10920_s2 + $0x128] sm:$0xff] }
  0x2d   : > { %v876_v62 = vpack.c.bf16 %v806_v59, %v806_v59  ;;  %910 = vst [vmem:[#allocation3 + $0x4c] sm:$0xf] %v840_v52  ;;  %v9045_v0 = vld [vmem:[#allocation3 + $0x514] sm:$0xf]  ;;  %5724 = vmatpush.bf16.msrb.mxu0 %v9237_v55  ;;  %5356 = vmatpush.bf16.msrb.mxu2 %v9221_v56  ;;  %v9291_v52 = vunpack.c.h.bf16 %v9602_v34  ;;  %v9604_v23 = vld [vmem:[%s9820_s15 + $0x30] sm:$0xff]  }
  0x2e   : > { %472 = vst [vmem:[#allocation2 + $0x28] sm:$0xff] %v9283_v54  ;;  %5540 = vmatpush.bf16.msrb.mxu3 %v9229_v61  ;;  %v7976_v26 = vld [vmem:[#allocation3 + $0x558] sm:$0xf] }
  0x2f   : > { %946 = vst [vmem:[#allocation3 + $0x55c] sm:$0xf] %v876_v62  ;;  %v9058_v27 = vld [vmem:[#allocation3 + $0x578] sm:$0xf0]  ;;  %v637_v55 = vpack.c.bf16 %v9291_v52, %v9291_v52  ;;  %v673_v62 = vpack.c.bf16 %v9363_v57, %v9363_v57 }
  0x30   : > { %v7942_v4 = vld [vmem:[#allocation3 + $0x534] sm:$0xf0]  ;;  %702 = vst [vmem:[#allocation3 + $0x90] sm:$0xf] %v632_v60  ;;  %v7977_v36 = vor.u32 %v9058_v27, %v7976_v26  ;;  %v672_v60 = vpack.c.bf16 %v9362_v46, %v9362_v46  ;;  %v9219_v26 = vld [vmem:[%s10920_s2 + $0xa8] sm:$0xff] }
  0x31   : > { %v7945_v7 = vor.u32 %v9045_v0, %v7942_v4  ;;  %v7294_v8 = vld [vmem:[#allocation3 + $0x24] sm:$0xf0]  ;;  %703 = vst [vmem:[#allocation3 + $0xb4] sm:$0xf] %v633_v63  ;;  %5725 = vmatpush.bf16.msrb.mxu0 %v9236_v17  ;;  %5357 = vmatpush.bf16.msrb.mxu2 %v9220_v18  ;;  %v9621_v63 = vld [vmem:[%s9820_s15 + $0xb8] sm:$0xff]  }
  0x32   : > { %v7297_v10 = vor.u32 %v8883_v2, %v7294_v8  ;;  %v807_v11 = vld [vmem:[#allocation2 + $0x139] sm:$0xff]  ;;  %508 = vst [vmem:[#allocation2 + $0x148] sm:$0xff] %v9355_v1  ;;  %5541 = vmatpush.bf16.msrb.mxu3 %v9228_v20  ;;  %v9603_v1 = vld [vmem:[%s9820_s15 + $0x28] sm:$0xff]   ;;  %v9366_v6 = vunpack.c.l.bf16 %v9621_v63 }
  0x33   : > { %5270 = vmatmul.bf16.vlgmr.msra.gmra.mxu3 %v7945_v7  ;;  %v877_v12 = vpack.c.bf16 %v807_v11, %v807_v11  ;;  %v771_v13 = vld [vmem:[#allocation2 + $0x19] sm:$0xff]  ;;  %738 = vst [vmem:[#allocation3 + $0x5a0] sm:$0xf] %v668_v3  ;;  %v9295_v18 = vunpack.c.h.bf16 %v9603_v1 }
  0x34   : > { %5180 = vmatmul.bf16.vlgmr.msra.gmra.mxu1 %v7297_v10  ;;  %v841_v15 = vpack.c.bf16 %v771_v13, %v771_v13  ;;  %739 = vst [vmem:[#allocation3 + $0x5c4] sm:$0xf] %v669_v5  ;;  %v8892_v40 = vld [vmem:[#allocation3 + $0x4c] sm:$0xf] }
  0x35   : > { %947 = vst [vmem:[#allocation3 + $0x580] sm:$0xf] %v877_v12  ;;  %v772_v19 = vld [vmem:[#allocation2 + $0x21] sm:$0xff]  ;;  %v9294_v12 = vunpack.c.l.bf16 %v9603_v1  ;;  %5726 = vmatpush.bf16.msrb.mxu0 %v9235_v25  ;;  %5358 = vmatpush.bf16.msrb.mxu2 %v9219_v26 }
  0x36   : > { %911 = vst [vmem:[#allocation3 + $0x70] sm:$0xf] %v841_v15  ;;  %v842_v21 = vpack.c.bf16 %v772_v19, %v772_v19  ;;  %v9054_v37 = vld [vmem:[#allocation3 + $0x55c] sm:$0xf]  ;;  %v9367_v19 = vunpack.c.h.bf16 %v9621_v63 }
  0x37   : > { %509 = vst [vmem:[#allocation2 + $0x150] sm:$0xff] %v9358_v14  ;;  %v7364_v58 = vld [vmem:[#allocation3 + $0x90] sm:$0xf]  ;;  %v638_v27 = vpack.c.bf16 %v9294_v12, %v9294_v12 }
  0x38   : > { %473 = vst [vmem:[#allocation2 + $0x30] sm:$0xff] %v9286_v16  ;;  %v8905_v59 = vld [vmem:[#allocation3 + $0xb0] sm:$0xf0]  ;;  %v9622_v16 = vld [vmem:[%s9820_s15 + $0xc0] sm:$0xff]  }
  0x39   : > { %v808_v28 = vld [vmem:[#allocation2 + $0x141] sm:$0xff]  ;;  %912 = vst [vmem:[#allocation3 + $0x94] sm:$0xf] %v842_v21  ;;  %v7365_v7 = vor.u32 %v8905_v59, %v7364_v58  ;;  %v9299_v58 = vunpack.c.h.bf16 %v9604_v23 }
  0x3a   : > { %v878_v30 = vpack.c.bf16 %v808_v28, %v808_v28  ;;  %474 = vst [vmem:[#allocation2 + $0x38] sm:$0xff] %v9287_v22  ;;  %v8012_v61 = vld [vmem:[#allocation3 + $0x5a0] sm:$0xf]  ;;  %v9892_v22 = vunpack.c.l.bf16 %v9622_v16  ;;  %v639_v28 = vpack.c.bf16 %v9295_v18, %v9295_v18 }
  0x3b   : > { %704 = vst [vmem:[#allocation3 + $0xd8] sm:$0xf] %v634_v24  ;;  %v9067_v0 = vld [vmem:[#allocation3 + $0x5c0] sm:$0xf0] }
  0x3c   : > { %v7978_v38 = vld [vmem:[#allocation3 + $0x57c] sm:$0xf0]  ;;  %948 = vst [vmem:[#allocation3 + $0x5a4] sm:$0xf] %v878_v30  ;;  %5001 = vmatmul.bf16.gmra.mxu0 %v7329_v35  ;;  %5091 = vmatmul.bf16.gmra.mxu2 %v7977_v36  ;;  %v8013_v8 = vor.u32 %v9067_v0, %v8012_v61  ;;  %v674_v35 = vpack.c.bf16 %v9366_v6, %v9366_v6 }
  0x3d   : > { %v7330_v41 = vld [vmem:[#allocation3 + $0x6c] sm:$0xf0]  ;;  %705 = vst [vmem:[#allocation3 + $0xfc] sm:$0xf] %v635_v29  ;;  %v7981_v43 = vor.u32 %v9054_v37, %v7978_v38  ;;  %v9298_v29 = vunpack.c.l.bf16 %v9604_v23  ;;  %v9227_v30 = vld [vmem:[%s10920_s2 + $0xe8] sm:$0xff]  ;;  %v641_v0 = vpack.c.bf16 %v9299_v58, %v9299_v58  ;;  %v676_v1 = vpack.c.bf16 %v9892_v22, %v9892_v22 }
  0x3e   : > { %v809_v42 = vld [vmem:[#allocation2 + $0x149] sm:$0xff]  ;;  %510 = vst [vmem:[#allocation2 + $0x158] sm:$0xff] %v9359_v31  ;;  %v7333_v47 = vor.u32 %v8892_v40, %v7330_v41  ;;  %5542 = vmatpush.bf16.msrb.mxu3 %v9227_v30  ;;  %v9234_v30 = vld [vmem:[%s10920_s2 + $0x120] sm:$0xff] }
  0x3f   : > { %v879_v44 = vpack.c.bf16 %v809_v42, %v809_v42  ;;  %v773_v45 = vld [vmem:[#allocation2 + $0x29] sm:$0xff]  ;;  %740 = vst [vmem:[#allocation3 + $0x5e8] sm:$0xf] %v670_v32  ;;  %v640_v63 = vpack.c.bf16 %v9298_v29, %v9298_v29  ;;  %5727 = vmatpush.bf16.msrb.mxu0 %v9234_v30 }
  0x40   : > { %v843_v48 = vpack.c.bf16 %v773_v45, %v773_v45  ;;  %741 = vst [vmem:[#allocation3 + $0x60c] sm:$0xf] %v671_v39  ;;  %v8901_v3 = vld [vmem:[#allocation3 + $0x94] sm:$0xf]  ;;  %v675_v39 = vpack.c.bf16 %v9367_v19, %v9367_v19 }
  0x41   : > { %949 = vst [vmem:[#allocation3 + $0x5c8] sm:$0xf] %v879_v44  ;;  %v774_v50 = vld [vmem:[#allocation2 + $0x31] sm:$0xff] }
  0x42   : > { %913 = vst [vmem:[#allocation3 + $0xb8] sm:$0xf] %v843_v48  ;;  %v844_v51 = vpack.c.bf16 %v774_v50, %v774_v50  ;;  %v7400_v32 = vld [vmem:[#allocation3 + $0xd8] sm:$0xf]  ;;  %v9623_v50 = vld [vmem:[%s9820_s15 + $0xc8] sm:$0xff]  }
  0x43   : > { %5275 = vmatmul.bf16.gmra.mxu3 %v7981_v43  ;;  %511 = vst [vmem:[#allocation2 + $0x160] sm:$0xff] %v9362_v46  ;;  %v9063_v9 = vld [vmem:[#allocation3 + $0x5a4] sm:$0xf]  ;;  %v9907_v59 = vunpack.c.l.bf16 %v9623_v50 }
  0x44   : > { %5185 = vmatmul.bf16.gmra.mxu1 %v7333_v47  ;;  %475 = vst [vmem:[#allocation2 + $0x40] sm:$0xff] %v9290_v49  ;;  %v8914_v36 = vld [vmem:[#allocation3 + $0xf8] sm:$0xf0] }
  0x45   : > { %v810_v54 = vld [vmem:[#allocation2 + $0x151] sm:$0xff]  ;;  %914 = vst [vmem:[#allocation3 + $0xdc] sm:$0xf] %v844_v51  ;;  %v7401_v46 = vor.u32 %v8914_v36, %v7400_v32  ;;  %v678_v36 = vpack.c.bf16 %v9907_v59, %v9907_v59 }
  0x46   : > { %v880_v56 = vpack.c.bf16 %v810_v54, %v810_v54  ;;  %476 = vst [vmem:[#allocation2 + $0x48] sm:$0xff] %v9291_v52  ;;  %v8048_v37 = vld [vmem:[#allocation3 + $0x5e8] sm:$0xf]  ;;  %v9371_v54 = vunpack.c.h.bf16 %v9622_v16 }
  0x47   : > { %706 = vst [vmem:[#allocation3 + $0x120] sm:$0xf] %v636_v53  ;;  %v9076_v40 = vld [vmem:[#allocation3 + $0x608] sm:$0xf0] }
  0x48   : > { %950 = vst [vmem:[#allocation3 + $0x5ec] sm:$0xf] %v880_v56  ;;  %v8014_v10 = vld [vmem:[#allocation3 + $0x5c4] sm:$0xf0]  ;;  %v8049_v47 = vor.u32 %v9076_v40, %v8048_v37 }
  0x49   : > { %707 = vst [vmem:[#allocation3 + $0x144] sm:$0xf] %v637_v55  ;;  %v7366_v13 = vld [vmem:[#allocation3 + $0xb4] sm:$0xf0]  ;;  %v8017_v17 = vor.u32 %v9063_v9, %v8014_v10  ;;  %v9605_v55 = vld [vmem:[%s9820_s15 + $0x38] sm:$0xff]  }
  0x4a   : > { %v811_v2 = vld [vmem:[#allocation2 + $0x159] sm:$0xff]  ;;  %512 = vst [vmem:[#allocation2 + $0x168] sm:$0xff] %v9363_v57  ;;  %v7369_v20 = vor.u32 %v8901_v3, %v7366_v13  ;;  %v9303_v26 = vunpack.c.h.bf16 %v9605_v55 }
  0x4b   : > { %v881_v4 = vpack.c.bf16 %v811_v2, %v811_v2  ;;  %v775_v5 = vld [vmem:[#allocation2 + $0x39] sm:$0xff]  ;;  %742 = vst [vmem:[#allocation3 + $0x630] sm:$0xf] %v672_v60  ;;  %v677_v2 = vpack.c.bf16 %v9371_v54, %v9371_v54 }
  0x4c   : > { %v845_v11 = vpack.c.bf16 %v775_v5, %v775_v5  ;;  %743 = vst [vmem:[#allocation3 + $0x654] sm:$0xf] %v673_v62  ;;  %5006 = vmatmul.bf16.gmra.mxu0 %v7365_v7  ;;  %5096 = vmatmul.bf16.gmra.mxu2 %v8013_v8  ;;  %v8910_v51 = vld [vmem:[#allocation3 + $0xdc] sm:$0xf]  ;;  %v9302_v62 = vunpack.c.l.bf16 %v9605_v55  ;;  %v643_v32 = vpack.c.bf16 %v9303_v26, %v9303_v26 }
  0x4d   : > { %951 = vst [vmem:[#allocation3 + $0x610] sm:$0xf] %v881_v4  ;;  %v776_v14 = vld [vmem:[#allocation2 + $0x41] sm:$0xff] }
  0x4e   : > { %915 = vst [vmem:[#allocation3 + $0x100] sm:$0xf] %v845_v11  ;;  %v846_v15 = vpack.c.bf16 %v776_v14, %v776_v14  ;;  %v7436_v4 = vld [vmem:[#allocation3 + $0x120] sm:$0xf] }
  0x4f   : > { %513 = vst [vmem:[#allocation2 + $0x170] sm:$0xff] %v9366_v6  ;;  %v9072_v44 = vld [vmem:[#allocation3 + $0x5ec] sm:$0xf] }
  0x50   : > { %477 = vst [vmem:[#allocation2 + $0x50] sm:$0xff] %v9294_v12  ;;  %v8923_v5 = vld [vmem:[#allocation3 + $0x140] sm:$0xf0] }
  0x51   : > { %v812_v21 = vld [vmem:[#allocation2 + $0x161] sm:$0xff]  ;;  %916 = vst [vmem:[#allocation3 + $0x124] sm:$0xf] %v846_v15  ;;  %v7437_v15 = vor.u32 %v8923_v5, %v7436_v4 }
  0x52   : > { %v882_v24 = vpack.c.bf16 %v812_v21, %v812_v21  ;;  %478 = vst [vmem:[#allocation2 + $0x58] sm:$0xff] %v9295_v18  ;;  %v8084_v8 = vld [vmem:[#allocation3 + $0x630] sm:$0xf] }
  0x53   : > { %5280 = vmatmul.bf16.gmra.mxu3 %v8017_v17  ;;  %514 = vst [vmem:[#allocation2 + $0x178] sm:$0xff] %v9367_v19  ;;  %v9085_v9 = vld [vmem:[#allocation3 + $0x650] sm:$0xf0]  ;;  %v9624_v19 = vld [vmem:[%s9820_s15 + $0xd0] sm:$0xff]  }
  0x54   : > { %5190 = vmatmul.bf16.gmra.mxu1 %v7369_v20  ;;  %952 = vst [vmem:[#allocation3 + $0x634] sm:$0xf] %v882_v24  ;;  %v8050_v48 = vld [vmem:[#allocation3 + $0x60c] sm:$0xf0]  ;;  %v8085_v16 = vor.u32 %v9085_v9, %v8084_v8  ;;  %v9913_v23 = vunpack.c.l.bf16 %v9624_v19  ;;  %v9606_v24 = vld [vmem:[%s9820_s15 + $0x40] sm:$0xff]   ;;  %v9379_v55 = vunpack.c.h.bf16 %v9624_v19 }
  0x55   : > { %515 = vst [vmem:[#allocation2 + $0x180] sm:$0xff] %v9892_v22  ;;  %v7402_v52 = vld [vmem:[#allocation3 + $0xfc] sm:$0xf0]  ;;  %v8053_v56 = vor.u32 %v9072_v44, %v8050_v48  ;;  %v9375_v22 = vunpack.c.h.bf16 %v9623_v50 }
  0x56   : > { %v813_v31 = vld [vmem:[#allocation2 + $0x169] sm:$0xff]  ;;  %708 = vst [vmem:[#allocation3 + $0x168] sm:$0xf] %v638_v27  ;;  %v7405_v60 = vor.u32 %v8910_v51, %v7402_v52  ;;  %v9916_v27 = vunpack.c.l.bf16 %v9606_v24  ;;  %v9625_v52 = vld [vmem:[%s9820_s15 + $0xd8] sm:$0xff]  }
  0x57   : > { %v883_v33 = vpack.c.bf16 %v813_v31, %v813_v31  ;;  %v777_v34 = vld [vmem:[#allocation2 + $0x49] sm:$0xff]  ;;  %709 = vst [vmem:[#allocation3 + $0x18c] sm:$0xf] %v639_v28  ;;  %v642_v31 = vpack.c.bf16 %v9302_v62, %v9302_v62  ;;  %v679_v37 = vpack.c.bf16 %v9375_v22, %v9375_v22 }
  0x58   : > { %v847_v38 = vpack.c.bf16 %v777_v34, %v777_v34  ;;  %479 = vst [vmem:[#allocation2 + $0x60] sm:$0xff] %v9298_v29  ;;  %v8919_v20 = vld [vmem:[#allocation3 + $0x124] sm:$0xf]  ;;  %v9218_v29 = vld [vmem:[%s10920_s2 + $0xa0] sm:$0xff] }
  0x59   : > { %953 = vst [vmem:[#allocation3 + $0x658] sm:$0xf] %v883_v33  ;;  %v778_v41 = vld [vmem:[#allocation2 + $0x51] sm:$0xff]  ;;  %v9226_v33 = vld [vmem:[%s10920_s2 + $0xe0] sm:$0xff]  ;;  %5359 = vmatpush.bf16.msrb.mxu2 %v9218_v29 }
  0x5a   : > { %917 = vst [vmem:[#allocation3 + $0x148] sm:$0xf] %v847_v38  ;;  %v814_v42 = vld [vmem:[#allocation2 + $0x171] sm:$0xff]  ;;  %v848_v43 = vpack.c.bf16 %v778_v41, %v778_v41  ;;  %5543 = vmatpush.bf16.msrb.mxu3 %v9226_v33 }
  0x5b   : > { %744 = vst [vmem:[#allocation3 + $0x678] sm:$0xf] %v674_v35  ;;  %v884_v45 = vpack.c.bf16 %v814_v42, %v814_v42  ;;  %v9081_v12 = vld [vmem:[#allocation3 + $0x634] sm:$0xf] }
  0x5c   : > { %745 = vst [vmem:[#allocation3 + $0x69c] sm:$0xf] %v675_v39  ;;  %v815_v49 = vld [vmem:[#allocation2 + $0x179] sm:$0xff]  ;;  %5011 = vmatmul.bf16.gmra.mxu0 %v7401_v46  ;;  %5101 = vmatmul.bf16.gmra.mxu2 %v8049_v47 }
  0x5d   : > { %v885_v53 = vpack.c.bf16 %v815_v49, %v815_v49  ;;  %954 = vst [vmem:[#allocation3 + $0x67c] sm:$0xf] %v884_v45  ;;  %v7472_v35 = vld [vmem:[#allocation3 + $0x168] sm:$0xf] }
  0x5e   : > { %918 = vst [vmem:[#allocation3 + $0x16c] sm:$0xf] %v848_v43  ;;  %v8932_v40 = vld [vmem:[#allocation3 + $0x188] sm:$0xf0] }
  0x5f   : > { %955 = vst [vmem:[#allocation3 + $0x6a0] sm:$0xf] %v885_v53  ;;  %v779_v57 = vld [vmem:[#allocation2 + $0x59] sm:$0xff]  ;;  %v7473_v49 = vor.u32 %v8932_v40, %v7472_v35 }
  0x60   : > { %v849_v61 = vpack.c.bf16 %v779_v57, %v779_v57  ;;  %516 = vst [vmem:[#allocation2 + $0x188] sm:$0xff] %v9371_v54  ;;  %v8086_v17 = vld [vmem:[#allocation3 + $0x654] sm:$0xf0]  ;;  %v9607_v57 = vld [vmem:[%s9820_s15 + $0x48] sm:$0xff]  }
  0x61   : > { %480 = vst [vmem:[#allocation2 + $0x68] sm:$0xff] %v9299_v58  ;;  %v7438_v21 = vld [vmem:[#allocation3 + $0x144] sm:$0xf0]  ;;  %v8089_v25 = vor.u32 %v9081_v12, %v8086_v17 }
  0x62   : > { %919 = vst [vmem:[#allocation3 + $0x190] sm:$0xf] %v849_v61  ;;  %v7441_v28 = vor.u32 %v8919_v20, %v7438_v21  ;;  %v8120_v41 = vld [vmem:[#allocation3 + $0x678] sm:$0xf]  ;;  %v9383_v21 = vunpack.c.h.bf16 %v9625_v52 }
  0x63   : > { %5285 = vmatmul.bf16.gmra.mxu3 %v8053_v56  ;;  %517 = vst [vmem:[#allocation2 + $0x190] sm:$0xff] %v9907_v59  ;;  %v9094_v44 = vld [vmem:[#allocation3 + $0x698] sm:$0xf0]  ;;  %v9932_v56 = vunpack.c.l.bf16 %v9625_v52  ;;  %v9307_v59 = vunpack.c.h.bf16 %v9606_v24  ;;  %v9311_v24 = vunpack.c.h.bf16 %v9607_v57  ;;  %v9609_v52 = vld [vmem:[%s9820_s15 + $0x58] sm:$0xff]  }
  0x64   : > { %5195 = vmatmul.bf16.gmra.mxu1 %v7405_v60  ;;  %481 = vst [vmem:[#allocation2 + $0x70] sm:$0xff] %v9302_v62  ;;  %v9090_v48 = vld [vmem:[#allocation3 + $0x67c] sm:$0xf]  ;;  %v8121_v50 = vor.u32 %v9094_v44, %v8120_v41  ;;  %v9935_v60 = vunpack.c.l.bf16 %v9607_v57 }
  0x65   : > { %710 = vst [vmem:[#allocation3 + $0x1b0] sm:$0xf] %v640_v63  ;;  %v8928_v53 = vld [vmem:[#allocation3 + $0x16c] sm:$0xf]  ;;  %v647_v30 = vpack.c.bf16 %v9311_v24, %v9311_v24 }
  0x66   : > { %711 = vst [vmem:[#allocation3 + $0x1d4] sm:$0xf] %v641_v0  ;;  %v8122_v51 = vld [vmem:[#allocation3 + $0x69c] sm:$0xf0]  ;;  %v644_v0 = vpack.c.bf16 %v9916_v27, %v9916_v27  ;;  %v646_v29 = vpack.c.bf16 %v9935_v60, %v9935_v60 }
  0x67   : > { %v816_v3 = vld [vmem:[#allocation2 + $0x181] sm:$0xff]  ;;  %746 = vst [vmem:[#allocation3 + $0x6c0] sm:$0xf] %v676_v1  ;;  %v8125_v58 = vor.u32 %v9090_v48, %v8122_v51  ;;  %v645_v1 = vpack.c.bf16 %v9307_v59, %v9307_v59 }
  0x68   : > { %v886_v6 = vpack.c.bf16 %v816_v3, %v816_v3  ;;  %v780_v7 = vld [vmem:[#allocation2 + $0x61] sm:$0xff]  ;;  %747 = vst [vmem:[#allocation3 + $0x6e4] sm:$0xf] %v677_v2  ;;  %v680_v2 = vpack.c.bf16 %v9913_v23, %v9913_v23 }
  0x69   : > { %v850_v10 = vpack.c.bf16 %v780_v7, %v780_v7  ;;  %518 = vst [vmem:[#allocation2 + $0x198] sm:$0xff] %v9375_v22  ;;  %v7474_v54 = vld [vmem:[#allocation3 + $0x18c] sm:$0xf0]  ;;  %v9608_v22 = vld [vmem:[%s9820_s15 + $0x50] sm:$0xff]   ;;  %v9627_v48 = vld [vmem:[%s9820_s15 + $0xe8] sm:$0xff]  }
  0x6a   : > { %v817_v11 = vld [vmem:[#allocation2 + $0x189] sm:$0xff]  ;;  %956 = vst [vmem:[#allocation3 + $0x6c4] sm:$0xf] %v886_v6  ;;  %v7477_v61 = vor.u32 %v8928_v53, %v7474_v54  ;;  %v681_v6 = vpack.c.bf16 %v9379_v55, %v9379_v55  ;;  %v9245_v54 = vld [vmem:[%s10920_s2 + $0x178] sm:$0xff]  ;;  %v9963_v57 = vunpack.c.l.bf16 %v9627_v48 }
  0x6b   : > { %v887_v13 = vpack.c.bf16 %v817_v11, %v817_v11  ;;  %v781_v14 = vld [vmem:[#allocation2 + $0x69] sm:$0xff]  ;;  %920 = vst [vmem:[#allocation3 + $0x1b4] sm:$0xf] %v850_v10  ;;  %5908 = vmatpush.bf16.msrb.mxu1 %v9245_v54 }
  0x6c   : > { %v851_v18 = vpack.c.bf16 %v781_v14, %v781_v14  ;;  %5016 = vmatmul.bf16.gmra.mxu0 %v7437_v15  ;;  %5106 = vmatmul.bf16.gmra.mxu2 %v8085_v16  ;;  %519 = vst [vmem:[#allocation2 + $0x1a0] sm:$0xff] %v9913_v23  ;;  %v7508_v63 = vld [vmem:[#allocation3 + $0x1b0] sm:$0xf] }
  0x6d   : > { %957 = vst [vmem:[#allocation3 + $0x6e8] sm:$0xf] %v887_v13  ;;  %v8941_v4 = vld [vmem:[#allocation3 + $0x1d0] sm:$0xf0] }
  0x6e   : > { %921 = vst [vmem:[#allocation3 + $0x1d8] sm:$0xf] %v851_v18  ;;  %v8156_v5 = vld [vmem:[#allocation3 + $0x6c0] sm:$0xf]  ;;  %v7509_v14 = vor.u32 %v8941_v4, %v7508_v63  ;;  %v9626_v18 = vld [vmem:[%s9820_s15 + $0xe0] sm:$0xff]  }
  0x6f   : > { %482 = vst [vmem:[#allocation2 + $0x78] sm:$0xff] %v9303_v26  ;;  %v9103_v8 = vld [vmem:[#allocation3 + $0x6e0] sm:$0xf0]  ;;  %v9387_v51 = vunpack.c.h.bf16 %v9626_v18 }
  0x70   : > { %483 = vst [vmem:[#allocation2 + $0x80] sm:$0xff] %v9916_v27  ;;  %v818_v34 = vld [vmem:[#allocation2 + $0x191] sm:$0xff]  ;;  %v8157_v15 = vor.u32 %v9103_v8, %v8156_v5  ;;  %v9947_v27 = vunpack.c.l.bf16 %v9608_v22  ;;  %v9979_v8 = vld [vmem:[#allocation4] ss:$0 sm:$0xff] }
  0x71   : > { %712 = vst [vmem:[#allocation3 + $0x1f8] sm:$0xf] %v642_v31  ;;  %v888_v39 = vpack.c.bf16 %v818_v34, %v818_v34  ;;  %v9099_v12 = vld [vmem:[#allocation3 + $0x6c4] sm:$0xf]  ;;  %v682_v31 = vpack.c.bf16 %v9932_v56, %v9932_v56  ;;  %v683_v34 = vpack.c.bf16 %v9383_v21, %v9383_v21  ;;  %v685_v4 = vpack.c.bf16 %v9387_v51, %v9387_v51 }
  0x72   : > { %713 = vst [vmem:[#allocation3 + $0x21c] sm:$0xf] %v643_v32  ;;  %v8937_v19 = vld [vmem:[#allocation3 + $0x1b4] sm:$0xf]  ;;  %v648_v63 = vpack.c.bf16 %v9947_v27, %v9947_v27 }
  0x73   : > { %5290 = vmatmul.bf16.gmra.mxu3 %v8089_v25  ;;  %v819_v38 = vld [vmem:[#allocation2 + $0x199] sm:$0xff]  ;;  %748 = vst [vmem:[#allocation3 + $0x708] sm:$0xf] %v678_v36  ;;  %v9945_v25 = vunpack.c.l.bf16 %v9626_v18 }
  0x74   : > { %5200 = vmatmul.bf16.gmra.mxu1 %v7441_v28  ;;  %v889_v42 = vpack.c.bf16 %v819_v38, %v819_v38  ;;  %749 = vst [vmem:[#allocation3 + $0x72c] sm:$0xf] %v679_v37  ;;  %v8158_v16 = vld [vmem:[#allocation3 + $0x6e4] sm:$0xf0] }
  0x75   : > { %958 = vst [vmem:[#allocation3 + $0x70c] sm:$0xf] %v888_v39  ;;  %v7510_v20 = vld [vmem:[#allocation3 + $0x1d4] sm:$0xf0]  ;;  %v8161_v23 = vor.u32 %v9099_v12, %v8158_v16 }
  0x76   : > { %v782_v43 = vld [vmem:[#allocation2 + $0x71] sm:$0xff]  ;;  %959 = vst [vmem:[#allocation3 + $0x730] sm:$0xf] %v889_v42  ;;  %v7513_v26 = vor.u32 %v8937_v19, %v7510_v20 }
  0x77   : > { %v783_v45 = vld [vmem:[#allocation2 + $0x79] sm:$0xff]  ;;  %v852_v46 = vpack.c.bf16 %v782_v43, %v782_v43  ;;  %520 = vst [vmem:[#allocation2 + $0x1a8] sm:$0xff] %v9379_v55  ;;  %v9628_v19 = vld [vmem:[%s9820_s15 + $0xf0] sm:$0xff]  }
  0x78   : > { %v853_v47 = vpack.c.bf16 %v783_v45, %v783_v45  ;;  %521 = vst [vmem:[#allocation2 + $0x1b0] sm:$0xff] %v9932_v56  ;;  %v7544_v28 = vld [vmem:[#allocation3 + $0x1f8] sm:$0xf]  ;;  %v9217_v55 = vld [vmem:[%s10920_s2 + $0x98] sm:$0xff]  ;;  %v9315_v56 = vunpack.c.h.bf16 %v9608_v22 }
  0x79   : > { %922 = vst [vmem:[#allocation3 + $0x1fc] sm:$0xf] %v852_v46  ;;  %v8950_v32 = vld [vmem:[#allocation3 + $0x218] sm:$0xf0]  ;;  %5360 = vmatpush.bf16.msrb.mxu2 %v9217_v55 }
  0x7a   : > { %923 = vst [vmem:[#allocation3 + $0x220] sm:$0xf] %v853_v47  ;;  %v8192_v33 = vld [vmem:[#allocation3 + $0x708] sm:$0xf]  ;;  %v7545_v44 = vor.u32 %v8950_v32, %v7544_v28  ;;  %v9986_v28 = vunpack.c.l.bf16 %v9628_v19 }
  0x7b   : > { %484 = vst [vmem:[#allocation2 + $0x88] sm:$0xff] %v9307_v59  ;;  %v9112_v36 = vld [vmem:[#allocation3 + $0x728] sm:$0xf0]  ;;  %v9965_v59 = vunpack.c.l.bf16 %v9609_v52 }
  0x7c   : > { %5021 = vmatmul.bf16.gmra.mxu0 %v7473_v49  ;;  %5111 = vmatmul.bf16.gmra.mxu2 %v8121_v50  ;;  %485 = vst [vmem:[#allocation2 + $0x90] sm:$0xff] %v9935_v60  ;;  %v9108_v40 = vld [vmem:[#allocation3 + $0x70c] sm:$0xf]  ;;  %v8193_v45 = vor.u32 %v9112_v36, %v8192_v33  ;;  %v9225_v60 = vld [vmem:[%s10920_s2 + $0xd8] sm:$0xff] }
  0x7d   : > { %714 = vst [vmem:[#allocation3 + $0x240] sm:$0xf] %v644_v0  ;;  %v8194_v46 = vld [vmem:[#allocation3 + $0x72c] sm:$0xf0]  ;;  %5544 = vmatpush.bf16.msrb.mxu3 %v9225_v60  ;;  %v649_v0 = vpack.c.bf16 %v9315_v56, %v9315_v56 }
  0x7e   : > { %v820_v62 = vld [vmem:[#allocation2 + $0x1a1] sm:$0xff]  ;;  %715 = vst [vmem:[#allocation3 + $0x264] sm:$0xf] %v645_v1  ;;  %v8197_v53 = vor.u32 %v9108_v40, %v8194_v46  ;;  %v684_v1 = vpack.c.bf16 %v9945_v25, %v9945_v25 }
  0x7f   : > { %v821_v3 = vld [vmem:[#allocation2 + $0x1a9] sm:$0xff]  ;;  %v890_v9 = vpack.c.bf16 %v820_v62, %v820_v62  ;;  %750 = vst [vmem:[#allocation3 + $0x750] sm:$0xf] %v680_v2 }
  0x80   : > { %v891_v11 = vpack.c.bf16 %v821_v3, %v821_v3  ;;  %751 = vst [vmem:[#allocation3 + $0x774] sm:$0xf] %v681_v6  ;;  %v8946_v49 = vld [vmem:[#allocation3 + $0x1fc] sm:$0xf] }
  0x81   : > { %960 = vst [vmem:[#allocation3 + $0x754] sm:$0xf] %v890_v9  ;;  %v7546_v50 = vld [vmem:[#allocation3 + $0x21c] sm:$0xf0] }
  0x82   : > { %v784_v7 = vld [vmem:[#allocation2 + $0x81] sm:$0xff]  ;;  %961 = vst [vmem:[#allocation3 + $0x778] sm:$0xf] %v891_v11 }
  0x83   : > { %5295 = vmatmul.bf16.gmra.mxu3 %v8125_v58  ;;  %v785_v10 = vld [vmem:[#allocation2 + $0x89] sm:$0xff]  ;;  %v854_v13 = vpack.c.bf16 %v784_v7, %v784_v7  ;;  %486 = vst [vmem:[#allocation2 + $0x98] sm:$0xff] %v9311_v24  ;;  %v7549_v58 = vor.u32 %v8946_v49, %v7546_v50  ;;  %v9391_v24 = vunpack.c.h.bf16 %v9627_v48 }
  0x84   : > { %5205 = vmatmul.bf16.gmra.mxu1 %v7477_v61  ;;  %v855_v17 = vpack.c.bf16 %v785_v10, %v785_v10  ;;  %522 = vst [vmem:[#allocation2 + $0x1b8] sm:$0xff] %v9383_v21  ;;  %v9233_v61 = vld [vmem:[%s10920_s2 + $0x118] sm:$0xff]  ;;  %v7580_v62 = vld [vmem:[#allocation3 + $0x240] sm:$0xf] }
  0x85   : > { %924 = vst [vmem:[#allocation3 + $0x244] sm:$0xf] %v854_v13  ;;  %5728 = vmatpush.bf16.msrb.mxu0 %v9233_v61  ;;  %v8959_v2 = vld [vmem:[#allocation3 + $0x260] sm:$0xf0] }
  0x86   : > { %925 = vst [vmem:[#allocation3 + $0x268] sm:$0xf] %v855_v17  ;;  %v8228_v3 = vld [vmem:[#allocation3 + $0x750] sm:$0xf] }
  0x87   : > { %523 = vst [vmem:[#allocation2 + $0x1c0] sm:$0xff] %v9945_v25  ;;  %v9121_v6 = vld [vmem:[#allocation3 + $0x770] sm:$0xf0]  ;;  %v9984_v25 = vld [vmem:[%s9820_s15 + $0x60] sm:$0xff]  }
  0x88   : > { %487 = vst [vmem:[#allocation2 + $0xa0] sm:$0xff] %v9947_v27  ;;  %v9117_v11 = vld [vmem:[#allocation3 + $0x754] sm:$0xf]  ;;  %v8229_v16 = vor.u32 %v9121_v6, %v8228_v3  ;;  %v9319_v27 = vunpack.c.h.bf16 %v9609_v52  ;;  %v10013_v6 = vld [vmem:[%s9820_s15 + $0x68] sm:$0xff]  }
  0x89   : > { %716 = vst [vmem:[#allocation3 + $0x288] sm:$0xf] %v646_v29  ;;  %v8230_v17 = vld [vmem:[#allocation3 + $0x774] sm:$0xf0] }
  0x8a   : > { %v786_v35 = vld [vmem:[#allocation2 + $0x91] sm:$0xff]  ;;  %717 = vst [vmem:[#allocation3 + $0x2ac] sm:$0xf] %v647_v30  ;;  %v9989_v30 = vunpack.c.l.bf16 %v9984_v25  ;;  %v651_v40 = vpack.c.bf16 %v9319_v27, %v9319_v27 }
  0x8b   : > { %v822_v37 = vld [vmem:[#allocation2 + $0x1b1] sm:$0xff]  ;;  %752 = vst [vmem:[#allocation3 + $0x798] sm:$0xf] %v682_v31  ;;  %v856_v43 = vpack.c.bf16 %v786_v35, %v786_v35 }
  0x8c   : > { %5026 = vmatmul.bf16.gmra.mxu0 %v7509_v14  ;;  %5116 = vmatmul.bf16.gmra.mxu2 %v8157_v15  ;;  %v892_v39 = vpack.c.bf16 %v822_v37, %v822_v37  ;;  %753 = vst [vmem:[#allocation3 + $0x7bc] sm:$0xf] %v683_v34  ;;  %v7581_v15 = vor.u32 %v8959_v2, %v7580_v62  ;;  %v8955_v21 = vld [vmem:[#allocation3 + $0x244] sm:$0xf]  ;;  %v10007_v62 = vld [vmem:[%s9820_s15 + $0xf8] sm:$0xff]   ;;  %v10009_v2 = vunpack.c.h.bf16 %v9628_v19 }
  0x8d   : > { %926 = vst [vmem:[#allocation3 + $0x28c] sm:$0xf] %v856_v43  ;;  %v7582_v22 = vld [vmem:[#allocation3 + $0x264] sm:$0xf0] }
  0x8e   : > { %v823_v38 = vld [vmem:[#allocation2 + $0x1b9] sm:$0xff]  ;;  %962 = vst [vmem:[#allocation3 + $0x79c] sm:$0xf] %v892_v39  ;;  %v7585_v29 = vor.u32 %v8955_v21, %v7582_v22  ;;  %v650_v39 = vpack.c.bf16 %v9965_v59, %v9965_v59 }
  0x8f   : > { %v893_v41 = vpack.c.bf16 %v823_v38, %v823_v38  ;;  %v787_v42 = vld [vmem:[#allocation2 + $0x99] sm:$0xff]  ;;  %488 = vst [vmem:[#allocation2 + $0xa8] sm:$0xff] %v9315_v56 }
  0x90   : > { %v857_v47 = vpack.c.bf16 %v787_v42, %v787_v42  ;;  %524 = vst [vmem:[#allocation2 + $0x1c8] sm:$0xff] %v9387_v51  ;;  %v7616_v42 = vld [vmem:[#allocation3 + $0x288] sm:$0xf] }
  0x91   : > { %963 = vst [vmem:[#allocation3 + $0x7c0] sm:$0xf] %v893_v41  ;;  %v686_v41 = vpack.c.bf16 %v9963_v57, %v9963_v57  ;;  %v8968_v43 = vld [vmem:[#allocation3 + $0x2a8] sm:$0xf0] }
  0x92   : > { %927 = vst [vmem:[#allocation3 + $0x2b0] sm:$0xf] %v857_v47 }
  0x93   : > { %5300 = vmatmul.bf16.gmra.mxu3 %v8161_v23  ;;  %525 = vst [vmem:[#allocation2 + $0x1d0] sm:$0xff] %v9963_v57  ;;  %v9130_v47 = vld [vmem:[#allocation3 + $0x7b8] sm:$0xf0] }
  0x94   : > { %5210 = vmatmul.bf16.gmra.mxu1 %v7513_v26  ;;  %489 = vst [vmem:[#allocation2 + $0xb0] sm:$0xff] %v9965_v59  ;;  %v8233_v26 = vor.u32 %v9117_v11, %v8230_v17  ;;  %v10020_v11 = vunpack.c.l.bf16 %v10007_v62  ;;  %v9216_v17 = vld [vmem:[%s10920_s2 + $0x90] sm:$0xff] }
  0x95   : > { %718 = vst [vmem:[#allocation3 + $0x2d0] sm:$0xf] %v648_v63  ;;  %v9126_v54 = vld [vmem:[#allocation3 + $0x79c] sm:$0xf]  ;;  %5361 = vmatpush.bf16.msrb.mxu2 %v9216_v17 }
  0x96   : > { %v788_v5 = vld [vmem:[#allocation2 + $0xa1] sm:$0xff]  ;;  %719 = vst [vmem:[#allocation3 + $0x2f4] sm:$0xf] %v649_v0  ;;  %v8964_v0 = vld [vmem:[#allocation3 + $0x28c] sm:$0xf] }
  0x97   : > { %v824_v7 = vld [vmem:[#allocation2 + $0x1c1] sm:$0xff]  ;;  %754 = vst [vmem:[#allocation3 + $0x7e0] sm:$0xf] %v684_v1  ;;  %v858_v14 = vpack.c.bf16 %v788_v5, %v788_v5 }
  0x98   : > { %v894_v10 = vpack.c.bf16 %v824_v7, %v824_v7  ;;  %755 = vst [vmem:[#allocation3 + $0x804] sm:$0xf] %v685_v4  ;;  %v8266_v60 = vld [vmem:[#allocation3 + $0x7bc] sm:$0xf0] }
  0x99   : > { %928 = vst [vmem:[#allocation3 + $0x2d4] sm:$0xf] %v858_v14  ;;  %v7618_v1 = vld [vmem:[#allocation3 + $0x2ac] sm:$0xf0] }
  0x9a   : > { %v825_v9 = vld [vmem:[#allocation2 + $0x1c9] sm:$0xff]  ;;  %964 = vst [vmem:[#allocation3 + $0x7e4] sm:$0xf] %v894_v10  ;;  %v9323_v10 = vunpack.c.h.bf16 %v9984_v25 }
  0x9b   : > { %v895_v12 = vpack.c.bf16 %v825_v9, %v825_v9  ;;  %v789_v13 = vld [vmem:[#allocation2 + $0xa9] sm:$0xff]  ;;  %490 = vst [vmem:[#allocation2 + $0xb8] sm:$0xff] %v9319_v27  ;;  %v8269_v9 = vor.u32 %v9126_v54, %v8266_v60  ;;  %v652_v27 = vpack.c.bf16 %v9989_v30, %v9989_v30 }
  0x9c   : > { %5031 = vmatmul.bf16.gmra.mxu0 %v7545_v44  ;;  %5121 = vmatmul.bf16.gmra.mxu2 %v8193_v45  ;;  %v859_v18 = vpack.c.bf16 %v789_v13, %v789_v13  ;;  %526 = vst [vmem:[#allocation2 + $0x1d8] sm:$0xff] %v9391_v24  ;;  %v8264_v44 = vld [vmem:[#allocation3 + $0x798] sm:$0xf]  ;;  %v687_v45 = vpack.c.bf16 %v9391_v24, %v9391_v24  ;;  %v10023_v13 = vunpack.c.l.bf16 %v10013_v6  ;;  %v10060_v60 = vld [vmem:[%s9820_s15 + $0x70] sm:$0xff]  }
  0x9d   : > { %965 = vst [vmem:[#allocation3 + $0x808] sm:$0xf] %v895_v12  ;;  %v8265_v59 = vor.u32 %v9130_v47, %v8264_v44  ;;  %v7621_v12 = vor.u32 %v8964_v0, %v7618_v1  ;;  %v9327_v0 = vunpack.c.h.bf16 %v10013_v6 }
  0x9e   : > { %929 = vst [vmem:[#allocation3 + $0x2f8] sm:$0xf] %v859_v18  ;;  %v9244_v18 = vld [vmem:[%s10920_s2 + $0x170] sm:$0xff]  ;;  %v654_v17 = vpack.c.bf16 %v10023_v13, %v10023_v13 }
  0x9f   : > { %527 = vst [vmem:[#allocation2 + $0x1e0] sm:$0xff] %v9986_v28  ;;  %5909 = vmatpush.bf16.msrb.mxu1 %v9244_v18  ;;  %v655_v18 = vpack.c.bf16 %v9327_v0, %v9327_v0 }
  0xa0   : > { %491 = vst [vmem:[#allocation2 + $0xc0] sm:$0xff] %v9989_v30 }
  0xa1   : > { %720 = vst [vmem:[#allocation3 + $0x318] sm:$0xf] %v650_v39  ;;  %v9139_v39 = vld [vmem:[#allocation3 + $0x800] sm:$0xf0] }
  0xa2   : > { %v790_v49 = vld [vmem:[#allocation2 + $0xb1] sm:$0xff]  ;;  %721 = vst [vmem:[#allocation3 + $0x33c] sm:$0xf] %v651_v40  ;;  %v9135_v44 = vld [vmem:[#allocation3 + $0x7e4] sm:$0xf] }
  0xa3   : > { %5305 = vmatmul.bf16.gmra.mxu3 %v8197_v53  ;;  %v826_v48 = vld [vmem:[#allocation2 + $0x1d1] sm:$0xff]  ;;  %756 = vst [vmem:[#allocation3 + $0x828] sm:$0xf] %v686_v41  ;;  %v860_v61 = vpack.c.bf16 %v790_v49, %v790_v49 }
  0xa4   : > { %5215 = vmatmul.bf16.gmra.mxu1 %v7549_v58  ;;  %v896_v52 = vpack.c.bf16 %v826_v48, %v826_v48  ;;  %v7617_v58 = vor.u32 %v8968_v43, %v7616_v42  ;;  %757 = vst [vmem:[#allocation3 + $0x84c] sm:$0xf] %v687_v45 }
  0xa5   : > { %528 = vst [vmem:[#allocation2 + $0x1e8] sm:$0xff] %v10009_v2 }
  0xa6   : > { %v827_v51 = vld [vmem:[#allocation2 + $0x1d9] sm:$0xff]  ;;  %966 = vst [vmem:[#allocation3 + $0x82c] sm:$0xf] %v896_v52 }
  0xa7   : > { %v897_v55 = vpack.c.bf16 %v827_v51, %v827_v51  ;;  %v791_v56 = vld [vmem:[#allocation2 + $0xb9] sm:$0xff]  ;;  %930 = vst [vmem:[#allocation3 + $0x31c] sm:$0xf] %v860_v61  ;;  %v8302_v51 = vld [vmem:[#allocation3 + $0x804] sm:$0xf0] }
  0xa8   : > { %v861_v3 = vpack.c.bf16 %v791_v56, %v791_v56  ;;  %492 = vst [vmem:[#allocation2 + $0xc8] sm:$0xff] %v9323_v10  ;;  %v7654_v56 = vld [vmem:[#allocation3 + $0x2f4] sm:$0xf0] }
  0xa9   : > { %v4997_v20 = vpop.f32.mrf.mxu0  ;;  %967 = vst [vmem:[#allocation3 + $0x850] sm:$0xf] %v897_v55  ;;  %v8973_v55 = vld [vmem:[#allocation3 + $0x2d4] sm:$0xf] }
  0xaa   : > { %v4998_v23 = vadd.f32 %v9979_v8, %v4997_v20  ;;  %931 = vst [vmem:[#allocation3 + $0x340] sm:$0xf] %v861_v3  ;;  %v9224_v20 = vld [vmem:[%s10920_s2 + $0xd0] sm:$0xff]  ;;  %v10069_v3 = vunpack.c.l.bf16 %v10060_v60 }
  0xab   : > { %529 = vst [vmem:[#allocation2 + $0x1f0] sm:$0xff] %v10020_v11  ;;  %5545 = vmatpush.bf16.msrb.mxu3 %v9224_v20  ;;  %v8986_v20 = vld [vmem:[#allocation3 + $0x338] sm:$0xf0] }
  0xac   : > { %5036 = vmatmul.bf16.gmra.mxu0 %v7581_v15  ;;  %5126 = vmatmul.bf16.gmra.mxu2 %v8229_v16  ;;  %493 = vst [vmem:[#allocation2 + $0xd0] sm:$0xff] %v10023_v13  ;;  %v828_v24 = vld [vmem:[#allocation2 + $0x1e1] sm:$0xff] }
  0xad   : > { %722 = vst [vmem:[#allocation3 + $0x360] sm:$0xf] %v652_v27  ;;  %v898_v40 = vpack.c.bf16 %v828_v24, %v828_v24  ;;  %v9144_v13 = vld [vmem:[#allocation3 + $0x82c] sm:$0xf] }
  0xae   : > { %494 = vst [vmem:[#allocation2 + $0xd8] sm:$0xff] %v9327_v0 }
  0xaf   : > { %v5087_v33 = vpop.f32.mrf.mxu2  ;;  %v792_v41 = vld [vmem:[#allocation2 + $0xc1] sm:$0xff]  ;;  %968 = vst [vmem:[#allocation3 + $0x874] sm:$0xf] %v898_v40 }
  0xb0   : > { %v5088_v34 = vadd.f32 %v9979_v8, %v5087_v33  ;;  %v7652_v33 = vld [vmem:[#allocation3 + $0x2d0] sm:$0xf]  ;;  %495 = vst [vmem:[#allocation2 + $0xe0] sm:$0xff] %v10069_v3 }
  0xb1   : > { %v5181_v31 = vpop.f32.mrf.mxu1  ;;  %v4999_v35 = vpop.f32.mrf.mxu0  ;;  %724 = vst [vmem:[#allocation3 + $0x3a8] sm:$0xf] %v654_v17 }
  0xb2   : > { %v9991_v32 = vadd.f32 %v5181_v31, %v4998_v23  ;;  %v5000_v37 = vadd.f32 %v9979_v8, %v4999_v35  ;;  %v688_v31 = vpack.c.bf16 %v9986_v28, %v9986_v28  ;;  %v8300_v35 = vld [vmem:[#allocation3 + $0x7e0] sm:$0xf]  ;;  %725 = vst [vmem:[#allocation3 + $0x3cc] sm:$0xf] %v655_v18 }
  0xb3   : > { %5310 = vmatmul.bf16.gmra.mxu3 %v8233_v26  ;;  %v9232_v26 = vld [vmem:[%s10920_s2 + $0x110] sm:$0xff]  ;;  %v8301_v49 = vor.u32 %v9139_v39, %v8300_v35 }
  0xb4   : > { %5220 = vmatmul.bf16.gmra.mxu1 %v7585_v29  ;;  %v653_v29 = vpack.c.bf16 %v9323_v10, %v9323_v10  ;;  %5729 = vmatpush.bf16.msrb.mxu0 %v9232_v26  ;;  %v829_v30 = vld [vmem:[#allocation2 + $0x1e9] sm:$0xff]  ;;  %758 = vst [vmem:[#allocation3 + $0x870] sm:$0xf] %v688_v31  ;;  %v9148_v26 = vld [vmem:[#allocation3 + $0x848] sm:$0xf0] }
  0xb5   : > { %v899_v28 = vpack.c.bf16 %v829_v30, %v829_v30  ;;  %v793_v45 = vld [vmem:[#allocation2 + $0xc9] sm:$0xff] }
  0xb6   : > { %v5271_v36 = vpop.f32.mrf.mxu3  ;;  %723 = vst [vmem:[#allocation3 + $0x384] sm:$0xf] %v653_v29  ;;  %v863_v52 = vpack.c.bf16 %v793_v45, %v793_v45  ;;  %v7690_v45 = vld [vmem:[#allocation3 + $0x33c] sm:$0xf0] }
  0xb7   : > { %v9997_v38 = vadd.f32 %v5271_v36, %v5088_v34  ;;  %v5089_v53 = vpop.f32.mrf.mxu2  ;;  %v8977_v34 = vld [vmem:[#allocation3 + $0x2f0] sm:$0xf0]  ;;  %v689_v36 = vpack.c.bf16 %v10009_v2, %v10009_v2  ;;  %969 = vst [vmem:[#allocation3 + $0x898] sm:$0xf] %v899_v28  ;;  %v7657_v2 = vor.u32 %v8973_v55, %v7654_v56  ;;  %v8982_v28 = vld [vmem:[#allocation3 + $0x31c] sm:$0xf] }
  0xb8   : > { %v5090_v57 = vadd.f32 %v9979_v8, %v5089_v53  ;;  %v7653_v48 = vor.u32 %v8977_v34, %v7652_v33  ;;  %v10055_v53 = vld [vmem:[%s9820_s15 + $0x100] sm:$0xff]   ;;  %933 = vst [vmem:[#allocation3 + $0x388] sm:$0xf] %v863_v52  ;;  %v7693_v56 = vor.u32 %v8982_v28, %v7690_v45 }
  0xb9   : > { %v5183_v46 = vpop.f32.mrf.mxu1  ;;  %v5002_v63 = vpop.f32.mrf.mxu0  ;;  %759 = vst [vmem:[#allocation3 + $0x894] sm:$0xf] %v689_v36  ;;  %v10066_v1 = vunpack.c.l.bf16 %v10055_v53  ;;  %v795_v36 = vld [vmem:[#allocation2 + $0xd9] sm:$0xff] }
  0xba   : > { %v10003_v50 = vadd.f32 %v5183_v46, %v5000_v37  ;;  %v5003_v5 = vadd.f32 %v9979_v8, %v5002_v63  ;;  %v862_v46 = vpack.c.bf16 %v792_v41, %v792_v41  ;;  %v8305_v63 = vor.u32 %v9135_v44, %v8302_v51  ;;  %v8338_v41 = vld [vmem:[#allocation3 + $0x84c] sm:$0xf0] }
  0xbb   : > { %531 = vst [vmem:[#allocation2 + $0x200] sm:$0xff] %v10066_v1  ;;  %v865_v30 = vpack.c.bf16 %v795_v36, %v795_v36  ;;  %v8341_v52 = vor.u32 %v9144_v13, %v8338_v41  ;;  %v692_v17 = vpack.c.bf16 %v10066_v1, %v10066_v1  ;;  %v10134_v41 = vld [vmem:[%s9820_s15 + $0x110] sm:$0xff]  }
  0xbc   : > { %5041 = vmatmul.bf16.gmra.mxu0 %v7617_v58  ;;  %5131 = vmatmul.bf16.gmra.mxu2 %v8265_v59  ;;  %v9399_v59 = vunpack.c.h.bf16 %v10007_v62  ;;  %932 = vst [vmem:[#allocation3 + $0x364] sm:$0xf] %v862_v46 }
  0xbd   : > { %935 = vst [vmem:[#allocation3 + $0x3d0] sm:$0xf] %v865_v30  ;;  %v8995_v18 = vld [vmem:[#allocation3 + $0x380] sm:$0xf0] }
  0xbe   : > { %v5273_v4 = vpop.f32.mrf.mxu3  ;;  %530 = vst [vmem:[#allocation2 + $0x1f8] sm:$0xff] %v9399_v59 }
  0xbf   : > { %v10015_v7 = vadd.f32 %v5273_v4, %v5090_v57  ;;  %v5092_v16 = vpop.f32.mrf.mxu2  ;;  %762 = vst [vmem:[#allocation3 + $0x900] sm:$0xf] %v692_v17  ;;  %v7726_v28 = vld [vmem:[#allocation3 + $0x384] sm:$0xf0] }
  0xc0   : > { %v5093_v19 = vadd.f32 %v9979_v8, %v5092_v16  ;;  %v7688_v16 = vld [vmem:[#allocation3 + $0x318] sm:$0xf] }
  0xc1   : > { %v5186_v14 = vpop.f32.mrf.mxu1  ;;  %v5004_v21 = vpop.f32.mrf.mxu0  ;;  %v7689_v39 = vor.u32 %v8986_v20, %v7688_v16 }
  0xc2   : > { %v10025_v15 = vadd.f32 %v5186_v14, %v5003_v5  ;;  %v5005_v23 = vadd.f32 %v9979_v8, %v5004_v21  ;;  %v8336_v21 = vld [vmem:[#allocation3 + $0x828] sm:$0xf] }
  0xc3   : > { %5315 = vmatmul.bf16.gmra.mxu3 %v8269_v9  ;;  %v8337_v40 = vor.u32 %v9148_v26, %v8336_v21 }
  0xc4   : > { %5225 = vmatmul.bf16.gmra.mxu1 %v7621_v12 }
  0xc5   : > { %v830_v27 = vld [vmem:[#allocation2 + $0x1f1] sm:$0xff]  ;;  %v831_v31 = vld [vmem:[#allocation2 + $0x1f9] sm:$0xff] }
  0xc6   : > { %v5276_v22 = vpop.f32.mrf.mxu3  ;;  %v900_v33 = vpack.c.bf16 %v830_v27, %v830_v27  ;;  %v901_v35 = vpack.c.bf16 %v831_v31, %v831_v31 }
  0xc7   : > { %v10040_v25 = vadd.f32 %v5276_v22, %v5093_v19  ;;  %v5094_v43 = vpop.f32.mrf.mxu2  ;;  %v690_v19 = vpack.c.bf16 %v10020_v11, %v10020_v11  ;;  %v691_v22 = vpack.c.bf16 %v9399_v59, %v9399_v59 }
  0xc8   : > { %v5095_v47 = vadd.f32 %v9979_v8, %v5094_v43  ;;  %v10087_v43 = vld [vmem:[%s9820_s15 + $0x108] sm:$0xff]   ;;  %970 = vst [vmem:[#allocation3 + $0x8bc] sm:$0xf] %v900_v33 }
  0xc9   : > { %v5188_v37 = vpop.f32.mrf.mxu1  ;;  %v5007_v54 = vpop.f32.mrf.mxu0  ;;  %760 = vst [vmem:[#allocation3 + $0x8b8] sm:$0xf] %v690_v19  ;;  %v10098_v55 = vunpack.c.l.bf16 %v10087_v43  ;;  %v8372_v19 = vld [vmem:[#allocation3 + $0x870] sm:$0xf] }
  0xca   : > { %v10051_v42 = vadd.f32 %v5188_v37, %v5005_v23  ;;  %v5008_v58 = vadd.f32 %v9979_v8, %v5007_v54  ;;  %v794_v23 = vld [vmem:[#allocation2 + $0xd1] sm:$0xff]  ;;  %761 = vst [vmem:[#allocation3 + $0x8dc] sm:$0xf] %v691_v22  ;;  %v9331_v54 = vunpack.c.h.bf16 %v10060_v60 }
  0xcb   : > { %v864_v11 = vpack.c.bf16 %v794_v23, %v794_v23  ;;  %971 = vst [vmem:[#allocation3 + $0x8e0] sm:$0xf] %v901_v35  ;;  %v9157_v23 = vld [vmem:[#allocation3 + $0x890] sm:$0xf0]  ;;  %v694_v17 = vpack.c.bf16 %v10098_v55, %v10098_v55 }
  0xcc   : > { %5046 = vmatmul.bf16.gmra.mxu0 %v7653_v48  ;;  %5136 = vmatmul.bf16.gmra.mxu2 %v8301_v49  ;;  %v9403_v48 = vunpack.c.h.bf16 %v10055_v53  ;;  %v10092_v49 = vld [vmem:[%s9820_s15 + $0x78] sm:$0xff]   ;;  %496 = vst [vmem:[#allocation2 + $0xe8] sm:$0xff] %v9331_v54  ;;  %v657_v16 = vpack.c.bf16 %v9331_v54, %v9331_v54 }
  0xcd   : > { %934 = vst [vmem:[#allocation3 + $0x3ac] sm:$0xf] %v864_v11 }
  0xce   : > { %v5278_v57 = vpop.f32.mrf.mxu3  ;;  %532 = vst [vmem:[#allocation2 + $0x208] sm:$0xff] %v9403_v48  ;;  %v693_v20 = vpack.c.bf16 %v9403_v48, %v9403_v48  ;;  %v10139_v48 = vld [vmem:[%s9820_s15 + $0x80] sm:$0xff]  }
  0xcf   : > { %v10062_v61 = vadd.f32 %v5278_v57, %v5095_v47  ;;  %v5097_v5 = vpop.f32.mrf.mxu2  ;;  %v10101_v57 = vunpack.c.l.bf16 %v10092_v49  ;;  %533 = vst [vmem:[#allocation2 + $0x210] sm:$0xff] %v10098_v55 }
  0xd0   : > { %v5098_v6 = vadd.f32 %v9979_v8, %v5097_v5  ;;  %727 = vst [vmem:[#allocation3 + $0x414] sm:$0xf] %v657_v16 }
  0xd1   : > { %10925 = vst [vmem:[#allocation7_spill] sm:$0xff] %v10062_v61  ;;  %v5191_v4 = vpop.f32.mrf.mxu1  ;;  %v5009_v9 = vpop.f32.mrf.mxu0 }
  0xd2   : > { %v10071_v62 = vadd.f32 %v5191_v4, %v5008_v58  ;;  %v5010_v12 = vadd.f32 %v9979_v8, %v5009_v9  ;;  %497 = vst [vmem:[#allocation2 + $0xf0] sm:$0xff] %v10101_v57  ;;  %v9223_v9 = vld [vmem:[%s10920_s2 + $0xc8] sm:$0xff] }
  0xd3   : > { %5320 = vmatmul.bf16.gmra.mxu3 %v8305_v63  ;;  %v9215_v63 = vld [vmem:[%s10920_s2 + $0x88] sm:$0xff]  ;;  %763 = vst [vmem:[#allocation3 + $0x924] sm:$0xf] %v693_v20 }
  0xd4   : > { %5230 = vmatmul.bf16.gmra.mxu1 %v7657_v2  ;;  %5362 = vmatpush.bf16.msrb.mxu2 %v9215_v63  ;;  %v796_v21 = vld [vmem:[#allocation2 + $0xe1] sm:$0xff]  ;;  %764 = vst [vmem:[#allocation3 + $0x948] sm:$0xf] %v694_v17 }
  0xd5   : > { %5546 = vmatpush.bf16.msrb.mxu3 %v9223_v9  ;;  %v866_v36 = vpack.c.bf16 %v796_v21, %v796_v21 }
  0xd6   : > { %v5281_v10 = vpop.f32.mrf.mxu3  ;;  %v833_v27 = vld [vmem:[#allocation2 + $0x209] sm:$0xff] }
  0xd7   : > { %v10077_v14 = vadd.f32 %v5281_v10, %v5098_v6  ;;  %v5099_v34 = vpop.f32.mrf.mxu2  ;;  %v7724_v6 = vld [vmem:[#allocation3 + $0x360] sm:$0xf]  ;;  %v903_v13 = vpack.c.bf16 %v833_v27, %v833_v27  ;;  %936 = vst [vmem:[#allocation3 + $0x3f4] sm:$0xf] %v866_v36 }
  0xd8   : > { %v5100_v37 = vadd.f32 %v9979_v8, %v5099_v34  ;;  %v9243_v10 = vld [vmem:[%s10920_s2 + $0x168] sm:$0xff]  ;;  %v7725_v33 = vor.u32 %v8995_v18, %v7724_v6  ;;  %v9153_v34 = vld [vmem:[#allocation3 + $0x874] sm:$0xf]  ;;  %v9004_v18 = vld [vmem:[#allocation3 + $0x3c8] sm:$0xf0] }
  0xd9   : > { %10926 = vst [vmem:[#allocation8_spill] sm:$0xff] %v10077_v14  ;;  %v5193_v24 = vpop.f32.mrf.mxu1  ;;  %v5012_v44 = vpop.f32.mrf.mxu0  ;;  %5910 = vmatpush.bf16.msrb.mxu1 %v9243_v10  ;;  %v797_v35 = vld [vmem:[#allocation2 + $0xe9] sm:$0xff] }
  0xda   : > { %v10083_v29 = vadd.f32 %v5193_v24, %v5010_v12  ;;  %v5013_v47 = vadd.f32 %v9979_v8, %v5012_v44  ;;  %v656_v12 = vpack.c.bf16 %v10069_v3, %v10069_v3  ;;  %v832_v24 = vld [vmem:[#allocation2 + $0x201] sm:$0xff]  ;;  %v8991_v44 = vld [vmem:[#allocation3 + $0x364] sm:$0xf]  ;;  %973 = vst [vmem:[#allocation3 + $0x928] sm:$0xf] %v903_v13 }
  0xdb   : > { %v9231_v3 = vld [vmem:[%s10920_s2 + $0x108] sm:$0xff]  ;;  %v902_v1 = vpack.c.bf16 %v832_v24, %v832_v24  ;;  %v7760_v10 = vld [vmem:[#allocation3 + $0x3a8] sm:$0xf] }
  0xdc   : > { %5051 = vmatmul.bf16.gmra.mxu0 %v7689_v39  ;;  %5141 = vmatmul.bf16.gmra.mxu2 %v8337_v40  ;;  %726 = vst [vmem:[#allocation3 + $0x3f0] sm:$0xf] %v656_v12  ;;  %v8374_v39 = vld [vmem:[#allocation3 + $0x894] sm:$0xf0]  ;;  %v867_v40 = vpack.c.bf16 %v797_v35, %v797_v35  ;;  %v658_v12 = vpack.c.bf16 %v10101_v57, %v10101_v57 }
  0xdd   : > { %5730 = vmatpush.bf16.msrb.mxu0 %v9231_v3  ;;  %972 = vst [vmem:[#allocation3 + $0x904] sm:$0xf] %v902_v1  ;;  %v8377_v54 = vor.u32 %v9153_v34, %v8374_v39  ;;  %v9162_v1 = vld [vmem:[#allocation3 + $0x8bc] sm:$0xf]  ;;  %v7761_v35 = vor.u32 %v9004_v18, %v7760_v10 }
  0xde   : > { %v5283_v46 = vpop.f32.mrf.mxu3  ;;  %937 = vst [vmem:[#allocation3 + $0x418] sm:$0xf] %v867_v40  ;;  %v9413_v39 = vld [vmem:[%s10169_s13] sm:$0xff]  }
  0xdf   : > { %v10094_v51 = vadd.f32 %v5283_v46, %v5100_v37  ;;  %v5102_v59 = vpop.f32.mrf.mxu2  ;;  %v8373_v37 = vor.u32 %v9157_v23, %v8372_v19  ;;  %v8408_v19 = vld [vmem:[#allocation3 + $0x8b8] sm:$0xf]  ;;  %v9166_v23 = vld [vmem:[#allocation3 + $0x8d8] sm:$0xf0]  ;;  %728 = vst [vmem:[#allocation3 + $0x438] sm:$0xf] %v658_v12 }
  0xe0   : > { %v5103_v60 = vadd.f32 %v9979_v8, %v5102_v59  ;;  %v7729_v59 = vor.u32 %v8991_v44, %v7726_v28  ;;  %v8409_v36 = vor.u32 %v9166_v23, %v8408_v19  ;;  %v7762_v44 = vld [vmem:[#allocation3 + $0x3cc] sm:$0xf0]  ;;  %v9214_v18 = vld [vmem:[%s10920_s2 + $0x80] sm:$0xff]  ;;  %v9013_v23 = vld [vmem:[#allocation3 + $0x410] sm:$0xf0] }
  0xe1   : > { %10927 = vst [vmem:[#allocation9_spill] sm:$0xff] %v10094_v51  ;;  %v5196_v58 = vpop.f32.mrf.mxu1  ;;  %v5014_v0 = vpop.f32.mrf.mxu0  ;;  %v9222_v19 = vld [vmem:[%s10920_s2 + $0xc0] sm:$0xff]  ;;  %5363 = vmatpush.bf16.msrb.mxu2 %v9214_v18 }
  0xe2   : > { %v10103_v53 = vadd.f32 %v5196_v58, %v5013_v47  ;;  %v5015_v4 = vadd.f32 %v9979_v8, %v5014_v0  ;;  %v9407_v47 = vunpack.c.h.bf16 %v10087_v43  ;;  %v10146_v58 = vunpack.c.l.bf16 %v10134_v41  ;;  %5547 = vmatpush.bf16.msrb.mxu3 %v9222_v19 }
  0xe3   : > { %5325 = vmatmul.bf16.gmra.mxu3 %v8341_v52  ;;  %v10149_v43 = vunpack.c.l.bf16 %v10139_v48  ;;  %v7796_v17 = vld [vmem:[#allocation3 + $0x3f0] sm:$0xf] }
  0xe4   : > { %5235 = vmatmul.bf16.gmra.mxu1 %v7693_v56  ;;  %v9335_v56 = vunpack.c.h.bf16 %v10092_v49  ;;  %534 = vst [vmem:[#allocation2 + $0x218] sm:$0xff] %v9407_v47  ;;  %v695_v20 = vpack.c.bf16 %v9407_v47, %v9407_v47  ;;  %v10178_v47 = vld [vmem:[%s9820_s15 + $0x88] sm:$0xff]  }
  0xe5   : > { %535 = vst [vmem:[#allocation2 + $0x220] sm:$0xff] %v10146_v58 }
  0xe6   : > { %v5286_v2 = vpop.f32.mrf.mxu3  ;;  %498 = vst [vmem:[#allocation2 + $0xf8] sm:$0xff] %v9335_v56  ;;  %v659_v16 = vpack.c.bf16 %v9335_v56, %v9335_v56 }
  0xe7   : > { %v10112_v5 = vadd.f32 %v5286_v2, %v5103_v60  ;;  %v5104_v31 = vpop.f32.mrf.mxu2  ;;  %499 = vst [vmem:[#allocation2 + $0x100] sm:$0xff] %v10149_v43 }
  0xe8   : > { %v5105_v11 = vadd.f32 %v9979_v8, %v5104_v31  ;;  %729 = vst [vmem:[#allocation3 + $0x45c] sm:$0xf] %v659_v16 }
  0xe9   : > { %10928 = vst [vmem:[#allocation10_spill] sm:$0xff] %v10112_v5  ;;  %v5198_v22 = vpop.f32.mrf.mxu1  ;;  %v5017_v30 = vpop.f32.mrf.mxu0 }
  0xea   : > { %v10125_v26 = vadd.f32 %v5198_v22, %v5015_v4  ;;  %v5018_v46 = vadd.f32 %v9979_v8, %v5017_v30  ;;  %765 = vst [vmem:[#allocation3 + $0x96c] sm:$0xf] %v695_v20  ;;  %v9000_v30 = vld [vmem:[#allocation3 + $0x3ac] sm:$0xf]  ;;  %v660_v20 = vpack.c.bf16 %v10149_v43, %v10149_v43  ;;  %v9242_v43 = vld [vmem:[%s10920_s2 + $0x160] sm:$0xff] }
  0xeb   : > { %v834_v24 = vld [vmem:[#allocation2 + $0x211] sm:$0xff]  ;;  %5911 = vmatpush.bf16.msrb.mxu1 %v9242_v43 }
  0xec   : > { %5056 = vmatmul.bf16.gmra.mxu0 %v7725_v33  ;;  %5146 = vmatmul.bf16.gmra.mxu2 %v8373_v37  ;;  %v835_v57 = vld [vmem:[#allocation2 + $0x219] sm:$0xff]  ;;  %v904_v27 = vpack.c.bf16 %v834_v24, %v834_v24  ;;  %v8444_v24 = vld [vmem:[#allocation3 + $0x900] sm:$0xf]  ;;  %730 = vst [vmem:[#allocation3 + $0x480] sm:$0xf] %v660_v20 }
  0xed   : > { %v798_v21 = vld [vmem:[#allocation2 + $0xf1] sm:$0xff]  ;;  %v905_v31 = vpack.c.bf16 %v835_v57, %v835_v57 }
  0xee   : > { %v5288_v45 = vpop.f32.mrf.mxu3  ;;  %v799_v33 = vld [vmem:[#allocation2 + $0xf9] sm:$0xff]  ;;  %v868_v34 = vpack.c.bf16 %v798_v21, %v798_v21  ;;  %974 = vst [vmem:[#allocation3 + $0x94c] sm:$0xf] %v904_v27 }
  0xef   : > { %v10142_v52 = vadd.f32 %v5288_v45, %v5105_v11  ;;  %v5107_v0 = vpop.f32.mrf.mxu2  ;;  %v8410_v11 = vld [vmem:[#allocation3 + $0x8dc] sm:$0xf0]  ;;  %v869_v37 = vpack.c.bf16 %v799_v33, %v799_v33  ;;  %975 = vst [vmem:[#allocation3 + $0x970] sm:$0xf] %v905_v31  ;;  %v9022_v43 = vld [vmem:[#allocation3 + $0x458] sm:$0xf0] }
  0xf0   : > { %v5108_v49 = vadd.f32 %v9979_v8, %v5107_v0  ;;  %v8413_v56 = vor.u32 %v9162_v1, %v8410_v11  ;;  %938 = vst [vmem:[#allocation3 + $0x43c] sm:$0xf] %v868_v34  ;;  %v7765_v0 = vor.u32 %v9000_v30, %v7762_v44  ;;  %v9175_v1 = vld [vmem:[#allocation3 + $0x920] sm:$0xf0]  ;;  %v8446_v44 = vld [vmem:[#allocation3 + $0x924] sm:$0xf0] }
  0xf1   : > { %10929 = vst [vmem:[#allocation11_spill] sm:$0xff] %v10142_v52  ;;  %v5201_v60 = vpop.f32.mrf.mxu1  ;;  %v5019_v2 = vpop.f32.mrf.mxu0  ;;  %v9171_v30 = vld [vmem:[#allocation3 + $0x904] sm:$0xf] }
  0xf2   : > { %v10151_v63 = vadd.f32 %v5201_v60, %v5018_v46  ;;  %v5020_v6 = vadd.f32 %v9979_v8, %v5019_v2  ;;  %v9411_v46 = vunpack.c.h.bf16 %v10134_v41  ;;  %v9414_v60 = vunpack.c.l.bf16 %v9413_v39  ;;  %939 = vst [vmem:[#allocation3 + $0x460] sm:$0xf] %v869_v37 }
  0xf3   : > { %5330 = vmatmul.bf16.gmra.mxu3 %v8377_v54 }
  0xf4   : > { %5240 = vmatmul.bf16.gmra.mxu1 %v7729_v59  ;;  %v9339_v59 = vunpack.c.h.bf16 %v10139_v48  ;;  %536 = vst [vmem:[#allocation2 + $0x228] sm:$0xff] %v9411_v46  ;;  %v697_v57 = vpack.c.bf16 %v9411_v46, %v9411_v46  ;;  %v9009_v46 = vld [vmem:[#allocation3 + $0x3f4] sm:$0xf] }
  0xf5   : > { %551 = vst [vmem:[#allocation2 + $0x230] sm:$0xff] %v9414_v60 }
  0xf6   : > { %v5291_v4 = vpop.f32.mrf.mxu3  ;;  %500 = vst [vmem:[#allocation2 + $0x108] sm:$0xff] %v9339_v59  ;;  %v661_v21 = vpack.c.bf16 %v9339_v59, %v9339_v59 }
  0xf7   : > { %v10160_v9 = vadd.f32 %v5291_v4, %v5108_v49  ;;  %v5109_v55 = vpop.f32.mrf.mxu2  ;;  %v10184_v49 = vunpack.c.l.bf16 %v10178_v47  ;;  %767 = vst [vmem:[#allocation3 + $0x9b4] sm:$0xf] %v697_v57 }
  0xf8   : > { %v5110_v13 = vadd.f32 %v9979_v8, %v5109_v55  ;;  %731 = vst [vmem:[#allocation3 + $0x4a4] sm:$0xf] %v661_v21 }
  0xf9   : > { %10930 = vst [vmem:[#allocation12_spill] sm:$0xff] %v10160_v9  ;;  %v5203_v22 = vpop.f32.mrf.mxu1  ;;  %v5022_v40 = vpop.f32.mrf.mxu0  ;;  %v662_v57 = vpack.c.bf16 %v10184_v49, %v10184_v49 }
  0xfa   : > { %v10171_v3 = vadd.f32 %v5203_v22, %v5020_v6  ;;  %v5023_v45 = vadd.f32 %v9979_v8, %v5022_v40  ;;  %501 = vst [vmem:[#allocation2 + $0x110] sm:$0xff] %v10184_v49  ;;  %v696_v22 = vpack.c.bf16 %v10146_v58, %v10146_v58  ;;  %v8445_v40 = vor.u32 %v9175_v1, %v8444_v24  ;;  %v7832_v24 = vld [vmem:[#allocation3 + $0x438] sm:$0xf]  ;;  %v1188_v1 = vld [vmem:[#allocation2 + $0x18] sm:$0xff] }
  0xfb   : > { %v836_v31 = vld [vmem:[#allocation2 + $0x221] sm:$0xff]  ;;  %732 = vst [vmem:[#allocation3 + $0x4c8] sm:$0xf] %v662_v57 }
  0xfc   : > { %5061 = vmatmul.bf16.gmra.mxu0 %v7761_v35  ;;  %5151 = vmatmul.bf16.gmra.mxu2 %v8409_v36  ;;  %v837_v34 = vld [vmem:[#allocation2 + $0x229] sm:$0xff]  ;;  %v7797_v35 = vor.u32 %v9013_v23, %v7796_v17  ;;  %766 = vst [vmem:[#allocation3 + $0x990] sm:$0xf] %v696_v22 }
  0xfd   : > { %v800_v27 = vld [vmem:[#allocation2 + $0x101] sm:$0xff]  ;;  %v907_v36 = vpack.c.bf16 %v837_v34, %v837_v34  ;;  %v8480_v34 = vld [vmem:[#allocation3 + $0x948] sm:$0xf] }
  0xfe   : > { %v5293_v28 = vpop.f32.mrf.mxu3  ;;  %v870_v37 = vpack.c.bf16 %v800_v27, %v800_v27  ;;  %v978_v22 = vld [vmem:[#allocation2 + $0x2] sm:$0xff] }
  0xff   : > { %v10180_v54 = vadd.f32 %v5293_v28, %v5110_v13  ;;  %v5112_v41 = vpop.f32.mrf.mxu2  ;;  %v906_v13 = vpack.c.bf16 %v836_v31, %v836_v31  ;;  %977 = vst [vmem:[#allocation3 + $0x9b8] sm:$0xf] %v907_v36  ;;  %v1189_v31 = vld [vmem:[#allocation2 + $0x20] sm:$0xff]  ;;  %v9184_v36 = vld [vmem:[#allocation3 + $0x968] sm:$0xf0] }
 0x100   : > { %v5113_v6 = vadd.f32 %v9979_v8, %v5112_v41  ;;  %v9230_v41 = vld [vmem:[%s10920_s2 + $0x100] sm:$0xff]  ;;  %940 = vst [vmem:[#allocation3 + $0x484] sm:$0xf] %v870_v37 }
 0x101   : > { %10931 = vst [vmem:[#allocation13_spill] sm:$0xff] %v10180_v54  ;;  %v5206_v2 = vpop.f32.mrf.mxu1  ;;  %v5024_v48 = vpop.f32.mrf.mxu0  ;;  %v801_v11 = vld [vmem:[#allocation2 + $0x109] sm:$0xff]  ;;  %5731 = vmatpush.bf16.msrb.mxu0 %v9230_v41 }
 0x102   : > { %v10186_v4 = vadd.f32 %v5206_v2, %v5023_v45  ;;  %v5025_v12 = vadd.f32 %v9979_v8, %v5024_v48  ;;  %v871_v28 = vpack.c.bf16 %v801_v11, %v801_v11  ;;  %976 = vst [vmem:[#allocation3 + $0x994] sm:$0xf] %v906_v13  ;;  %v8449_v2 = vor.u32 %v9171_v30, %v8446_v44  ;;  %v7834_v41 = vld [vmem:[#allocation3 + $0x45c] sm:$0xf0] }
 0x103   : > { %5335 = vmatmul.bf16.gmra.mxu3 %v8413_v56  ;;  %v7798_v56 = vld [vmem:[#allocation3 + $0x414] sm:$0xf0]  ;;  %v1258_v11 = vpack.c.bf16 %v1188_v1, %v1188_v1  ;;  %v9031_v1 = vld [vmem:[#allocation3 + $0x4a0] sm:$0xf0] }
 0x104   : > { %5245 = vmatmul.bf16.gmra.mxu1 %v7765_v0  ;;  %v7801_v48 = vor.u32 %v9009_v46, %v7798_v56  ;;  %941 = vst [vmem:[#allocation3 + $0x4a8] sm:$0xf] %v871_v28  ;;  %v7833_v28 = vor.u32 %v9022_v43, %v7832_v24  ;;  %v9180_v46 = vld [vmem:[#allocation3 + $0x94c] sm:$0xf]  ;;  %v8482_v56 = vld [vmem:[#allocation3 + $0x96c] sm:$0xf0] }
 0x105   : > { %1328 = vst [vmem:[#allocation3 + $0xc] sm:$0xf] %v1258_v11  ;;  %v981_v43 = vld [vmem:[#allocation2 + $0x1a] sm:$0xff]  ;;  %v1190_v11 = vld [vmem:[#allocation2 + $0x28] sm:$0xff] }
 0x106   : > { %v5296_v10 = vpop.f32.mrf.mxu3 }
 0x107   : > { %v10191_v16 = vadd.f32 %v5296_v10, %v5113_v6  ;;  %v5114_v58 = vpop.f32.mrf.mxu2  ;;  %v9343_v6 = vunpack.c.h.bf16 %v10178_v47  ;;  %v979_v47 = vld [vmem:[#allocation2 + $0xa] sm:$0xff] }
 0x108   : > { %v5115_v39 = vadd.f32 %v9979_v8, %v5114_v58  ;;  %v1049_v13 = vpack.c.bf16 %v979_v47, %v979_v47  ;;  %v9241_v47 = vld [vmem:[%s10920_s2 + $0x158] sm:$0xff] }
 0x109   : > { %10932 = vst [vmem:[#allocation14_spill] sm:$0xff] %v10191_v16  ;;  %v5208_v55 = vpop.f32.mrf.mxu1  ;;  %v5027_v45 = vpop.f32.mrf.mxu0  ;;  %v663_v27 = vpack.c.bf16 %v9343_v6, %v9343_v6  ;;  %5912 = vmatpush.bf16.msrb.mxu1 %v9241_v47 }
 0x10a   : > { %v10203_v33 = vadd.f32 %v5208_v55, %v5025_v12  ;;  %v5028_v60 = vadd.f32 %v9979_v8, %v5027_v45  ;;  %502 = vst [vmem:[#allocation2 + $0x118] sm:$0xff] %v9343_v6  ;;  %v1048_v55 = vpack.c.bf16 %v978_v22, %v978_v22  ;;  %v8481_v45 = vor.u32 %v9184_v36, %v8480_v34 }
 0x10b   : > { %733 = vst [vmem:[#allocation3 + $0x4ec] sm:$0xf] %v663_v27  ;;  %v1051_v36 = vpack.c.bf16 %v981_v43, %v981_v43 }
 0x10c   : > { %5066 = vmatmul.bf16.gmra.mxu0 %v7797_v35  ;;  %5156 = vmatmul.bf16.gmra.mxu2 %v8445_v40  ;;  %v1259_v40 = vpack.c.bf16 %v1189_v31, %v1189_v31  ;;  %1118 = vst [vmem:[#allocation3 + $0x8] sm:$0xf] %v1048_v55  ;;  %v7868_v55 = vld [vmem:[#allocation3 + $0x480] sm:$0xf]  ;;  %v980_v31 = vld [vmem:[#allocation2 + $0x12] sm:$0xff] }
 0x10d   : > { %1119 = vst [vmem:[#allocation3 + $0x2c] sm:$0xf] %v1049_v13  ;;  %v8516_v13 = vld [vmem:[#allocation3 + $0x990] sm:$0xf] }
 0x10e   : > { %v5298_v59 = vpop.f32.mrf.mxu3  ;;  %1329 = vst [vmem:[#allocation3 + $0x30] sm:$0xf] %v1259_v40  ;;  %v1260_v40 = vpack.c.bf16 %v1190_v11, %v1190_v11 }
 0x10f   : > { %v10210_v0 = vadd.f32 %v5298_v59, %v5115_v39  ;;  %v5117_v17 = vpop.f32.mrf.mxu2  ;;  %1121 = vst [vmem:[#allocation3 + $0x74] sm:$0xf] %v1051_v36 }
 0x110   : > { %v5118_v18 = vadd.f32 %v9979_v8, %v5117_v17  ;;  %v8485_v17 = vor.u32 %v9180_v46, %v8482_v56  ;;  %v1609_v56 = vld [vmem:[#allocation2 + $0x22] sm:$0xff]  ;;  %1330 = vst [vmem:[#allocation3 + $0x54] sm:$0xf] %v1260_v40 }
 0x111   : > { %10933 = vst [vmem:[#allocation15_spill] sm:$0xff] %v10210_v0  ;;  %v5211_v10 = vpop.f32.mrf.mxu1  ;;  %v5029_v19 = vpop.f32.mrf.mxu0  ;;  %v802_v58 = vld [vmem:[#allocation2 + $0x111] sm:$0xff]  ;;  %v803_v37 = vld [vmem:[#allocation2 + $0x119] sm:$0xff]  ;;  %v1679_v47 = vpack.c.bf16 %v1609_v56, %v1609_v56 }
 0x112   : > { %v10216_v12 = vadd.f32 %v5211_v10, %v5028_v60  ;;  %v5030_v21 = vadd.f32 %v9979_v8, %v5029_v19  ;;  %v872_v49 = vpack.c.bf16 %v802_v58, %v802_v58  ;;  %v873_v59 = vpack.c.bf16 %v803_v37, %v803_v37  ;;  %v9253_v58 = vld [vmem:[%s10920_s2 + $0x1b8] sm:$0xff]  ;;  %v9240_v37 = vld [vmem:[%s10920_s2 + $0x150] sm:$0xff]  ;;  %1748 = vst [vmem:[#allocation3 + $0x14] sm:$0xf] %v1051_v36 }
 0x113   : > { %5340 = vmatmul.bf16.gmra.mxu3 %v8449_v2  ;;  %v9018_v2 = vld [vmem:[#allocation3 + $0x43c] sm:$0xf]  ;;  %6092 = vmatpush.bf16.msra.mxu2 %v9253_v58  ;;  %1749 = vst [vmem:[#allocation3 + $0x38] sm:$0xf] %v1679_v47 }
 0x114   : > { %5250 = vmatmul.bf16.gmra.mxu1 %v7801_v48  ;;  %942 = vst [vmem:[#allocation3 + $0x4cc] sm:$0xf] %v872_v49  ;;  %v9238_v58 = vld [vmem:[%s10920_s2 + $0x140] sm:$0xff] }
 0x115   : > { %943 = vst [vmem:[#allocation3 + $0x4f0] sm:$0xf] %v873_v59  ;;  %5913 = vmatpush.bf16.msrb.mxu1 %v9240_v37 }
 0x116   : > { %v5301_v20 = vpop.f32.mrf.mxu3  ;;  %1122 = vst [vmem:[#allocation3 + $0x98] sm:$0xf] %v1679_v47  ;;  %v7300_v47 = vld [vmem:[#allocation3 + $0x8] sm:$0xf] }
 0x117   : > { %v10220_v23 = vadd.f32 %v5301_v20, %v5118_v18  ;;  %v5119_v30 = vpop.f32.mrf.mxu2  ;;  %v7837_v18 = vor.u32 %v9018_v2, %v7834_v41 }
 0x118   : > { %v5120_v44 = vadd.f32 %v9979_v8, %v5119_v30  ;;  %v1398_v30 = vld [vmem:[#allocation2 + $0x19] sm:$0xff] }
 0x119   : > { %10934 = vst [vmem:[#allocation16_spill] sm:$0xff] %v10220_v23  ;;  %v5213_v35 = vpop.f32.mrf.mxu1  ;;  %v5032_v60 = vpop.f32.mrf.mxu0  ;;  %v1468_v46 = vpack.c.bf16 %v1398_v30, %v1398_v30 }
 0x11a   : > { %v10224_v39 = vadd.f32 %v5213_v35, %v5030_v21  ;;  %v5033_v48 = vadd.f32 %v9979_v8, %v5032_v60  ;;  %v1050_v35 = vpack.c.bf16 %v980_v31, %v980_v31  ;;  %v9261_v60 = vld [vmem:[%s10920_s2 + $0x1f8] sm:$0xff] }
 0x11b   : > { %6276 = vmatpush.bf16.msra.mxu3 %v9261_v60  ;;  %1538 = vst [vmem:[#allocation3 + $0x10] sm:$0xf] %v1468_v46  ;;  %v7904_v46 = vld [vmem:[#allocation3 + $0x4c8] sm:$0xf]  ;;  %v1193_v60 = vld [vmem:[#allocation2 + $0x40] sm:$0xff] }
 0x11c   : > { %5071 = vmatmul.bf16.gmra.mxu0 %v7833_v28  ;;  %5161 = vmatmul.bf16.gmra.mxu2 %v8481_v45  ;;  %1120 = vst [vmem:[#allocation3 + $0x50] sm:$0xf] %v1050_v35  ;;  %v1399_v45 = vld [vmem:[#allocation2 + $0x21] sm:$0xff] }
 0x11d   : > { %v1469_v2 = vpack.c.bf16 %v1399_v45, %v1399_v45 }
 0x11e   : > { %v5303_v6 = vpop.f32.mrf.mxu3 }
 0x11f   : > { %v10228_v10 = vadd.f32 %v5303_v6, %v5120_v44  ;;  %v5122_v21 = vpop.f32.mrf.mxu2  ;;  %v9193_v44 = vld [vmem:[#allocation3 + $0x9b0] sm:$0xf0]  ;;  %v7869_v6 = vor.u32 %v9031_v1, %v7868_v55  ;;  %1539 = vst [vmem:[#allocation3 + $0x34] sm:$0xf] %v1469_v2 }
 0x120   : > { %v5123_v22 = vadd.f32 %v9979_v8, %v5122_v21  ;;  %v8518_v21 = vld [vmem:[#allocation3 + $0x9b4] sm:$0xf0] }
 0x121   : > { %10935 = vst [vmem:[#allocation17_spill] sm:$0xff] %v10228_v10  ;;  %v5216_v19 = vpop.f32.mrf.mxu1  ;;  %v5034_v24 = vpop.f32.mrf.mxu0 }
 0x122   : > { %v10230_v20 = vadd.f32 %v5216_v19, %v5033_v48  ;;  %v5035_v27 = vadd.f32 %v9979_v8, %v5034_v24  ;;  %v1191_v8 = vld [vmem:[#allocation2 + $0x30] sm:$0xff]  ;;  %v9189_v48 = vld [vmem:[#allocation3 + $0x994] sm:$0xf]  ;;  %v8517_v19 = vor.u32 %v9193_v44, %v8516_v13 }
 0x123   : > { %5345 = vmatmul.bf16.gmra.mxu3 %v8485_v17  ;;  %v1261_v28 = vpack.c.bf16 %v1191_v8, %v1191_v8  ;;  %v10250_v17 = vld [vmem:[#allocation4] ss:$0 sm:$0xff]  ;;  %v8521_v43 = vor.u32 %v9189_v48, %v8518_v21  ;;  %v9269_v8 = vld [vmem:[%s10920_s2 + $0x238] sm:$0xff]  ;;  %v983_v44 = vld [vmem:[#allocation2 + $0x2a] sm:$0xff]  ;;  %v1263_v48 = vpack.c.bf16 %v1193_v60, %v1193_v60 }
 0x124   : > { %5255 = vmatmul.bf16.gmra.mxu1 %v7837_v18  ;;  %6460 = vmatpush.bf16.msra.mxu0 %v9269_v8  ;;  %v1053_v56 = vpack.c.bf16 %v983_v44, %v983_v44  ;;  %v1611_v21 = vld [vmem:[#allocation2 + $0x32] sm:$0xff] }
 0x125   : > { %1331 = vst [vmem:[#allocation3 + $0x78] sm:$0xf] %v1261_v28  ;;  %v1192_v28 = vld [vmem:[#allocation2 + $0x38] sm:$0xff] }
 0x126   : > { %v5306_v57 = vpop.f32.mrf.mxu3  ;;  %v1262_v2 = vpack.c.bf16 %v1192_v28, %v1192_v28  ;;  %1123 = vst [vmem:[#allocation3 + $0xbc] sm:$0xf] %v1053_v56 }
 0x127   : > { %v10237_v34 = vadd.f32 %v5306_v57, %v5123_v22  ;;  %v5124_v41 = vpop.f32.mrf.mxu2  ;;  %v9239_v22 = vld [vmem:[%s10920_s2 + $0x148] sm:$0xff]  ;;  %1333 = vst [vmem:[#allocation3 + $0xc0] sm:$0xf] %v1263_v48 }
 0x128   : > { %v5125_v18 = vadd.f32 %v10250_v17, %v5124_v41  ;;  %v9027_v57 = vld [vmem:[#allocation3 + $0x484] sm:$0xf]  ;;  %5914 = vmatpush.bf16.msrb.mxu1 %v9239_v22  ;;  %1332 = vst [vmem:[#allocation3 + $0x9c] sm:$0xf] %v1262_v2 }
 0x129   : > { %10936 = vst [vmem:[#allocation18_spill] sm:$0xff] %v10237_v34  ;;  %v5218_v49 = vpop.f32.mrf.mxu1  ;;  %v5037_v24 = vpop.f32.mrf.mxu0  ;;  %v1400_v41 = vld [vmem:[#allocation2 + $0x29] sm:$0xff] }
 0x12a   : > { %v10245_v59 = vadd.f32 %v5218_v49, %v5035_v27  ;;  %v7870_v27 = vld [vmem:[#allocation3 + $0x4a4] sm:$0xf0]  ;;  %v5038_v1 = vadd.f32 %v10250_v17, %v5037_v24  ;;  %v8888_v24 = vld [vmem:[#allocation3 + $0x28] sm:$0xf0]  ;;  %1750 = vst [vmem:[#allocation3 + $0x5c] sm:$0xf] %v1053_v56 }
 0x12b   : > { %v7873_v13 = vor.u32 %v9027_v57, %v7870_v27 }
 0x12c   : > { %5076 = vmatmul.bf16.gmra.mxu0 %v7869_v6  ;;  %5166 = vmatmul.bf16.gmra.mxu2 %v8517_v19  ;;  %v9040_v6 = vld [vmem:[#allocation3 + $0x4e8] sm:$0xf0]  ;;  %v1470_v19 = vpack.c.bf16 %v1400_v41, %v1400_v41 }
 0x12d   : > { %5915 = vmatpush.bf16.msrb.mxu1 %v9238_v58  ;;  %v7301_v58 = vor.u32 %v8888_v24, %v7300_v47  ;;  %v1195_v24 = vld [vmem:[#allocation2 + $0x50] sm:$0xff] }
 0x12e   : > { %v5308_v55 = vpop.f32.mrf.mxu3  ;;  %1540 = vst [vmem:[#allocation3 + $0x58] sm:$0xf] %v1470_v19  ;;  %v985_v19 = vld [vmem:[#allocation2 + $0x3a] sm:$0xff] }
 0x12f   : > { %v10257_v31 = vadd.f32 %v5308_v55, %v5125_v18  ;;  %v5127_v37 = vpop.f32.mrf.mxu2  ;;  %v1401_v18 = vld [vmem:[#allocation2 + $0x31] sm:$0xff]  ;;  %v1055_v47 = vpack.c.bf16 %v985_v19, %v985_v19 }
 0x130   : > { %v5128_v36 = vadd.f32 %v10250_v17, %v5127_v37  ;;  %v1471_v57 = vpack.c.bf16 %v1401_v18, %v1401_v18  ;;  %v7302_v37 = vld [vmem:[#allocation3 + $0x2c] sm:$0xf0] }
 0x131   : > { %10937 = vst [vmem:[#allocation19_spill] sm:$0xff] %v10257_v31  ;;  %v5221_v35 = vpop.f32.mrf.mxu1  ;;  %v5039_v40 = vpop.f32.mrf.mxu0 }
 0x132   : > { %v10262_v11 = vadd.f32 %v5221_v35, %v5038_v1  ;;  %v5040_v49 = vadd.f32 %v10250_v17, %v5039_v40  ;;  %v1681_v1 = vpack.c.bf16 %v1611_v21, %v1611_v21  ;;  %v8884_v35 = vld [vmem:[#allocation3 + $0xc] sm:$0xf]  ;;  %v7906_v40 = vld [vmem:[#allocation3 + $0x4ec] sm:$0xf0]  ;;  %1541 = vst [vmem:[#allocation3 + $0x7c] sm:$0xf] %v1471_v57 }
 0x133   : > { %5350 = vmatmul.bf16.gmra.mxu3 %v8521_v43  ;;  %v7305_v28 = vor.u32 %v8884_v35, %v7302_v37  ;;  %v1194_v21 = vld [vmem:[#allocation2 + $0x48] sm:$0xff]  ;;  %1125 = vst [vmem:[#allocation3 + $0x104] sm:$0xf] %v1055_v47 }
 0x134   : > { %5260 = vmatmul.bf16.gmra.mxu1 %v7873_v13  ;;  %v7905_v13 = vor.u32 %v9040_v6, %v7904_v46  ;;  %1751 = vst [vmem:[#allocation3 + $0x80] sm:$0xf] %v1681_v1  ;;  %v1264_v57 = vpack.c.bf16 %v1194_v21, %v1194_v21  ;;  %v1613_v37 = vld [vmem:[#allocation2 + $0x42] sm:$0xff]  ;;  %v8885_v21 = vld [vmem:[#allocation3 + $0x14] sm:$0xf] }
 0x135   : > { %1124 = vst [vmem:[#allocation3 + $0xe0] sm:$0xf] %v1681_v1  ;;  %v1403_v1 = vld [vmem:[#allocation2 + $0x41] sm:$0xff] }
 0x136   : > { %v5311_v30 = vpop.f32.mrf.mxu3  ;;  %1334 = vst [vmem:[#allocation3 + $0xe4] sm:$0xf] %v1264_v57 }
 0x137   : > { %v10269_v45 = vadd.f32 %v5311_v30, %v5128_v36  ;;  %v5129_v55 = vpop.f32.mrf.mxu2  ;;  %v9036_v36 = vld [vmem:[#allocation3 + $0x4cc] sm:$0xf]  ;;  %1752 = vst [vmem:[#allocation3 + $0xa4] sm:$0xf] %v1055_v47 }
 0x138   : > { %v5130_v43 = vadd.f32 %v10250_v17, %v5129_v55  ;;  %v7909_v60 = vor.u32 %v9036_v36, %v7906_v40  ;;  %v1402_v55 = vld [vmem:[#allocation2 + $0x39] sm:$0xff] }
 0x139   : > { %10938 = vst [vmem:[#allocation20_spill] sm:$0xff] %v10269_v45  ;;  %v5223_v22 = vpop.f32.mrf.mxu1  ;;  %v5042_v8 = vpop.f32.mrf.mxu0  ;;  %v1472_v35 = vpack.c.bf16 %v1402_v55, %v1402_v55  ;;  %v7308_v36 = vld [vmem:[#allocation3 + $0x10] sm:$0xf]  ;;  %v8889_v40 = vld [vmem:[#allocation3 + $0x30] sm:$0xf0] }
 0x13a   : > { %v10271_v27 = vadd.f32 %v5223_v22, %v5040_v49  ;;  %v5043_v44 = vadd.f32 %v10250_v17, %v5042_v8 }
 0x13b   : > { %1542 = vst [vmem:[#allocation3 + $0xa0] sm:$0xf] %v1472_v35 }
 0x13c   : > { %5081 = vmatmul.bf16.gmra.mxu0 %v7905_v13  ;;  %5364 = vmatmul.bf16.vlgmr.msrb.gmra.mxu2 %v7301_v58  ;;  %v8897_v13 = vld [vmem:[#allocation3 + $0x70] sm:$0xf0]  ;;  %v1265_v58 = vpack.c.bf16 %v1195_v24, %v1195_v24  ;;  %v7310_v24 = vld [vmem:[#allocation3 + $0x34] sm:$0xf0] }
 0x13e   : > { %v5313_v30 = vpop.f32.mrf.mxu3  ;;  %1335 = vst [vmem:[#allocation3 + $0x108] sm:$0xf] %v1265_v58  ;;  %v7313_v58 = vor.u32 %v8885_v21, %v7310_v24 }
 0x13f   : > { %v10275_v49 = vadd.f32 %v5313_v30, %v5130_v43  ;;  %v5132_v41 = vpop.f32.mrf.mxu2  ;;  %v7336_v43 = vld [vmem:[#allocation3 + $0x50] sm:$0xf]  ;;  %v1473_v30 = vpack.c.bf16 %v1403_v1, %v1403_v1 }
 0x140   : > { %v5133_v6 = vadd.f32 %v10250_v17, %v5132_v41  ;;  %v7337_v41 = vor.u32 %v8897_v13, %v7336_v43 }
 0x141   : > { %10939 = vst [vmem:[#allocation21_spill] sm:$0xff] %v10275_v49  ;;  %v5226_v46 = vpop.f32.mrf.mxu1  ;;  %v5044_v48 = vpop.f32.mrf.mxu0 }
 0x142   : > { %v10277_v2 = vadd.f32 %v5226_v46, %v5043_v44  ;;  %v5045_v56 = vadd.f32 %v10250_v17, %v5044_v48  ;;  %v7338_v48 = vld [vmem:[#allocation3 + $0x74] sm:$0xf0]  ;;  %1543 = vst [vmem:[#allocation3 + $0xc4] sm:$0xf] %v1473_v30  ;;  %v1196_v30 = vld [vmem:[#allocation2 + $0x58] sm:$0xff] }
 0x143   : > { %5548 = vmatmul.bf16.vlgmr.msrb.gmra.mxu3 %v7305_v28 }
 0x144   : > { %5265 = vmatmul.bf16.gmra.mxu1 %v7909_v60  ;;  %v1683_v60 = vpack.c.bf16 %v1613_v37, %v1613_v37 }
 0x146   : > { %v5316_v18 = vpop.f32.mrf.mxu3  ;;  %1753 = vst [vmem:[#allocation3 + $0xc8] sm:$0xf] %v1683_v60 }
 0x147   : > { %v10281_v22 = vadd.f32 %v5316_v18, %v5133_v6  ;;  %v5134_v28 = vpop.f32.mrf.mxu2  ;;  %v8893_v6 = vld [vmem:[#allocation3 + $0x54] sm:$0xf]  ;;  %v7309_v18 = vor.u32 %v8889_v40, %v7308_v36  ;;  %1126 = vst [vmem:[#allocation3 + $0x128] sm:$0xf] %v1683_v60  ;;  %v987_v40 = vld [vmem:[#allocation2 + $0x4a] sm:$0xff] }
 0x148   : > { %v5135_v46 = vadd.f32 %v10250_v17, %v5134_v28  ;;  %v7341_v57 = vor.u32 %v8893_v6, %v7338_v48  ;;  %v1266_v6 = vpack.c.bf16 %v1196_v30, %v1196_v30  ;;  %v1404_v60 = vld [vmem:[#allocation2 + $0x49] sm:$0xff]  ;;  %v1405_v48 = vld [vmem:[#allocation2 + $0x51] sm:$0xff]  ;;  %v8902_v30 = vld [vmem:[#allocation3 + $0x9c] sm:$0xf] }
 0x149   : > { %10940 = vst [vmem:[#allocation22_spill] sm:$0xff] %v10281_v22  ;;  %v5228_v8 = vpop.f32.mrf.mxu1  ;;  %v5047_v19 = vpop.f32.mrf.mxu0  ;;  %v1474_v24 = vpack.c.bf16 %v1404_v60, %v1404_v60  ;;  %v8894_v60 = vld [vmem:[#allocation3 + $0x5c] sm:$0xf]  ;;  %v7346_v22 = vld [vmem:[#allocation3 + $0x7c] sm:$0xf0] }
 0x14a   : > { %v10283_v44 = vadd.f32 %v5228_v8, %v5045_v56  ;;  %v5048_v1 = vadd.f32 %v10250_v17, %v5047_v19  ;;  %v8906_v19 = vld [vmem:[#allocation3 + $0xb8] sm:$0xf0]  ;;  %1336 = vst [vmem:[#allocation3 + $0x12c] sm:$0xf] %v1266_v6 }
 0x14b   : > { %1544 = vst [vmem:[#allocation3 + $0xe8] sm:$0xf] %v1474_v24 }
 0x14c   : > { %5369 = vmatmul.bf16.gmra.mxu2 %v7337_v41  ;;  %5732 = vmatmul.bf16.vlgmr.msrb.gmra.mxu0 %v7309_v18  ;;  %v1197_v41 = vld [vmem:[#allocation2 + $0x60] sm:$0xff] }
 0x14d   : > { %v7372_v18 = vld [vmem:[#allocation3 + $0x98] sm:$0xf]  ;;  %v1267_v21 = vpack.c.bf16 %v1197_v41, %v1197_v41  ;;  %v7382_v45 = vld [vmem:[#allocation3 + $0xc4] sm:$0xf0] }
 0x14e   : > { %v5318_v55 = vpop.f32.mrf.mxu3 }
 0x14f   : > { %v10287_v56 = vadd.f32 %v5318_v55, %v5135_v46  ;;  %v5137_v35 = vpop.f32.mrf.mxu2  ;;  %v1057_v46 = vpack.c.bf16 %v987_v40, %v987_v40  ;;  %v1615_v55 = vld [vmem:[#allocation2 + $0x52] sm:$0xff]  ;;  %1337 = vst [vmem:[#allocation3 + $0x150] sm:$0xf] %v1267_v21  ;;  %v7373_v40 = vor.u32 %v8906_v19, %v7372_v18  ;;  %v7349_v21 = vor.u32 %v8894_v60, %v7346_v22  ;;  %v1617_v60 = vld [vmem:[#allocation2 + $0x62] sm:$0xff] }
 0x150   : > { %v5138_v37 = vadd.f32 %v10250_v17, %v5137_v35 }
 0x151   : > { %10941 = vst [vmem:[#allocation23_spill] sm:$0xff] %v10287_v56  ;;  %v5231_v43 = vpop.f32.mrf.mxu1  ;;  %v5049_v8 = vpop.f32.mrf.mxu0 }
 0x152   : > { %v10289_v13 = vadd.f32 %v5231_v43, %v5048_v1  ;;  %v5050_v47 = vadd.f32 %v10250_v17, %v5049_v8  ;;  %1127 = vst [vmem:[#allocation3 + $0x14c] sm:$0xf] %v1057_v46  ;;  %v1475_v43 = vpack.c.bf16 %v1405_v48, %v1405_v48  ;;  %v1685_v8 = vpack.c.bf16 %v1615_v55, %v1615_v55 }
 0x153   : > { %5553 = vmatmul.bf16.gmra.mxu3 %v7341_v57  ;;  %v7344_v57 = vld [vmem:[#allocation3 + $0x58] sm:$0xf]  ;;  %1754 = vst [vmem:[#allocation3 + $0xec] sm:$0xf] %v1057_v46 }
 0x154   : > { %5916 = vmatmul.bf16.vlgmr.msrb.gmra.mxu1 %v7313_v58  ;;  %v8898_v58 = vld [vmem:[#allocation3 + $0x78] sm:$0xf0]  ;;  %1545 = vst [vmem:[#allocation3 + $0x10c] sm:$0xf] %v1475_v43 }
 0x155   : > { %v7345_v56 = vor.u32 %v8898_v58, %v7344_v57  ;;  %1755 = vst [vmem:[#allocation3 + $0x110] sm:$0xf] %v1685_v8  ;;  %v1198_v58 = vld [vmem:[#allocation2 + $0x68] sm:$0xff] }
 0x156   : > { %v5321_v36 = vpop.f32.mrf.mxu3  ;;  %1128 = vst [vmem:[#allocation3 + $0x170] sm:$0xf] %v1685_v8  ;;  %v1268_v22 = vpack.c.bf16 %v1198_v58, %v1198_v58  ;;  %v1407_v8 = vld [vmem:[#allocation2 + $0x61] sm:$0xff]  ;;  %v8911_v58 = vld [vmem:[#allocation3 + $0xe4] sm:$0xf] }
 0x157   : > { %v10293_v28 = vadd.f32 %v5321_v36, %v5138_v37  ;;  %v5139_v37 = vpop.f32.mrf.mxu2 }
 0x158   : > { %v5140_v36 = vadd.f32 %v10250_v17, %v5139_v37  ;;  %v1406_v37 = vld [vmem:[#allocation2 + $0x59] sm:$0xff]  ;;  %1338 = vst [vmem:[#allocation3 + $0x174] sm:$0xf] %v1268_v22 }
 0x159   : > { %10942 = vst [vmem:[#allocation24_spill] sm:$0xff] %v10293_v28  ;;  %v5233_v1 = vpop.f32.mrf.mxu1  ;;  %v7374_v28 = vld [vmem:[#allocation3 + $0xbc] sm:$0xf0]  ;;  %v5052_v41 = vpop.f32.mrf.mxu0 }
 0x15a   : > { %v10295_v35 = vadd.f32 %v5233_v1, %v5050_v47  ;;  %v5053_v48 = vadd.f32 %v10250_v17, %v5052_v41  ;;  %v7377_v6 = vor.u32 %v8902_v30, %v7374_v28  ;;  %v1476_v41 = vpack.c.bf16 %v1406_v37, %v1406_v37  ;;  %v8903_v37 = vld [vmem:[#allocation3 + $0xa4] sm:$0xf]  ;;  %v8912_v34 = vld [vmem:[#allocation3 + $0xec] sm:$0xf] }
 0x15c   : > { %5374 = vmatmul.bf16.gmra.mxu2 %v7373_v40  ;;  %5737 = vmatmul.bf16.gmra.mxu0 %v7345_v56  ;;  %v1199_v56 = vld [vmem:[#allocation2 + $0x70] sm:$0xff]  ;;  %v8915_v40 = vld [vmem:[#allocation3 + $0x100] sm:$0xf0]  ;;  %1546 = vst [vmem:[#allocation3 + $0x130] sm:$0xf] %v1476_v41 }
 0x15d   : > { %v1269_v30 = vpack.c.bf16 %v1199_v56, %v1199_v56  ;;  %v7418_v10 = vld [vmem:[#allocation3 + $0x10c] sm:$0xf0] }
 0x15e   : > { %v5323_v49 = vpop.f32.mrf.mxu3 }
 0x15f   : > { %v10299_v47 = vadd.f32 %v5323_v49, %v5140_v36  ;;  %v5142_v24 = vpop.f32.mrf.mxu2  ;;  %v989_v49 = vld [vmem:[#allocation2 + $0x5a] sm:$0xff]  ;;  %v7408_v36 = vld [vmem:[#allocation3 + $0xe0] sm:$0xf]  ;;  %1339 = vst [vmem:[#allocation3 + $0x198] sm:$0xf] %v1269_v30  ;;  %v9252_v30 = vld [vmem:[%s10920_s2 + $0x1b0] sm:$0xff] }
 0x160   : > { %v5143_v55 = vadd.f32 %v10250_v17, %v5142_v24  ;;  %v1059_v43 = vpack.c.bf16 %v989_v49, %v989_v49  ;;  %v7409_v49 = vor.u32 %v8915_v40, %v7408_v36  ;;  %v9260_v36 = vld [vmem:[%s10920_s2 + $0x1f0] sm:$0xff]  ;;  %v7385_v40 = vor.u32 %v8903_v37, %v7382_v45  ;;  %6093 = vmatpush.bf16.msra.mxu2 %v9252_v30 }
 0x161   : > { %10943 = vst [vmem:[#allocation25_spill] sm:$0xff] %v10299_v47  ;;  %v5236_v18 = vpop.f32.mrf.mxu1  ;;  %v5054_v1 = vpop.f32.mrf.mxu0  ;;  %6277 = vmatpush.bf16.msra.mxu3 %v9260_v36  ;;  %v7444_v45 = vld [vmem:[#allocation3 + $0x128] sm:$0xf] }
 0x162   : > { %v10301_v19 = vadd.f32 %v5236_v18, %v5053_v48  ;;  %v5055_v46 = vadd.f32 %v10250_v17, %v5054_v1  ;;  %1129 = vst [vmem:[#allocation3 + $0x194] sm:$0xf] %v1059_v43  ;;  %v1477_v18 = vpack.c.bf16 %v1407_v8, %v1407_v8  ;;  %v1687_v1 = vpack.c.bf16 %v1617_v60, %v1617_v60  ;;  %v1619_v30 = vld [vmem:[#allocation2 + $0x72] sm:$0xff] }
 0x163   : > { %5558 = vmatmul.bf16.gmra.mxu3 %v7377_v6  ;;  %v7380_v6 = vld [vmem:[#allocation3 + $0xa0] sm:$0xf]  ;;  %1756 = vst [vmem:[#allocation3 + $0x134] sm:$0xf] %v1059_v43 }
 0x164   : > { %5921 = vmatmul.bf16.gmra.mxu1 %v7349_v21  ;;  %v8907_v21 = vld [vmem:[#allocation3 + $0xc0] sm:$0xf0]  ;;  %1547 = vst [vmem:[#allocation3 + $0x154] sm:$0xf] %v1477_v18  ;;  %v1200_v18 = vld [vmem:[#allocation2 + $0x78] sm:$0xff] }
 0x165   : > { %v7381_v47 = vor.u32 %v8907_v21, %v7380_v6  ;;  %1757 = vst [vmem:[#allocation3 + $0x158] sm:$0xf] %v1687_v1  ;;  %v991_v21 = vld [vmem:[#allocation2 + $0x6a] sm:$0xff] }
 0x166   : > { %v5326_v57 = vpop.f32.mrf.mxu3  ;;  %1130 = vst [vmem:[#allocation3 + $0x1b8] sm:$0xf] %v1687_v1  ;;  %v1061_v1 = vpack.c.bf16 %v991_v21, %v991_v21 }
 0x167   : > { %v10305_v28 = vadd.f32 %v5326_v57, %v5143_v55  ;;  %v5144_v55 = vpop.f32.mrf.mxu2 }
 0x168   : > { %v5145_v57 = vadd.f32 %v10250_v17, %v5144_v55  ;;  %1131 = vst [vmem:[#allocation3 + $0x1dc] sm:$0xf] %v1061_v1 }
 0x169   : > { %10944 = vst [vmem:[#allocation26_spill] sm:$0xff] %v10305_v28  ;;  %v5238_v48 = vpop.f32.mrf.mxu1  ;;  %v7410_v28 = vld [vmem:[#allocation3 + $0x104] sm:$0xf0]  ;;  %v5057_v56 = vpop.f32.mrf.mxu0 }
 0x16a   : > { %v10307_v24 = vadd.f32 %v5238_v48, %v5055_v46  ;;  %v5058_v8 = vadd.f32 %v10250_v17, %v5057_v56  ;;  %v7413_v22 = vor.u32 %v8911_v58, %v7410_v28  ;;  %v1408_v58 = vld [vmem:[#allocation2 + $0x69] sm:$0xff]  ;;  %v8924_v56 = vld [vmem:[#allocation3 + $0x148] sm:$0xf0]  ;;  %1758 = vst [vmem:[#allocation3 + $0x17c] sm:$0xf] %v1061_v1 }
 0x16c   : > { %5379 = vmatmul.bf16.gmra.mxu2 %v7409_v49  ;;  %5742 = vmatmul.bf16.gmra.mxu0 %v7381_v47  ;;  %v9268_v47 = vld [vmem:[%s10920_s2 + $0x230] sm:$0xff]  ;;  %v1270_v49 = vpack.c.bf16 %v1200_v18, %v1200_v18  ;;  %v7445_v18 = vor.u32 %v8924_v56, %v7444_v45  ;;  %v7454_v23 = vld [vmem:[#allocation3 + $0x154] sm:$0xf0] }
 0x16d   : > { %6461 = vmatpush.bf16.msra.mxu0 %v9268_v47 }
 0x16e   : > { %v5328_v31 = vpop.f32.mrf.mxu3  ;;  %1340 = vst [vmem:[#allocation3 + $0x1bc] sm:$0xf] %v1270_v49 }
 0x16f   : > { %v10311_v46 = vadd.f32 %v5328_v31, %v5145_v57  ;;  %v5147_v31 = vpop.f32.mrf.mxu2  ;;  %v1201_v57 = vld [vmem:[#allocation2 + $0x80] sm:$0xff] }
 0x170   : > { %v5148_v28 = vadd.f32 %v10250_v17, %v5147_v31  ;;  %v1271_v37 = vpack.c.bf16 %v1201_v57, %v1201_v57  ;;  %v7446_v57 = vld [vmem:[#allocation3 + $0x14c] sm:$0xf0] }
 0x171   : > { %10945 = vst [vmem:[#allocation27_spill] sm:$0xff] %v10311_v46  ;;  %v5241_v41 = vpop.f32.mrf.mxu1  ;;  %v5059_v60 = vpop.f32.mrf.mxu0 }
 0x172   : > { %v10319_v43 = vadd.f32 %v5241_v41, %v5058_v8  ;;  %v5060_v6 = vadd.f32 %v10250_v17, %v5059_v60  ;;  %v1409_v8 = vld [vmem:[#allocation2 + $0x71] sm:$0xff]  ;;  %1341 = vst [vmem:[#allocation3 + $0x1e0] sm:$0xf] %v1271_v37  ;;  %v7421_v37 = vor.u32 %v8912_v34, %v7418_v10  ;;  %v1410_v34 = vld [vmem:[#allocation2 + $0x79] sm:$0xff] }
 0x173   : > { %5563 = vmatmul.bf16.gmra.mxu3 %v7413_v22  ;;  %v1478_v22 = vpack.c.bf16 %v1408_v58, %v1408_v58  ;;  %v8916_v41 = vld [vmem:[#allocation3 + $0x108] sm:$0xf0]  ;;  %v1479_v31 = vpack.c.bf16 %v1409_v8, %v1409_v8 }
 0x174   : > { %5926 = vmatmul.bf16.gmra.mxu1 %v7385_v40  ;;  %v7416_v40 = vld [vmem:[#allocation3 + $0xe8] sm:$0xf] }
 0x175   : > { %v7417_v46 = vor.u32 %v8916_v41, %v7416_v40  ;;  %1548 = vst [vmem:[#allocation3 + $0x178] sm:$0xf] %v1478_v22  ;;  %v993_v41 = vld [vmem:[#allocation2 + $0x7a] sm:$0xff] }
 0x176   : > { %v5331_v48 = vpop.f32.mrf.mxu3  ;;  %1549 = vst [vmem:[#allocation3 + $0x19c] sm:$0xf] %v1479_v31  ;;  %v1202_v31 = vld [vmem:[#allocation2 + $0x88] sm:$0xff] }
 0x177   : > { %v10323_v55 = vadd.f32 %v5331_v48, %v5148_v28  ;;  %v5149_v60 = vpop.f32.mrf.mxu2  ;;  %v1689_v48 = vpack.c.bf16 %v1619_v30, %v1619_v30  ;;  %v1272_v10 = vpack.c.bf16 %v1202_v31, %v1202_v31  ;;  %v8929_v31 = vld [vmem:[#allocation3 + $0x174] sm:$0xf] }
 0x178   : > { %v5150_v21 = vadd.f32 %v10250_v17, %v5149_v60  ;;  %v1063_v60 = vpack.c.bf16 %v993_v41, %v993_v41 }
 0x179   : > { %10946 = vst [vmem:[#allocation28_spill] sm:$0xff] %v10323_v55  ;;  %v5243_v36 = vpop.f32.mrf.mxu1  ;;  %v8920_v55 = vld [vmem:[#allocation3 + $0x12c] sm:$0xf]  ;;  %v5062_v58 = vpop.f32.mrf.mxu0 }
 0x17a   : > { %v10328_v28 = vadd.f32 %v5243_v36, %v5060_v6  ;;  %v5063_v8 = vadd.f32 %v10250_v17, %v5062_v58  ;;  %v7449_v49 = vor.u32 %v8920_v55, %v7446_v57  ;;  %1759 = vst [vmem:[#allocation3 + $0x1a0] sm:$0xf] %v1689_v48  ;;  %v1480_v58 = vpack.c.bf16 %v1410_v34, %v1410_v34  ;;  %v8921_v34 = vld [vmem:[#allocation3 + $0x134] sm:$0xf] }
 0x17b   : > { %1132 = vst [vmem:[#allocation3 + $0x200] sm:$0xf] %v1689_v48  ;;  %v1411_v48 = vld [vmem:[#allocation2 + $0x81] sm:$0xff] }
 0x17c   : > { %5384 = vmatmul.bf16.gmra.mxu2 %v7445_v18  ;;  %5747 = vmatmul.bf16.gmra.mxu0 %v7417_v46  ;;  %v1203_v46 = vld [vmem:[#allocation2 + $0x90] sm:$0xff]  ;;  %v8933_v18 = vld [vmem:[#allocation3 + $0x190] sm:$0xf0]  ;;  %1133 = vst [vmem:[#allocation3 + $0x224] sm:$0xf] %v1063_v60 }
 0x17d   : > { %v1273_v57 = vpack.c.bf16 %v1203_v46, %v1203_v46  ;;  %1342 = vst [vmem:[#allocation3 + $0x204] sm:$0xf] %v1272_v10 }
 0x17e   : > { %v5333_v47 = vpop.f32.mrf.mxu3  ;;  %1550 = vst [vmem:[#allocation3 + $0x1c0] sm:$0xf] %v1480_v58 }
 0x17f   : > { %v10332_v6 = vadd.f32 %v5333_v47, %v5150_v21  ;;  %v5152_v22 = vpop.f32.mrf.mxu2  ;;  %v7480_v21 = vld [vmem:[#allocation3 + $0x170] sm:$0xf]  ;;  %v1621_v47 = vld [vmem:[#allocation2 + $0x82] sm:$0xff]  ;;  %1343 = vst [vmem:[#allocation3 + $0x228] sm:$0xf] %v1273_v57  ;;  %v7457_v57 = vor.u32 %v8921_v34, %v7454_v23 }
 0x180   : > { %v5153_v30 = vadd.f32 %v10250_v17, %v5152_v22  ;;  %v7481_v41 = vor.u32 %v8933_v18, %v7480_v21  ;;  %1760 = vst [vmem:[#allocation3 + $0x1c4] sm:$0xf] %v1063_v60  ;;  %v1623_v34 = vld [vmem:[#allocation2 + $0x92] sm:$0xff] }
 0x181   : > { %10947 = vst [vmem:[#allocation29_spill] sm:$0xff] %v10332_v6  ;;  %v5246_v45 = vpop.f32.mrf.mxu1  ;;  %v5064_v36 = vpop.f32.mrf.mxu0  ;;  %v7490_v16 = vld [vmem:[#allocation3 + $0x19c] sm:$0xf0] }
 0x182   : > { %v10334_v56 = vadd.f32 %v5246_v45, %v5063_v8  ;;  %v5065_v1 = vadd.f32 %v10250_v17, %v5064_v36  ;;  %v1481_v45 = vpack.c.bf16 %v1411_v48, %v1411_v48  ;;  %v1691_v36 = vpack.c.bf16 %v1621_v47, %v1621_v47 }
 0x183   : > { %5568 = vmatmul.bf16.gmra.mxu3 %v7449_v49  ;;  %v7452_v49 = vld [vmem:[#allocation3 + $0x130] sm:$0xf] }
 0x184   : > { %5931 = vmatmul.bf16.gmra.mxu1 %v7421_v37  ;;  %v8925_v37 = vld [vmem:[#allocation3 + $0x150] sm:$0xf0]  ;;  %1551 = vst [vmem:[#allocation3 + $0x1e4] sm:$0xf] %v1481_v45 }
 0x185   : > { %v7453_v6 = vor.u32 %v8925_v37, %v7452_v49  ;;  %1761 = vst [vmem:[#allocation3 + $0x1e8] sm:$0xf] %v1691_v36  ;;  %v1204_v37 = vld [vmem:[#allocation2 + $0x98] sm:$0xff] }
 0x186   : > { %v5336_v40 = vpop.f32.mrf.mxu3  ;;  %1134 = vst [vmem:[#allocation3 + $0x248] sm:$0xf] %v1691_v36  ;;  %v1274_v23 = vpack.c.bf16 %v1204_v37, %v1204_v37  ;;  %v1413_v36 = vld [vmem:[#allocation2 + $0x91] sm:$0xff]  ;;  %v8938_v37 = vld [vmem:[#allocation3 + $0x1bc] sm:$0xf] }
 0x187   : > { %v10338_v55 = vadd.f32 %v5336_v40, %v5153_v30  ;;  %v5154_v30 = vpop.f32.mrf.mxu2 }
 0x188   : > { %v5155_v40 = vadd.f32 %v10250_v17, %v5154_v30  ;;  %v1412_v30 = vld [vmem:[#allocation2 + $0x89] sm:$0xff]  ;;  %1344 = vst [vmem:[#allocation3 + $0x24c] sm:$0xf] %v1274_v23 }
 0x189   : > { %10948 = vst [vmem:[#allocation30_spill] sm:$0xff] %v10338_v55  ;;  %v5248_v8 = vpop.f32.mrf.mxu1  ;;  %v7482_v55 = vld [vmem:[#allocation3 + $0x194] sm:$0xf0]  ;;  %v5067_v46 = vpop.f32.mrf.mxu0 }
 0x18a   : > { %v10340_v22 = vadd.f32 %v5248_v8, %v5065_v1  ;;  %v5068_v48 = vadd.f32 %v10250_v17, %v5067_v46  ;;  %v7485_v10 = vor.u32 %v8929_v31, %v7482_v55  ;;  %v1482_v46 = vpack.c.bf16 %v1412_v30, %v1412_v30  ;;  %v8930_v30 = vld [vmem:[#allocation3 + $0x17c] sm:$0xf] }
 0x18c   : > { %5389 = vmatmul.bf16.gmra.mxu2 %v7481_v41  ;;  %5752 = vmatmul.bf16.gmra.mxu0 %v7453_v6  ;;  %v1205_v6 = vld [vmem:[#allocation2 + $0xa0] sm:$0xff]  ;;  %1552 = vst [vmem:[#allocation3 + $0x208] sm:$0xf] %v1482_v46  ;;  %v7526_v9 = vld [vmem:[#allocation3 + $0x1e4] sm:$0xf0] }
 0x18d   : > { %v8942_v41 = vld [vmem:[#allocation3 + $0x1d8] sm:$0xf0]  ;;  %v1275_v31 = vpack.c.bf16 %v1205_v6, %v1205_v6 }
 0x18e   : > { %v5338_v0 = vpop.f32.mrf.mxu3 }
 0x18f   : > { %v10344_v1 = vadd.f32 %v5338_v0, %v5155_v40  ;;  %v5157_v58 = vpop.f32.mrf.mxu2  ;;  %v995_v0 = vld [vmem:[#allocation2 + $0x8a] sm:$0xff]  ;;  %v7516_v40 = vld [vmem:[#allocation3 + $0x1b8] sm:$0xf]  ;;  %1345 = vst [vmem:[#allocation3 + $0x270] sm:$0xf] %v1275_v31  ;;  %v7493_v31 = vor.u32 %v8930_v30, %v7490_v16 }
 0x190   : > { %v5158_v47 = vadd.f32 %v10250_v17, %v5157_v58  ;;  %v1065_v45 = vpack.c.bf16 %v995_v0, %v995_v0  ;;  %v7517_v0 = vor.u32 %v8942_v41, %v7516_v40  ;;  %v1625_v30 = vld [vmem:[#allocation2 + $0xa2] sm:$0xff] }
 0x191   : > { %10949 = vst [vmem:[#allocation31_spill] sm:$0xff] %v10344_v1  ;;  %v5251_v21 = vpop.f32.mrf.mxu1  ;;  %v5069_v8 = vpop.f32.mrf.mxu0 }
 0x192   : > { %v10346_v18 = vadd.f32 %v5251_v21, %v5068_v48  ;;  %v5070_v60 = vadd.f32 %v10250_v17, %v5069_v8  ;;  %1135 = vst [vmem:[#allocation3 + $0x26c] sm:$0xf] %v1065_v45  ;;  %v1483_v21 = vpack.c.bf16 %v1413_v36, %v1413_v36  ;;  %v1693_v8 = vpack.c.bf16 %v1623_v34, %v1623_v34 }
 0x193   : > { %5573 = vmatmul.bf16.gmra.mxu3 %v7485_v10  ;;  %v7488_v10 = vld [vmem:[#allocation3 + $0x178] sm:$0xf]  ;;  %1762 = vst [vmem:[#allocation3 + $0x20c] sm:$0xf] %v1065_v45 }
 0x194   : > { %5936 = vmatmul.bf16.gmra.mxu1 %v7457_v57  ;;  %v8934_v57 = vld [vmem:[#allocation3 + $0x198] sm:$0xf0]  ;;  %1553 = vst [vmem:[#allocation3 + $0x22c] sm:$0xf] %v1483_v21 }
 0x195   : > { %v7489_v1 = vor.u32 %v8934_v57, %v7488_v10  ;;  %1763 = vst [vmem:[#allocation3 + $0x230] sm:$0xf] %v1693_v8  ;;  %v1206_v57 = vld [vmem:[#allocation2 + $0xa8] sm:$0xff] }
 0x196   : > { %v5341_v49 = vpop.f32.mrf.mxu3  ;;  %1136 = vst [vmem:[#allocation3 + $0x290] sm:$0xf] %v1693_v8  ;;  %v1276_v16 = vpack.c.bf16 %v1206_v57, %v1206_v57  ;;  %v1415_v8 = vld [vmem:[#allocation2 + $0xa1] sm:$0xff]  ;;  %v8947_v57 = vld [vmem:[#allocation3 + $0x204] sm:$0xf] }
 0x197   : > { %v10350_v55 = vadd.f32 %v5341_v49, %v5158_v47  ;;  %v5159_v47 = vpop.f32.mrf.mxu2 }
 0x198   : > { %v5160_v49 = vadd.f32 %v10250_v17, %v5159_v47  ;;  %v1414_v47 = vld [vmem:[#allocation2 + $0x99] sm:$0xff]  ;;  %1346 = vst [vmem:[#allocation3 + $0x294] sm:$0xf] %v1276_v16 }
 0x199   : > { %10950 = vst [vmem:[#allocation32_spill] sm:$0xff] %v10350_v55  ;;  %v5253_v48 = vpop.f32.mrf.mxu1  ;;  %v7518_v55 = vld [vmem:[#allocation3 + $0x1dc] sm:$0xf0]  ;;  %v5072_v6 = vpop.f32.mrf.mxu0 }
 0x19a   : > { %v10352_v58 = vadd.f32 %v5253_v48, %v5070_v60  ;;  %v5073_v36 = vadd.f32 %v10250_v17, %v5072_v6  ;;  %v7521_v23 = vor.u32 %v8938_v37, %v7518_v55  ;;  %v1484_v6 = vpack.c.bf16 %v1414_v47, %v1414_v47  ;;  %v8939_v47 = vld [vmem:[#allocation3 + $0x1c4] sm:$0xf]  ;;  %v8948_v5 = vld [vmem:[#allocation3 + $0x20c] sm:$0xf] }
 0x19c   : > { %5394 = vmatmul.bf16.gmra.mxu2 %v7517_v0  ;;  %5757 = vmatmul.bf16.gmra.mxu0 %v7489_v1  ;;  %v1207_v1 = vld [vmem:[#allocation2 + $0xb0] sm:$0xff]  ;;  %v8951_v0 = vld [vmem:[#allocation3 + $0x220] sm:$0xf0]  ;;  %1554 = vst [vmem:[#allocation3 + $0x250] sm:$0xf] %v1484_v6 }
 0x19d   : > { %v1277_v37 = vpack.c.bf16 %v1207_v1, %v1207_v1  ;;  %v7562_v51 = vld [vmem:[#allocation3 + $0x22c] sm:$0xf0] }
 0x19e   : > { %v5343_v54 = vpop.f32.mrf.mxu3 }
 0x19f   : > { %v10356_v60 = vadd.f32 %v5343_v54, %v5160_v49  ;;  %v5162_v46 = vpop.f32.mrf.mxu2  ;;  %v997_v54 = vld [vmem:[#allocation2 + $0x9a] sm:$0xff]  ;;  %v7552_v49 = vld [vmem:[#allocation3 + $0x200] sm:$0xf]  ;;  %1347 = vst [vmem:[#allocation3 + $0x2b8] sm:$0xf] %v1277_v37  ;;  %v7529_v37 = vor.u32 %v8939_v47, %v7526_v9  ;;  %v1417_v47 = vld [vmem:[#allocation2 + $0xb1] sm:$0xff] }
 0x1a0   : > { %v5163_v34 = vadd.f32 %v10250_v17, %v5162_v46  ;;  %v1067_v21 = vpack.c.bf16 %v997_v54, %v997_v54  ;;  %v7553_v54 = vor.u32 %v8951_v0, %v7552_v49  ;;  %v1208_v9 = vld [vmem:[#allocation2 + $0xb8] sm:$0xff] }
 0x1a1   : > { %10951 = vst [vmem:[#allocation33_spill] sm:$0xff] %v10356_v60  ;;  %v5256_v40 = vpop.f32.mrf.mxu1  ;;  %v5074_v48 = vpop.f32.mrf.mxu0 }
 0x1a2   : > { %v10358_v41 = vadd.f32 %v5256_v40, %v5073_v36  ;;  %v5075_v45 = vadd.f32 %v10250_v17, %v5074_v48  ;;  %1137 = vst [vmem:[#allocation3 + $0x2b4] sm:$0xf] %v1067_v21  ;;  %v1485_v40 = vpack.c.bf16 %v1415_v8, %v1415_v8  ;;  %v1695_v48 = vpack.c.bf16 %v1625_v30, %v1625_v30 }
 0x1a3   : > { %5578 = vmatmul.bf16.gmra.mxu3 %v7521_v23  ;;  %v7524_v23 = vld [vmem:[#allocation3 + $0x1c0] sm:$0xf]  ;;  %1764 = vst [vmem:[#allocation3 + $0x254] sm:$0xf] %v1067_v21 }
 0x1a4   : > { %5941 = vmatmul.bf16.gmra.mxu1 %v7493_v31  ;;  %v8943_v31 = vld [vmem:[#allocation3 + $0x1e0] sm:$0xf0]  ;;  %1555 = vst [vmem:[#allocation3 + $0x274] sm:$0xf] %v1485_v40 }
 0x1a5   : > { %v7525_v60 = vor.u32 %v8943_v31, %v7524_v23  ;;  %1765 = vst [vmem:[#allocation3 + $0x278] sm:$0xf] %v1695_v48  ;;  %v9251_v21 = vld [vmem:[%s10920_s2 + $0x1a8] sm:$0xff]  ;;  %v7588_v31 = vld [vmem:[#allocation3 + $0x248] sm:$0xf] }
 0x1a6   : > { %v5346_v10 = vpop.f32.mrf.mxu3  ;;  %1138 = vst [vmem:[#allocation3 + $0x2d8] sm:$0xf] %v1695_v48  ;;  %6094 = vmatpush.bf16.msra.mxu2 %v9251_v21  ;;  %v9259_v40 = vld [vmem:[%s10920_s2 + $0x1e8] sm:$0xff]  ;;  %v1209_v48 = vld [vmem:[#allocation2 + $0xc0] sm:$0xff] }
 0x1a7   : > { %v10362_v55 = vadd.f32 %v5346_v10, %v5163_v34  ;;  %v5164_v34 = vpop.f32.mrf.mxu2  ;;  %6278 = vmatpush.bf16.msra.mxu3 %v9259_v40 }
 0x1a8   : > { %v5165_v10 = vadd.f32 %v10250_v17, %v5164_v34 }
 0x1a9   : > { %10952 = vst [vmem:[#allocation34_spill] sm:$0xff] %v10362_v55  ;;  %v5258_v36 = vpop.f32.mrf.mxu1  ;;  %v7554_v55 = vld [vmem:[#allocation3 + $0x224] sm:$0xf0]  ;;  %v5077_v1 = vpop.f32.mrf.mxu0 }
 0x1aa   : > { %v10364_v46 = vadd.f32 %v5258_v36, %v5075_v45  ;;  %v5078_v8 = vadd.f32 %v10250_v17, %v5077_v1  ;;  %v7557_v16 = vor.u32 %v8947_v57, %v7554_v55  ;;  %v8960_v57 = vld [vmem:[#allocation3 + $0x268] sm:$0xf0]  ;;  %v1279_v1 = vpack.c.bf16 %v1209_v48, %v1209_v48  ;;  %v7590_v48 = vld [vmem:[#allocation3 + $0x26c] sm:$0xf0] }
 0x1ac   : > { %5399 = vmatmul.bf16.gmra.mxu2 %v7553_v54  ;;  %5762 = vmatmul.bf16.gmra.mxu0 %v7525_v60  ;;  %v999_v60 = vld [vmem:[#allocation2 + $0xaa] sm:$0xff]  ;;  %1349 = vst [vmem:[#allocation3 + $0x300] sm:$0xf] %v1279_v1 }
 0x1ad   : > { %v1069_v34 = vpack.c.bf16 %v999_v60, %v999_v60  ;;  %v1416_v54 = vld [vmem:[#allocation2 + $0xa9] sm:$0xff] }
 0x1ae   : > { %v5348_v52 = vpop.f32.mrf.mxu3  ;;  %v9267_v1 = vld [vmem:[%s10920_s2 + $0x228] sm:$0xff] }
 0x1af   : > { %v10368_v45 = vadd.f32 %v5348_v52, %v5165_v10  ;;  %v5167_v6 = vpop.f32.mrf.mxu2  ;;  %v1278_v10 = vpack.c.bf16 %v1208_v9, %v1208_v9  ;;  %1139 = vst [vmem:[#allocation3 + $0x2fc] sm:$0xf] %v1069_v34  ;;  %v7589_v9 = vor.u32 %v8960_v57, %v7588_v31  ;;  %v9271_v31 = vld [vmem:[%s10922_s4 + $0x8] sm:$0xff]  ;;  %v7565_v57 = vor.u32 %v8948_v5, %v7562_v51  ;;  %v1211_v51 = vld [vmem:[#allocation2 + $0xd0] sm:$0xff] }
 0x1b0   : > { %v5168_v30 = vadd.f32 %v10250_v17, %v5167_v6  ;;  %v8952_v6 = vld [vmem:[#allocation3 + $0x228] sm:$0xf0]  ;;  %1766 = vst [vmem:[#allocation3 + $0x29c] sm:$0xf] %v1069_v34  ;;  %6462 = vmatpush.bf16.msra.mxu0 %v9267_v1  ;;  %6881 = vmatpush.bf16.msra.mxu1 %v9271_v31  ;;  %v7596_v31 = vld [vmem:[#allocation3 + $0x250] sm:$0xf] }
 0x1b1   : > { %10953 = vst [vmem:[#allocation35_spill] sm:$0xff] %v10368_v45  ;;  %v5261_v49 = vpop.f32.mrf.mxu1  ;;  %v5079_v52 = vpop.f32.mrf.mxu0 }
 0x1b2   : > { %v10370_v0 = vadd.f32 %v5261_v49, %v5078_v8  ;;  %v5080_v55 = vadd.f32 %v10250_v17, %v5079_v52  ;;  %v1486_v8 = vpack.c.bf16 %v1416_v54, %v1416_v54  ;;  %v7560_v49 = vld [vmem:[#allocation3 + $0x208] sm:$0xf]  ;;  %1348 = vst [vmem:[#allocation3 + $0x2dc] sm:$0xf] %v1278_v10 }
 0x1b3   : > { %5583 = vmatmul.bf16.gmra.mxu3 %v7557_v16  ;;  %v1627_v16 = vld [vmem:[#allocation2 + $0xb2] sm:$0xff]  ;;  %v7561_v45 = vor.u32 %v8952_v6, %v7560_v49  ;;  %v9707_v49 = vld [vmem:[#allocation4] ss:$0 sm:$0xff] }
 0x1b4   : > { %5946 = vmatmul.bf16.gmra.mxu1 %v7529_v37  ;;  %1556 = vst [vmem:[#allocation3 + $0x298] sm:$0xf] %v1486_v8 }
 0x1b6   : > { %v5351_v36 = vpop.f32.mrf.mxu3 }
 0x1b7   : > { %v10377_v23 = vadd.f32 %v5351_v36, %v5168_v30  ;;  %v1487_v30 = vpack.c.bf16 %v1417_v47, %v1417_v47  ;;  %v5169_v52 = vpop.f32.mrf.mxu2  ;;  %v1697_v36 = vpack.c.bf16 %v1627_v16, %v1627_v16 }
 0x1b8   : > { %v5170_v60 = vadd.f32 %v10250_v17, %v5169_v52  ;;  %v1210_v52 = vld [vmem:[#allocation2 + $0xc8] sm:$0xff] }
 0x1b9   : > { %10954 = vst [vmem:[#allocation36_spill] sm:$0xff] %v10377_v23  ;;  %v5263_v37 = vpop.f32.mrf.mxu1  ;;  %v8956_v23 = vld [vmem:[#allocation3 + $0x24c] sm:$0xf]  ;;  %v5082_v54 = vpop.f32.mrf.mxu0  ;;  %v1280_v5 = vpack.c.bf16 %v1210_v52, %v1210_v52 }
 0x1ba   : > { %v10382_v21 = vadd.f32 %v5263_v37, %v5080_v55  ;;  %1557 = vst [vmem:[#allocation3 + $0x2bc] sm:$0xf] %v1487_v30  ;;  %v5083_v47 = vadd.f32 %v10250_v17, %v5082_v54  ;;  %v7593_v10 = vor.u32 %v8956_v23, %v7590_v48  ;;  %v1001_v30 = vld [vmem:[#allocation2 + $0xba] sm:$0xff] }
 0x1bb   : > { %1767 = vst [vmem:[#allocation3 + $0x2c0] sm:$0xf] %v1697_v36  ;;  %v7624_v48 = vld [vmem:[#allocation3 + $0x290] sm:$0xf]  ;;  %v8969_v54 = vld [vmem:[#allocation3 + $0x2b0] sm:$0xf0] }
 0x1bc   : > { %5404 = vmatmul.bf16.gmra.mxu2 %v7589_v9  ;;  %5767 = vmatmul.bf16.gmra.mxu0 %v7561_v45  ;;  %1140 = vst [vmem:[#allocation3 + $0x320] sm:$0xf] %v1697_v36  ;;  %v1071_v45 = vpack.c.bf16 %v1001_v30, %v1001_v30  ;;  %v1418_v36 = vld [vmem:[#allocation2 + $0xb9] sm:$0xff]  ;;  %v1419_v9 = vld [vmem:[#allocation2 + $0xc1] sm:$0xff] }
 0x1bd   : > { %1350 = vst [vmem:[#allocation3 + $0x324] sm:$0xf] %v1280_v5  ;;  %v7626_v30 = vld [vmem:[#allocation3 + $0x2b4] sm:$0xf0] }
 0x1be   : > { %v5353_v40 = vpop.f32.mrf.mxu3  ;;  %1141 = vst [vmem:[#allocation3 + $0x344] sm:$0xf] %v1071_v45 }
 0x1bf   : > { %v10386_v55 = vadd.f32 %v5353_v40, %v5170_v60  ;;  %v5365_v23 = vpop.f32.mrf.mxu2  ;;  %v1281_v40 = vpack.c.bf16 %v1211_v51, %v1211_v51  ;;  %1768 = vst [vmem:[#allocation3 + $0x2e4] sm:$0xf] %v1071_v45  ;;  %v1212_v45 = vld [vmem:[#allocation2 + $0xd8] sm:$0xff] }
 0x1c0   : > { %v5366_v34 = vadd.f32 %v5365_v23, %v9991_v32  ;;  %v8961_v32 = vld [vmem:[#allocation3 + $0x270] sm:$0xf0] }
 0x1c1   : > { %10955 = vst [vmem:[#allocation37_spill] sm:$0xff] %v10386_v55  ;;  %v5266_v8 = vpop.f32.mrf.mxu1  ;;  %v5084_v16 = vpop.f32.mrf.mxu0  ;;  %v7597_v52 = vor.u32 %v8961_v32, %v7596_v31  ;;  %v7598_v55 = vld [vmem:[#allocation3 + $0x274] sm:$0xf0] }
 0x1c2   : > { %v10394_v17 = vadd.f32 %v5266_v8, %v5083_v47  ;;  %v5085_v6 = vadd.f32 %v9707_v49, %v5084_v16  ;;  %v1488_v47 = vpack.c.bf16 %v1418_v36, %v1418_v36  ;;  %1351 = vst [vmem:[#allocation3 + $0x348] sm:$0xf] %v1281_v40  ;;  %v8965_v49 = vld [vmem:[#allocation3 + $0x294] sm:$0xf]  ;;  %v1213_v32 = vld [vmem:[#allocation2 + $0xe0] sm:$0xff] }
 0x1c3   : > { %5588 = vmatmul.bf16.gmra.mxu3 %v7593_v10  ;;  %v1629_v10 = vld [vmem:[#allocation2 + $0xc2] sm:$0xff]  ;;  %v8957_v36 = vld [vmem:[#allocation3 + $0x254] sm:$0xf] }
 0x1c4   : > { %5951 = vmatmul.bf16.gmra.mxu1 %v7565_v57  ;;  %v1489_v57 = vpack.c.bf16 %v1419_v9, %v1419_v9  ;;  %1558 = vst [vmem:[#allocation3 + $0x2e0] sm:$0xf] %v1488_v47  ;;  %v7629_v9 = vor.u32 %v8965_v49, %v7626_v30  ;;  %v7601_v5 = vor.u32 %v8957_v36, %v7598_v55  ;;  %v1421_v55 = vld [vmem:[#allocation2 + $0xd1] sm:$0xff] }
 0x1c5   : > { %v1631_v49 = vld [vmem:[#allocation2 + $0xd2] sm:$0xff] }
 0x1c6   : > { %v5549_v37 = vpop.f32.mrf.mxu3  ;;  %1559 = vst [vmem:[#allocation3 + $0x304] sm:$0xf] %v1489_v57  ;;  %v1282_v57 = vpack.c.bf16 %v1212_v45, %v1212_v45  ;;  %v7634_v45 = vld [vmem:[#allocation3 + $0x2bc] sm:$0xf0] }
 0x1c7   : > { %v5550_v60 = vadd.f32 %v5549_v37, %v5366_v34  ;;  %v5367_v23 = vpop.f32.mrf.mxu2  ;;  %v1699_v34 = vpack.c.bf16 %v1629_v10, %v1629_v10  ;;  %v7625_v37 = vor.u32 %v8969_v54, %v7624_v48 }
 0x1c8   : > { %v5368_v16 = vadd.f32 %v5367_v23, %v10003_v50  ;;  %v1420_v23 = vld [vmem:[#allocation2 + $0xc9] sm:$0xff]  ;;  %1352 = vst [vmem:[#allocation3 + $0x36c] sm:$0xf] %v1282_v57 }
 0x1c9   : > { %v5268_v1 = vpop.f32.mrf.mxu1  ;;  %v5733_v51 = vpop.f32.mrf.mxu0  ;;  %1769 = vst [vmem:[#allocation3 + $0x308] sm:$0xf] %v1699_v34 }
 0x1ca   : > { %v10397_v8 = vadd.f32 %v5268_v1, %v5085_v6  ;;  %v5734_v61 = vadd.f32 %v5733_v51, %v5550_v60  ;;  %1142 = vst [vmem:[#allocation3 + $0x368] sm:$0xf] %v1699_v34  ;;  %v1003_v60 = vld [vmem:[#allocation2 + $0xca] sm:$0xff]  ;;  %v7660_v34 = vld [vmem:[#allocation3 + $0x2d8] sm:$0xf] }
 0x1cb   : > { %v1073_v31 = vpack.c.bf16 %v1003_v60, %v1003_v60  ;;  %v8970_v51 = vld [vmem:[#allocation3 + $0x2b8] sm:$0xf0] }
 0x1cc   : > { %5409 = vmatmul.bf16.gmra.mxu2 %v7625_v37  ;;  %5772 = vmatmul.bf16.gmra.mxu0 %v7597_v52  ;;  %v1490_v37 = vpack.c.bf16 %v1420_v23, %v1420_v23  ;;  %v7632_v52 = vld [vmem:[#allocation3 + $0x298] sm:$0xf]  ;;  %v8966_v60 = vld [vmem:[#allocation3 + $0x29c] sm:$0xf] }
 0x1cd   : > { %1143 = vst [vmem:[#allocation3 + $0x38c] sm:$0xf] %v1073_v31  ;;  %v7637_v57 = vor.u32 %v8966_v60, %v7634_v45  ;;  %v7668_v45 = vld [vmem:[#allocation3 + $0x2e0] sm:$0xf] }
 0x1ce   : > { %v5551_v14 = vpop.f32.mrf.mxu3  ;;  %1560 = vst [vmem:[#allocation3 + $0x328] sm:$0xf] %v1490_v37 }
 0x1cf   : > { %v5552_v6 = vadd.f32 %v5551_v14, %v5368_v16  ;;  %v5370_v54 = vpop.f32.mrf.mxu2  ;;  %v8978_v16 = vld [vmem:[#allocation3 + $0x2f8] sm:$0xf0]  ;;  %1770 = vst [vmem:[#allocation3 + $0x32c] sm:$0xf] %v1073_v31  ;;  %v1214_v31 = vld [vmem:[#allocation2 + $0xe8] sm:$0xff] }
 0x1d0   : > { %v5371_v40 = vadd.f32 %v5370_v54, %v10025_v15  ;;  %v1491_v15 = vpack.c.bf16 %v1421_v55, %v1421_v55  ;;  %v8974_v54 = vld [vmem:[#allocation3 + $0x2dc] sm:$0xf] }
 0x1d1   : > { %v5917_v50 = vpop.f32.mrf.mxu1  ;;  %v5735_v47 = vpop.f32.mrf.mxu0 }
 0x1d2   : > { %v10400_v48 = vadd.f32 %v5917_v50, %v5734_v61  ;;  %v5736_v1 = vadd.f32 %v5735_v47, %v5552_v6  ;;  %v1283_v61 = vpack.c.bf16 %v1213_v32, %v1213_v32  ;;  %v7661_v50 = vor.u32 %v8978_v16, %v7660_v34  ;;  %1561 = vst [vmem:[#allocation3 + $0x34c] sm:$0xf] %v1491_v15  ;;  %v1215_v15 = vld [vmem:[#allocation2 + $0xf0] sm:$0xff] }
 0x1d3   : > { %5593 = vmatmul.bf16.gmra.mxu3 %v7629_v9  ;;  %v1701_v9 = vpack.c.bf16 %v1631_v49, %v1631_v49  ;;  %v7633_v47 = vor.u32 %v8970_v51, %v7632_v52 }
 0x1d4   : > { %5956 = vmatmul.bf16.gmra.mxu1 %v7601_v5  ;;  %1353 = vst [vmem:[#allocation3 + $0x390] sm:$0xf] %v1283_v61 }
 0x1d5   : > { %1771 = vst [vmem:[#allocation3 + $0x350] sm:$0xf] %v1701_v9 }
 0x1d6   : > { %v5554_v10 = vpop.f32.mrf.mxu3  ;;  %1144 = vst [vmem:[#allocation3 + $0x3b0] sm:$0xf] %v1701_v9  ;;  %v7696_v9 = vld [vmem:[#allocation3 + $0x320] sm:$0xf] }
 0x1d7   : > { %v5555_v14 = vadd.f32 %v5554_v10, %v5371_v40  ;;  %v5372_v6 = vpop.f32.mrf.mxu2  ;;  %v7662_v40 = vld [vmem:[#allocation3 + $0x2fc] sm:$0xf0] }
 0x1d8   : > { %v5373_v5 = vadd.f32 %v5372_v6, %v10051_v42  ;;  %v7665_v55 = vor.u32 %v8974_v54, %v7662_v40  ;;  %v1284_v6 = vpack.c.bf16 %v1214_v31, %v1214_v31  ;;  %v8987_v54 = vld [vmem:[#allocation3 + $0x340] sm:$0xf0]  ;;  %v1285_v40 = vpack.c.bf16 %v1215_v15, %v1215_v15  ;;  %v7670_v31 = vld [vmem:[#allocation3 + $0x304] sm:$0xf0] }
 0x1d9   : > { %v5919_v30 = vpop.f32.mrf.mxu1  ;;  %v5738_v10 = vpop.f32.mrf.mxu0 }
 0x1da   : > { %v10403_v36 = vadd.f32 %v5919_v30, %v5736_v1  ;;  %v5739_v23 = vadd.f32 %v5738_v10, %v5555_v14  ;;  %v1005_v14 = vld [vmem:[#allocation2 + $0xda] sm:$0xff]  ;;  %v1633_v10 = vld [vmem:[#allocation2 + $0xe2] sm:$0xff]  ;;  %1354 = vst [vmem:[#allocation3 + $0x3b4] sm:$0xf] %v1284_v6 }
 0x1db   : > { %v1075_v51 = vpack.c.bf16 %v1005_v14, %v1005_v14  ;;  %1355 = vst [vmem:[#allocation3 + $0x3d8] sm:$0xf] %v1285_v40  ;;  %v8975_v14 = vld [vmem:[#allocation3 + $0x2e4] sm:$0xf] }
 0x1dc   : > { %5414 = vmatmul.bf16.gmra.mxu2 %v7661_v50  ;;  %5777 = vmatmul.bf16.gmra.mxu0 %v7633_v47  ;;  %v1423_v50 = vld [vmem:[#allocation2 + $0xe1] sm:$0xff]  ;;  %v7673_v6 = vor.u32 %v8975_v14, %v7670_v31  ;;  %v7704_v31 = vld [vmem:[#allocation3 + $0x328] sm:$0xf] }
 0x1dd   : > { %1145 = vst [vmem:[#allocation3 + $0x3d4] sm:$0xf] %v1075_v51 }
 0x1de   : > { %v5556_v32 = vpop.f32.mrf.mxu3  ;;  %1772 = vst [vmem:[#allocation3 + $0x374] sm:$0xf] %v1075_v51  ;;  %v1216_v51 = vld [vmem:[#allocation2 + $0xf8] sm:$0xff] }
 0x1df   : > { %v5557_v1 = vadd.f32 %v5556_v32, %v5373_v5  ;;  %v5375_v16 = vpop.f32.mrf.mxu2  ;;  %v1422_v5 = vld [vmem:[#allocation2 + $0xd9] sm:$0xff]  ;;  %v8979_v32 = vld [vmem:[#allocation3 + $0x300] sm:$0xf0] }
 0x1e0   : > { %v5376_v61 = vadd.f32 %v5375_v16, %v10071_v62  ;;  %v1492_v47 = vpack.c.bf16 %v1422_v5, %v1422_v5  ;;  %v1493_v62 = vpack.c.bf16 %v1423_v50, %v1423_v50  ;;  %v8983_v16 = vld [vmem:[#allocation3 + $0x324] sm:$0xf] }
 0x1e1   : > { %v5922_v42 = vpop.f32.mrf.mxu1  ;;  %v5740_v37 = vpop.f32.mrf.mxu0 }
 0x1e2   : > { %v10406_v34 = vadd.f32 %v5922_v42, %v5739_v23  ;;  %v5741_v30 = vadd.f32 %v5740_v37, %v5557_v1  ;;  %v7697_v42 = vor.u32 %v8987_v54, %v7696_v9  ;;  %v7669_v37 = vor.u32 %v8979_v32, %v7668_v45  ;;  %1562 = vst [vmem:[#allocation3 + $0x370] sm:$0xf] %v1492_v47 }
 0x1e3   : > { %5598 = vmatmul.bf16.gmra.mxu3 %v7665_v55  ;;  %v1703_v55 = vpack.c.bf16 %v1633_v10, %v1633_v10  ;;  %1563 = vst [vmem:[#allocation3 + $0x394] sm:$0xf] %v1493_v62  ;;  %v1217_v62 = vld [vmem:[#allocation2 + $0x100] sm:$0xff] }
 0x1e4   : > { %5961 = vmatmul.bf16.gmra.mxu1 %v7637_v57 }
 0x1e5   : > { %1773 = vst [vmem:[#allocation3 + $0x398] sm:$0xf] %v1703_v55 }
 0x1e6   : > { %v5559_v49 = vpop.f32.mrf.mxu3  ;;  %1146 = vst [vmem:[#allocation3 + $0x3f8] sm:$0xf] %v1703_v55  ;;  %v7732_v55 = vld [vmem:[#allocation3 + $0x368] sm:$0xf] }
 0x1e7   : > { %v5560_v52 = vadd.f32 %v5559_v49, %v5376_v61  ;;  %v5377_v1 = vpop.f32.mrf.mxu2  ;;  %v7698_v61 = vld [vmem:[#allocation3 + $0x344] sm:$0xf0] }
 0x1e8   : > { %v5378_v57 = vadd.f32 %v5377_v1, %v10083_v29  ;;  %v7701_v50 = vor.u32 %v8983_v16, %v7698_v61  ;;  %v1286_v1 = vpack.c.bf16 %v1216_v51, %v1216_v51  ;;  %v8996_v16 = vld [vmem:[#allocation3 + $0x388] sm:$0xf0]  ;;  %v1287_v61 = vpack.c.bf16 %v1217_v62, %v1217_v62  ;;  %v7706_v62 = vld [vmem:[#allocation3 + $0x34c] sm:$0xf0] }
 0x1e9   : > { %v5924_v60 = vpop.f32.mrf.mxu1  ;;  %v5743_v49 = vpop.f32.mrf.mxu0  ;;  %v8984_v51 = vld [vmem:[#allocation3 + $0x32c] sm:$0xf] }
 0x1ea   : > { %v10409_v23 = vadd.f32 %v5924_v60, %v5741_v30  ;;  %v5744_v5 = vadd.f32 %v5743_v49, %v5560_v52  ;;  %v1007_v52 = vld [vmem:[#allocation2 + $0xea] sm:$0xff]  ;;  %v1635_v49 = vld [vmem:[#allocation2 + $0xf2] sm:$0xff]  ;;  %1356 = vst [vmem:[#allocation3 + $0x3fc] sm:$0xf] %v1286_v1 }
 0x1eb   : > { %v1077_v32 = vpack.c.bf16 %v1007_v52, %v1007_v52  ;;  %1357 = vst [vmem:[#allocation3 + $0x420] sm:$0xf] %v1287_v61 }
 0x1ec   : > { %5419 = vmatmul.bf16.gmra.mxu2 %v7697_v42  ;;  %5782 = vmatmul.bf16.gmra.mxu0 %v7669_v37  ;;  %v1425_v42 = vld [vmem:[#allocation2 + $0xf1] sm:$0xff] }
 0x1ed   : > { %1147 = vst [vmem:[#allocation3 + $0x41c] sm:$0xf] %v1077_v32 }
 0x1ee   : > { %v5561_v15 = vpop.f32.mrf.mxu3  ;;  %1774 = vst [vmem:[#allocation3 + $0x3bc] sm:$0xf] %v1077_v32 }
 0x1ef   : > { %v5562_v30 = vadd.f32 %v5561_v15, %v5378_v57  ;;  %v5380_v54 = vpop.f32.mrf.mxu2  ;;  %v1424_v57 = vld [vmem:[#allocation2 + $0xe9] sm:$0xff]  ;;  %v8988_v15 = vld [vmem:[#allocation3 + $0x348] sm:$0xf0] }
 0x1f0   : > { %v5381_v40 = vadd.f32 %v5380_v54, %v10103_v53  ;;  %v1494_v37 = vpack.c.bf16 %v1424_v57, %v1424_v57  ;;  %v1495_v53 = vpack.c.bf16 %v1425_v42, %v1425_v42  ;;  %v7705_v52 = vor.u32 %v8988_v15, %v7704_v31  ;;  %v1009_v15 = vld [vmem:[#allocation2 + $0xfa] sm:$0xff] }
 0x1f1   : > { %v5927_v29 = vpop.f32.mrf.mxu1  ;;  %v5745_v47 = vpop.f32.mrf.mxu0 }
 0x1f2   : > { %v10412_v9 = vadd.f32 %v5927_v29, %v5744_v5  ;;  %v5746_v60 = vadd.f32 %v5745_v47, %v5562_v30  ;;  %v9250_v30 = vld [vmem:[%s10920_s2 + $0x1a0] sm:$0xff]  ;;  %v1705_v29 = vpack.c.bf16 %v1635_v49, %v1635_v49  ;;  %v8992_v47 = vld [vmem:[#allocation3 + $0x36c] sm:$0xf]  ;;  %1564 = vst [vmem:[#allocation3 + $0x3b8] sm:$0xf] %v1494_v37 }
 0x1f3   : > { %5603 = vmatmul.bf16.gmra.mxu3 %v7701_v50  ;;  %v9258_v50 = vld [vmem:[%s10920_s2 + $0x1e0] sm:$0xff]  ;;  %6095 = vmatpush.bf16.msra.mxu2 %v9250_v30  ;;  %1565 = vst [vmem:[#allocation3 + $0x3dc] sm:$0xf] %v1495_v53  ;;  %v1218_v53 = vld [vmem:[#allocation2 + $0x108] sm:$0xff] }
 0x1f4   : > { %5966 = vmatmul.bf16.gmra.mxu1 %v7673_v6  ;;  %6279 = vmatpush.bf16.msra.mxu3 %v9258_v50  ;;  %1775 = vst [vmem:[#allocation3 + $0x3e0] sm:$0xf] %v1705_v29  ;;  %v1079_v50 = vpack.c.bf16 %v1009_v15, %v1009_v15  ;;  %v8993_v15 = vld [vmem:[#allocation3 + $0x374] sm:$0xf] }
 0x1f5   : > { %1148 = vst [vmem:[#allocation3 + $0x440] sm:$0xf] %v1705_v29  ;;  %v1288_v29 = vpack.c.bf16 %v1218_v53, %v1218_v53  ;;  %v7742_v53 = vld [vmem:[#allocation3 + $0x394] sm:$0xf0] }
 0x1f6   : > { %v5564_v10 = vpop.f32.mrf.mxu3  ;;  %1149 = vst [vmem:[#allocation3 + $0x464] sm:$0xf] %v1079_v50 }
 0x1f7   : > { %v5565_v45 = vadd.f32 %v5564_v10, %v5381_v40  ;;  %v5382_v6 = vpop.f32.mrf.mxu2  ;;  %v7733_v40 = vor.u32 %v8996_v16, %v7732_v55  ;;  %v7734_v10 = vld [vmem:[#allocation3 + $0x38c] sm:$0xf0]  ;;  %1358 = vst [vmem:[#allocation3 + $0x444] sm:$0xf] %v1288_v29  ;;  %v7745_v29 = vor.u32 %v8993_v15, %v7742_v53 }
 0x1f8   : > { %v5383_v54 = vadd.f32 %v5382_v6, %v10125_v26  ;;  %v7709_v26 = vor.u32 %v8984_v51, %v7706_v62  ;;  %v1219_v6 = vld [vmem:[#allocation2 + $0x110] sm:$0xff]  ;;  %v7740_v62 = vld [vmem:[#allocation3 + $0x370] sm:$0xf]  ;;  %1776 = vst [vmem:[#allocation3 + $0x404] sm:$0xf] %v1079_v50 }
 0x1f9   : > { %v5929_v14 = vpop.f32.mrf.mxu1  ;;  %v1220_v50 = vld [vmem:[#allocation2 + $0x118] sm:$0xff]  ;;  %v7776_v53 = vld [vmem:[#allocation3 + $0x3b8] sm:$0xf] }
 0x1fa   : > { %v10415_v5 = vadd.f32 %v5929_v14, %v5746_v60  ;;  %v5748_v60 = vpop.f32.mrf.mxu0  ;;  %v7737_v14 = vor.u32 %v8992_v47, %v7734_v10  ;;  %v7768_v47 = vld [vmem:[#allocation3 + $0x3b0] sm:$0xf]  ;;  %v9005_v10 = vld [vmem:[#allocation3 + $0x3d0] sm:$0xf0] }
 0x1fb   : > { %v5749_v42 = vadd.f32 %v5748_v60, %v5565_v45  ;;  %v9266_v45 = vld [vmem:[%s10920_s2 + $0x220] sm:$0xff] }
 0x1fc   : > { %5424 = vmatmul.bf16.gmra.mxu2 %v7733_v40  ;;  %5787 = vmatmul.bf16.gmra.mxu0 %v7705_v52  ;;  %v1427_v40 = vld [vmem:[#allocation2 + $0x101] sm:$0xff]  ;;  %v1289_v52 = vpack.c.bf16 %v1219_v6, %v1219_v6 }
 0x1fd   : > { %6463 = vmatpush.bf16.msra.mxu0 %v9266_v45  ;;  %v1637_v60 = vld [vmem:[#allocation2 + $0x102] sm:$0xff] }
 0x1fe   : > { %v5566_v57 = vpop.f32.mrf.mxu3  ;;  %1359 = vst [vmem:[#allocation3 + $0x468] sm:$0xf] %v1289_v52  ;;  %v7770_v45 = vld [vmem:[#allocation3 + $0x3d4] sm:$0xf0] }
 0x1ff   : > { %v5567_v1 = vadd.f32 %v5566_v57, %v5383_v54  ;;  %v5385_v61 = vpop.f32.mrf.mxu2  ;;  %v1426_v54 = vld [vmem:[#allocation2 + $0xf9] sm:$0xff] }
 0x200   : > { %v5386_v37 = vadd.f32 %v5385_v61, %v10151_v63  ;;  %v1496_v63 = vpack.c.bf16 %v1426_v54, %v1426_v54  ;;  %v8997_v57 = vld [vmem:[#allocation3 + $0x390] sm:$0xf0]  ;;  %v7769_v61 = vor.u32 %v9005_v10, %v7768_v47 }
 0x201   : > { %v5932_v55 = vpop.f32.mrf.mxu1 }
 0x202   : > { %v10424_v16 = vadd.f32 %v5932_v55, %v5749_v42  ;;  %v5750_v32 = vpop.f32.mrf.mxu0  ;;  %v1497_v42 = vpack.c.bf16 %v1427_v40, %v1427_v40  ;;  %1566 = vst [vmem:[#allocation3 + $0x400] sm:$0xf] %v1496_v63 }
 0x203   : > { %5608 = vmatmul.bf16.gmra.mxu3 %v7737_v14  ;;  %v5751_v31 = vadd.f32 %v5750_v32, %v5567_v1  ;;  %v7741_v32 = vor.u32 %v8997_v57, %v7740_v62 }
 0x204   : > { %5971 = vmatmul.bf16.gmra.mxu1 %v7709_v26  ;;  %v1707_v26 = vpack.c.bf16 %v1637_v60, %v1637_v60  ;;  %1567 = vst [vmem:[#allocation3 + $0x424] sm:$0xf] %v1497_v42  ;;  %v1221_v42 = vld [vmem:[#allocation2 + $0x120] sm:$0xff] }
 0x206   : > { %v5569_v49 = vpop.f32.mrf.mxu3  ;;  %1777 = vst [vmem:[#allocation3 + $0x428] sm:$0xf] %v1707_v26 }
 0x207   : > { %v5570_v30 = vadd.f32 %v5569_v49, %v5386_v37  ;;  %v5387_v14 = vpop.f32.mrf.mxu2  ;;  %v9001_v37 = vld [vmem:[#allocation3 + $0x3b4] sm:$0xf]  ;;  %1150 = vst [vmem:[#allocation3 + $0x488] sm:$0xf] %v1707_v26  ;;  %v7804_v26 = vld [vmem:[#allocation3 + $0x3f8] sm:$0xf] }
 0x208   : > { %v5388_v55 = vadd.f32 %v5387_v14, %v10171_v3  ;;  %v7773_v40 = vor.u32 %v9001_v37, %v7770_v45  ;;  %v1290_v14 = vpack.c.bf16 %v1220_v50, %v1220_v50  ;;  %v9014_v37 = vld [vmem:[#allocation3 + $0x418] sm:$0xf0]  ;;  %v1291_v45 = vpack.c.bf16 %v1221_v42, %v1221_v42  ;;  %v7778_v50 = vld [vmem:[#allocation3 + $0x3dc] sm:$0xf0] }
 0x209   : > { %v5934_v51 = vpop.f32.mrf.mxu1 }
 0x20a   : > { %v10430_v1 = vadd.f32 %v5934_v51, %v5751_v31  ;;  %v5753_v49 = vpop.f32.mrf.mxu0  ;;  %1360 = vst [vmem:[#allocation3 + $0x48c] sm:$0xf] %v1290_v14 }
 0x20b   : > { %v5754_v54 = vadd.f32 %v5753_v49, %v5570_v30  ;;  %v1011_v30 = vld [vmem:[#allocation2 + $0x10a] sm:$0xff]  ;;  %v1639_v49 = vld [vmem:[#allocation2 + $0x112] sm:$0xff]  ;;  %1361 = vst [vmem:[#allocation3 + $0x4b0] sm:$0xf] %v1291_v45 }
 0x20c   : > { %5429 = vmatmul.bf16.gmra.mxu2 %v7769_v61  ;;  %5792 = vmatmul.bf16.gmra.mxu0 %v7741_v32  ;;  %v1081_v57 = vpack.c.bf16 %v1011_v30, %v1011_v30  ;;  %v1429_v61 = vld [vmem:[#allocation2 + $0x111] sm:$0xff]  ;;  %v9002_v30 = vld [vmem:[#allocation3 + $0x3bc] sm:$0xf] }
 0x20d   : > { %v7781_v14 = vor.u32 %v9002_v30, %v7778_v50  ;;  %v7812_v50 = vld [vmem:[#allocation3 + $0x400] sm:$0xf] }
 0x20e   : > { %v5571_v6 = vpop.f32.mrf.mxu3  ;;  %1151 = vst [vmem:[#allocation3 + $0x4ac] sm:$0xf] %v1081_v57 }
 0x20f   : > { %v5572_v31 = vadd.f32 %v5571_v6, %v5388_v55  ;;  %v5390_v10 = vpop.f32.mrf.mxu2  ;;  %v1428_v55 = vld [vmem:[#allocation2 + $0x109] sm:$0xff]  ;;  %v9006_v6 = vld [vmem:[#allocation3 + $0x3d8] sm:$0xf0]  ;;  %1778 = vst [vmem:[#allocation3 + $0x44c] sm:$0xf] %v1081_v57 }
 0x210   : > { %v5391_v52 = vadd.f32 %v5390_v10, %v10186_v4  ;;  %v1498_v32 = vpack.c.bf16 %v1428_v55, %v1428_v55  ;;  %v1499_v4 = vpack.c.bf16 %v1429_v61, %v1429_v61  ;;  %v9010_v10 = vld [vmem:[#allocation3 + $0x3fc] sm:$0xf]  ;;  %v1222_v57 = vld [vmem:[#allocation2 + $0x128] sm:$0xff] }
 0x211   : > { %v5937_v3 = vpop.f32.mrf.mxu1 }
 0x212   : > { %v10433_v47 = vadd.f32 %v5937_v3, %v5754_v54  ;;  %v5755_v63 = vpop.f32.mrf.mxu0  ;;  %v7805_v3 = vor.u32 %v9014_v37, %v7804_v26  ;;  %1568 = vst [vmem:[#allocation3 + $0x448] sm:$0xf] %v1498_v32 }
 0x213   : > { %5613 = vmatmul.bf16.gmra.mxu3 %v7773_v40  ;;  %v5756_v51 = vadd.f32 %v5755_v63, %v5572_v31  ;;  %v1709_v40 = vpack.c.bf16 %v1639_v49, %v1639_v49  ;;  %v7777_v63 = vor.u32 %v9006_v6, %v7776_v53  ;;  %1569 = vst [vmem:[#allocation3 + $0x46c] sm:$0xf] %v1499_v4  ;;  %v1223_v4 = vld [vmem:[#allocation2 + $0x130] sm:$0xff] }
 0x214   : > { %5976 = vmatmul.bf16.gmra.mxu1 %v7745_v29 }
 0x215   : > { %1779 = vst [vmem:[#allocation3 + $0x470] sm:$0xf] %v1709_v40 }
 0x216   : > { %v5574_v60 = vpop.f32.mrf.mxu3  ;;  %1152 = vst [vmem:[#allocation3 + $0x4d0] sm:$0xf] %v1709_v40  ;;  %v7840_v40 = vld [vmem:[#allocation3 + $0x440] sm:$0xf] }
 0x217   : > { %v5575_v62 = vadd.f32 %v5574_v60, %v5391_v52  ;;  %v5392_v31 = vpop.f32.mrf.mxu2  ;;  %v7806_v52 = vld [vmem:[#allocation3 + $0x41c] sm:$0xf0] }
 0x218   : > { %v5393_v29 = vadd.f32 %v5392_v31, %v10203_v33  ;;  %v7809_v61 = vor.u32 %v9010_v10, %v7806_v52  ;;  %v1292_v31 = vpack.c.bf16 %v1222_v57, %v1222_v57  ;;  %v9023_v10 = vld [vmem:[#allocation3 + $0x460] sm:$0xf0]  ;;  %v1293_v52 = vpack.c.bf16 %v1223_v4, %v1223_v4  ;;  %v7814_v57 = vld [vmem:[#allocation3 + $0x424] sm:$0xf0] }
 0x219   : > { %v5939_v15 = vpop.f32.mrf.mxu1 }
 0x21a   : > { %v10436_v54 = vadd.f32 %v5939_v15, %v5756_v51  ;;  %v5758_v60 = vpop.f32.mrf.mxu0  ;;  %1362 = vst [vmem:[#allocation3 + $0x4d4] sm:$0xf] %v1292_v31 }
 0x21b   : > { %v5759_v55 = vadd.f32 %v5758_v60, %v5575_v62  ;;  %v1013_v62 = vld [vmem:[#allocation2 + $0x11a] sm:$0xff]  ;;  %v1641_v60 = vld [vmem:[#allocation2 + $0x122] sm:$0xff]  ;;  %1363 = vst [vmem:[#allocation3 + $0x4f8] sm:$0xf] %v1293_v52 }
 0x21c   : > { %5434 = vmatmul.bf16.gmra.mxu2 %v7805_v3  ;;  %5797 = vmatmul.bf16.gmra.mxu0 %v7777_v63  ;;  %v1083_v6 = vpack.c.bf16 %v1013_v62, %v1013_v62  ;;  %v1431_v3 = vld [vmem:[#allocation2 + $0x121] sm:$0xff]  ;;  %v9011_v62 = vld [vmem:[#allocation3 + $0x404] sm:$0xf] }
 0x21d   : > { %v7817_v31 = vor.u32 %v9011_v62, %v7814_v57  ;;  %v7848_v57 = vld [vmem:[#allocation3 + $0x448] sm:$0xf] }
 0x21e   : > { %v5576_v42 = vpop.f32.mrf.mxu3  ;;  %1153 = vst [vmem:[#allocation3 + $0x4f4] sm:$0xf] %v1083_v6 }
 0x21f   : > { %v5577_v51 = vadd.f32 %v5576_v42, %v5393_v29  ;;  %v5395_v37 = vpop.f32.mrf.mxu2  ;;  %v1430_v29 = vld [vmem:[#allocation2 + $0x119] sm:$0xff]  ;;  %v9015_v42 = vld [vmem:[#allocation3 + $0x420] sm:$0xf0]  ;;  %1780 = vst [vmem:[#allocation3 + $0x494] sm:$0xf] %v1083_v6 }
 0x220   : > { %v5396_v45 = vadd.f32 %v5395_v37, %v10216_v12  ;;  %v1500_v63 = vpack.c.bf16 %v1430_v29, %v1430_v29  ;;  %v1501_v12 = vpack.c.bf16 %v1431_v3, %v1431_v3  ;;  %v9019_v37 = vld [vmem:[#allocation3 + $0x444] sm:$0xf]  ;;  %v1224_v6 = vld [vmem:[#allocation2 + $0x138] sm:$0xff] }
 0x221   : > { %v5942_v33 = vpop.f32.mrf.mxu1 }
 0x222   : > { %v10439_v26 = vadd.f32 %v5942_v33, %v5759_v55  ;;  %v5760_v32 = vpop.f32.mrf.mxu0  ;;  %v7841_v33 = vor.u32 %v9023_v10, %v7840_v40  ;;  %1570 = vst [vmem:[#allocation3 + $0x490] sm:$0xf] %v1500_v63 }
 0x223   : > { %5618 = vmatmul.bf16.gmra.mxu3 %v7809_v61  ;;  %v5761_v15 = vadd.f32 %v5760_v32, %v5577_v51  ;;  %v1711_v61 = vpack.c.bf16 %v1641_v60, %v1641_v60  ;;  %v7813_v32 = vor.u32 %v9015_v42, %v7812_v50  ;;  %1571 = vst [vmem:[#allocation3 + $0x4b4] sm:$0xf] %v1501_v12  ;;  %v1225_v12 = vld [vmem:[#allocation2 + $0x140] sm:$0xff] }
 0x224   : > { %5981 = vmatmul.bf16.gmra.mxu1 %v7781_v14 }
 0x225   : > { %1781 = vst [vmem:[#allocation3 + $0x4b8] sm:$0xf] %v1711_v61 }
 0x226   : > { %v5579_v49 = vpop.f32.mrf.mxu3  ;;  %1154 = vst [vmem:[#allocation3 + $0x518] sm:$0xf] %v1711_v61  ;;  %v7876_v61 = vld [vmem:[#allocation3 + $0x488] sm:$0xf] }
 0x227   : > { %v5580_v53 = vadd.f32 %v5579_v49, %v5396_v45  ;;  %v5397_v51 = vpop.f32.mrf.mxu2  ;;  %v7842_v45 = vld [vmem:[#allocation3 + $0x464] sm:$0xf0] }
 0x228   : > { %v5398_v14 = vadd.f32 %v5397_v51, %v10224_v39  ;;  %v7845_v3 = vor.u32 %v9019_v37, %v7842_v45  ;;  %v1294_v51 = vpack.c.bf16 %v1224_v6, %v1224_v6  ;;  %v9032_v37 = vld [vmem:[#allocation3 + $0x4a8] sm:$0xf0]  ;;  %v1295_v45 = vpack.c.bf16 %v1225_v12, %v1225_v12  ;;  %v7850_v6 = vld [vmem:[#allocation3 + $0x46c] sm:$0xf0] }
 0x229   : > { %v5944_v30 = vpop.f32.mrf.mxu1 }
 0x22a   : > { %v10442_v55 = vadd.f32 %v5944_v30, %v5761_v15  ;;  %v5763_v49 = vpop.f32.mrf.mxu0  ;;  %1364 = vst [vmem:[#allocation3 + $0x51c] sm:$0xf] %v1294_v51  ;;  %v9249_v51 = vld [vmem:[%s10920_s2 + $0x198] sm:$0xff] }
 0x22b   : > { %v5764_v29 = vadd.f32 %v5763_v49, %v5580_v53  ;;  %v1015_v53 = vld [vmem:[#allocation2 + $0x12a] sm:$0xff]  ;;  %v1643_v49 = vld [vmem:[#allocation2 + $0x132] sm:$0xff]  ;;  %1365 = vst [vmem:[#allocation3 + $0x540] sm:$0xf] %v1295_v45  ;;  %6096 = vmatpush.bf16.msra.mxu2 %v9249_v51 }
 0x22c   : > { %5439 = vmatmul.bf16.gmra.mxu2 %v7841_v33  ;;  %5802 = vmatmul.bf16.gmra.mxu0 %v7813_v32  ;;  %v1085_v42 = vpack.c.bf16 %v1015_v53, %v1015_v53  ;;  %v1433_v33 = vld [vmem:[#allocation2 + $0x131] sm:$0xff] }
 0x22d   : > { %v9020_v53 = vld [vmem:[#allocation3 + $0x44c] sm:$0xf] }
 0x22e   : > { %v5581_v4 = vpop.f32.mrf.mxu3  ;;  %1155 = vst [vmem:[#allocation3 + $0x53c] sm:$0xf] %v1085_v42 }
 0x22f   : > { %v5582_v15 = vadd.f32 %v5581_v4, %v5398_v14  ;;  %v5400_v10 = vpop.f32.mrf.mxu2  ;;  %v1432_v14 = vld [vmem:[#allocation2 + $0x129] sm:$0xff]  ;;  %v9024_v4 = vld [vmem:[#allocation3 + $0x468] sm:$0xf0]  ;;  %1782 = vst [vmem:[#allocation3 + $0x4dc] sm:$0xf] %v1085_v42 }
 0x230   : > { %v5401_v52 = vadd.f32 %v5400_v10, %v10230_v20  ;;  %v1502_v32 = vpack.c.bf16 %v1432_v14, %v1432_v14  ;;  %v1503_v20 = vpack.c.bf16 %v1433_v33, %v1433_v33  ;;  %v9028_v10 = vld [vmem:[#allocation3 + $0x48c] sm:$0xf] }
 0x231   : > { %v5947_v39 = vpop.f32.mrf.mxu1 }
 0x232   : > { %v10445_v40 = vadd.f32 %v5947_v39, %v5764_v29  ;;  %v5765_v63 = vpop.f32.mrf.mxu0  ;;  %v7877_v39 = vor.u32 %v9032_v37, %v7876_v61  ;;  %1572 = vst [vmem:[#allocation3 + $0x4d8] sm:$0xf] %v1502_v32 }
 0x233   : > { %5623 = vmatmul.bf16.gmra.mxu3 %v7845_v3  ;;  %v5766_v30 = vadd.f32 %v5765_v63, %v5582_v15  ;;  %v1713_v3 = vpack.c.bf16 %v1643_v49, %v1643_v49  ;;  %v7849_v63 = vor.u32 %v9024_v4, %v7848_v57  ;;  %1573 = vst [vmem:[#allocation3 + $0x4fc] sm:$0xf] %v1503_v20  ;;  %v1017_v57 = vld [vmem:[#allocation2 + $0x13a] sm:$0xff]  ;;  %v1226_v4 = vld [vmem:[#allocation2 + $0x148] sm:$0xff] }
 0x234   : > { %5986 = vmatmul.bf16.gmra.mxu1 %v7817_v31 }
 0x235   : > { %1783 = vst [vmem:[#allocation3 + $0x500] sm:$0xf] %v1713_v3 }
 0x236   : > { %v5584_v60 = vpop.f32.mrf.mxu3  ;;  %1156 = vst [vmem:[#allocation3 + $0x560] sm:$0xf] %v1713_v3  ;;  %v1227_v3 = vld [vmem:[#allocation2 + $0x150] sm:$0xff] }
 0x237   : > { %v5585_v50 = vadd.f32 %v5584_v60, %v5401_v52  ;;  %v5402_v15 = vpop.f32.mrf.mxu2  ;;  %v7878_v52 = vld [vmem:[#allocation3 + $0x4ac] sm:$0xf0] }
 0x238   : > { %v5403_v31 = vadd.f32 %v5402_v15, %v10245_v59  ;;  %v7881_v33 = vor.u32 %v9028_v10, %v7878_v52  ;;  %v7853_v59 = vor.u32 %v9020_v53, %v7850_v6  ;;  %v1087_v15 = vpack.c.bf16 %v1017_v57, %v1017_v57  ;;  %v1435_v10 = vld [vmem:[#allocation2 + $0x141] sm:$0xff]  ;;  %v7912_v52 = vld [vmem:[#allocation3 + $0x4d0] sm:$0xf] }
 0x239   : > { %v5949_v62 = vpop.f32.mrf.mxu1  ;;  %v1645_v6 = vld [vmem:[#allocation2 + $0x142] sm:$0xff] }
 0x23a   : > { %v10448_v29 = vadd.f32 %v5949_v62, %v5766_v30  ;;  %v5768_v60 = vpop.f32.mrf.mxu0  ;;  %1157 = vst [vmem:[#allocation3 + $0x584] sm:$0xf] %v1087_v15 }
 0x23b   : > { %v5769_v14 = vadd.f32 %v5768_v60, %v5585_v50  ;;  %v9257_v50 = vld [vmem:[%s10920_s2 + $0x1d8] sm:$0xff]  ;;  %v1297_v60 = vpack.c.bf16 %v1227_v3, %v1227_v3  ;;  %1784 = vst [vmem:[#allocation3 + $0x524] sm:$0xf] %v1087_v15 }
 0x23c   : > { %5444 = vmatmul.bf16.gmra.mxu2 %v7877_v39  ;;  %5807 = vmatmul.bf16.gmra.mxu0 %v7849_v63  ;;  %v1434_v39 = vld [vmem:[#allocation2 + $0x139] sm:$0xff] }
 0x23d   : > { %6280 = vmatpush.bf16.msra.mxu3 %v9257_v50  ;;  %v9041_v63 = vld [vmem:[#allocation3 + $0x4f0] sm:$0xf0]  ;;  %v1504_v53 = vpack.c.bf16 %v1434_v39, %v1434_v39  ;;  %1367 = vst [vmem:[#allocation3 + $0x588] sm:$0xf] %v1297_v60 }
 0x23e   : > { %v5586_v12 = vpop.f32.mrf.mxu3  ;;  %v7913_v50 = vor.u32 %v9041_v63, %v7912_v52  ;;  %v1228_v15 = vld [vmem:[#allocation2 + $0x158] sm:$0xff] }
 0x23f   : > { %v5587_v30 = vadd.f32 %v5586_v12, %v5403_v31  ;;  %v5405_v45 = vpop.f32.mrf.mxu2  ;;  %v1296_v31 = vpack.c.bf16 %v1226_v4, %v1226_v4  ;;  %1574 = vst [vmem:[#allocation3 + $0x520] sm:$0xf] %v1504_v53  ;;  %v9029_v4 = vld [vmem:[#allocation3 + $0x494] sm:$0xf] }
 0x240   : > { %v5406_v42 = vadd.f32 %v5405_v45, %v10262_v11  ;;  %v9033_v11 = vld [vmem:[#allocation3 + $0x4b0] sm:$0xf0] }
 0x241   : > { %v5952_v61 = vpop.f32.mrf.mxu1  ;;  %1366 = vst [vmem:[#allocation3 + $0x564] sm:$0xf] %v1296_v31 }
 0x242   : > { %v10454_v37 = vadd.f32 %v5952_v61, %v5769_v14  ;;  %v5770_v32 = vpop.f32.mrf.mxu0  ;;  %v7884_v14 = vld [vmem:[#allocation3 + $0x490] sm:$0xf]  ;;  %v1715_v61 = vpack.c.bf16 %v1645_v6, %v1645_v6 }
 0x243   : > { %5628 = vmatmul.bf16.gmra.mxu3 %v7881_v33  ;;  %v5771_v62 = vadd.f32 %v5770_v32, %v5587_v30  ;;  %v1505_v33 = vpack.c.bf16 %v1435_v10, %v1435_v10  ;;  %v9265_v30 = vld [vmem:[%s10920_s2 + $0x218] sm:$0xff]  ;;  %v7914_v32 = vld [vmem:[#allocation3 + $0x4f4] sm:$0xf0] }
 0x244   : > { %5991 = vmatmul.bf16.gmra.mxu1 %v7853_v59  ;;  %6464 = vmatpush.bf16.msra.mxu0 %v9265_v30  ;;  %1785 = vst [vmem:[#allocation3 + $0x548] sm:$0xf] %v1715_v61  ;;  %v1229_v30 = vld [vmem:[#allocation2 + $0x160] sm:$0xff] }
 0x245   : > { %1575 = vst [vmem:[#allocation3 + $0x544] sm:$0xf] %v1505_v33 }
 0x246   : > { %v5589_v49 = vpop.f32.mrf.mxu3  ;;  %1158 = vst [vmem:[#allocation3 + $0x5a8] sm:$0xf] %v1715_v61  ;;  %v7948_v61 = vld [vmem:[#allocation3 + $0x518] sm:$0xf] }
 0x247   : > { %v5590_v20 = vadd.f32 %v5589_v49, %v5406_v42  ;;  %v5407_v59 = vpop.f32.mrf.mxu2  ;;  %v9037_v42 = vld [vmem:[#allocation3 + $0x4d4] sm:$0xf]  ;;  %v7885_v49 = vor.u32 %v9033_v11, %v7884_v14 }
 0x248   : > { %v5408_v45 = vadd.f32 %v5407_v59, %v10271_v27  ;;  %v7917_v31 = vor.u32 %v9037_v42, %v7914_v32  ;;  %v1298_v59 = vpack.c.bf16 %v1228_v15, %v1228_v15  ;;  %v9050_v42 = vld [vmem:[#allocation3 + $0x538] sm:$0xf0]  ;;  %v1299_v32 = vpack.c.bf16 %v1229_v30, %v1229_v30  ;;  %v7922_v15 = vld [vmem:[#allocation3 + $0x4fc] sm:$0xf0] }
 0x249   : > { %v5954_v12 = vpop.f32.mrf.mxu1 }
 0x24a   : > { %v10460_v51 = vadd.f32 %v5954_v12, %v5771_v62  ;;  %v5773_v57 = vpop.f32.mrf.mxu0  ;;  %v7886_v62 = vld [vmem:[#allocation3 + $0x4b4] sm:$0xf0]  ;;  %1368 = vst [vmem:[#allocation3 + $0x5ac] sm:$0xf] %v1298_v59 }
 0x24b   : > { %v5774_v39 = vadd.f32 %v5773_v57, %v5590_v20  ;;  %v7889_v60 = vor.u32 %v9029_v4, %v7886_v62  ;;  %v1019_v20 = vld [vmem:[#allocation2 + $0x14a] sm:$0xff]  ;;  %v1647_v57 = vld [vmem:[#allocation2 + $0x152] sm:$0xff]  ;;  %v7920_v62 = vld [vmem:[#allocation3 + $0x4d8] sm:$0xf]  ;;  %1369 = vst [vmem:[#allocation3 + $0x5d0] sm:$0xf] %v1299_v32 }
 0x24c   : > { %5449 = vmatmul.bf16.gmra.mxu2 %v7913_v50  ;;  %5812 = vmatmul.bf16.gmra.mxu0 %v7885_v49  ;;  %v1089_v33 = vpack.c.bf16 %v1019_v20, %v1019_v20  ;;  %v1437_v50 = vld [vmem:[#allocation2 + $0x151] sm:$0xff]  ;;  %v9038_v20 = vld [vmem:[#allocation3 + $0x4dc] sm:$0xf] }
 0x24d   : > { %v7925_v59 = vor.u32 %v9038_v20, %v7922_v15  ;;  %v7956_v15 = vld [vmem:[#allocation3 + $0x520] sm:$0xf] }
 0x24e   : > { %v5591_v3 = vpop.f32.mrf.mxu3  ;;  %1159 = vst [vmem:[#allocation3 + $0x5cc] sm:$0xf] %v1089_v33 }
 0x24f   : > { %v5592_v10 = vadd.f32 %v5591_v3, %v5408_v45  ;;  %v5410_v63 = vpop.f32.mrf.mxu2  ;;  %v1436_v45 = vld [vmem:[#allocation2 + $0x149] sm:$0xff]  ;;  %v9042_v3 = vld [vmem:[#allocation3 + $0x4f8] sm:$0xf0]  ;;  %1786 = vst [vmem:[#allocation3 + $0x56c] sm:$0xf] %v1089_v33 }
 0x250   : > { %v5411_v53 = vadd.f32 %v5410_v63, %v10277_v2  ;;  %v1506_v49 = vpack.c.bf16 %v1436_v45, %v1436_v45  ;;  %v1507_v2 = vpack.c.bf16 %v1437_v50, %v1437_v50  ;;  %v9046_v63 = vld [vmem:[#allocation3 + $0x51c] sm:$0xf]  ;;  %v1230_v33 = vld [vmem:[#allocation2 + $0x168] sm:$0xff] }
 0x251   : > { %v5957_v27 = vpop.f32.mrf.mxu1 }
 0x252   : > { %v10466_v52 = vadd.f32 %v5957_v27, %v5774_v39  ;;  %v5775_v6 = vpop.f32.mrf.mxu0  ;;  %v7949_v27 = vor.u32 %v9050_v42, %v7948_v61  ;;  %1576 = vst [vmem:[#allocation3 + $0x568] sm:$0xf] %v1506_v49 }
 0x253   : > { %5633 = vmatmul.bf16.gmra.mxu3 %v7917_v31  ;;  %v5776_v14 = vadd.f32 %v5775_v6, %v5592_v10  ;;  %v1717_v31 = vpack.c.bf16 %v1647_v57, %v1647_v57  ;;  %v7921_v6 = vor.u32 %v9042_v3, %v7920_v62  ;;  %1577 = vst [vmem:[#allocation3 + $0x58c] sm:$0xf] %v1507_v2  ;;  %v1231_v2 = vld [vmem:[#allocation2 + $0x170] sm:$0xff] }
 0x254   : > { %5996 = vmatmul.bf16.gmra.mxu1 %v7889_v60 }
 0x255   : > { %1787 = vst [vmem:[#allocation3 + $0x590] sm:$0xf] %v1717_v31 }
 0x256   : > { %v5594_v12 = vpop.f32.mrf.mxu3  ;;  %1160 = vst [vmem:[#allocation3 + $0x5f0] sm:$0xf] %v1717_v31  ;;  %v7984_v31 = vld [vmem:[#allocation3 + $0x560] sm:$0xf] }
 0x257   : > { %v5595_v11 = vadd.f32 %v5594_v12, %v5411_v53  ;;  %v5412_v10 = vpop.f32.mrf.mxu2  ;;  %v7950_v53 = vld [vmem:[#allocation3 + $0x53c] sm:$0xf0] }
 0x258   : > { %v5413_v60 = vadd.f32 %v5412_v10, %v10283_v44  ;;  %v7953_v50 = vor.u32 %v9046_v63, %v7950_v53  ;;  %v1300_v10 = vpack.c.bf16 %v1230_v33, %v1230_v33  ;;  %v9059_v63 = vld [vmem:[#allocation3 + $0x580] sm:$0xf0]  ;;  %v1301_v53 = vpack.c.bf16 %v1231_v2, %v1231_v2  ;;  %v7958_v33 = vld [vmem:[#allocation3 + $0x544] sm:$0xf0] }
 0x259   : > { %v5959_v4 = vpop.f32.mrf.mxu1 }
 0x25a   : > { %v10469_v39 = vadd.f32 %v5959_v4, %v5776_v14  ;;  %v5778_v12 = vpop.f32.mrf.mxu0  ;;  %1370 = vst [vmem:[#allocation3 + $0x5f4] sm:$0xf] %v1300_v10 }
 0x25b   : > { %v5779_v45 = vadd.f32 %v5778_v12, %v5595_v11  ;;  %v1021_v11 = vld [vmem:[#allocation2 + $0x15a] sm:$0xff]  ;;  %v1649_v12 = vld [vmem:[#allocation2 + $0x162] sm:$0xff]  ;;  %1371 = vst [vmem:[#allocation3 + $0x618] sm:$0xf] %v1301_v53 }
 0x25c   : > { %5454 = vmatmul.bf16.gmra.mxu2 %v7949_v27  ;;  %5817 = vmatmul.bf16.gmra.mxu0 %v7921_v6  ;;  %v1091_v3 = vpack.c.bf16 %v1021_v11, %v1021_v11  ;;  %v1439_v27 = vld [vmem:[#allocation2 + $0x161] sm:$0xff]  ;;  %v9047_v11 = vld [vmem:[#allocation3 + $0x524] sm:$0xf] }
 0x25d   : > { %v7961_v10 = vor.u32 %v9047_v11, %v7958_v33  ;;  %v7992_v33 = vld [vmem:[#allocation3 + $0x568] sm:$0xf] }
 0x25e   : > { %v5596_v30 = vpop.f32.mrf.mxu3  ;;  %1161 = vst [vmem:[#allocation3 + $0x614] sm:$0xf] %v1091_v3 }
 0x25f   : > { %v5597_v14 = vadd.f32 %v5596_v30, %v5413_v60  ;;  %v5415_v42 = vpop.f32.mrf.mxu2  ;;  %v1438_v60 = vld [vmem:[#allocation2 + $0x159] sm:$0xff]  ;;  %v9051_v30 = vld [vmem:[#allocation3 + $0x540] sm:$0xf0]  ;;  %1788 = vst [vmem:[#allocation3 + $0x5b4] sm:$0xf] %v1091_v3 }
 0x260   : > { %v5416_v32 = vadd.f32 %v5415_v42, %v10289_v13  ;;  %v1508_v6 = vpack.c.bf16 %v1438_v60, %v1438_v60  ;;  %v1509_v13 = vpack.c.bf16 %v1439_v27, %v1439_v27  ;;  %v9055_v42 = vld [vmem:[#allocation3 + $0x564] sm:$0xf]  ;;  %v1232_v3 = vld [vmem:[#allocation2 + $0x178] sm:$0xff] }
 0x261   : > { %v5962_v44 = vpop.f32.mrf.mxu1 }
 0x262   : > { %v10472_v61 = vadd.f32 %v5962_v44, %v5779_v45  ;;  %v5780_v49 = vpop.f32.mrf.mxu0  ;;  %v7985_v44 = vor.u32 %v9059_v63, %v7984_v31  ;;  %1578 = vst [vmem:[#allocation3 + $0x5b0] sm:$0xf] %v1508_v6 }
 0x263   : > { %5638 = vmatmul.bf16.gmra.mxu3 %v7953_v50  ;;  %v5781_v4 = vadd.f32 %v5780_v49, %v5597_v14  ;;  %v1719_v50 = vpack.c.bf16 %v1649_v12, %v1649_v12  ;;  %v7957_v49 = vor.u32 %v9051_v30, %v7956_v15  ;;  %1579 = vst [vmem:[#allocation3 + $0x5d4] sm:$0xf] %v1509_v13  ;;  %v1233_v13 = vld [vmem:[#allocation2 + $0x180] sm:$0xff] }
 0x264   : > { %6001 = vmatmul.bf16.gmra.mxu1 %v7925_v59 }
 0x265   : > { %1789 = vst [vmem:[#allocation3 + $0x5d8] sm:$0xf] %v1719_v50 }
 0x266   : > { %v5599_v57 = vpop.f32.mrf.mxu3  ;;  %1162 = vst [vmem:[#allocation3 + $0x638] sm:$0xf] %v1719_v50  ;;  %v8020_v50 = vld [vmem:[#allocation3 + $0x5a8] sm:$0xf] }
 0x267   : > { %v5600_v62 = vadd.f32 %v5599_v57, %v5416_v32  ;;  %v5417_v14 = vpop.f32.mrf.mxu2  ;;  %v7986_v32 = vld [vmem:[#allocation3 + $0x584] sm:$0xf0] }
 0x268   : > { %v5418_v59 = vadd.f32 %v5417_v14, %v10295_v35  ;;  %v7989_v27 = vor.u32 %v9055_v42, %v7986_v32  ;;  %v1302_v14 = vpack.c.bf16 %v1232_v3, %v1232_v3  ;;  %v9068_v42 = vld [vmem:[#allocation3 + $0x5c8] sm:$0xf0]  ;;  %v1303_v32 = vpack.c.bf16 %v1233_v13, %v1233_v13  ;;  %v7994_v3 = vld [vmem:[#allocation3 + $0x58c] sm:$0xf0] }
 0x269   : > { %v5964_v20 = vpop.f32.mrf.mxu1 }
 0x26a   : > { %v10475_v45 = vadd.f32 %v5964_v20, %v5781_v4  ;;  %v5783_v57 = vpop.f32.mrf.mxu0  ;;  %1372 = vst [vmem:[#allocation3 + $0x63c] sm:$0xf] %v1302_v14 }
 0x26b   : > { %v5784_v60 = vadd.f32 %v5783_v57, %v5600_v62  ;;  %v1023_v62 = vld [vmem:[#allocation2 + $0x16a] sm:$0xff]  ;;  %v1651_v57 = vld [vmem:[#allocation2 + $0x172] sm:$0xff]  ;;  %1373 = vst [vmem:[#allocation3 + $0x660] sm:$0xf] %v1303_v32 }
 0x26c   : > { %5459 = vmatmul.bf16.gmra.mxu2 %v7985_v44  ;;  %5822 = vmatmul.bf16.gmra.mxu0 %v7957_v49  ;;  %v1093_v30 = vpack.c.bf16 %v1023_v62, %v1023_v62  ;;  %v1441_v44 = vld [vmem:[#allocation2 + $0x171] sm:$0xff] }
 0x26d   : > { %v9056_v62 = vld [vmem:[#allocation3 + $0x56c] sm:$0xf] }
 0x26e   : > { %v5601_v2 = vpop.f32.mrf.mxu3  ;;  %1163 = vst [vmem:[#allocation3 + $0x65c] sm:$0xf] %v1093_v30  ;;  %v7997_v14 = vor.u32 %v9056_v62, %v7994_v3  ;;  %v8028_v3 = vld [vmem:[#allocation3 + $0x5b0] sm:$0xf] }
 0x26f   : > { %v5602_v4 = vadd.f32 %v5601_v2, %v5418_v59  ;;  %v5420_v63 = vpop.f32.mrf.mxu2  ;;  %v1440_v59 = vld [vmem:[#allocation2 + $0x169] sm:$0xff]  ;;  %v9060_v2 = vld [vmem:[#allocation3 + $0x588] sm:$0xf0]  ;;  %1790 = vst [vmem:[#allocation3 + $0x5fc] sm:$0xf] %v1093_v30 }
 0x270   : > { %v5421_v53 = vadd.f32 %v5420_v63, %v10301_v19  ;;  %v1510_v49 = vpack.c.bf16 %v1440_v59, %v1440_v59  ;;  %v1511_v19 = vpack.c.bf16 %v1441_v44, %v1441_v44  ;;  %v9064_v63 = vld [vmem:[#allocation3 + $0x5ac] sm:$0xf]  ;;  %v1234_v30 = vld [vmem:[#allocation2 + $0x188] sm:$0xff] }
 0x271   : > { %v5967_v35 = vpop.f32.mrf.mxu1 }
 0x272   : > { %v10478_v31 = vadd.f32 %v5967_v35, %v5784_v60  ;;  %v5785_v6 = vpop.f32.mrf.mxu0  ;;  %v8021_v35 = vor.u32 %v9068_v42, %v8020_v50  ;;  %1580 = vst [vmem:[#allocation3 + $0x5f8] sm:$0xf] %v1510_v49 }
 0x273   : > { %5643 = vmatmul.bf16.gmra.mxu3 %v7989_v27  ;;  %v5786_v20 = vadd.f32 %v5785_v6, %v5602_v4  ;;  %v1721_v27 = vpack.c.bf16 %v1651_v57, %v1651_v57  ;;  %v7993_v6 = vor.u32 %v9060_v2, %v7992_v33  ;;  %1581 = vst [vmem:[#allocation3 + $0x61c] sm:$0xf] %v1511_v19  ;;  %v8056_v2 = vld [vmem:[#allocation3 + $0x5f0] sm:$0xf]  ;;  %v9077_v19 = vld [vmem:[#allocation3 + $0x610] sm:$0xf0] }
 0x274   : > { %6006 = vmatmul.bf16.gmra.mxu1 %v7961_v10 }
 0x275   : > { %1791 = vst [vmem:[#allocation3 + $0x620] sm:$0xf] %v1721_v27 }
 0x276   : > { %v5604_v12 = vpop.f32.mrf.mxu3  ;;  %1164 = vst [vmem:[#allocation3 + $0x680] sm:$0xf] %v1721_v27  ;;  %v9256_v27 = vld [vmem:[%s10920_s2 + $0x1d0] sm:$0xff] }
 0x277   : > { %v5605_v15 = vadd.f32 %v5604_v12, %v5421_v53  ;;  %v5422_v4 = vpop.f32.mrf.mxu2  ;;  %v8022_v53 = vld [vmem:[#allocation3 + $0x5cc] sm:$0xf0]  ;;  %6281 = vmatpush.bf16.msra.mxu3 %v9256_v27 }
 0x278   : > { %v5423_v10 = vadd.f32 %v5422_v4, %v10307_v24  ;;  %v8025_v44 = vor.u32 %v9064_v63, %v8022_v53  ;;  %v9248_v4 = vld [vmem:[%s10920_s2 + $0x190] sm:$0xff]  ;;  %v1304_v63 = vpack.c.bf16 %v1234_v30, %v1234_v30  ;;  %v1442_v53 = vld [vmem:[#allocation2 + $0x179] sm:$0xff] }
 0x279   : > { %v5969_v11 = vpop.f32.mrf.mxu1  ;;  %6097 = vmatpush.bf16.msra.mxu2 %v9248_v4  ;;  %v8030_v4 = vld [vmem:[#allocation3 + $0x5d4] sm:$0xf0] }
 0x27a   : > { %v10481_v60 = vadd.f32 %v5969_v11, %v5786_v20  ;;  %v5788_v12 = vpop.f32.mrf.mxu0  ;;  %1374 = vst [vmem:[#allocation3 + $0x684] sm:$0xf] %v1304_v63  ;;  %v9264_v63 = vld [vmem:[%s10920_s2 + $0x210] sm:$0xff] }
 0x27b   : > { %v5789_v59 = vadd.f32 %v5788_v12, %v5605_v15  ;;  %v1025_v15 = vld [vmem:[#allocation2 + $0x17a] sm:$0xff]  ;;  %v1653_v12 = vld [vmem:[#allocation2 + $0x182] sm:$0xff]  ;;  %6465 = vmatpush.bf16.msra.mxu0 %v9264_v63 }
 0x27c   : > { %5464 = vmatmul.bf16.gmra.mxu2 %v8021_v35  ;;  %5827 = vmatmul.bf16.gmra.mxu0 %v7993_v6  ;;  %v1235_v35 = vld [vmem:[#allocation2 + $0x190] sm:$0xff]  ;;  %v1443_v6 = vld [vmem:[#allocation2 + $0x181] sm:$0xff] }
 0x27e   : > { %v5606_v13 = vpop.f32.mrf.mxu3 }
 0x27f   : > { %v5607_v20 = vadd.f32 %v5606_v13, %v5423_v10  ;;  %v5425_v42 = vpop.f32.mrf.mxu2  ;;  %v1095_v10 = vpack.c.bf16 %v1025_v15, %v1025_v15  ;;  %v9069_v13 = vld [vmem:[#allocation3 + $0x5d0] sm:$0xf0] }
 0x280   : > { %v5426_v32 = vadd.f32 %v5425_v42, %v10319_v43  ;;  %v1305_v43 = vpack.c.bf16 %v1235_v35, %v1235_v35  ;;  %v8029_v15 = vor.u32 %v9069_v13, %v8028_v3  ;;  %v9065_v35 = vld [vmem:[#allocation3 + $0x5b4] sm:$0xf]  ;;  %v1027_v3 = vld [vmem:[#allocation2 + $0x18a] sm:$0xff] }
 0x281   : > { %v5972_v24 = vpop.f32.mrf.mxu1  ;;  %1165 = vst [vmem:[#allocation3 + $0x6a4] sm:$0xf] %v1095_v10  ;;  %v1236_v13 = vld [vmem:[#allocation2 + $0x198] sm:$0xff] }
 0x282   : > { %v10484_v50 = vadd.f32 %v5972_v24, %v5789_v59  ;;  %v5790_v49 = vpop.f32.mrf.mxu0  ;;  %v1512_v59 = vpack.c.bf16 %v1442_v53, %v1442_v53  ;;  %1375 = vst [vmem:[#allocation3 + $0x6a8] sm:$0xf] %v1305_v43  ;;  %v1723_v24 = vpack.c.bf16 %v1653_v12, %v1653_v12 }
 0x283   : > { %5648 = vmatmul.bf16.gmra.mxu3 %v8025_v44  ;;  %v5791_v11 = vadd.f32 %v5790_v49, %v5607_v20  ;;  %v1513_v20 = vpack.c.bf16 %v1443_v6, %v1443_v6  ;;  %v9073_v49 = vld [vmem:[#allocation3 + $0x5f4] sm:$0xf]  ;;  %1792 = vst [vmem:[#allocation3 + $0x644] sm:$0xf] %v1095_v10 }
 0x284   : > { %6011 = vmatmul.bf16.gmra.mxu1 %v7997_v14  ;;  %1582 = vst [vmem:[#allocation3 + $0x640] sm:$0xf] %v1512_v59 }
 0x285   : > { %1583 = vst [vmem:[#allocation3 + $0x664] sm:$0xf] %v1513_v20  ;;  %v1097_v20 = vpack.c.bf16 %v1027_v3, %v1027_v3  ;;  %v9074_v3 = vld [vmem:[#allocation3 + $0x5fc] sm:$0xf] }
 0x286   : > { %v5609_v57 = vpop.f32.mrf.mxu3  ;;  %1793 = vst [vmem:[#allocation3 + $0x668] sm:$0xf] %v1723_v24 }
 0x287   : > { %v5610_v33 = vadd.f32 %v5609_v57, %v5426_v32  ;;  %v5427_v14 = vpop.f32.mrf.mxu2  ;;  %v8057_v32 = vor.u32 %v9077_v19, %v8056_v2  ;;  %v8058_v57 = vld [vmem:[#allocation3 + $0x614] sm:$0xf0]  ;;  %1166 = vst [vmem:[#allocation3 + $0x6c8] sm:$0xf] %v1723_v24  ;;  %v1445_v24 = vld [vmem:[#allocation2 + $0x191] sm:$0xff] }
 0x288   : > { %v5428_v42 = vadd.f32 %v5427_v14, %v10328_v28  ;;  %v8061_v6 = vor.u32 %v9073_v49, %v8058_v57  ;;  %v8033_v28 = vor.u32 %v9065_v35, %v8030_v4  ;;  %v1237_v14 = vld [vmem:[#allocation2 + $0x1a0] sm:$0xff]  ;;  %v1655_v35 = vld [vmem:[#allocation2 + $0x192] sm:$0xff]  ;;  %1167 = vst [vmem:[#allocation3 + $0x6ec] sm:$0xf] %v1097_v20 }
 0x289   : > { %v5974_v62 = vpop.f32.mrf.mxu1  ;;  %v8092_v49 = vld [vmem:[#allocation3 + $0x638] sm:$0xf]  ;;  %v9086_v57 = vld [vmem:[#allocation3 + $0x658] sm:$0xf0]  ;;  %v1725_v63 = vpack.c.bf16 %v1655_v35, %v1655_v35  ;;  %1794 = vst [vmem:[#allocation3 + $0x68c] sm:$0xf] %v1097_v20 }
 0x28a   : > { %v10493_v44 = vadd.f32 %v5974_v62, %v5791_v11  ;;  %v5793_v30 = vpop.f32.mrf.mxu0  ;;  %v1238_v20 = vld [vmem:[#allocation2 + $0x1a8] sm:$0xff] }
 0x28b   : > { %v5794_v53 = vadd.f32 %v5793_v30, %v5610_v33  ;;  %1795 = vst [vmem:[#allocation3 + $0x6b0] sm:$0xf] %v1725_v63 }
 0x28c   : > { %5469 = vmatmul.bf16.gmra.mxu2 %v8057_v32  ;;  %5832 = vmatmul.bf16.gmra.mxu0 %v8029_v15  ;;  %v1444_v32 = vld [vmem:[#allocation2 + $0x189] sm:$0xff]  ;;  %v1307_v15 = vpack.c.bf16 %v1237_v14, %v1237_v14  ;;  %1168 = vst [vmem:[#allocation3 + $0x710] sm:$0xf] %v1725_v63 }
 0x28d   : > { %v1514_v30 = vpack.c.bf16 %v1444_v32, %v1444_v32  ;;  %v8128_v63 = vld [vmem:[#allocation3 + $0x680] sm:$0xf] }
 0x28e   : > { %v5611_v27 = vpop.f32.mrf.mxu3  ;;  %1377 = vst [vmem:[#allocation3 + $0x6f0] sm:$0xf] %v1307_v15 }
 0x28f   : > { %v5612_v11 = vadd.f32 %v5611_v27, %v5428_v42  ;;  %v5430_v43 = vpop.f32.mrf.mxu2  ;;  %v1306_v42 = vpack.c.bf16 %v1236_v13, %v1236_v13  ;;  %v8064_v27 = vld [vmem:[#allocation3 + $0x5f8] sm:$0xf]  ;;  %1584 = vst [vmem:[#allocation3 + $0x688] sm:$0xf] %v1514_v30  ;;  %v8066_v13 = vld [vmem:[#allocation3 + $0x61c] sm:$0xf0] }
 0x290   : > { %v5431_v33 = vadd.f32 %v5430_v43, %v10334_v56  ;;  %v1515_v56 = vpack.c.bf16 %v1445_v24, %v1445_v24  ;;  %v9082_v43 = vld [vmem:[#allocation3 + $0x63c] sm:$0xf] }
 0x291   : > { %v5977_v2 = vpop.f32.mrf.mxu1  ;;  %1376 = vst [vmem:[#allocation3 + $0x6cc] sm:$0xf] %v1306_v42  ;;  %v8069_v42 = vor.u32 %v9074_v3, %v8066_v13  ;;  %v8100_v13 = vld [vmem:[#allocation3 + $0x640] sm:$0xf] }
 0x292   : > { %v10499_v19 = vadd.f32 %v5977_v2, %v5794_v53  ;;  %v5795_v10 = vpop.f32.mrf.mxu0  ;;  %v9078_v53 = vld [vmem:[#allocation3 + $0x618] sm:$0xf0]  ;;  %v8093_v2 = vor.u32 %v9086_v57, %v8092_v49  ;;  %1585 = vst [vmem:[#allocation3 + $0x6ac] sm:$0xf] %v1515_v56  ;;  %v1239_v56 = vld [vmem:[#allocation2 + $0x1b0] sm:$0xff] }
 0x293   : > { %5653 = vmatmul.bf16.gmra.mxu3 %v8061_v6  ;;  %v5796_v62 = vadd.f32 %v5795_v10, %v5612_v11  ;;  %v8065_v10 = vor.u32 %v9078_v53, %v8064_v27 }
 0x294   : > { %6016 = vmatmul.bf16.gmra.mxu1 %v8033_v28 }
 0x296   : > { %v5614_v12 = vpop.f32.mrf.mxu3 }
 0x297   : > { %v5615_v59 = vadd.f32 %v5614_v12, %v5431_v33  ;;  %v5432_v11 = vpop.f32.mrf.mxu2  ;;  %v8094_v33 = vld [vmem:[#allocation3 + $0x65c] sm:$0xf0] }
 0x298   : > { %v5433_v28 = vadd.f32 %v5432_v11, %v10340_v22  ;;  %v8097_v24 = vor.u32 %v9082_v43, %v8094_v33  ;;  %v1308_v11 = vpack.c.bf16 %v1238_v20, %v1238_v20  ;;  %v9095_v43 = vld [vmem:[#allocation3 + $0x6a0] sm:$0xf0]  ;;  %v1309_v33 = vpack.c.bf16 %v1239_v56, %v1239_v56  ;;  %v8102_v20 = vld [vmem:[#allocation3 + $0x664] sm:$0xf0] }
 0x299   : > { %v5979_v4 = vpop.f32.mrf.mxu1 }
 0x29a   : > { %v10502_v6 = vadd.f32 %v5979_v4, %v5796_v62  ;;  %v5798_v12 = vpop.f32.mrf.mxu0  ;;  %1378 = vst [vmem:[#allocation3 + $0x714] sm:$0xf] %v1308_v11 }
 0x29b   : > { %v5799_v32 = vadd.f32 %v5798_v12, %v5615_v59  ;;  %v1029_v59 = vld [vmem:[#allocation2 + $0x19a] sm:$0xff]  ;;  %v1657_v12 = vld [vmem:[#allocation2 + $0x1a2] sm:$0xff]  ;;  %1379 = vst [vmem:[#allocation3 + $0x738] sm:$0xf] %v1309_v33 }
 0x29c   : > { %5474 = vmatmul.bf16.gmra.mxu2 %v8093_v2  ;;  %5837 = vmatmul.bf16.gmra.mxu0 %v8065_v10  ;;  %v1099_v53 = vpack.c.bf16 %v1029_v59, %v1029_v59  ;;  %v1447_v2 = vld [vmem:[#allocation2 + $0x1a1] sm:$0xff]  ;;  %v9083_v59 = vld [vmem:[#allocation3 + $0x644] sm:$0xf] }
 0x29d   : > { %v8105_v11 = vor.u32 %v9083_v59, %v8102_v20  ;;  %v8136_v20 = vld [vmem:[#allocation3 + $0x688] sm:$0xf] }
 0x29e   : > { %v5616_v14 = vpop.f32.mrf.mxu3  ;;  %1169 = vst [vmem:[#allocation3 + $0x734] sm:$0xf] %v1099_v53 }
 0x29f   : > { %v5617_v62 = vadd.f32 %v5616_v14, %v5433_v28  ;;  %v5435_v57 = vpop.f32.mrf.mxu2  ;;  %v1446_v28 = vld [vmem:[#allocation2 + $0x199] sm:$0xff]  ;;  %v9087_v14 = vld [vmem:[#allocation3 + $0x660] sm:$0xf0]  ;;  %1796 = vst [vmem:[#allocation3 + $0x6d4] sm:$0xf] %v1099_v53 }
 0x2a0   : > { %v5436_v15 = vadd.f32 %v5435_v57, %v10346_v18  ;;  %v1516_v10 = vpack.c.bf16 %v1446_v28, %v1446_v28  ;;  %v1517_v18 = vpack.c.bf16 %v1447_v2, %v1447_v2  ;;  %v9091_v57 = vld [vmem:[#allocation3 + $0x684] sm:$0xf]  ;;  %v1240_v53 = vld [vmem:[#allocation2 + $0x1b8] sm:$0xff] }
 0x2a1   : > { %v5982_v22 = vpop.f32.mrf.mxu1 }
 0x2a2   : > { %v10505_v49 = vadd.f32 %v5982_v22, %v5799_v32  ;;  %v5800_v30 = vpop.f32.mrf.mxu0  ;;  %v8129_v22 = vor.u32 %v9095_v43, %v8128_v63  ;;  %1586 = vst [vmem:[#allocation3 + $0x6d0] sm:$0xf] %v1516_v10 }
 0x2a3   : > { %5658 = vmatmul.bf16.gmra.mxu3 %v8097_v24  ;;  %v5801_v4 = vadd.f32 %v5800_v30, %v5617_v62  ;;  %v1727_v24 = vpack.c.bf16 %v1657_v12, %v1657_v12  ;;  %v8101_v30 = vor.u32 %v9087_v14, %v8100_v13  ;;  %1587 = vst [vmem:[#allocation3 + $0x6f4] sm:$0xf] %v1517_v18  ;;  %v1241_v18 = vld [vmem:[#allocation2 + $0x1c0] sm:$0xff] }
 0x2a4   : > { %6021 = vmatmul.bf16.gmra.mxu1 %v8069_v42 }
 0x2a5   : > { %1797 = vst [vmem:[#allocation3 + $0x6f8] sm:$0xf] %v1727_v24 }
 0x2a6   : > { %v5619_v35 = vpop.f32.mrf.mxu3  ;;  %1170 = vst [vmem:[#allocation3 + $0x758] sm:$0xf] %v1727_v24  ;;  %v8164_v24 = vld [vmem:[#allocation3 + $0x6c8] sm:$0xf] }
 0x2a7   : > { %v5620_v27 = vadd.f32 %v5619_v35, %v5436_v15  ;;  %v5437_v62 = vpop.f32.mrf.mxu2  ;;  %v8130_v15 = vld [vmem:[#allocation3 + $0x6a4] sm:$0xf0] }
 0x2a8   : > { %v5438_v42 = vadd.f32 %v5437_v62, %v10352_v58  ;;  %v8133_v2 = vor.u32 %v9091_v57, %v8130_v15  ;;  %v1310_v62 = vpack.c.bf16 %v1240_v53, %v1240_v53  ;;  %v9104_v57 = vld [vmem:[#allocation3 + $0x6e8] sm:$0xf0]  ;;  %v1311_v15 = vpack.c.bf16 %v1241_v18, %v1241_v18  ;;  %v8138_v53 = vld [vmem:[#allocation3 + $0x6ac] sm:$0xf0] }
 0x2a9   : > { %v5984_v3 = vpop.f32.mrf.mxu1 }
 0x2aa   : > { %v10508_v32 = vadd.f32 %v5984_v3, %v5801_v4  ;;  %v5803_v35 = vpop.f32.mrf.mxu0  ;;  %1380 = vst [vmem:[#allocation3 + $0x75c] sm:$0xf] %v1310_v62 }
 0x2ab   : > { %v5804_v28 = vadd.f32 %v5803_v35, %v5620_v27  ;;  %v1031_v27 = vld [vmem:[#allocation2 + $0x1aa] sm:$0xff]  ;;  %v1659_v35 = vld [vmem:[#allocation2 + $0x1b2] sm:$0xff]  ;;  %1381 = vst [vmem:[#allocation3 + $0x780] sm:$0xf] %v1311_v15 }
 0x2ac   : > { %5479 = vmatmul.bf16.gmra.mxu2 %v8129_v22  ;;  %5842 = vmatmul.bf16.gmra.mxu0 %v8101_v30  ;;  %v1101_v14 = vpack.c.bf16 %v1031_v27, %v1031_v27  ;;  %v1449_v22 = vld [vmem:[#allocation2 + $0x1b1] sm:$0xff] }
 0x2ad   : > { %v9092_v27 = vld [vmem:[#allocation3 + $0x68c] sm:$0xf] }
 0x2ae   : > { %v5621_v56 = vpop.f32.mrf.mxu3  ;;  %1171 = vst [vmem:[#allocation3 + $0x77c] sm:$0xf] %v1101_v14  ;;  %v8141_v62 = vor.u32 %v9092_v27, %v8138_v53  ;;  %v8172_v53 = vld [vmem:[#allocation3 + $0x6d0] sm:$0xf] }
 0x2af   : > { %v5622_v4 = vadd.f32 %v5621_v56, %v5438_v42  ;;  %v5440_v43 = vpop.f32.mrf.mxu2  ;;  %v1448_v42 = vld [vmem:[#allocation2 + $0x1a9] sm:$0xff]  ;;  %v9096_v56 = vld [vmem:[#allocation3 + $0x6a8] sm:$0xf0]  ;;  %1798 = vst [vmem:[#allocation3 + $0x71c] sm:$0xf] %v1101_v14 }
 0x2b0   : > { %v5441_v33 = vadd.f32 %v5440_v43, %v10358_v41  ;;  %v1518_v30 = vpack.c.bf16 %v1448_v42, %v1448_v42  ;;  %v1519_v41 = vpack.c.bf16 %v1449_v22, %v1449_v22  ;;  %v9100_v43 = vld [vmem:[#allocation3 + $0x6cc] sm:$0xf]  ;;  %v1242_v14 = vld [vmem:[#allocation2 + $0x1c8] sm:$0xff] }
 0x2b1   : > { %v5987_v58 = vpop.f32.mrf.mxu1 }
 0x2b2   : > { %v10511_v63 = vadd.f32 %v5987_v58, %v5804_v28  ;;  %v5805_v10 = vpop.f32.mrf.mxu0  ;;  %v8165_v58 = vor.u32 %v9104_v57, %v8164_v24  ;;  %1588 = vst [vmem:[#allocation3 + $0x718] sm:$0xf] %v1518_v30 }
 0x2b3   : > { %5663 = vmatmul.bf16.gmra.mxu3 %v8133_v2  ;;  %v5806_v3 = vadd.f32 %v5805_v10, %v5622_v4  ;;  %v1729_v2 = vpack.c.bf16 %v1659_v35, %v1659_v35  ;;  %v8137_v10 = vor.u32 %v9096_v56, %v8136_v20  ;;  %1589 = vst [vmem:[#allocation3 + $0x73c] sm:$0xf] %v1519_v41  ;;  %v1243_v41 = vld [vmem:[#allocation2 + $0x1d0] sm:$0xff] }
 0x2b4   : > { %6026 = vmatmul.bf16.gmra.mxu1 %v8105_v11 }
 0x2b5   : > { %1799 = vst [vmem:[#allocation3 + $0x740] sm:$0xf] %v1729_v2 }
 0x2b6   : > { %v5624_v12 = vpop.f32.mrf.mxu3  ;;  %1172 = vst [vmem:[#allocation3 + $0x7a0] sm:$0xf] %v1729_v2  ;;  %v8200_v2 = vld [vmem:[#allocation3 + $0x710] sm:$0xf] }
 0x2b7   : > { %v5625_v13 = vadd.f32 %v5624_v12, %v5441_v33  ;;  %v5442_v4 = vpop.f32.mrf.mxu2  ;;  %v8166_v33 = vld [vmem:[#allocation3 + $0x6ec] sm:$0xf0] }
 0x2b8   : > { %v5443_v11 = vadd.f32 %v5442_v4, %v10364_v46  ;;  %v8169_v22 = vor.u32 %v9100_v43, %v8166_v33  ;;  %v1312_v4 = vpack.c.bf16 %v1242_v14, %v1242_v14  ;;  %v9113_v43 = vld [vmem:[#allocation3 + $0x730] sm:$0xf0]  ;;  %v1313_v33 = vpack.c.bf16 %v1243_v41, %v1243_v41 }
 0x2b9   : > { %v5989_v59 = vpop.f32.mrf.mxu1  ;;  %v9101_v14 = vld [vmem:[#allocation3 + $0x6d4] sm:$0xf] }
 0x2ba   : > { %v10514_v28 = vadd.f32 %v5989_v59, %v5806_v3  ;;  %v5808_v12 = vpop.f32.mrf.mxu0  ;;  %1382 = vst [vmem:[#allocation3 + $0x7a4] sm:$0xf] %v1312_v4 }
 0x2bb   : > { %v5809_v42 = vadd.f32 %v5808_v12, %v5625_v13  ;;  %v1033_v13 = vld [vmem:[#allocation2 + $0x1ba] sm:$0xff]  ;;  %v1661_v12 = vld [vmem:[#allocation2 + $0x1c2] sm:$0xff]  ;;  %1383 = vst [vmem:[#allocation3 + $0x7c8] sm:$0xf] %v1313_v33 }
 0x2bc   : > { %5484 = vmatmul.bf16.gmra.mxu2 %v8165_v58  ;;  %5847 = vmatmul.bf16.gmra.mxu0 %v8137_v10  ;;  %v1103_v56 = vpack.c.bf16 %v1033_v13, %v1033_v13  ;;  %v1451_v58 = vld [vmem:[#allocation2 + $0x1c1] sm:$0xff] }
 0x2bd   : > { %v9255_v33 = vld [vmem:[%s10920_s2 + $0x1c8] sm:$0xff] }
 0x2be   : > { %v5626_v18 = vpop.f32.mrf.mxu3  ;;  %1173 = vst [vmem:[#allocation3 + $0x7c4] sm:$0xf] %v1103_v56  ;;  %6282 = vmatpush.bf16.msra.mxu3 %v9255_v33 }
 0x2bf   : > { %v5627_v3 = vadd.f32 %v5626_v18, %v5443_v11  ;;  %v5445_v57 = vpop.f32.mrf.mxu2  ;;  %v1450_v11 = vld [vmem:[#allocation2 + $0x1b9] sm:$0xff]  ;;  %1800 = vst [vmem:[#allocation3 + $0x764] sm:$0xf] %v1103_v56 }
 0x2c0   : > { %v5446_v15 = vadd.f32 %v5445_v57, %v10370_v0  ;;  %v1520_v10 = vpack.c.bf16 %v1450_v11, %v1450_v11  ;;  %v9105_v18 = vld [vmem:[#allocation3 + $0x6f0] sm:$0xf0]  ;;  %v1521_v0 = vpack.c.bf16 %v1451_v58, %v1451_v58  ;;  %v8201_v57 = vor.u32 %v9113_v43, %v8200_v2 }
 0x2c1   : > { %v5992_v46 = vpop.f32.mrf.mxu1 }
 0x2c2   : > { %v10517_v24 = vadd.f32 %v5992_v46, %v5809_v42  ;;  %v5810_v30 = vpop.f32.mrf.mxu0  ;;  %1590 = vst [vmem:[#allocation3 + $0x760] sm:$0xf] %v1520_v10 }
 0x2c3   : > { %5668 = vmatmul.bf16.gmra.mxu3 %v8169_v22  ;;  %v5811_v59 = vadd.f32 %v5810_v30, %v5627_v3  ;;  %v9247_v3 = vld [vmem:[%s10920_s2 + $0x188] sm:$0xff]  ;;  %v8202_v30 = vld [vmem:[#allocation3 + $0x734] sm:$0xf0]  ;;  %1591 = vst [vmem:[#allocation3 + $0x784] sm:$0xf] %v1521_v0 }
 0x2c4   : > { %6031 = vmatmul.bf16.gmra.mxu1 %v8141_v62  ;;  %v1731_v62 = vpack.c.bf16 %v1661_v12, %v1661_v12  ;;  %6098 = vmatpush.bf16.msra.mxu2 %v9247_v3  ;;  %v8236_v3 = vld [vmem:[#allocation3 + $0x758] sm:$0xf] }
 0x2c6   : > { %v5629_v35 = vpop.f32.mrf.mxu3  ;;  %1801 = vst [vmem:[#allocation3 + $0x788] sm:$0xf] %v1731_v62 }
 0x2c7   : > { %v5630_v20 = vadd.f32 %v5629_v35, %v5446_v15  ;;  %v5447_v22 = vpop.f32.mrf.mxu2  ;;  %v9109_v15 = vld [vmem:[#allocation3 + $0x714] sm:$0xf]  ;;  %v8173_v35 = vor.u32 %v9105_v18, %v8172_v53  ;;  %1174 = vst [vmem:[#allocation3 + $0x7e8] sm:$0xf] %v1731_v62  ;;  %v1035_v53 = vld [vmem:[#allocation2 + $0x1ca] sm:$0xff] }
 0x2c8   : > { %v5448_v46 = vadd.f32 %v5447_v22, %v10382_v21  ;;  %v8205_v4 = vor.u32 %v9109_v15, %v8202_v30  ;;  %v1244_v18 = vld [vmem:[#allocation2 + $0x1d8] sm:$0xff]  ;;  %v9122_v22 = vld [vmem:[#allocation3 + $0x778] sm:$0xf0]  ;;  %v9263_v62 = vld [vmem:[%s10920_s2 + $0x208] sm:$0xff] }
 0x2c9   : > { %v5994_v27 = vpop.f32.mrf.mxu1  ;;  %v1245_v15 = vld [vmem:[#allocation2 + $0x1e0] sm:$0xff]  ;;  %v1314_v30 = vpack.c.bf16 %v1244_v18, %v1244_v18  ;;  %6466 = vmatpush.bf16.msra.mxu0 %v9263_v62  ;;  %v8210_v62 = vld [vmem:[#allocation3 + $0x73c] sm:$0xf0] }
 0x2ca   : > { %v10520_v42 = vadd.f32 %v5994_v27, %v5811_v59  ;;  %v5813_v13 = vpop.f32.mrf.mxu0  ;;  %v8174_v59 = vld [vmem:[#allocation3 + $0x6f4] sm:$0xf0] }
 0x2cb   : > { %v5814_v11 = vadd.f32 %v5813_v13, %v5630_v20  ;;  %v8177_v21 = vor.u32 %v9101_v14, %v8174_v59  ;;  %v1453_v13 = vld [vmem:[#allocation2 + $0x1d1] sm:$0xff]  ;;  %1384 = vst [vmem:[#allocation3 + $0x7ec] sm:$0xf] %v1314_v30 }
 0x2cc   : > { %5489 = vmatmul.bf16.gmra.mxu2 %v8201_v57  ;;  %5852 = vmatmul.bf16.gmra.mxu0 %v8173_v35  ;;  %v1105_v57 = vpack.c.bf16 %v1035_v53, %v1035_v53  ;;  %v1452_v35 = vld [vmem:[#allocation2 + $0x1c9] sm:$0xff]  ;;  %v1663_v14 = vld [vmem:[#allocation2 + $0x1d2] sm:$0xff] }
 0x2ce   : > { %v5631_v41 = vpop.f32.mrf.mxu3  ;;  %1175 = vst [vmem:[#allocation3 + $0x80c] sm:$0xf] %v1105_v57 }
 0x2cf   : > { %v5632_v58 = vadd.f32 %v5631_v41, %v5448_v46  ;;  %v5450_v10 = vpop.f32.mrf.mxu2  ;;  %v9270_v46 = vld [vmem:[%s10922_s4] sm:$0xff]  ;;  %1802 = vst [vmem:[#allocation3 + $0x7ac] sm:$0xf] %v1105_v57  ;;  %v1246_v57 = vld [vmem:[#allocation2 + $0x1e8] sm:$0xff] }
 0x2d0   : > { %v5451_v20 = vadd.f32 %v5450_v10, %v10394_v17  ;;  %v1315_v17 = vpack.c.bf16 %v1245_v15, %v1245_v15  ;;  %v8208_v41 = vld [vmem:[#allocation3 + $0x718] sm:$0xf]  ;;  %6882 = vmatpush.bf16.msra.mxu1 %v9270_v46  ;;  %v9110_v15 = vld [vmem:[#allocation3 + $0x71c] sm:$0xf] }
 0x2d1   : > { %v5997_v2 = vpop.f32.mrf.mxu1  ;;  %v8213_v30 = vor.u32 %v9110_v15, %v8210_v62  ;;  %v8244_v62 = vld [vmem:[#allocation3 + $0x760] sm:$0xf] }
 0x2d2   : > { %v10529_v43 = vadd.f32 %v5997_v2, %v5814_v11  ;;  %v5815_v56 = vpop.f32.mrf.mxu0  ;;  %v9114_v11 = vld [vmem:[#allocation3 + $0x738] sm:$0xf0]  ;;  %1385 = vst [vmem:[#allocation3 + $0x810] sm:$0xf] %v1315_v17  ;;  %v1733_v2 = vpack.c.bf16 %v1663_v14, %v1663_v14 }
 0x2d3   : > { %5673 = vmatmul.bf16.gmra.mxu3 %v8205_v4  ;;  %v5816_v27 = vadd.f32 %v5815_v56, %v5632_v58  ;;  %v1522_v58 = vpack.c.bf16 %v1452_v35, %v1452_v35  ;;  %v1523_v4 = vpack.c.bf16 %v1453_v13, %v1453_v13  ;;  %v9118_v56 = vld [vmem:[#allocation3 + $0x75c] sm:$0xf]  ;;  %v8209_v53 = vor.u32 %v9114_v11, %v8208_v41 }
 0x2d4   : > { %6036 = vmatmul.bf16.gmra.mxu1 %v8177_v21  ;;  %1803 = vst [vmem:[#allocation3 + $0x7d0] sm:$0xf] %v1733_v2 }
 0x2d5   : > { %1592 = vst [vmem:[#allocation3 + $0x7a8] sm:$0xf] %v1522_v58 }
 0x2d6   : > { %v5634_v12 = vpop.f32.mrf.mxu3  ;;  %1593 = vst [vmem:[#allocation3 + $0x7cc] sm:$0xf] %v1523_v4  ;;  %v1247_v4 = vld [vmem:[#allocation2 + $0x1f0] sm:$0xff] }
 0x2d7   : > { %v5635_v0 = vadd.f32 %v5634_v12, %v5451_v20  ;;  %v5452_v21 = vpop.f32.mrf.mxu2  ;;  %v8237_v20 = vor.u32 %v9122_v22, %v8236_v3  ;;  %v8238_v12 = vld [vmem:[#allocation3 + $0x77c] sm:$0xf0]  ;;  %1176 = vst [vmem:[#allocation3 + $0x830] sm:$0xf] %v1733_v2 }
 0x2d8   : > { %v5453_v10 = vadd.f32 %v5452_v21, %v10397_v8  ;;  %v8241_v13 = vor.u32 %v9118_v56, %v8238_v12  ;;  %v1316_v21 = vpack.c.bf16 %v1246_v57, %v1246_v57  ;;  %v8272_v2 = vld [vmem:[#allocation3 + $0x7a0] sm:$0xf]  ;;  %v9131_v56 = vld [vmem:[#allocation3 + $0x7c0] sm:$0xf0]  ;;  %v1317_v12 = vpack.c.bf16 %v1247_v4, %v1247_v4  ;;  %v8246_v57 = vld [vmem:[#allocation3 + $0x784] sm:$0xf0] }
 0x2d9   : > { %v5999_v59 = vpop.f32.mrf.mxu1 }
 0x2da   : > { %v10538_v33 = vadd.f32 %v5999_v59, %v5816_v27  ;;  %v5818_v18 = vpop.f32.mrf.mxu0  ;;  %1386 = vst [vmem:[#allocation3 + $0x834] sm:$0xf] %v1316_v21 }
 0x2db   : > { %v5819_v35 = vadd.f32 %v5818_v18, %v5635_v0  ;;  %v1037_v0 = vld [vmem:[#allocation2 + $0x1da] sm:$0xff]  ;;  %v1665_v18 = vld [vmem:[#allocation2 + $0x1e2] sm:$0xff]  ;;  %1387 = vst [vmem:[#allocation3 + $0x858] sm:$0xf] %v1317_v12 }
 0x2dc   : > { %5494 = vmatmul.bf16.gmra.mxu2 %v8237_v20  ;;  %5857 = vmatmul.bf16.gmra.mxu0 %v8209_v53  ;;  %v1107_v58 = vpack.c.bf16 %v1037_v0, %v1037_v0  ;;  %v1455_v20 = vld [vmem:[#allocation2 + $0x1e1] sm:$0xff]  ;;  %v9119_v0 = vld [vmem:[#allocation3 + $0x764] sm:$0xf] }
 0x2dd   : > { %v8249_v21 = vor.u32 %v9119_v0, %v8246_v57  ;;  %v8280_v57 = vld [vmem:[#allocation3 + $0x7a8] sm:$0xf] }
 0x2de   : > { %v5636_v46 = vpop.f32.mrf.mxu3  ;;  %1177 = vst [vmem:[#allocation3 + $0x854] sm:$0xf] %v1107_v58 }
 0x2df   : > { %v5637_v27 = vadd.f32 %v5636_v46, %v5453_v10  ;;  %v5455_v22 = vpop.f32.mrf.mxu2  ;;  %v1454_v10 = vld [vmem:[#allocation2 + $0x1d9] sm:$0xff]  ;;  %v9123_v46 = vld [vmem:[#allocation3 + $0x780] sm:$0xf0]  ;;  %1804 = vst [vmem:[#allocation3 + $0x7f4] sm:$0xf] %v1107_v58 }
 0x2e0   : > { %v5456_v17 = vadd.f32 %v5455_v22, %v9997_v38  ;;  %v1524_v53 = vpack.c.bf16 %v1454_v10, %v1454_v10  ;;  %v1525_v38 = vpack.c.bf16 %v1455_v20, %v1455_v20  ;;  %v9127_v22 = vld [vmem:[#allocation3 + $0x7a4] sm:$0xf]  ;;  %v1248_v58 = vld [vmem:[#allocation2 + $0x1f8] sm:$0xff] }
 0x2e1   : > { %v6002_v8 = vpop.f32.mrf.mxu1 }
 0x2e2   : > { %v10541_v3 = vadd.f32 %v6002_v8, %v5819_v35  ;;  %v5820_v14 = vpop.f32.mrf.mxu0  ;;  %v8273_v8 = vor.u32 %v9131_v56, %v8272_v2  ;;  %1594 = vst [vmem:[#allocation3 + $0x7f0] sm:$0xf] %v1524_v53 }
 0x2e3   : > { %5678 = vmatmul.bf16.gmra.mxu3 %v8241_v13  ;;  %v5821_v41 = vadd.f32 %v5820_v14, %v5637_v27  ;;  %v1735_v13 = vpack.c.bf16 %v1665_v18, %v1665_v18  ;;  %v8245_v14 = vor.u32 %v9123_v46, %v8244_v62  ;;  %1595 = vst [vmem:[#allocation3 + $0x814] sm:$0xf] %v1525_v38  ;;  %v1249_v38 = vld [vmem:[#allocation2 + $0x200] sm:$0xff] }
 0x2e4   : > { %6041 = vmatmul.bf16.gmra.mxu1 %v8213_v30 }
 0x2e5   : > { %1805 = vst [vmem:[#allocation3 + $0x818] sm:$0xf] %v1735_v13 }
 0x2e6   : > { %v5639_v59 = vpop.f32.mrf.mxu3  ;;  %1178 = vst [vmem:[#allocation3 + $0x878] sm:$0xf] %v1735_v13  ;;  %v8308_v13 = vld [vmem:[#allocation3 + $0x7e8] sm:$0xf] }
 0x2e7   : > { %v5640_v11 = vadd.f32 %v5639_v59, %v5456_v17  ;;  %v5457_v27 = vpop.f32.mrf.mxu2  ;;  %v8274_v17 = vld [vmem:[#allocation3 + $0x7c4] sm:$0xf0] }
 0x2e8   : > { %v5458_v30 = vadd.f32 %v5457_v27, %v10015_v7  ;;  %v8277_v20 = vor.u32 %v9127_v22, %v8274_v17  ;;  %v1318_v27 = vpack.c.bf16 %v1248_v58, %v1248_v58  ;;  %v9140_v22 = vld [vmem:[#allocation3 + $0x808] sm:$0xf0]  ;;  %v1319_v17 = vpack.c.bf16 %v1249_v38, %v1249_v38  ;;  %v8282_v38 = vld [vmem:[#allocation3 + $0x7cc] sm:$0xf0] }
 0x2e9   : > { %v6004_v15 = vpop.f32.mrf.mxu1  ;;  %v9128_v58 = vld [vmem:[#allocation3 + $0x7ac] sm:$0xf] }
 0x2ea   : > { %v10544_v35 = vadd.f32 %v6004_v15, %v5821_v41  ;;  %v5823_v59 = vpop.f32.mrf.mxu0  ;;  %1388 = vst [vmem:[#allocation3 + $0x87c] sm:$0xf] %v1318_v27  ;;  %v8285_v27 = vor.u32 %v9128_v58, %v8282_v38  ;;  %v8316_v38 = vld [vmem:[#allocation3 + $0x7f0] sm:$0xf] }
 0x2eb   : > { %v5824_v10 = vadd.f32 %v5823_v59, %v5640_v11  ;;  %v1039_v11 = vld [vmem:[#allocation2 + $0x1ea] sm:$0xff]  ;;  %v1667_v59 = vld [vmem:[#allocation2 + $0x1f2] sm:$0xff]  ;;  %1389 = vst [vmem:[#allocation3 + $0x8a0] sm:$0xf] %v1319_v17 }
 0x2ec   : > { %10956 = vst [vmem:[#allocation38_spill] sm:$0xff] %v10544_v35  ;;  %5499 = vmatmul.bf16.gmra.mxu2 %v8273_v8  ;;  %5862 = vmatmul.bf16.gmra.mxu0 %v8245_v14  ;;  %v1109_v46 = vpack.c.bf16 %v1039_v11, %v1039_v11  ;;  %v1457_v8 = vld [vmem:[#allocation2 + $0x1f1] sm:$0xff] }
 0x2ee   : > { %v5641_v4 = vpop.f32.mrf.mxu3  ;;  %1179 = vst [vmem:[#allocation3 + $0x89c] sm:$0xf] %v1109_v46 }
 0x2ef   : > { %v5642_v41 = vadd.f32 %v5641_v4, %v5458_v30  ;;  %v5460_v56 = vpop.f32.mrf.mxu2  ;;  %v1456_v30 = vld [vmem:[#allocation2 + $0x1e9] sm:$0xff]  ;;  %v9132_v4 = vld [vmem:[#allocation3 + $0x7c8] sm:$0xf0]  ;;  %1806 = vst [vmem:[#allocation3 + $0x83c] sm:$0xf] %v1109_v46 }
 0x2f0   : > { %v5461_v12 = vadd.f32 %v5460_v56, %v10040_v25  ;;  %v1526_v14 = vpack.c.bf16 %v1456_v30, %v1456_v30  ;;  %v1527_v25 = vpack.c.bf16 %v1457_v8, %v1457_v8  ;;  %v8309_v56 = vor.u32 %v9140_v22, %v8308_v13  ;;  %v1250_v46 = vld [vmem:[#allocation2 + $0x208] sm:$0xff] }
 0x2f1   : > { %v6007_v7 = vpop.f32.mrf.mxu1 }
 0x2f2   : > { %v10547_v2 = vadd.f32 %v6007_v7, %v5824_v10  ;;  %v5825_v53 = vpop.f32.mrf.mxu0  ;;  %1596 = vst [vmem:[#allocation3 + $0x838] sm:$0xf] %v1526_v14  ;;  %v10961_v14 = vld [vmem:[#allocation8_spill] sm:$0xff] }
 0x2f3   : > { %5683 = vmatmul.bf16.gmra.mxu3 %v8277_v20  ;;  %v5826_v15 = vadd.f32 %v5825_v53, %v5642_v41  ;;  %v1737_v20 = vpack.c.bf16 %v1667_v59, %v1667_v59  ;;  %v8310_v53 = vld [vmem:[#allocation3 + $0x80c] sm:$0xf0]  ;;  %1597 = vst [vmem:[#allocation3 + $0x85c] sm:$0xf] %v1527_v25 }
 0x2f4   : > { %10957 = vst [vmem:[#allocation39_spill] sm:$0xff] %v10547_v2  ;;  %6046 = vmatmul.bf16.gmra.mxu1 %v8249_v21  ;;  %v10959_v21 = vld [vmem:[#allocation7_spill] sm:$0xff] }
 0x2f5   : > { %1807 = vst [vmem:[#allocation3 + $0x860] sm:$0xf] %v1737_v20 }
 0x2f6   : > { %v5644_v18 = vpop.f32.mrf.mxu3  ;;  %1180 = vst [vmem:[#allocation3 + $0x8c0] sm:$0xf] %v1737_v20  ;;  %v8344_v20 = vld [vmem:[#allocation3 + $0x830] sm:$0xf] }
 0x2f7   : > { %v5645_v62 = vadd.f32 %v5644_v18, %v5461_v12  ;;  %v5462_v41 = vpop.f32.mrf.mxu2  ;;  %v9136_v12 = vld [vmem:[#allocation3 + $0x7ec] sm:$0xf]  ;;  %v8281_v18 = vor.u32 %v9132_v4, %v8280_v57 }
 0x2f8   : > { %v5463_v7 = vadd.f32 %v5462_v41, %v10959_v21  ;;  %v8313_v8 = vor.u32 %v9136_v12, %v8310_v53  ;;  %v1251_v21 = vld [vmem:[#allocation2 + $0x210] sm:$0xff]  ;;  %v1459_v12 = vld [vmem:[#allocation2 + $0x201] sm:$0xff]  ;;  %v9149_v53 = vld [vmem:[#allocation3 + $0x850] sm:$0xf0] }
 0x2f9   : > { %v6009_v0 = vpop.f32.mrf.mxu1 }
 0x2fa   : > { %v10550_v10 = vadd.f32 %v6009_v0, %v5826_v15  ;;  %v5828_v11 = vpop.f32.mrf.mxu0 }
 0x2fb   : > { %v5829_v2 = vadd.f32 %v5828_v11, %v5645_v62  ;;  %v1041_v62 = vld [vmem:[#allocation2 + $0x1fa] sm:$0xff]  ;;  %v1669_v11 = vld [vmem:[#allocation2 + $0x202] sm:$0xff] }
 0x2fc   : > { %10958 = vst [vmem:[#allocation40_spill] sm:$0xff] %v10550_v10  ;;  %5504 = vmatmul.bf16.gmra.mxu2 %v8309_v56  ;;  %5867 = vmatmul.bf16.gmra.mxu0 %v8281_v18  ;;  %v1111_v41 = vpack.c.bf16 %v1041_v62, %v1041_v62  ;;  %v1458_v56 = vld [vmem:[#allocation2 + $0x1f9] sm:$0xff] }
 0x2fd   : > { %v1528_v18 = vpack.c.bf16 %v1458_v56, %v1458_v56  ;;  %v8318_v56 = vld [vmem:[#allocation3 + $0x814] sm:$0xf0] }
 0x2fe   : > { %v5646_v30 = vpop.f32.mrf.mxu3  ;;  %1181 = vst [vmem:[#allocation3 + $0x8e4] sm:$0xf] %v1111_v41 }
 0x2ff   : > { %v5647_v15 = vadd.f32 %v5646_v30, %v5463_v7  ;;  %v5465_v22 = vpop.f32.mrf.mxu2  ;;  %v1320_v7 = vpack.c.bf16 %v1250_v46, %v1250_v46  ;;  %v9141_v30 = vld [vmem:[#allocation3 + $0x810] sm:$0xf0]  ;;  %1598 = vst [vmem:[#allocation3 + $0x880] sm:$0xf] %v1528_v18  ;;  %v9246_v18 = vld [vmem:[%s10920_s2 + $0x180] sm:$0xff] }
 0x300   : > { %v5466_v59 = vadd.f32 %v5465_v22, %v10961_v14  ;;  %v10963_v22 = vld [vmem:[#allocation9_spill] sm:$0xff]  ;;  %v8317_v62 = vor.u32 %v9141_v30, %v8316_v38  ;;  %1808 = vst [vmem:[#allocation3 + $0x884] sm:$0xf] %v1111_v41  ;;  %6099 = vmatpush.bf16.msra.mxu2 %v9246_v18 }
 0x301   : > { %v6012_v17 = vpop.f32.mrf.mxu1  ;;  %1390 = vst [vmem:[#allocation3 + $0x8c4] sm:$0xf] %v1320_v7  ;;  %v1252_v30 = vld [vmem:[#allocation2 + $0x218] sm:$0xff] }
 0x302   : > { %v10553_v13 = vadd.f32 %v6012_v17, %v5829_v2  ;;  %v5830_v0 = vpop.f32.mrf.mxu0  ;;  %v1321_v2 = vpack.c.bf16 %v1251_v21, %v1251_v21  ;;  %v1739_v17 = vpack.c.bf16 %v1669_v11, %v1669_v11  ;;  %v9137_v21 = vld [vmem:[#allocation3 + $0x7f4] sm:$0xf] }
 0x303   : > { %5688 = vmatmul.bf16.gmra.mxu3 %v8313_v8  ;;  %v5831_v4 = vadd.f32 %v5830_v0, %v5647_v15  ;;  %v1529_v8 = vpack.c.bf16 %v1459_v12, %v1459_v12  ;;  %v9145_v0 = vld [vmem:[#allocation3 + $0x834] sm:$0xf]  ;;  %v8321_v7 = vor.u32 %v9137_v21, %v8318_v56  ;;  %v1671_v21 = vld [vmem:[#allocation2 + $0x212] sm:$0xff] }
 0x304   : > { %10960 = vst [vmem:[#allocation7_spill] sm:$0xff] %v10553_v13  ;;  %6051 = vmatmul.bf16.gmra.mxu1 %v8285_v27  ;;  %v10965_v11 = vld [vmem:[#allocation10_spill] sm:$0xff] }
 0x305   : > { %1391 = vst [vmem:[#allocation3 + $0x8e8] sm:$0xf] %v1321_v2 }
 0x306   : > { %v5649_v57 = vpop.f32.mrf.mxu3  ;;  %1599 = vst [vmem:[#allocation3 + $0x8a4] sm:$0xf] %v1529_v8 }
 0x307   : > { %v5650_v25 = vadd.f32 %v5649_v57, %v5466_v59  ;;  %v5467_v15 = vpop.f32.mrf.mxu2  ;;  %v8345_v59 = vor.u32 %v9149_v53, %v8344_v20  ;;  %v8346_v57 = vld [vmem:[#allocation3 + $0x854] sm:$0xf0]  ;;  %1809 = vst [vmem:[#allocation3 + $0x8a8] sm:$0xf] %v1739_v17 }
 0x308   : > { %v5468_v14 = vadd.f32 %v5467_v15, %v10963_v22  ;;  %v8349_v12 = vor.u32 %v9145_v0, %v8346_v57  ;;  %1182 = vst [vmem:[#allocation3 + $0x908] sm:$0xf] %v1739_v17  ;;  %v1253_v17 = vld [vmem:[#allocation2 + $0x220] sm:$0xff]  ;;  %v1322_v22 = vpack.c.bf16 %v1252_v30, %v1252_v30 }
 0x309   : > { %v6014_v58 = vpop.f32.mrf.mxu1  ;;  %v8380_v0 = vld [vmem:[#allocation3 + $0x878] sm:$0xf]  ;;  %v9158_v57 = vld [vmem:[#allocation3 + $0x898] sm:$0xf0] }
 0x30a   : > { %v10556_v27 = vadd.f32 %v6014_v58, %v5831_v4  ;;  %v5833_v46 = vpop.f32.mrf.mxu0  ;;  %1392 = vst [vmem:[#allocation3 + $0x90c] sm:$0xf] %v1322_v22 }
 0x30b   : > { %v5834_v10 = vadd.f32 %v5833_v46, %v5650_v25 }
 0x30c   : > { %10962 = vst [vmem:[#allocation8_spill] sm:$0xff] %v10556_v27  ;;  %5509 = vmatmul.bf16.gmra.mxu2 %v8345_v59  ;;  %5872 = vmatmul.bf16.gmra.mxu0 %v8317_v62  ;;  %v1461_v59 = vld [vmem:[#allocation2 + $0x211] sm:$0xff]  ;;  %v1323_v62 = vpack.c.bf16 %v1253_v17, %v1253_v17 }
 0x30e   : > { %v5651_v13 = vpop.f32.mrf.mxu3  ;;  %1393 = vst [vmem:[#allocation3 + $0x930] sm:$0xf] %v1323_v62 }
 0x30f   : > { %v5652_v4 = vadd.f32 %v5651_v13, %v5468_v14  ;;  %v5470_v53 = vpop.f32.mrf.mxu2  ;;  %v9254_v13 = vld [vmem:[%s10920_s2 + $0x1c0] sm:$0xff]  ;;  %v1460_v14 = vld [vmem:[#allocation2 + $0x209] sm:$0xff] }
 0x310   : > { %v5471_v25 = vadd.f32 %v5470_v53, %v10965_v11  ;;  %6283 = vmatpush.bf16.msra.mxu3 %v9254_v13  ;;  %v1530_v46 = vpack.c.bf16 %v1460_v14, %v1460_v14  ;;  %v9262_v53 = vld [vmem:[%s10920_s2 + $0x200] sm:$0xff]  ;;  %v1741_v11 = vpack.c.bf16 %v1671_v21, %v1671_v21 }
 0x311   : > { %v6017_v2 = vpop.f32.mrf.mxu1  ;;  %6467 = vmatpush.bf16.msra.mxu0 %v9262_v53  ;;  %v9146_v14 = vld [vmem:[#allocation3 + $0x83c] sm:$0xf] }
 0x312   : > { %v10559_v20 = vadd.f32 %v6017_v2, %v5834_v10  ;;  %v5835_v41 = vpop.f32.mrf.mxu0  ;;  %v1043_v10 = vld [vmem:[#allocation2 + $0x20a] sm:$0xff]  ;;  %v1531_v2 = vpack.c.bf16 %v1461_v59, %v1461_v59  ;;  %1600 = vst [vmem:[#allocation3 + $0x8c8] sm:$0xf] %v1530_v46 }
 0x313   : > { %5693 = vmatmul.bf16.gmra.mxu3 %v8349_v12  ;;  %v5836_v38 = vadd.f32 %v5835_v41, %v5652_v4  ;;  %v1113_v15 = vpack.c.bf16 %v1043_v10, %v1043_v10  ;;  %v8352_v12 = vld [vmem:[#allocation3 + $0x838] sm:$0xf]  ;;  %v8381_v41 = vor.u32 %v9158_v57, %v8380_v0  ;;  %v8382_v10 = vld [vmem:[#allocation3 + $0x89c] sm:$0xf0]  ;;  %1811 = vst [vmem:[#allocation3 + $0x8f0] sm:$0xf] %v1741_v11 }
 0x314   : > { %10964 = vst [vmem:[#allocation9_spill] sm:$0xff] %v10559_v20  ;;  %6056 = vmatmul.bf16.gmra.mxu1 %v8321_v7  ;;  %v9150_v7 = vld [vmem:[#allocation3 + $0x858] sm:$0xf0]  ;;  %v10969_v46 = vld [vmem:[#allocation12_spill] sm:$0xff] }
 0x315   : > { %1183 = vst [vmem:[#allocation3 + $0x92c] sm:$0xf] %v1113_v15  ;;  %v8353_v30 = vor.u32 %v9150_v7, %v8352_v12  ;;  %v9708_v20 = vld [vmem:[%s10169_s13] sm:$0xff]  }
 0x316   : > { %v5654_v58 = vpop.f32.mrf.mxu3  ;;  %1601 = vst [vmem:[#allocation3 + $0x8ec] sm:$0xf] %v1531_v2 }
 0x317   : > { %v5655_v8 = vadd.f32 %v5654_v58, %v5471_v25  ;;  %v5472_v18 = vpop.f32.mrf.mxu2  ;;  %v10967_v25 = vld [vmem:[#allocation11_spill] sm:$0xff]  ;;  %1810 = vst [vmem:[#allocation3 + $0x8cc] sm:$0xf] %v1113_v15 }
 0x318   : > { %v5473_v13 = vadd.f32 %v5472_v18, %v10967_v25  ;;  %v9154_v58 = vld [vmem:[#allocation3 + $0x87c] sm:$0xf]  ;;  %1184 = vst [vmem:[#allocation3 + $0x950] sm:$0xf] %v1741_v11  ;;  %v1254_v15 = vld [vmem:[#allocation2 + $0x228] sm:$0xff] }
 0x319   : > { %v6019_v56 = vpop.f32.mrf.mxu1  ;;  %v8385_v22 = vor.u32 %v9154_v58, %v8382_v10  ;;  %v1462_v58 = vld [vmem:[#allocation2 + $0x219] sm:$0xff]  ;;  %v1463_v10 = vld [vmem:[#allocation2 + $0x221] sm:$0xff] }
 0x31a   : > { %v10568_v4 = vadd.f32 %v6019_v56, %v5836_v38  ;;  %v5838_v17 = vpop.f32.mrf.mxu0  ;;  %v8354_v38 = vld [vmem:[#allocation3 + $0x85c] sm:$0xf0] }
 0x31b   : > { %v5839_v56 = vadd.f32 %v5838_v17, %v5655_v8  ;;  %v8357_v62 = vor.u32 %v9146_v14, %v8354_v38  ;;  %v1045_v8 = vld [vmem:[#allocation2 + $0x21a] sm:$0xff]  ;;  %v8416_v11 = vld [vmem:[#allocation3 + $0x8c0] sm:$0xf]  ;;  %v1532_v14 = vpack.c.bf16 %v1462_v58, %v1462_v58  ;;  %v9155_v58 = vld [vmem:[#allocation3 + $0x884] sm:$0xf] }
 0x31c   : > { %10966 = vst [vmem:[#allocation10_spill] sm:$0xff] %v10568_v4  ;;  %5514 = vmatmul.bf16.gmra.mxu2 %v8381_v41  ;;  %5877 = vmatmul.bf16.gmra.mxu0 %v8353_v30  ;;  %v1115_v25 = vpack.c.bf16 %v1045_v8, %v1045_v8  ;;  %v1324_v41 = vpack.c.bf16 %v1254_v15, %v1254_v15  ;;  %v9167_v30 = vld [vmem:[#allocation3 + $0x8e0] sm:$0xf0]  ;;  %v1673_v38 = vld [vmem:[#allocation2 + $0x222] sm:$0xff]  ;;  %v8418_v8 = vld [vmem:[#allocation3 + $0x8e4] sm:$0xf0] }
 0x31d   : > { %1602 = vst [vmem:[#allocation3 + $0x910] sm:$0xf] %v1532_v14 }
 0x31e   : > { %v5656_v59 = vpop.f32.mrf.mxu3  ;;  %1185 = vst [vmem:[#allocation3 + $0x974] sm:$0xf] %v1115_v25 }
 0x31f   : > { %v5657_v4 = vadd.f32 %v5656_v59, %v5473_v13  ;;  %v5475_v21 = vpop.f32.mrf.mxu2  ;;  %v1255_v13 = vld [vmem:[#allocation2 + $0x230] sm:$0xff]  ;;  %1394 = vst [vmem:[#allocation3 + $0x954] sm:$0xf] %v1324_v41 }
 0x320   : > { %v5476_v12 = vadd.f32 %v5475_v21, %v10969_v46  ;;  %v1325_v17 = vpack.c.bf16 %v1255_v13, %v1255_v13  ;;  %v1743_v21 = vpack.c.bf16 %v1673_v38, %v1673_v38  ;;  %v10971_v46 = vld [vmem:[#allocation13_spill] sm:$0xff]  ;;  %1812 = vst [vmem:[#allocation3 + $0x914] sm:$0xf] %v1115_v25 }
 0x321   : > { %v6022_v0 = vpop.f32.mrf.mxu1 }
 0x322   : > { %v10574_v57 = vadd.f32 %v6022_v0, %v5839_v56  ;;  %v5840_v7 = vpop.f32.mrf.mxu0  ;;  %v8388_v56 = vld [vmem:[#allocation3 + $0x880] sm:$0xf]  ;;  %1395 = vst [vmem:[#allocation3 + $0x978] sm:$0xf] %v1325_v17 }
 0x323   : > { %5698 = vmatmul.bf16.gmra.mxu3 %v8385_v22  ;;  %v5841_v53 = vadd.f32 %v5840_v7, %v5657_v4  ;;  %v9159_v22 = vld [vmem:[#allocation3 + $0x8a0] sm:$0xf0]  ;;  %v8417_v7 = vor.u32 %v9167_v30, %v8416_v11  ;;  %1813 = vst [vmem:[#allocation3 + $0x938] sm:$0xf] %v1743_v21 }
 0x324   : > { %10968 = vst [vmem:[#allocation11_spill] sm:$0xff] %v10574_v57  ;;  %6061 = vmatmul.bf16.gmra.mxu1 %v8357_v62  ;;  %v1533_v62 = vpack.c.bf16 %v1463_v10, %v1463_v10  ;;  %v8389_v15 = vor.u32 %v9159_v22, %v8388_v56  ;;  %v8390_v57 = vld [vmem:[#allocation3 + $0x8a4] sm:$0xf0]  ;;  %v9415_v10 = vunpack.c.h.bf16 %v9708_v20  ;;  %v9633_v56 = vld [vmem:[%s10169_s13 + $0x8] sm:$0xff]  }
 0x325   : > { %v8393_v11 = vor.u32 %v9155_v58, %v8390_v57  ;;  %1186 = vst [vmem:[#allocation3 + $0x998] sm:$0xf] %v1743_v21  ;;  %v9418_v22 = vunpack.c.l.bf16 %v9633_v56 }
 0x326   : > { %v5659_v2 = vpop.f32.mrf.mxu3  ;;  %1603 = vst [vmem:[#allocation3 + $0x934] sm:$0xf] %v1533_v62  ;;  %v1047_v62 = vld [vmem:[#allocation2 + $0x22a] sm:$0xff]  ;;  %v1326_v21 = vpack.c.bf16 %v9415_v10, %v9415_v10 }
 0x327   : > { %v5660_v18 = vadd.f32 %v5659_v2, %v5476_v12  ;;  %v5477_v0 = vpop.f32.mrf.mxu2  ;;  %v9163_v2 = vld [vmem:[#allocation3 + $0x8c4] sm:$0xf]  ;;  %552 = vst [vmem:[#allocation2 + $0x238] sm:$0xff] %v9415_v10  ;;  %v1117_v57 = vpack.c.bf16 %v1047_v62, %v1047_v62  ;;  %v9172_v10 = vld [vmem:[#allocation3 + $0x90c] sm:$0xf] }
 0x328   : > { %v5478_v12 = vadd.f32 %v5477_v0, %v10971_v46  ;;  %v8421_v17 = vor.u32 %v9163_v2, %v8418_v8  ;;  %v1464_v0 = vld [vmem:[#allocation2 + $0x229] sm:$0xff]  ;;  %553 = vst [vmem:[#allocation2 + $0x240] sm:$0xff] %v9418_v22  ;;  %v1327_v2 = vpack.c.bf16 %v9418_v22, %v9418_v22 }
 0x329   : > { %v6024_v59 = vpop.f32.mrf.mxu1  ;;  %1187 = vst [vmem:[#allocation3 + $0x9bc] sm:$0xf] %v1117_v57 }
 0x32a   : > { %v10577_v4 = vadd.f32 %v6024_v59, %v5841_v53  ;;  %v5843_v13 = vpop.f32.mrf.mxu0  ;;  %v10973_v59 = vld [vmem:[#allocation14_spill] sm:$0xff]  ;;  %1396 = vst [vmem:[#allocation3 + $0x99c] sm:$0xf] %v1326_v21 }
 0x32b   : > { %v5844_v53 = vadd.f32 %v5843_v13, %v5660_v18  ;;  %1397 = vst [vmem:[#allocation3 + $0x9c0] sm:$0xf] %v1327_v2 }
 0x32c   : > { %10970 = vst [vmem:[#allocation12_spill] sm:$0xff] %v10577_v4  ;;  %5519 = vmatmul.bf16.gmra.mxu2 %v8417_v7  ;;  %5882 = vmatmul.bf16.gmra.mxu0 %v8389_v15  ;;  %v9176_v7 = vld [vmem:[#allocation3 + $0x928] sm:$0xf0]  ;;  %v1534_v15 = vpack.c.bf16 %v1464_v0, %v1464_v0  ;;  %v9419_v4 = vunpack.c.h.bf16 %v9633_v56 }
 0x32d   : > { %v9164_v0 = vld [vmem:[#allocation3 + $0x8cc] sm:$0xf]  ;;  %1814 = vst [vmem:[#allocation3 + $0x95c] sm:$0xf] %v1117_v57 }
 0x32e   : > { %v5661_v27 = vpop.f32.mrf.mxu3  ;;  %v1465_v8 = vld [vmem:[#allocation2 + $0x231] sm:$0xff]  ;;  %1604 = vst [vmem:[#allocation3 + $0x958] sm:$0xf] %v1534_v15 }
 0x32f   : > { %v5662_v41 = vadd.f32 %v5661_v27, %v5478_v12  ;;  %v5480_v38 = vpop.f32.mrf.mxu2  ;;  %v8452_v12 = vld [vmem:[#allocation3 + $0x908] sm:$0xf]  ;;  %554 = vst [vmem:[#allocation2 + $0x248] sm:$0xff] %v9419_v4  ;;  %v1819_v4 = vld [vmem:[#allocation2 + $0x38] sm:$0xff] }
 0x330   : > { %v5481_v20 = vadd.f32 %v5480_v38, %v10973_v59  ;;  %v1675_v13 = vld [vmem:[#allocation2 + $0x232] sm:$0xff]  ;;  %v10974_v59 = vld [vmem:[#allocation15_spill] sm:$0xff] }
 0x331   : > { %v6027_v30 = vpop.f32.mrf.mxu1  ;;  %v1745_v38 = vpack.c.bf16 %v1675_v13, %v1675_v13  ;;  %v10976_v13 = vld [vmem:[#allocation16_spill] sm:$0xff] }
 0x332   : > { %v10581_v14 = vadd.f32 %v6027_v30, %v5844_v53  ;;  %v5845_v18 = vpop.f32.mrf.mxu0  ;;  %v8424_v53 = vld [vmem:[#allocation3 + $0x8c8] sm:$0xf] }
 0x333   : > { %5703 = vmatmul.bf16.gmra.mxu3 %v8421_v17  ;;  %v5846_v27 = vadd.f32 %v5845_v18, %v5662_v41  ;;  %v9168_v17 = vld [vmem:[#allocation3 + $0x8e8] sm:$0xf0]  ;;  %v8453_v18 = vor.u32 %v9176_v7, %v8452_v12  ;;  %1815 = vst [vmem:[#allocation3 + $0x980] sm:$0xf] %v1745_v38 }
 0x334   : > { %10972 = vst [vmem:[#allocation13_spill] sm:$0xff] %v10581_v14  ;;  %6066 = vmatmul.bf16.gmra.mxu1 %v8393_v11  ;;  %v1535_v11 = vpack.c.bf16 %v1465_v8, %v1465_v8  ;;  %v8425_v22 = vor.u32 %v9168_v17, %v8424_v53  ;;  %v8426_v14 = vld [vmem:[#allocation3 + $0x8ec] sm:$0xf0] }
 0x335   : > { %v8429_v2 = vor.u32 %v9164_v0, %v8426_v14 }
 0x336   : > { %v5664_v25 = vpop.f32.mrf.mxu3  ;;  %1605 = vst [vmem:[#allocation3 + $0x97c] sm:$0xf] %v1535_v11  ;;  %v8488_v11 = vld [vmem:[#allocation3 + $0x950] sm:$0xf]  ;;  %v1467_v38 = vld [vmem:[#allocation2 + $0x241] sm:$0xff] }
 0x337   : > { %v5665_v46 = vadd.f32 %v5664_v25, %v5481_v20  ;;  %v5482_v41 = vpop.f32.mrf.mxu2  ;;  %v8454_v25 = vld [vmem:[#allocation3 + $0x92c] sm:$0xf0] }
 0x338   : > { %v5483_v20 = vadd.f32 %v5482_v41, %v10974_v59  ;;  %v8457_v21 = vor.u32 %v9172_v10, %v8454_v25  ;;  %v9185_v41 = vld [vmem:[#allocation3 + $0x970] sm:$0xf0]  ;;  %v1537_v10 = vpack.c.bf16 %v1467_v38, %v1467_v38  ;;  %v1889_v25 = vpack.c.bf16 %v1819_v4, %v1819_v4 }
 0x339   : > { %v6029_v58 = vpop.f32.mrf.mxu1 }
 0x33a   : > { %v10585_v30 = vadd.f32 %v6029_v58, %v5846_v27  ;;  %v5848_v62 = vpop.f32.mrf.mxu0  ;;  %1607 = vst [vmem:[#allocation3 + $0x9c4] sm:$0xf] %v1537_v10 }
 0x33b   : > { %v5849_v8 = vadd.f32 %v5848_v62, %v5665_v46  ;;  %v1466_v46 = vld [vmem:[#allocation2 + $0x239] sm:$0xff]  ;;  %1959 = vst [vmem:[#allocation3 + $0x3c] sm:$0xf] %v1889_v25 }
 0x33c   : > { %5524 = vmatmul.bf16.gmra.mxu2 %v8453_v18  ;;  %5887 = vmatmul.bf16.gmra.mxu0 %v8425_v22  ;;  %v1536_v14 = vpack.c.bf16 %v1466_v46, %v1466_v46  ;;  %v8460_v18 = vld [vmem:[#allocation3 + $0x910] sm:$0xf]  ;;  %v8490_v46 = vld [vmem:[#allocation3 + $0x974] sm:$0xf0] }
 0x33d   : > { %v2029_v22 = vld [vmem:[#allocation2 + $0x39] sm:$0xff] }
 0x33e   : > { %v5666_v35 = vpop.f32.mrf.mxu3  ;;  %v1676_v62 = vld [vmem:[#allocation2 + $0x23a] sm:$0xff]  ;;  %1606 = vst [vmem:[#allocation3 + $0x9a0] sm:$0xf] %v1536_v14 }
 0x33f   : > { %v5667_v27 = vadd.f32 %v5666_v35, %v5483_v20  ;;  %v5485_v15 = vpop.f32.mrf.mxu2  ;;  %v1818_v35 = vld [vmem:[#allocation2 + $0x30] sm:$0xff]  ;;  %v10980_v25 = vld [vmem:[#allocation18_spill] sm:$0xff] }
 0x340   : > { %v5486_v58 = vadd.f32 %v5485_v15, %v10976_v13  ;;  %v1888_v59 = vpack.c.bf16 %v1818_v35, %v1818_v35  ;;  %v2028_v20 = vld [vmem:[#allocation2 + $0x31] sm:$0xff]  ;;  %v1746_v15 = vpack.c.bf16 %v1676_v62, %v1676_v62 }
 0x341   : > { %v6032_v12 = vpop.f32.mrf.mxu1  ;;  %v10978_v13 = vld [vmem:[#allocation17_spill] sm:$0xff] }
 0x342   : > { %v10588_v7 = vadd.f32 %v6032_v12, %v5849_v8  ;;  %v5850_v53 = vpop.f32.mrf.mxu0  ;;  %v9177_v8 = vld [vmem:[#allocation3 + $0x930] sm:$0xf0]  ;;  %1958 = vst [vmem:[#allocation3 + $0x18] sm:$0xf] %v1888_v59 }
 0x343   : > { %5708 = vmatmul.bf16.gmra.mxu3 %v8457_v21  ;;  %v10591_v17 = vadd.f32 %v5850_v53, %v5667_v27  ;;  %v2098_v27 = vpack.c.bf16 %v2028_v20, %v2028_v20  ;;  %v1677_v21 = vld [vmem:[#allocation2 + $0x242] sm:$0xff]  ;;  %v8489_v53 = vor.u32 %v9185_v41, %v8488_v11  ;;  %v8461_v35 = vor.u32 %v9177_v8, %v8460_v18 }
 0x344   : > { %10975 = vst [vmem:[#allocation14_spill] sm:$0xff] %v10588_v7  ;;  %6071 = vmatmul.bf16.gmra.mxu1 %v8429_v2  ;;  %v2099_v2 = vpack.c.bf16 %v2029_v22, %v2029_v22  ;;  %v1747_v38 = vpack.c.bf16 %v1677_v21, %v1677_v21  ;;  %v9173_v7 = vld [vmem:[#allocation3 + $0x914] sm:$0xf] }
 0x345   : > { %2168 = vst [vmem:[#allocation3 + $0x1c] sm:$0xf] %v2098_v27 }
 0x346   : > { %v5669_v56 = vpop.f32.mrf.mxu3  ;;  %2169 = vst [vmem:[#allocation3 + $0x40] sm:$0xf] %v2099_v2  ;;  %v1821_v2 = vld [vmem:[#allocation2 + $0x48] sm:$0xff] }
 0x347   : > { %v5670_v57 = vadd.f32 %v5669_v56, %v5486_v58  ;;  %v5487_v12 = vpop.f32.mrf.mxu2  ;;  %v9181_v56 = vld [vmem:[#allocation3 + $0x954] sm:$0xf]  ;;  %1816 = vst [vmem:[#allocation3 + $0x9a4] sm:$0xf] %v1746_v15  ;;  %v8524_v15 = vld [vmem:[#allocation3 + $0x998] sm:$0xf] }
 0x348   : > { %v5488_v58 = vadd.f32 %v5487_v12, %v10978_v13  ;;  %v8493_v22 = vor.u32 %v9181_v56, %v8490_v46  ;;  %1817 = vst [vmem:[#allocation3 + $0x9c8] sm:$0xf] %v1747_v38  ;;  %v2239_v38 = vld [vmem:[#allocation2 + $0x3a] sm:$0xff] }
 0x349   : > { %v10593_v0 = vpop.f32.mrf.mxu1 }
 0x34a   : > { %10977 = vst [vmem:[#allocation15_spill] sm:$0xff] %v10593_v0  ;;  %v5853_v4 = vpop.f32.mrf.mxu0  ;;  %v8462_v0 = vld [vmem:[#allocation3 + $0x934] sm:$0xf0] }
 0x34b   : > { %v5854_v20 = vadd.f32 %v5853_v4, %v5670_v57  ;;  %v8465_v59 = vor.u32 %v9173_v7, %v8462_v0  ;;  %v1820_v57 = vld [vmem:[#allocation2 + $0x40] sm:$0xff]  ;;  %v2031_v0 = vld [vmem:[#allocation2 + $0x49] sm:$0xff] }
 0x34c   : > { %5529 = vmatmul.bf16.gmra.mxu2 %v8489_v53  ;;  %5892 = vmatmul.bf16.gmra.mxu0 %v8461_v35  ;;  %v1890_v13 = vpack.c.bf16 %v1820_v57, %v1820_v57  ;;  %v2030_v7 = vld [vmem:[#allocation2 + $0x41] sm:$0xff]  ;;  %v2101_v46 = vpack.c.bf16 %v2031_v0, %v2031_v0  ;;  %v2238_v35 = vld [vmem:[#allocation2 + $0x32] sm:$0xff] }
 0x34d   : > { %v9194_v53 = vld [vmem:[#allocation3 + $0x9b8] sm:$0xf0]  ;;  %v2100_v56 = vpack.c.bf16 %v2030_v7, %v2030_v7  ;;  %v8498_v7 = vld [vmem:[#allocation3 + $0x97c] sm:$0xf0] }
 0x34e   : > { %v5671_v14 = vpop.f32.mrf.mxu3  ;;  %1960 = vst [vmem:[#allocation3 + $0x60] sm:$0xf] %v1890_v13 }
 0x34f   : > { %v5672_v10 = vadd.f32 %v5671_v14, %v5488_v58  ;;  %v5490_v18 = vpop.f32.mrf.mxu2  ;;  %v1891_v58 = vpack.c.bf16 %v1821_v2, %v1821_v2  ;;  %v8496_v14 = vld [vmem:[#allocation3 + $0x958] sm:$0xf]  ;;  %2170 = vst [vmem:[#allocation3 + $0x64] sm:$0xf] %v2100_v56  ;;  %v9182_v2 = vld [vmem:[#allocation3 + $0x95c] sm:$0xf] }
 0x350   : > { %v5491_v62 = vadd.f32 %v5490_v18, %v10980_v25  ;;  %v8525_v25 = vor.u32 %v9194_v53, %v8524_v15  ;;  %2171 = vst [vmem:[#allocation3 + $0x88] sm:$0xf] %v2101_v46  ;;  %v10983_v53 = vld [vmem:[#allocation20_spill] sm:$0xff] }
 0x351   : > { %v6037_v11 = vpop.f32.mrf.mxu1  ;;  %1961 = vst [vmem:[#allocation3 + $0x84] sm:$0xf] %v1891_v58  ;;  %v8501_v58 = vor.u32 %v9182_v2, %v8498_v7  ;;  %v9195_v2 = vld [vmem:[#allocation3 + $0x9c0] sm:$0xf0] }
 0x352   : > { %v10596_v41 = vadd.f32 %v6037_v11, %v5854_v20  ;;  %v5855_v8 = vpop.f32.mrf.mxu0  ;;  %v9186_v20 = vld [vmem:[#allocation3 + $0x978] sm:$0xf0] }
 0x353   : > { %5713 = vmatmul.bf16.gmra.mxu3 %v8493_v22  ;;  %v10599_v21 = vadd.f32 %v5855_v8, %v5672_v10  ;;  %v2308_v10 = vpack.c.bf16 %v2238_v35, %v2238_v35  ;;  %v2309_v22 = vpack.c.bf16 %v2239_v38, %v2239_v38  ;;  %v10981_v11 = vld [vmem:[#allocation19_spill] sm:$0xff] }
 0x354   : > { %10979 = vst [vmem:[#allocation16_spill] sm:$0xff] %v10596_v41  ;;  %6076 = vmatmul.bf16.gmra.mxu1 %v8465_v59  ;;  %v8526_v8 = vld [vmem:[#allocation3 + $0x9bc] sm:$0xf0] }
 0x355   : > { %2378 = vst [vmem:[#allocation3 + $0x20] sm:$0xf] %v2308_v10  ;;  %v1822_v10 = vld [vmem:[#allocation2 + $0x50] sm:$0xff] }
 0x356   : > { %v5674_v27 = vpop.f32.mrf.mxu3  ;;  %2379 = vst [vmem:[#allocation3 + $0x44] sm:$0xf] %v2309_v22  ;;  %v2032_v22 = vld [vmem:[#allocation2 + $0x51] sm:$0xff] }
 0x357   : > { %v5675_v12 = vadd.f32 %v5674_v27, %v5491_v62  ;;  %v5492_v59 = vpop.f32.mrf.mxu2  ;;  %v9190_v62 = vld [vmem:[#allocation3 + $0x99c] sm:$0xf]  ;;  %v8497_v27 = vor.u32 %v9186_v20, %v8496_v14 }
 0x358   : > { %v5493_v18 = vadd.f32 %v5492_v59, %v10981_v11  ;;  %v8529_v35 = vor.u32 %v9190_v62, %v8526_v8  ;;  %v2033_v62 = vld [vmem:[#allocation2 + $0x59] sm:$0xff]  ;;  %v2102_v8 = vpack.c.bf16 %v2032_v22, %v2032_v22 }
 0x359   : > { %v10601_v4 = vpop.f32.mrf.mxu1  ;;  %v2103_v7 = vpack.c.bf16 %v2033_v62, %v2033_v62  ;;  %v8534_v62 = vld [vmem:[#allocation3 + $0x9c4] sm:$0xf0] }
 0x35a   : > { %v5858_v57 = vpop.f32.mrf.mxu0  ;;  %2172 = vst [vmem:[#allocation3 + $0xac] sm:$0xf] %v2102_v8 }
 0x35b   : > { %v5859_v41 = vadd.f32 %v5858_v57, %v5675_v12  ;;  %v1823_v12 = vld [vmem:[#allocation2 + $0x58] sm:$0xff]  ;;  %v8532_v57 = vld [vmem:[#allocation3 + $0x9a0] sm:$0xf]  ;;  %2173 = vst [vmem:[#allocation3 + $0xd0] sm:$0xf] %v2103_v7 }
 0x35c   : > { %5534 = vmatmul.bf16.gmra.mxu2 %v8525_v25  ;;  %5897 = vmatmul.bf16.gmra.mxu0 %v8497_v27  ;;  %v1893_v25 = vpack.c.bf16 %v1823_v12, %v1823_v12  ;;  %v2240_v27 = vld [vmem:[#allocation2 + $0x42] sm:$0xff] }
 0x35d   : > { %v7318_v12 = vld [vmem:[#allocation3 + $0x3c] sm:$0xf0] }
 0x35e   : > { %v5676_v0 = vpop.f32.mrf.mxu3  ;;  %1963 = vst [vmem:[#allocation3 + $0xcc] sm:$0xf] %v1893_v25 }
 0x35f   : > { %v5677_v13 = vadd.f32 %v5676_v0, %v5493_v18  ;;  %v5495_v15 = vpop.f32.mrf.mxu2  ;;  %v1892_v18 = vpack.c.bf16 %v1822_v10, %v1822_v10  ;;  %v8886_v10 = vld [vmem:[#allocation3 + $0x1c] sm:$0xf] }
 0x360   : > { %v5496_v46 = vadd.f32 %v5495_v15, %v10983_v53  ;;  %v10986_v53 = vld [vmem:[#allocation21_spill] sm:$0xff] }
 0x361   : > { %v6042_v56 = vpop.f32.mrf.mxu1  ;;  %1962 = vst [vmem:[#allocation3 + $0xa8] sm:$0xf] %v1892_v18 }
 0x362   : > { %v10604_v38 = vadd.f32 %v6042_v56, %v5859_v41  ;;  %v5860_v14 = vpop.f32.mrf.mxu0  ;;  %v2241_v41 = vld [vmem:[#allocation2 + $0x4a] sm:$0xff] }
 0x363   : > { %5718 = vmatmul.bf16.gmra.mxu3 %v8529_v35  ;;  %v10607_v59 = vadd.f32 %v5860_v14, %v5677_v13  ;;  %v7316_v35 = vld [vmem:[#allocation3 + $0x18] sm:$0xf]  ;;  %v2310_v13 = vpack.c.bf16 %v2240_v27, %v2240_v27  ;;  %v2311_v56 = vpack.c.bf16 %v2241_v41, %v2241_v41  ;;  %v8533_v14 = vor.u32 %v9195_v2, %v8532_v57 }
 0x364   : > { %10982 = vst [vmem:[#allocation17_spill] sm:$0xff] %v10604_v38  ;;  %6081 = vmatmul.bf16.gmra.mxu1 %v8501_v58  ;;  %v8890_v58 = vld [vmem:[#allocation3 + $0x38] sm:$0xf0]  ;;  %v9191_v38 = vld [vmem:[#allocation3 + $0x9a4] sm:$0xf]  ;;  %v7321_v27 = vor.u32 %v8886_v10, %v7318_v12  ;;  %v10988_v2 = vld [vmem:[#allocation22_spill] sm:$0xff] }
 0x365   : > { %10984 = vst [vmem:[#allocation18_spill] sm:$0xff] %v10607_v59  ;;  %v8537_v25 = vor.u32 %v9191_v38, %v8534_v62  ;;  %v7352_v10 = vld [vmem:[#allocation3 + $0x60] sm:$0xf]  ;;  %v8899_v12 = vld [vmem:[#allocation3 + $0x80] sm:$0xf0] }
 0x366   : > { %v5679_v20 = vpop.f32.mrf.mxu3  ;;  %2380 = vst [vmem:[#allocation3 + $0x68] sm:$0xf] %v2310_v13  ;;  %v1824_v13 = vld [vmem:[#allocation2 + $0x60] sm:$0xff] }
 0x367   : > { %v5680_v11 = vadd.f32 %v5679_v20, %v5496_v46  ;;  %v5497_v15 = vpop.f32.mrf.mxu2  ;;  %v7317_v20 = vor.u32 %v8890_v58, %v7316_v35  ;;  %2381 = vst [vmem:[#allocation3 + $0x8c] sm:$0xf] %v2311_v56  ;;  %v2034_v56 = vld [vmem:[#allocation2 + $0x61] sm:$0xff] }
 0x368   : > { %v5498_v46 = vadd.f32 %v5497_v15, %v10986_v53  ;;  %v1894_v53 = vpack.c.bf16 %v1824_v13, %v1824_v13  ;;  %v2104_v38 = vpack.c.bf16 %v2034_v56, %v2034_v56  ;;  %v7354_v13 = vld [vmem:[#allocation3 + $0x84] sm:$0xf0] }
 0x369   : > { %v10609_v0 = vpop.f32.mrf.mxu1 }
 0x36a   : > { %10985 = vst [vmem:[#allocation19_spill] sm:$0xff] %v10609_v0  ;;  %v5863_v22 = vpop.f32.mrf.mxu0 }
 0x36b   : > { %v5864_v59 = vadd.f32 %v5863_v22, %v5680_v11  ;;  %v1825_v11 = vld [vmem:[#allocation2 + $0x68] sm:$0xff]  ;;  %1964 = vst [vmem:[#allocation3 + $0xf0] sm:$0xf] %v1894_v53 }
 0x36c   : > { %5902 = vmatmul.bf16.gmra.mxu0 %v8533_v14  ;;  %6100 = vmatmul.bf16.vlgmr.msra.gmra.mxu2 %v7317_v20  ;;  %v2035_v14 = vld [vmem:[#allocation2 + $0x69] sm:$0xff]  ;;  %v2242_v20 = vld [vmem:[#allocation2 + $0x52] sm:$0xff]  ;;  %2174 = vst [vmem:[#allocation3 + $0xf4] sm:$0xf] %v2104_v38 }
 0x36d   : > { %v2105_v22 = vpack.c.bf16 %v2035_v14, %v2035_v14 }
 0x36e   : > { %v5681_v0 = vpop.f32.mrf.mxu3 }
 0x36f   : > { %v5682_v18 = vadd.f32 %v5681_v0, %v5498_v46  ;;  %v5500_v57 = vpop.f32.mrf.mxu2  ;;  %v1895_v46 = vpack.c.bf16 %v1825_v11, %v1825_v11  ;;  %2175 = vst [vmem:[#allocation3 + $0x118] sm:$0xf] %v2105_v22  ;;  %v1826_v22 = vld [vmem:[#allocation2 + $0x70] sm:$0xff] }
 0x370   : > { %v5501_v7 = vadd.f32 %v5500_v57, %v10988_v2  ;;  %v10991_v2 = vld [vmem:[#allocation23_spill] sm:$0xff] }
 0x371   : > { %v6047_v8 = vpop.f32.mrf.mxu1  ;;  %1965 = vst [vmem:[#allocation3 + $0x114] sm:$0xf] %v1895_v46 }
 0x372   : > { %v10612_v41 = vadd.f32 %v6047_v8, %v5864_v59  ;;  %v5865_v35 = vpop.f32.mrf.mxu0  ;;  %v2243_v59 = vld [vmem:[#allocation2 + $0x5a] sm:$0xff] }
 0x373   : > { %6284 = vmatmul.bf16.vlgmr.msra.gmra.mxu3 %v7321_v27  ;;  %v10615_v15 = vadd.f32 %v5865_v35, %v5682_v18  ;;  %v7324_v27 = vld [vmem:[#allocation3 + $0x20] sm:$0xf]  ;;  %v2312_v18 = vpack.c.bf16 %v2242_v20, %v2242_v20  ;;  %v2313_v8 = vpack.c.bf16 %v2243_v59, %v2243_v59  ;;  %v7353_v35 = vor.u32 %v8899_v12, %v7352_v10 }
 0x374   : > { %10987 = vst [vmem:[#allocation20_spill] sm:$0xff] %v10612_v41  ;;  %6086 = vmatmul.bf16.gmra.mxu1 %v8537_v25  ;;  %v8891_v25 = vld [vmem:[#allocation3 + $0x40] sm:$0xf0] }
 0x375   : > { %10989 = vst [vmem:[#allocation21_spill] sm:$0xff] %v10615_v15  ;;  %v7325_v11 = vor.u32 %v8891_v25, %v7324_v27  ;;  %v10993_v20 = vld [vmem:[#allocation24_spill] sm:$0xff]  ;;  %v1827_v25 = vld [vmem:[#allocation2 + $0x78] sm:$0xff] }
 0x376   : > { %v5684_v58 = vpop.f32.mrf.mxu3  ;;  %2382 = vst [vmem:[#allocation3 + $0xb0] sm:$0xf] %v2312_v18  ;;  %v2036_v18 = vld [vmem:[#allocation2 + $0x71] sm:$0xff] }
 0x377   : > { %v5685_v0 = vadd.f32 %v5684_v58, %v5501_v7  ;;  %v5502_v57 = vpop.f32.mrf.mxu2  ;;  %v8895_v58 = vld [vmem:[#allocation3 + $0x64] sm:$0xf]  ;;  %2383 = vst [vmem:[#allocation3 + $0xd4] sm:$0xf] %v2313_v8  ;;  %v1896_v8 = vpack.c.bf16 %v1826_v22, %v1826_v22  ;;  %v7390_v22 = vld [vmem:[#allocation3 + $0xcc] sm:$0xf0] }
 0x378   : > { %v5503_v7 = vadd.f32 %v5502_v57, %v10991_v2  ;;  %v7357_v15 = vor.u32 %v8895_v58, %v7354_v13  ;;  %v1897_v57 = vpack.c.bf16 %v1827_v25, %v1827_v25  ;;  %v2037_v2 = vld [vmem:[#allocation2 + $0x79] sm:$0xff]  ;;  %v2245_v58 = vld [vmem:[#allocation2 + $0x6a] sm:$0xff]  ;;  %v8908_v13 = vld [vmem:[#allocation3 + $0xc8] sm:$0xf0] }
 0x379   : > { %v10617_v62 = vpop.f32.mrf.mxu1  ;;  %1966 = vst [vmem:[#allocation3 + $0x138] sm:$0xf] %v1896_v8 }
 0x37a   : > { %10990 = vst [vmem:[#allocation22_spill] sm:$0xff] %v10617_v62  ;;  %v5868_v56 = vpop.f32.mrf.mxu0 }
 0x37b   : > { %v5869_v41 = vadd.f32 %v5868_v56, %v5685_v0  ;;  %v7360_v56 = vld [vmem:[#allocation3 + $0x68] sm:$0xf]  ;;  %1967 = vst [vmem:[#allocation3 + $0x15c] sm:$0xf] %v1897_v57 }
 0x37c   : > { %6105 = vmatmul.bf16.gmra.mxu2 %v7353_v35  ;;  %6468 = vmatmul.bf16.vlgmr.msra.gmra.mxu0 %v7325_v11  ;;  %v2244_v35 = vld [vmem:[#allocation2 + $0x62] sm:$0xff] }
 0x37e   : > { %v5686_v14 = vpop.f32.mrf.mxu3 }
 0x37f   : > { %v5687_v62 = vadd.f32 %v5686_v14, %v5503_v7  ;;  %v5505_v38 = vpop.f32.mrf.mxu2  ;;  %v2106_v7 = vpack.c.bf16 %v2036_v18, %v2036_v18  ;;  %v8900_v14 = vld [vmem:[#allocation3 + $0x88] sm:$0xf0] }
 0x380   : > { %v5506_v59 = vadd.f32 %v5505_v38, %v10993_v20  ;;  %v10996_v20 = vld [vmem:[#allocation25_spill] sm:$0xff]  ;;  %v7361_v25 = vor.u32 %v8900_v14, %v7360_v56  ;;  %v1829_v14 = vld [vmem:[#allocation2 + $0x88] sm:$0xff] }
 0x381   : > { %v6052_v53 = vpop.f32.mrf.mxu1  ;;  %2176 = vst [vmem:[#allocation3 + $0x13c] sm:$0xf] %v2106_v7 }
 0x382   : > { %v10620_v46 = vadd.f32 %v6052_v53, %v5869_v41  ;;  %v5870_v10 = vpop.f32.mrf.mxu0  ;;  %v7388_v41 = vld [vmem:[#allocation3 + $0xa8] sm:$0xf]  ;;  %v2315_v53 = vpack.c.bf16 %v2245_v58, %v2245_v58 }
 0x383   : > { %6289 = vmatmul.bf16.gmra.mxu3 %v7357_v15  ;;  %v10623_v27 = vadd.f32 %v5870_v10, %v5687_v62  ;;  %v2107_v15 = vpack.c.bf16 %v2037_v2, %v2037_v2  ;;  %v2314_v62 = vpack.c.bf16 %v2244_v35, %v2244_v35  ;;  %v7389_v10 = vor.u32 %v8908_v13, %v7388_v41  ;;  %v10998_v35 = vld [vmem:[#allocation26_spill] sm:$0xff] }
 0x384   : > { %10992 = vst [vmem:[#allocation23_spill] sm:$0xff] %v10620_v46 }
 0x385   : > { %10994 = vst [vmem:[#allocation24_spill] sm:$0xff] %v10623_v27 }
 0x386   : > { %v5689_v12 = vpop.f32.mrf.mxu3  ;;  %2177 = vst [vmem:[#allocation3 + $0x160] sm:$0xf] %v2107_v15  ;;  %v1828_v15 = vld [vmem:[#allocation2 + $0x80] sm:$0xff] }
 0x387   : > { %v5690_v0 = vadd.f32 %v5689_v12, %v5506_v59  ;;  %v5507_v38 = vpop.f32.mrf.mxu2  ;;  %v8904_v12 = vld [vmem:[#allocation3 + $0xac] sm:$0xf]  ;;  %2384 = vst [vmem:[#allocation3 + $0xf8] sm:$0xf] %v2314_v62  ;;  %v2038_v62 = vld [vmem:[#allocation2 + $0x81] sm:$0xff] }
 0x388   : > { %v5508_v59 = vadd.f32 %v5507_v38, %v10996_v20  ;;  %2385 = vst [vmem:[#allocation3 + $0x11c] sm:$0xf] %v2315_v53  ;;  %v7393_v27 = vor.u32 %v8904_v12, %v7390_v22  ;;  %v1898_v53 = vpack.c.bf16 %v1828_v15, %v1828_v15  ;;  %v1899_v38 = vpack.c.bf16 %v1829_v14, %v1829_v14  ;;  %v2039_v20 = vld [vmem:[#allocation2 + $0x89] sm:$0xff]  ;;  %v2247_v12 = vld [vmem:[#allocation2 + $0x7a] sm:$0xff] }
 0x389   : > { %v10625_v11 = vpop.f32.mrf.mxu1  ;;  %v8917_v22 = vld [vmem:[#allocation3 + $0x110] sm:$0xf0]  ;;  %v7426_v15 = vld [vmem:[#allocation3 + $0x114] sm:$0xf0] }
 0x38a   : > { %10995 = vst [vmem:[#allocation41_spill] sm:$0xff] %v10625_v11  ;;  %v5873_v18 = vpop.f32.mrf.mxu0 }
 0x38b   : > { %v5874_v46 = vadd.f32 %v5873_v18, %v5690_v0  ;;  %v7396_v18 = vld [vmem:[#allocation3 + $0xb0] sm:$0xf]  ;;  %1968 = vst [vmem:[#allocation3 + $0x180] sm:$0xf] %v1898_v53 }
 0x38c   : > { %6110 = vmatmul.bf16.gmra.mxu2 %v7389_v10  ;;  %6473 = vmatmul.bf16.gmra.mxu0 %v7361_v25  ;;  %v2246_v10 = vld [vmem:[#allocation2 + $0x72] sm:$0xff]  ;;  %1969 = vst [vmem:[#allocation3 + $0x1a4] sm:$0xf] %v1899_v38 }
 0x38e   : > { %v5691_v2 = vpop.f32.mrf.mxu3 }
 0x38f   : > { %v5692_v11 = vadd.f32 %v5691_v2, %v5508_v59  ;;  %v5510_v7 = vpop.f32.mrf.mxu2  ;;  %v2108_v59 = vpack.c.bf16 %v2038_v62, %v2038_v62  ;;  %v8909_v2 = vld [vmem:[#allocation3 + $0xd0] sm:$0xf0] }
 0x390   : > { %v5511_v58 = vadd.f32 %v5510_v7, %v10998_v35  ;;  %v11001_v35 = vld [vmem:[#allocation27_spill] sm:$0xff]  ;;  %v7397_v14 = vor.u32 %v8909_v2, %v7396_v18  ;;  %v1831_v2 = vld [vmem:[#allocation2 + $0x98] sm:$0xff] }
 0x391   : > { %v6057_v8 = vpop.f32.mrf.mxu1  ;;  %2178 = vst [vmem:[#allocation3 + $0x184] sm:$0xf] %v2108_v59 }
 0x392   : > { %v10628_v57 = vadd.f32 %v6057_v8, %v5874_v46  ;;  %v5875_v41 = vpop.f32.mrf.mxu0  ;;  %v7424_v46 = vld [vmem:[#allocation3 + $0xf0] sm:$0xf]  ;;  %v2317_v8 = vpack.c.bf16 %v2247_v12, %v2247_v12 }
 0x393   : > { %6294 = vmatmul.bf16.gmra.mxu3 %v7393_v27  ;;  %v10631_v56 = vadd.f32 %v5875_v41, %v5692_v11  ;;  %v2109_v27 = vpack.c.bf16 %v2039_v20, %v2039_v20  ;;  %v2316_v11 = vpack.c.bf16 %v2246_v10, %v2246_v10  ;;  %v7425_v41 = vor.u32 %v8917_v22, %v7424_v46  ;;  %v11003_v10 = vld [vmem:[#allocation28_spill] sm:$0xff] }
 0x394   : > { %10997 = vst [vmem:[#allocation25_spill] sm:$0xff] %v10628_v57 }
 0x395   : > { %10999 = vst [vmem:[#allocation26_spill] sm:$0xff] %v10631_v56 }
 0x396   : > { %v5694_v13 = vpop.f32.mrf.mxu3  ;;  %2179 = vst [vmem:[#allocation3 + $0x1a8] sm:$0xf] %v2109_v27  ;;  %v1830_v27 = vld [vmem:[#allocation2 + $0x90] sm:$0xff] }
 0x397   : > { %v5695_v0 = vadd.f32 %v5694_v13, %v5511_v58  ;;  %v5512_v7 = vpop.f32.mrf.mxu2  ;;  %v8913_v13 = vld [vmem:[#allocation3 + $0xf4] sm:$0xf]  ;;  %2386 = vst [vmem:[#allocation3 + $0x140] sm:$0xf] %v2316_v11  ;;  %v2040_v11 = vld [vmem:[#allocation2 + $0x91] sm:$0xff] }
 0x398   : > { %v5513_v58 = vadd.f32 %v5512_v7, %v11001_v35  ;;  %2387 = vst [vmem:[#allocation3 + $0x164] sm:$0xf] %v2317_v8  ;;  %v7429_v56 = vor.u32 %v8913_v13, %v7426_v15  ;;  %v1900_v8 = vpack.c.bf16 %v1830_v27, %v1830_v27  ;;  %v1901_v7 = vpack.c.bf16 %v1831_v2, %v1831_v2  ;;  %v2041_v35 = vld [vmem:[#allocation2 + $0x99] sm:$0xff]  ;;  %v2249_v13 = vld [vmem:[#allocation2 + $0x8a] sm:$0xff]  ;;  %v8926_v15 = vld [vmem:[#allocation3 + $0x158] sm:$0xf0] }
 0x399   : > { %v10633_v25 = vpop.f32.mrf.mxu1  ;;  %v7462_v27 = vld [vmem:[#allocation3 + $0x15c] sm:$0xf0] }
 0x39a   : > { %11000 = vst [vmem:[#allocation42_spill] sm:$0xff] %v10633_v25  ;;  %v5878_v62 = vpop.f32.mrf.mxu0 }
 0x39b   : > { %v5879_v57 = vadd.f32 %v5878_v62, %v5695_v0  ;;  %v7432_v62 = vld [vmem:[#allocation3 + $0xf8] sm:$0xf]  ;;  %1970 = vst [vmem:[#allocation3 + $0x1c8] sm:$0xf] %v1900_v8 }
 0x39c   : > { %6115 = vmatmul.bf16.gmra.mxu2 %v7425_v41  ;;  %6478 = vmatmul.bf16.gmra.mxu0 %v7397_v14  ;;  %v2248_v41 = vld [vmem:[#allocation2 + $0x82] sm:$0xff]  ;;  %1971 = vst [vmem:[#allocation3 + $0x1ec] sm:$0xf] %v1901_v7 }
 0x39e   : > { %v5696_v20 = vpop.f32.mrf.mxu3 }
 0x39f   : > { %v5697_v25 = vadd.f32 %v5696_v20, %v5513_v58  ;;  %v5515_v59 = vpop.f32.mrf.mxu2  ;;  %v2110_v58 = vpack.c.bf16 %v2040_v11, %v2040_v11  ;;  %v8918_v20 = vld [vmem:[#allocation3 + $0x118] sm:$0xf0] }
 0x3a0   : > { %v5516_v12 = vadd.f32 %v5515_v59, %v11003_v10  ;;  %v11006_v10 = vld [vmem:[#allocation29_spill] sm:$0xff]  ;;  %v7433_v2 = vor.u32 %v8918_v20, %v7432_v62  ;;  %v1833_v20 = vld [vmem:[#allocation2 + $0xa8] sm:$0xff] }
 0x3a1   : > { %v6062_v53 = vpop.f32.mrf.mxu1  ;;  %2180 = vst [vmem:[#allocation3 + $0x1cc] sm:$0xf] %v2110_v58 }
 0x3a2   : > { %v10636_v38 = vadd.f32 %v6062_v53, %v5879_v57  ;;  %v5880_v46 = vpop.f32.mrf.mxu0  ;;  %v7460_v57 = vld [vmem:[#allocation3 + $0x138] sm:$0xf]  ;;  %v2319_v53 = vpack.c.bf16 %v2249_v13, %v2249_v13 }
 0x3a3   : > { %6299 = vmatmul.bf16.gmra.mxu3 %v7429_v56  ;;  %v10639_v18 = vadd.f32 %v5880_v46, %v5697_v25  ;;  %v2111_v56 = vpack.c.bf16 %v2041_v35, %v2041_v35  ;;  %v2318_v25 = vpack.c.bf16 %v2248_v41, %v2248_v41  ;;  %v7461_v46 = vor.u32 %v8926_v15, %v7460_v57  ;;  %v11008_v41 = vld [vmem:[#allocation30_spill] sm:$0xff] }
 0x3a4   : > { %11002 = vst [vmem:[#allocation27_spill] sm:$0xff] %v10636_v38 }
 0x3a5   : > { %11004 = vst [vmem:[#allocation28_spill] sm:$0xff] %v10639_v18 }
 0x3a6   : > { %v5699_v22 = vpop.f32.mrf.mxu3  ;;  %2181 = vst [vmem:[#allocation3 + $0x1f0] sm:$0xf] %v2111_v56  ;;  %v1832_v56 = vld [vmem:[#allocation2 + $0xa0] sm:$0xff] }
 0x3a7   : > { %v5700_v0 = vadd.f32 %v5699_v22, %v5516_v12  ;;  %v5517_v59 = vpop.f32.mrf.mxu2  ;;  %v8922_v22 = vld [vmem:[#allocation3 + $0x13c] sm:$0xf]  ;;  %2388 = vst [vmem:[#allocation3 + $0x188] sm:$0xf] %v2318_v25 }
 0x3a8   : > { %v5518_v12 = vadd.f32 %v5517_v59, %v11006_v10  ;;  %2389 = vst [vmem:[#allocation3 + $0x1ac] sm:$0xf] %v2319_v53  ;;  %v7465_v18 = vor.u32 %v8922_v22, %v7462_v27  ;;  %v2042_v25 = vld [vmem:[#allocation2 + $0xa1] sm:$0xff]  ;;  %v1902_v53 = vpack.c.bf16 %v1832_v56, %v1832_v56  ;;  %v1903_v59 = vpack.c.bf16 %v1833_v20, %v1833_v20  ;;  %v2043_v10 = vld [vmem:[#allocation2 + $0xa9] sm:$0xff] }
 0x3a9   : > { %v10641_v14 = vpop.f32.mrf.mxu1  ;;  %v2251_v22 = vld [vmem:[#allocation2 + $0x9a] sm:$0xff]  ;;  %v8935_v27 = vld [vmem:[#allocation3 + $0x1a0] sm:$0xf0]  ;;  %v7498_v56 = vld [vmem:[#allocation3 + $0x1a4] sm:$0xf0] }
 0x3aa   : > { %11005 = vst [vmem:[#allocation43_spill] sm:$0xff] %v10641_v14  ;;  %v5883_v11 = vpop.f32.mrf.mxu0 }
 0x3ab   : > { %v5884_v38 = vadd.f32 %v5883_v11, %v5700_v0  ;;  %v7468_v11 = vld [vmem:[#allocation3 + $0x140] sm:$0xf]  ;;  %1972 = vst [vmem:[#allocation3 + $0x210] sm:$0xf] %v1902_v53 }
 0x3ac   : > { %6120 = vmatmul.bf16.gmra.mxu2 %v7461_v46  ;;  %6483 = vmatmul.bf16.gmra.mxu0 %v7433_v2  ;;  %v2250_v46 = vld [vmem:[#allocation2 + $0x92] sm:$0xff]  ;;  %1973 = vst [vmem:[#allocation3 + $0x234] sm:$0xf] %v1903_v59 }
 0x3ae   : > { %v5701_v35 = vpop.f32.mrf.mxu3 }
 0x3af   : > { %v5702_v14 = vadd.f32 %v5701_v35, %v5518_v12  ;;  %v5520_v58 = vpop.f32.mrf.mxu2  ;;  %v2112_v12 = vpack.c.bf16 %v2042_v25, %v2042_v25  ;;  %v8927_v35 = vld [vmem:[#allocation3 + $0x160] sm:$0xf0] }
 0x3b0   : > { %v5521_v13 = vadd.f32 %v5520_v58, %v11008_v41  ;;  %v11011_v41 = vld [vmem:[#allocation31_spill] sm:$0xff]  ;;  %v7469_v20 = vor.u32 %v8927_v35, %v7468_v11  ;;  %v1835_v35 = vld [vmem:[#allocation2 + $0xb8] sm:$0xff] }
 0x3b1   : > { %v6067_v8 = vpop.f32.mrf.mxu1  ;;  %2182 = vst [vmem:[#allocation3 + $0x214] sm:$0xf] %v2112_v12 }
 0x3b2   : > { %v10644_v7 = vadd.f32 %v6067_v8, %v5884_v38  ;;  %v5885_v57 = vpop.f32.mrf.mxu0  ;;  %v7496_v38 = vld [vmem:[#allocation3 + $0x180] sm:$0xf]  ;;  %v2321_v8 = vpack.c.bf16 %v2251_v22, %v2251_v22 }
 0x3b3   : > { %6304 = vmatmul.bf16.gmra.mxu3 %v7465_v18  ;;  %v10647_v62 = vadd.f32 %v5885_v57, %v5702_v14  ;;  %v2113_v18 = vpack.c.bf16 %v2043_v10, %v2043_v10  ;;  %v2320_v14 = vpack.c.bf16 %v2250_v46, %v2250_v46  ;;  %v7497_v57 = vor.u32 %v8935_v27, %v7496_v38  ;;  %v11013_v46 = vld [vmem:[#allocation32_spill] sm:$0xff] }
 0x3b4   : > { %11007 = vst [vmem:[#allocation29_spill] sm:$0xff] %v10644_v7 }
 0x3b5   : > { %11009 = vst [vmem:[#allocation30_spill] sm:$0xff] %v10647_v62 }
 0x3b6   : > { %v5704_v15 = vpop.f32.mrf.mxu3  ;;  %2183 = vst [vmem:[#allocation3 + $0x238] sm:$0xf] %v2113_v18  ;;  %v1834_v18 = vld [vmem:[#allocation2 + $0xb0] sm:$0xff] }
 0x3b7   : > { %v5705_v0 = vadd.f32 %v5704_v15, %v5521_v13  ;;  %v5522_v58 = vpop.f32.mrf.mxu2  ;;  %v8931_v15 = vld [vmem:[#allocation3 + $0x184] sm:$0xf]  ;;  %2390 = vst [vmem:[#allocation3 + $0x1d0] sm:$0xf] %v2320_v14  ;;  %v2044_v14 = vld [vmem:[#allocation2 + $0xb1] sm:$0xff] }
 0x3b8   : > { %v5523_v13 = vadd.f32 %v5522_v58, %v11011_v41  ;;  %2391 = vst [vmem:[#allocation3 + $0x1f4] sm:$0xf] %v2321_v8  ;;  %v7501_v62 = vor.u32 %v8931_v15, %v7498_v56  ;;  %v1904_v8 = vpack.c.bf16 %v1834_v18, %v1834_v18  ;;  %v1905_v58 = vpack.c.bf16 %v1835_v35, %v1835_v35  ;;  %v2045_v41 = vld [vmem:[#allocation2 + $0xb9] sm:$0xff]  ;;  %v2253_v15 = vld [vmem:[#allocation2 + $0xaa] sm:$0xff]  ;;  %v8944_v56 = vld [vmem:[#allocation3 + $0x1e8] sm:$0xf0] }
 0x3b9   : > { %v10649_v2 = vpop.f32.mrf.mxu1  ;;  %v7534_v18 = vld [vmem:[#allocation3 + $0x1ec] sm:$0xf0] }
 0x3ba   : > { %11010 = vst [vmem:[#allocation44_spill] sm:$0xff] %v10649_v2  ;;  %v5888_v25 = vpop.f32.mrf.mxu0 }
 0x3bb   : > { %v5889_v7 = vadd.f32 %v5888_v25, %v5705_v0  ;;  %v7504_v25 = vld [vmem:[#allocation3 + $0x188] sm:$0xf]  ;;  %1974 = vst [vmem:[#allocation3 + $0x258] sm:$0xf] %v1904_v8 }
 0x3bc   : > { %6125 = vmatmul.bf16.gmra.mxu2 %v7497_v57  ;;  %6488 = vmatmul.bf16.gmra.mxu0 %v7469_v20  ;;  %v2252_v57 = vld [vmem:[#allocation2 + $0xa2] sm:$0xff]  ;;  %1975 = vst [vmem:[#allocation3 + $0x27c] sm:$0xf] %v1905_v58 }
 0x3be   : > { %v5706_v10 = vpop.f32.mrf.mxu3 }
 0x3bf   : > { %v5707_v2 = vadd.f32 %v5706_v10, %v5523_v13  ;;  %v5525_v12 = vpop.f32.mrf.mxu2  ;;  %v2114_v13 = vpack.c.bf16 %v2044_v14, %v2044_v14  ;;  %v8936_v10 = vld [vmem:[#allocation3 + $0x1a8] sm:$0xf0] }
 0x3c0   : > { %v5526_v22 = vadd.f32 %v5525_v12, %v11013_v46  ;;  %v11016_v46 = vld [vmem:[#allocation33_spill] sm:$0xff]  ;;  %v7505_v35 = vor.u32 %v8936_v10, %v7504_v25  ;;  %v1837_v10 = vld [vmem:[#allocation2 + $0xc8] sm:$0xff] }
 0x3c1   : > { %v6072_v53 = vpop.f32.mrf.mxu1  ;;  %2184 = vst [vmem:[#allocation3 + $0x25c] sm:$0xf] %v2114_v13 }
 0x3c2   : > { %v10652_v59 = vadd.f32 %v6072_v53, %v5889_v7  ;;  %v5890_v38 = vpop.f32.mrf.mxu0  ;;  %v7532_v7 = vld [vmem:[#allocation3 + $0x1c8] sm:$0xf]  ;;  %v2323_v53 = vpack.c.bf16 %v2253_v15, %v2253_v15 }
 0x3c3   : > { %6309 = vmatmul.bf16.gmra.mxu3 %v7501_v62  ;;  %v10655_v11 = vadd.f32 %v5890_v38, %v5707_v2  ;;  %v2115_v62 = vpack.c.bf16 %v2045_v41, %v2045_v41  ;;  %v2322_v2 = vpack.c.bf16 %v2252_v57, %v2252_v57  ;;  %v7533_v38 = vor.u32 %v8944_v56, %v7532_v7  ;;  %v11018_v57 = vld [vmem:[#allocation34_spill] sm:$0xff] }
 0x3c4   : > { %11012 = vst [vmem:[#allocation31_spill] sm:$0xff] %v10652_v59 }
 0x3c5   : > { %11014 = vst [vmem:[#allocation32_spill] sm:$0xff] %v10655_v11 }
 0x3c6   : > { %v5709_v27 = vpop.f32.mrf.mxu3  ;;  %2185 = vst [vmem:[#allocation3 + $0x280] sm:$0xf] %v2115_v62  ;;  %v1836_v62 = vld [vmem:[#allocation2 + $0xc0] sm:$0xff] }
 0x3c7   : > { %v5710_v0 = vadd.f32 %v5709_v27, %v5526_v22  ;;  %v5527_v12 = vpop.f32.mrf.mxu2  ;;  %v8940_v27 = vld [vmem:[#allocation3 + $0x1cc] sm:$0xf]  ;;  %2392 = vst [vmem:[#allocation3 + $0x218] sm:$0xf] %v2322_v2  ;;  %v2046_v2 = vld [vmem:[#allocation2 + $0xc1] sm:$0xff] }
 0x3c8   : > { %v5528_v22 = vadd.f32 %v5527_v12, %v11016_v46  ;;  %2393 = vst [vmem:[#allocation3 + $0x23c] sm:$0xf] %v2323_v53  ;;  %v7537_v11 = vor.u32 %v8940_v27, %v7534_v18  ;;  %v1906_v53 = vpack.c.bf16 %v1836_v62, %v1836_v62  ;;  %v1907_v12 = vpack.c.bf16 %v1837_v10, %v1837_v10  ;;  %v2047_v46 = vld [vmem:[#allocation2 + $0xc9] sm:$0xff]  ;;  %v2255_v27 = vld [vmem:[#allocation2 + $0xba] sm:$0xff] }
 0x3c9   : > { %v10657_v20 = vpop.f32.mrf.mxu1  ;;  %v8953_v18 = vld [vmem:[#allocation3 + $0x230] sm:$0xf0]  ;;  %v7570_v62 = vld [vmem:[#allocation3 + $0x234] sm:$0xf0] }
 0x3ca   : > { %11015 = vst [vmem:[#allocation45_spill] sm:$0xff] %v10657_v20  ;;  %v5893_v14 = vpop.f32.mrf.mxu0 }
 0x3cb   : > { %v5894_v59 = vadd.f32 %v5893_v14, %v5710_v0  ;;  %v7540_v14 = vld [vmem:[#allocation3 + $0x1d0] sm:$0xf]  ;;  %1976 = vst [vmem:[#allocation3 + $0x2a0] sm:$0xf] %v1906_v53 }
 0x3cc   : > { %6130 = vmatmul.bf16.gmra.mxu2 %v7533_v38  ;;  %6493 = vmatmul.bf16.gmra.mxu0 %v7505_v35  ;;  %v2254_v38 = vld [vmem:[#allocation2 + $0xb2] sm:$0xff]  ;;  %1977 = vst [vmem:[#allocation3 + $0x2c4] sm:$0xf] %v1907_v12 }
 0x3ce   : > { %v5711_v41 = vpop.f32.mrf.mxu3 }
 0x3cf   : > { %v5712_v20 = vadd.f32 %v5711_v41, %v5528_v22  ;;  %v5530_v13 = vpop.f32.mrf.mxu2  ;;  %v2116_v22 = vpack.c.bf16 %v2046_v2, %v2046_v2  ;;  %v8945_v41 = vld [vmem:[#allocation3 + $0x1f0] sm:$0xf0] }
 0x3d0   : > { %v5531_v15 = vadd.f32 %v5530_v13, %v11018_v57  ;;  %v11021_v57 = vld [vmem:[#allocation35_spill] sm:$0xff]  ;;  %v7541_v10 = vor.u32 %v8945_v41, %v7540_v14  ;;  %v1839_v41 = vld [vmem:[#allocation2 + $0xd8] sm:$0xff] }
 0x3d1   : > { %v6077_v8 = vpop.f32.mrf.mxu1  ;;  %2186 = vst [vmem:[#allocation3 + $0x2a4] sm:$0xf] %v2116_v22 }
 0x3d2   : > { %v10660_v58 = vadd.f32 %v6077_v8, %v5894_v59  ;;  %v5895_v7 = vpop.f32.mrf.mxu0  ;;  %v7568_v59 = vld [vmem:[#allocation3 + $0x210] sm:$0xf]  ;;  %v2325_v8 = vpack.c.bf16 %v2255_v27, %v2255_v27 }
 0x3d3   : > { %6314 = vmatmul.bf16.gmra.mxu3 %v7537_v11  ;;  %v10663_v25 = vadd.f32 %v5895_v7, %v5712_v20  ;;  %v2117_v11 = vpack.c.bf16 %v2047_v46, %v2047_v46  ;;  %v2324_v20 = vpack.c.bf16 %v2254_v38, %v2254_v38  ;;  %v7569_v7 = vor.u32 %v8953_v18, %v7568_v59  ;;  %v11023_v38 = vld [vmem:[#allocation36_spill] sm:$0xff] }
 0x3d4   : > { %11017 = vst [vmem:[#allocation33_spill] sm:$0xff] %v10660_v58 }
 0x3d5   : > { %11019 = vst [vmem:[#allocation34_spill] sm:$0xff] %v10663_v25 }
 0x3d6   : > { %v5714_v56 = vpop.f32.mrf.mxu3  ;;  %2187 = vst [vmem:[#allocation3 + $0x2c8] sm:$0xf] %v2117_v11  ;;  %v1838_v11 = vld [vmem:[#allocation2 + $0xd0] sm:$0xff] }
 0x3d7   : > { %v5715_v0 = vadd.f32 %v5714_v56, %v5531_v15  ;;  %v5532_v13 = vpop.f32.mrf.mxu2  ;;  %v8949_v56 = vld [vmem:[#allocation3 + $0x214] sm:$0xf]  ;;  %2394 = vst [vmem:[#allocation3 + $0x260] sm:$0xf] %v2324_v20  ;;  %v2048_v20 = vld [vmem:[#allocation2 + $0xd1] sm:$0xff] }
 0x3d8   : > { %v5533_v15 = vadd.f32 %v5532_v13, %v11021_v57  ;;  %2395 = vst [vmem:[#allocation3 + $0x284] sm:$0xf] %v2325_v8  ;;  %v7573_v25 = vor.u32 %v8949_v56, %v7570_v62  ;;  %v1908_v8 = vpack.c.bf16 %v1838_v11, %v1838_v11  ;;  %v1909_v13 = vpack.c.bf16 %v1839_v41, %v1839_v41  ;;  %v2049_v57 = vld [vmem:[#allocation2 + $0xd9] sm:$0xff]  ;;  %v2257_v56 = vld [vmem:[#allocation2 + $0xca] sm:$0xff]  ;;  %v8962_v62 = vld [vmem:[#allocation3 + $0x278] sm:$0xf0] }
 0x3d9   : > { %v10665_v35 = vpop.f32.mrf.mxu1  ;;  %v7606_v11 = vld [vmem:[#allocation3 + $0x27c] sm:$0xf0] }
 0x3da   : > { %11020 = vst [vmem:[#allocation46_spill] sm:$0xff] %v10665_v35  ;;  %v5898_v2 = vpop.f32.mrf.mxu0 }
 0x3db   : > { %v5899_v58 = vadd.f32 %v5898_v2, %v5715_v0  ;;  %v7576_v2 = vld [vmem:[#allocation3 + $0x218] sm:$0xf]  ;;  %1978 = vst [vmem:[#allocation3 + $0x2e8] sm:$0xf] %v1908_v8 }
 0x3dc   : > { %6135 = vmatmul.bf16.gmra.mxu2 %v7569_v7  ;;  %6498 = vmatmul.bf16.gmra.mxu0 %v7541_v10  ;;  %v2256_v7 = vld [vmem:[#allocation2 + $0xc2] sm:$0xff]  ;;  %1979 = vst [vmem:[#allocation3 + $0x30c] sm:$0xf] %v1909_v13 }
 0x3de   : > { %v5716_v46 = vpop.f32.mrf.mxu3 }
 0x3df   : > { %v5717_v35 = vadd.f32 %v5716_v46, %v5533_v15  ;;  %v5535_v22 = vpop.f32.mrf.mxu2  ;;  %v2118_v15 = vpack.c.bf16 %v2048_v20, %v2048_v20  ;;  %v8954_v46 = vld [vmem:[#allocation3 + $0x238] sm:$0xf0] }
 0x3e0   : > { %v5536_v27 = vadd.f32 %v5535_v22, %v11023_v38  ;;  %v11026_v38 = vld [vmem:[#allocation37_spill] sm:$0xff]  ;;  %v7577_v41 = vor.u32 %v8954_v46, %v7576_v2  ;;  %v2050_v2 = vld [vmem:[#allocation2 + $0xe1] sm:$0xff] }
 0x3e1   : > { %v6082_v53 = vpop.f32.mrf.mxu1  ;;  %2188 = vst [vmem:[#allocation3 + $0x2ec] sm:$0xf] %v2118_v15 }
 0x3e2   : > { %v10668_v12 = vadd.f32 %v6082_v53, %v5899_v58  ;;  %v5900_v59 = vpop.f32.mrf.mxu0  ;;  %v7604_v58 = vld [vmem:[#allocation3 + $0x258] sm:$0xf]  ;;  %v2327_v53 = vpack.c.bf16 %v2257_v56, %v2257_v56 }
 0x3e3   : > { %6319 = vmatmul.bf16.gmra.mxu3 %v7573_v25  ;;  %v10671_v14 = vadd.f32 %v5900_v59, %v5717_v35  ;;  %v2119_v25 = vpack.c.bf16 %v2049_v57, %v2049_v57  ;;  %v2326_v35 = vpack.c.bf16 %v2256_v7, %v2256_v7  ;;  %v7605_v59 = vor.u32 %v8962_v62, %v7604_v58  ;;  %v1840_v62 = vld [vmem:[#allocation2 + $0xe0] sm:$0xff] }
 0x3e4   : > { %11022 = vst [vmem:[#allocation35_spill] sm:$0xff] %v10668_v12  ;;  %v1910_v46 = vpack.c.bf16 %v1840_v62, %v1840_v62 }
 0x3e5   : > { %11024 = vst [vmem:[#allocation36_spill] sm:$0xff] %v10671_v14 }
 0x3e6   : > { %v5719_v18 = vpop.f32.mrf.mxu3  ;;  %2189 = vst [vmem:[#allocation3 + $0x310] sm:$0xf] %v2119_v25  ;;  %v1841_v25 = vld [vmem:[#allocation2 + $0xe8] sm:$0xff] }
 0x3e7   : > { %v5720_v0 = vadd.f32 %v5719_v18, %v5536_v27  ;;  %v5537_v22 = vpop.f32.mrf.mxu2  ;;  %v8958_v18 = vld [vmem:[#allocation3 + $0x25c] sm:$0xf]  ;;  %2396 = vst [vmem:[#allocation3 + $0x2a8] sm:$0xf] %v2326_v35  ;;  %v1911_v35 = vpack.c.bf16 %v1841_v25, %v1841_v25 }
 0x3e8   : > { %v5538_v27 = vadd.f32 %v5537_v22, %v11026_v38  ;;  %2397 = vst [vmem:[#allocation3 + $0x2cc] sm:$0xf] %v2327_v53  ;;  %v7609_v14 = vor.u32 %v8958_v18, %v7606_v11  ;;  %v2120_v53 = vpack.c.bf16 %v2050_v2, %v2050_v2  ;;  %v2258_v22 = vld [vmem:[#allocation2 + $0xd2] sm:$0xff]  ;;  %v2259_v38 = vld [vmem:[#allocation2 + $0xda] sm:$0xff]  ;;  %v8963_v11 = vld [vmem:[#allocation3 + $0x280] sm:$0xf0] }
 0x3e9   : > { %v10673_v10 = vpop.f32.mrf.mxu1  ;;  %1980 = vst [vmem:[#allocation3 + $0x330] sm:$0xf] %v1910_v46 }
 0x3ea   : > { %11025 = vst [vmem:[#allocation47_spill] sm:$0xff] %v10673_v10  ;;  %v5903_v20 = vpop.f32.mrf.mxu0 }
 0x3eb   : > { %v5904_v12 = vadd.f32 %v5903_v20, %v5720_v0  ;;  %v2051_v0 = vld [vmem:[#allocation2 + $0xe9] sm:$0xff]  ;;  %1981 = vst [vmem:[#allocation3 + $0x354] sm:$0xf] %v1911_v35 }
 0x3ec   : > { %6140 = vmatmul.bf16.gmra.mxu2 %v7605_v59  ;;  %6503 = vmatmul.bf16.gmra.mxu0 %v7577_v41  ;;  %v8971_v59 = vld [vmem:[#allocation3 + $0x2c0] sm:$0xf0]  ;;  %v2121_v18 = vpack.c.bf16 %v2051_v0, %v2051_v0  ;;  %v2329_v41 = vpack.c.bf16 %v2259_v38, %v2259_v38  ;;  %2190 = vst [vmem:[#allocation3 + $0x334] sm:$0xf] %v2120_v53 }
 0x3ee   : > { %v5721_v57 = vpop.f32.mrf.mxu3  ;;  %2191 = vst [vmem:[#allocation3 + $0x358] sm:$0xf] %v2121_v18  ;;  %v1842_v18 = vld [vmem:[#allocation2 + $0xf0] sm:$0xff] }
 0x3ef   : > { %v5722_v10 = vadd.f32 %v5721_v57, %v5538_v27  ;;  %v6101_v15 = vpop.f32.mrf.mxu2  ;;  %v7640_v27 = vld [vmem:[#allocation3 + $0x2a0] sm:$0xf]  ;;  %v8967_v57 = vld [vmem:[#allocation3 + $0x2a4] sm:$0xf]  ;;  %2399 = vst [vmem:[#allocation3 + $0x314] sm:$0xf] %v2329_v41 }
 0x3f0   : > { %v7641_v20 = vor.u32 %v8971_v59, %v7640_v27  ;;  %v6102_v25 = vadd.f32 %v6101_v15, %v10400_v48  ;;  %v1912_v48 = vpack.c.bf16 %v1842_v18, %v1842_v18  ;;  %v7678_v18 = vld [vmem:[#allocation3 + $0x30c] sm:$0xf0] }
 0x3f1   : > { %v6087_v8 = vpop.f32.mrf.mxu1 }
 0x3f2   : > { %v10676_v13 = vadd.f32 %v6087_v8, %v5904_v12  ;;  %v5905_v7 = vpop.f32.mrf.mxu0  ;;  %v7612_v12 = vld [vmem:[#allocation3 + $0x260] sm:$0xf]  ;;  %v7642_v8 = vld [vmem:[#allocation3 + $0x2c4] sm:$0xf0]  ;;  %1982 = vst [vmem:[#allocation3 + $0x378] sm:$0xf] %v1912_v48 }
 0x3f3   : > { %6324 = vmatmul.bf16.gmra.mxu3 %v7609_v14  ;;  %v10678_v58 = vadd.f32 %v5905_v7, %v5722_v10  ;;  %v2328_v14 = vpack.c.bf16 %v2258_v22, %v2258_v22  ;;  %v7613_v7 = vor.u32 %v8963_v11, %v7612_v12  ;;  %v7645_v0 = vor.u32 %v8967_v57, %v7642_v8  ;;  %v1843_v12 = vld [vmem:[#allocation2 + $0xf8] sm:$0xff]  ;;  %v2260_v57 = vld [vmem:[#allocation2 + $0xe2] sm:$0xff]  ;;  %v8980_v8 = vld [vmem:[#allocation3 + $0x308] sm:$0xf0] }
 0x3f4   : > { %11027 = vst [vmem:[#allocation37_spill] sm:$0xff] %v10676_v13  ;;  %v2052_v11 = vld [vmem:[#allocation2 + $0xf1] sm:$0xff]  ;;  %v1913_v15 = vpack.c.bf16 %v1843_v12, %v1843_v12 }
 0x3f5   : > { %2398 = vst [vmem:[#allocation3 + $0x2f0] sm:$0xf] %v2328_v14  ;;  %v2053_v14 = vld [vmem:[#allocation2 + $0xf9] sm:$0xff]  ;;  %v2122_v41 = vpack.c.bf16 %v2052_v11, %v2052_v11 }
 0x3f6   : > { %v6285_v56 = vpop.f32.mrf.mxu3  ;;  %1983 = vst [vmem:[#allocation3 + $0x39c] sm:$0xf] %v1913_v15 }
 0x3f7   : > { %v6103_v10 = vpop.f32.mrf.mxu2  ;;  %v6286_v46 = vadd.f32 %v6285_v56, %v6102_v25  ;;  %v7676_v56 = vld [vmem:[#allocation3 + $0x2e8] sm:$0xf]  ;;  %v2330_v25 = vpack.c.bf16 %v2260_v57, %v2260_v57  ;;  %2192 = vst [vmem:[#allocation3 + $0x37c] sm:$0xf] %v2122_v41 }
 0x3f8   : > { %v6104_v13 = vadd.f32 %v6103_v10, %v10403_v36  ;;  %v2261_v36 = vld [vmem:[#allocation2 + $0xea] sm:$0xff] }
 0x3f9   : > { %2400 = vst [vmem:[#allocation3 + $0x338] sm:$0xf] %v2330_v25 }
 0x3fa   : > { %v6469_v62 = vpop.f32.mrf.mxu0 }
 0x3fb   : > { %v6470_v22 = vadd.f32 %v6469_v62, %v6286_v46  ;;  %v8972_v62 = vld [vmem:[#allocation3 + $0x2c8] sm:$0xf0] }
 0x3fc   : > { %6145 = vmatmul.bf16.gmra.mxu2 %v7641_v20  ;;  %6508 = vmatmul.bf16.gmra.mxu0 %v7613_v7  ;;  %v2123_v7 = vpack.c.bf16 %v2053_v14, %v2053_v14 }
 0x3fd   : > { %v6644_v10 = vmax.f32 %v6470_v22, 0.0 }
 0x3fe   : > { %v6287_v2 = vpop.f32.mrf.mxu3  ;;  %2193 = vst [vmem:[#allocation3 + $0x3a0] sm:$0xf] %v2123_v7  ;;  %v1845_v7 = vld [vmem:[#allocation2 + $0x108] sm:$0xff] }
 0x3ff   : > { %v6106_v35 = vpop.f32.mrf.mxu2  ;;  %v6288_v53 = vadd.f32 %v6287_v2, %v6104_v13  ;;  %v7648_v13 = vld [vmem:[#allocation3 + $0x2a8] sm:$0xf] }
 0x400   : > { %v7649_v12 = vor.u32 %v8972_v62, %v7648_v13  ;;  %v2054_v13 = vld [vmem:[#allocation2 + $0x101] sm:$0xff] }
 0x401   : > { %v2124_v25 = vpack.c.bf16 %v2054_v13, %v2054_v13 }
 0x402   : > { %v6471_v38 = vpop.f32.mrf.mxu0 }
 0x403   : > { %6329 = vmatmul.bf16.gmra.mxu3 %v7645_v0  ;;  %v6472_v59 = vadd.f32 %v6471_v38, %v6288_v53  ;;  %v2331_v0 = vpack.c.bf16 %v2261_v36, %v2261_v36  ;;  %v7677_v53 = vor.u32 %v8980_v8, %v7676_v56  ;;  %v8976_v38 = vld [vmem:[#allocation3 + $0x2ec] sm:$0xf]  ;;  %v1844_v8 = vld [vmem:[#allocation2 + $0x100] sm:$0xff]  ;;  %2194 = vst [vmem:[#allocation3 + $0x3c4] sm:$0xf] %v2124_v25 }
 0x404   : > { %v7681_v48 = vor.u32 %v8976_v38, %v7678_v18  ;;  %v1914_v62 = vpack.c.bf16 %v1844_v8, %v1844_v8  ;;  %v7684_v18 = vld [vmem:[#allocation3 + $0x2f0] sm:$0xf] }
 0x405   : > { %v6645_v20 = vmax.f32 %v6472_v59, 0.0  ;;  %v6107_v59 = vadd.f32 %v6106_v35, %v10406_v34  ;;  %2401 = vst [vmem:[#allocation3 + $0x35c] sm:$0xf] %v2331_v0  ;;  %v1915_v34 = vpack.c.bf16 %v1845_v7, %v1845_v7  ;;  %v2055_v35 = vld [vmem:[#allocation2 + $0x109] sm:$0xff]  ;;  %v2263_v0 = vld [vmem:[#allocation2 + $0xfa] sm:$0xff] }
 0x406   : > { %v6290_v27 = vpop.f32.mrf.mxu3  ;;  %v2125_v38 = vpack.c.bf16 %v2055_v35, %v2055_v35  ;;  %1984 = vst [vmem:[#allocation3 + $0x3c0] sm:$0xf] %v1914_v62 }
 0x407   : > { %v6714_v2 = vpack.c.bf16 %v6645_v20, %v6644_v10  ;;  %v6108_v46 = vpop.f32.mrf.mxu2  ;;  %v6291_v15 = vadd.f32 %v6290_v27, %v6107_v59  ;;  %v8989_v27 = vld [vmem:[#allocation3 + $0x350] sm:$0xf0]  ;;  %1985 = vst [vmem:[#allocation3 + $0x3e4] sm:$0xf] %v1915_v34 }
 0x408   : > { %v6109_v14 = vadd.f32 %v6108_v46, %v10409_v23  ;;  %2195 = vst [vmem:[#allocation3 + $0x3e8] sm:$0xf] %v2125_v38 }
 0x409   : > { %8846 = vmatmul.msk.bf16.vlgmr.msra.gmra.mxu1 %vm6769_vm0, %v6714_v2  ;;  %v2262_v2 = vld [vmem:[#allocation2 + $0xf2] sm:$0xff] }
 0x40a   : > { %v6474_v22 = vpop.f32.mrf.mxu0 }
 0x40b   : > { %v6475_v36 = vadd.f32 %v6474_v22, %v6291_v15  ;;  %v2332_v22 = vpack.c.bf16 %v2262_v2, %v2262_v2  ;;  %v8985_v15 = vld [vmem:[#allocation3 + $0x334] sm:$0xf] }
 0x40c   : > { %6150 = vmatmul.bf16.gmra.mxu2 %v7677_v53  ;;  %6513 = vmatmul.bf16.gmra.mxu0 %v7649_v12  ;;  %v7712_v53 = vld [vmem:[#allocation3 + $0x330] sm:$0xf]  ;;  %v8981_v12 = vld [vmem:[#allocation3 + $0x310] sm:$0xf0] }
 0x40d   : > { %v6646_v23 = vmax.f32 %v6475_v36, 0.0  ;;  %2402 = vst [vmem:[#allocation3 + $0x380] sm:$0xf] %v2332_v22  ;;  %v2265_v22 = vld [vmem:[#allocation2 + $0x10a] sm:$0xff] }
 0x40e   : > { %v6292_v11 = vpop.f32.mrf.mxu3 }
 0x40f   : > { %v6111_v41 = vpop.f32.mrf.mxu2  ;;  %v6293_v57 = vadd.f32 %v6292_v11, %v6109_v14  ;;  %v2333_v11 = vpack.c.bf16 %v2263_v0, %v2263_v0  ;;  %v7713_v14 = vor.u32 %v8989_v27, %v7712_v53  ;;  %v1847_v53 = vld [vmem:[#allocation2 + $0x118] sm:$0xff] }
 0x410   : > { %v2056_v27 = vld [vmem:[#allocation2 + $0x111] sm:$0xff] }
 0x411   : > { %2403 = vst [vmem:[#allocation3 + $0x3a4] sm:$0xf] %v2333_v11  ;;  %v7748_v11 = vld [vmem:[#allocation3 + $0x378] sm:$0xf] }
 0x412   : > { %v6476_v10 = vpop.f32.mrf.mxu0 }
 0x413   : > { %6334 = vmatmul.bf16.gmra.mxu3 %v7681_v48  ;;  %v6477_v56 = vadd.f32 %v6476_v10, %v6293_v57  ;;  %v7714_v57 = vld [vmem:[#allocation3 + $0x354] sm:$0xf0]  ;;  %v7685_v10 = vor.u32 %v8981_v12, %v7684_v18  ;;  %v2126_v18 = vpack.c.bf16 %v2056_v27, %v2056_v27 }
 0x414   : > { %v7717_v7 = vor.u32 %v8985_v15, %v7714_v57  ;;  %v2264_v12 = vld [vmem:[#allocation2 + $0x102] sm:$0xff] }
 0x415   : > { %v6647_v46 = vmax.f32 %v6477_v56, 0.0  ;;  %v6112_v56 = vadd.f32 %v6111_v41, %v10412_v9  ;;  %v1917_v9 = vpack.c.bf16 %v1847_v53, %v1847_v53  ;;  %v2057_v41 = vld [vmem:[#allocation2 + $0x119] sm:$0xff]  ;;  %v8990_v15 = vld [vmem:[#allocation3 + $0x358] sm:$0xf0]  ;;  %v2334_v57 = vpack.c.bf16 %v2264_v12, %v2264_v12  ;;  %2196 = vst [vmem:[#allocation3 + $0x40c] sm:$0xf] %v2126_v18 }
 0x416   : > { %v6295_v20 = vpop.f32.mrf.mxu3 }
 0x417   : > { %v6715_v59 = vpack.c.bf16 %v6647_v46, %v6646_v23  ;;  %v6113_v48 = vpop.f32.mrf.mxu2  ;;  %v6296_v62 = vadd.f32 %v6295_v20, %v6112_v56  ;;  %v1846_v46 = vld [vmem:[#allocation2 + $0x110] sm:$0xff]  ;;  %v8998_v20 = vld [vmem:[#allocation3 + $0x398] sm:$0xf0]  ;;  %1987 = vst [vmem:[#allocation3 + $0x42c] sm:$0xf] %v1917_v9 }
 0x418   : > { %v6114_v13 = vadd.f32 %v6113_v48, %v10415_v5  ;;  %v1916_v38 = vpack.c.bf16 %v1846_v46, %v1846_v46  ;;  %v2127_v48 = vpack.c.bf16 %v2057_v41, %v2057_v41  ;;  %2404 = vst [vmem:[#allocation3 + $0x3c8] sm:$0xf] %v2334_v57  ;;  %v7784_v57 = vld [vmem:[#allocation3 + $0x3c0] sm:$0xf] }
 0x419   : > { %8847 = vmatmul.msk.bf16.gmra.mxu1 %vm6769_vm0, %v6715_v59 }
 0x41a   : > { %v6479_v36 = vpop.f32.mrf.mxu0  ;;  %1986 = vst [vmem:[#allocation3 + $0x408] sm:$0xf] %v1916_v38 }
 0x41b   : > { %v6480_v25 = vadd.f32 %v6479_v36, %v6296_v62  ;;  %v2335_v36 = vpack.c.bf16 %v2265_v22, %v2265_v22  ;;  %2197 = vst [vmem:[#allocation3 + $0x430] sm:$0xf] %v2127_v48  ;;  %v1848_v22 = vld [vmem:[#allocation2 + $0x120] sm:$0xff]  ;;  %v2266_v48 = vld [vmem:[#allocation2 + $0x112] sm:$0xff] }
 0x41c   : > { %6155 = vmatmul.bf16.gmra.mxu2 %v7713_v14  ;;  %6518 = vmatmul.bf16.gmra.mxu0 %v7685_v10  ;;  %v7720_v14 = vld [vmem:[#allocation3 + $0x338] sm:$0xf] }
 0x41d   : > { %v6648_v5 = vmax.f32 %v6480_v25, 0.0  ;;  %v7721_v62 = vor.u32 %v8990_v15, %v7720_v14  ;;  %2405 = vst [vmem:[#allocation3 + $0x3ec] sm:$0xf] %v2335_v36  ;;  %v2267_v14 = vld [vmem:[#allocation2 + $0x11a] sm:$0xff]  ;;  %v7756_v36 = vld [vmem:[#allocation3 + $0x380] sm:$0xf] }
 0x41e   : > { %v6297_v8 = vpop.f32.mrf.mxu3 }
 0x41f   : > { %v6116_v34 = vpop.f32.mrf.mxu2  ;;  %v6298_v35 = vadd.f32 %v6297_v8, %v6114_v13  ;;  %v7749_v8 = vor.u32 %v8998_v20, %v7748_v11  ;;  %v7750_v13 = vld [vmem:[#allocation3 + $0x39c] sm:$0xf0]  ;;  %v1918_v11 = vpack.c.bf16 %v1848_v22, %v1848_v22 }
 0x420   : > { %v6117_v25 = vadd.f32 %v6116_v34, %v10424_v16  ;;  %v2059_v34 = vld [vmem:[#allocation2 + $0x129] sm:$0xff] }
 0x421   : > { %1988 = vst [vmem:[#allocation3 + $0x450] sm:$0xf] %v1918_v11 }
 0x422   : > { %v6481_v2 = vpop.f32.mrf.mxu0 }
 0x423   : > { %6339 = vmatmul.bf16.gmra.mxu3 %v7717_v7  ;;  %v6482_v23 = vadd.f32 %v6481_v2, %v6298_v35  ;;  %v8994_v7 = vld [vmem:[#allocation3 + $0x37c] sm:$0xf] }
 0x425   : > { %v6649_v59 = vmax.f32 %v6482_v23, 0.0  ;;  %v7753_v23 = vor.u32 %v8994_v7, %v7750_v13  ;;  %v2337_v13 = vpack.c.bf16 %v2267_v14, %v2267_v14  ;;  %v2060_v14 = vld [vmem:[#allocation2 + $0x131] sm:$0xff] }
 0x426   : > { %v6300_v0 = vpop.f32.mrf.mxu3 }
 0x427   : > { %v6716_v10 = vpack.c.bf16 %v6649_v59, %v6648_v5  ;;  %v6118_v56 = vpop.f32.mrf.mxu2  ;;  %v6301_v53 = vadd.f32 %v6300_v0, %v6117_v25  ;;  %v1849_v5 = vld [vmem:[#allocation2 + $0x128] sm:$0xff]  ;;  %2407 = vst [vmem:[#allocation3 + $0x434] sm:$0xf] %v2337_v13 }
 0x428   : > { %v6119_v46 = vadd.f32 %v6118_v56, %v10430_v1  ;;  %v2058_v59 = vld [vmem:[#allocation2 + $0x121] sm:$0xff]  ;;  %v1919_v16 = vpack.c.bf16 %v1849_v5, %v1849_v5  ;;  %v9007_v0 = vld [vmem:[#allocation3 + $0x3e0] sm:$0xf0] }
 0x429   : > { %8848 = vmatmul.msk.bf16.gmra.mxu1 %vm6769_vm0, %v6716_v10  ;;  %v2128_v20 = vpack.c.bf16 %v2058_v59, %v2058_v59  ;;  %v2129_v10 = vpack.c.bf16 %v2059_v34, %v2059_v34  ;;  %v8999_v56 = vld [vmem:[#allocation3 + $0x3a0] sm:$0xf0] }
 0x42a   : > { %v6484_v35 = vpop.f32.mrf.mxu0  ;;  %1989 = vst [vmem:[#allocation3 + $0x474] sm:$0xf] %v1919_v16  ;;  %v9003_v25 = vld [vmem:[#allocation3 + $0x3c4] sm:$0xf] }
 0x42b   : > { %v6485_v9 = vadd.f32 %v6484_v35, %v6301_v53  ;;  %2198 = vst [vmem:[#allocation3 + $0x454] sm:$0xf] %v2128_v20  ;;  %v7785_v35 = vor.u32 %v9007_v0, %v7784_v57  ;;  %v1850_v20 = vld [vmem:[#allocation2 + $0x130] sm:$0xff]  ;;  %v2268_v57 = vld [vmem:[#allocation2 + $0x122] sm:$0xff] }
 0x42c   : > { %6160 = vmatmul.bf16.gmra.mxu2 %v7749_v8  ;;  %6523 = vmatmul.bf16.gmra.mxu0 %v7721_v62  ;;  %v2336_v8 = vpack.c.bf16 %v2266_v48, %v2266_v48  ;;  %2199 = vst [vmem:[#allocation3 + $0x478] sm:$0xf] %v2129_v10  ;;  %v1851_v48 = vld [vmem:[#allocation2 + $0x138] sm:$0xff]  ;;  %v2269_v0 = vld [vmem:[#allocation2 + $0x12a] sm:$0xff]  ;;  %v2338_v13 = vpack.c.bf16 %v2268_v57, %v2268_v57 }
 0x42d   : > { %v6650_v1 = vmax.f32 %v6485_v9, 0.0 }
 0x42e   : > { %v6302_v2 = vpop.f32.mrf.mxu3  ;;  %2406 = vst [vmem:[#allocation3 + $0x410] sm:$0xf] %v2336_v8  ;;  %v7792_v8 = vld [vmem:[#allocation3 + $0x3c8] sm:$0xf] }
 0x42f   : > { %v6121_v27 = vpop.f32.mrf.mxu2  ;;  %v6303_v38 = vadd.f32 %v6302_v2, %v6119_v46  ;;  %v7786_v2 = vld [vmem:[#allocation3 + $0x3e4] sm:$0xf0]  ;;  %2408 = vst [vmem:[#allocation3 + $0x458] sm:$0xf] %v2338_v13 }
 0x430   : > { %v6122_v53 = vadd.f32 %v6121_v27, %v10433_v47  ;;  %v7789_v9 = vor.u32 %v9003_v25, %v7786_v2  ;;  %v1921_v47 = vpack.c.bf16 %v1851_v48, %v1851_v48  ;;  %v2061_v27 = vld [vmem:[#allocation2 + $0x139] sm:$0xff] }
 0x432   : > { %v6486_v41 = vpop.f32.mrf.mxu0  ;;  %1991 = vst [vmem:[#allocation3 + $0x4bc] sm:$0xf] %v1921_v47  ;;  %v1852_v47 = vld [vmem:[#allocation2 + $0x140] sm:$0xff] }
 0x433   : > { %6344 = vmatmul.bf16.gmra.mxu3 %v7753_v23  ;;  %v6487_v12 = vadd.f32 %v6486_v41, %v6303_v38  ;;  %v7757_v23 = vor.u32 %v8999_v56, %v7756_v36  ;;  %v7820_v36 = vld [vmem:[#allocation3 + $0x408] sm:$0xf]  ;;  %v2131_v56 = vpack.c.bf16 %v2061_v27, %v2061_v27  ;;  %v1853_v27 = vld [vmem:[#allocation2 + $0x148] sm:$0xff]  ;;  %v1922_v57 = vpack.c.bf16 %v1852_v47, %v1852_v47 }
 0x435   : > { %v6651_v15 = vmax.f32 %v6487_v12, 0.0  ;;  %2201 = vst [vmem:[#allocation3 + $0x4c0] sm:$0xf] %v2131_v56 }
 0x436   : > { %v6305_v18 = vpop.f32.mrf.mxu3  ;;  %1992 = vst [vmem:[#allocation3 + $0x4e0] sm:$0xf] %v1922_v57  ;;  %v1855_v57 = vld [vmem:[#allocation2 + $0x158] sm:$0xff] }
 0x437   : > { %v6717_v7 = vpack.c.bf16 %v6651_v15, %v6650_v1  ;;  %v6123_v62 = vpop.f32.mrf.mxu2  ;;  %v6306_v12 = vadd.f32 %v6305_v18, %v6122_v53  ;;  %v1920_v1 = vpack.c.bf16 %v1850_v20, %v1850_v20  ;;  %v2130_v15 = vpack.c.bf16 %v2060_v14, %v2060_v14  ;;  %v9016_v18 = vld [vmem:[#allocation3 + $0x428] sm:$0xf0] }
 0x438   : > { %v6124_v41 = vadd.f32 %v6123_v62, %v10436_v54  ;;  %v7821_v2 = vor.u32 %v9016_v18, %v7820_v36  ;;  %v7856_v18 = vld [vmem:[#allocation3 + $0x450] sm:$0xf] }
 0x439   : > { %8849 = vmatmul.msk.bf16.gmra.mxu1 %vm6769_vm0, %v6717_v7  ;;  %v9008_v7 = vld [vmem:[#allocation3 + $0x3e8] sm:$0xf0]  ;;  %1990 = vst [vmem:[#allocation3 + $0x498] sm:$0xf] %v1920_v1 }
 0x43a   : > { %v6489_v46 = vpop.f32.mrf.mxu0  ;;  %2200 = vst [vmem:[#allocation3 + $0x49c] sm:$0xf] %v2130_v15  ;;  %v7793_v53 = vor.u32 %v9008_v7, %v7792_v8  ;;  %v2062_v15 = vld [vmem:[#allocation2 + $0x141] sm:$0xff]  ;;  %v7828_v8 = vld [vmem:[#allocation3 + $0x410] sm:$0xf] }
 0x43b   : > { %v6490_v59 = vadd.f32 %v6489_v46, %v6306_v12  ;;  %v7822_v46 = vld [vmem:[#allocation3 + $0x42c] sm:$0xf0]  ;;  %v9017_v7 = vld [vmem:[#allocation3 + $0x430] sm:$0xf0] }
 0x43c   : > { %6165 = vmatmul.bf16.gmra.mxu2 %v7785_v35  ;;  %6528 = vmatmul.bf16.gmra.mxu0 %v7757_v23  ;;  %v2339_v35 = vpack.c.bf16 %v2269_v0, %v2269_v0  ;;  %v9012_v23 = vld [vmem:[#allocation3 + $0x40c] sm:$0xf]  ;;  %v2132_v0 = vpack.c.bf16 %v2062_v15, %v2062_v15 }
 0x43d   : > { %v6652_v54 = vmax.f32 %v6490_v59, 0.0  ;;  %v7825_v12 = vor.u32 %v9012_v23, %v7822_v46  ;;  %v9021_v23 = vld [vmem:[#allocation3 + $0x454] sm:$0xf]  ;;  %v7858_v46 = vld [vmem:[#allocation3 + $0x474] sm:$0xf0]  ;;  %v1854_v15 = vld [vmem:[#allocation2 + $0x150] sm:$0xff] }
 0x43e   : > { %v6307_v38 = vpop.f32.mrf.mxu3  ;;  %2409 = vst [vmem:[#allocation3 + $0x47c] sm:$0xf] %v2339_v35 }
 0x43f   : > { %v6126_v22 = vpop.f32.mrf.mxu2  ;;  %v6308_v5 = vadd.f32 %v6307_v38, %v6124_v41  ;;  %2202 = vst [vmem:[#allocation3 + $0x4e4] sm:$0xf] %v2132_v0 }
 0x442   : > { %v6491_v11 = vpop.f32.mrf.mxu0 }
 0x443   : > { %6349 = vmatmul.bf16.gmra.mxu3 %v7789_v9  ;;  %v6492_v34 = vadd.f32 %v6491_v11, %v6308_v5  ;;  %v6127_v9 = vadd.f32 %v6126_v22, %v10439_v26  ;;  %v1923_v26 = vpack.c.bf16 %v1853_v27, %v1853_v27  ;;  %v2063_v22 = vld [vmem:[#allocation2 + $0x149] sm:$0xff] }
 0x444   : > { %v2133_v56 = vpack.c.bf16 %v2063_v22, %v2063_v22  ;;  %v1924_v22 = vpack.c.bf16 %v1854_v15, %v1854_v15  ;;  %v1856_v15 = vld [vmem:[#allocation2 + $0x160] sm:$0xff] }
 0x445   : > { %v6653_v10 = vmax.f32 %v6492_v34, 0.0  ;;  %1993 = vst [vmem:[#allocation3 + $0x504] sm:$0xf] %v1923_v26  ;;  %v2064_v26 = vld [vmem:[#allocation2 + $0x151] sm:$0xff] }
 0x446   : > { %v6310_v16 = vpop.f32.mrf.mxu3  ;;  %2203 = vst [vmem:[#allocation3 + $0x508] sm:$0xf] %v2133_v56  ;;  %v2134_v0 = vpack.c.bf16 %v2064_v26, %v2064_v26  ;;  %v9026_v56 = vld [vmem:[#allocation3 + $0x478] sm:$0xf0] }
 0x447   : > { %v6718_v62 = vpack.c.bf16 %v6653_v10, %v6652_v54  ;;  %v6128_v25 = vpop.f32.mrf.mxu2  ;;  %v6311_v59 = vadd.f32 %v6310_v16, %v6127_v9  ;;  %v2270_v54 = vld [vmem:[#allocation2 + $0x132] sm:$0xff]  ;;  %v2271_v10 = vld [vmem:[#allocation2 + $0x13a] sm:$0xff]  ;;  %1994 = vst [vmem:[#allocation3 + $0x528] sm:$0xf] %v1924_v22  ;;  %v1926_v22 = vpack.c.bf16 %v1856_v15, %v1856_v15 }
 0x448   : > { %v6129_v5 = vadd.f32 %v6128_v25, %v10442_v55  ;;  %v9025_v16 = vld [vmem:[#allocation3 + $0x470] sm:$0xf0]  ;;  %v2340_v13 = vpack.c.bf16 %v2270_v54, %v2270_v54  ;;  %v2341_v35 = vpack.c.bf16 %v2271_v10, %v2271_v10  ;;  %v2272_v54 = vld [vmem:[#allocation2 + $0x142] sm:$0xff]  ;;  %v2273_v10 = vld [vmem:[#allocation2 + $0x14a] sm:$0xff]  ;;  %2204 = vst [vmem:[#allocation3 + $0x52c] sm:$0xf] %v2134_v0 }
 0x449   : > { %8850 = vmatmul.msk.bf16.gmra.mxu1 %vm6769_vm0, %v6718_v62  ;;  %v2066_v26 = vld [vmem:[#allocation2 + $0x161] sm:$0xff]  ;;  %1996 = vst [vmem:[#allocation3 + $0x570] sm:$0xf] %v1926_v22 }
 0x44a   : > { %v6494_v38 = vpop.f32.mrf.mxu0  ;;  %2410 = vst [vmem:[#allocation3 + $0x4a0] sm:$0xf] %v2340_v13  ;;  %v2343_v13 = vpack.c.bf16 %v2273_v10, %v2273_v10  ;;  %v2275_v0 = vld [vmem:[#allocation2 + $0x15a] sm:$0xff]  ;;  %v7928_v10 = vld [vmem:[#allocation3 + $0x4e0] sm:$0xf] }
 0x44b   : > { %v6495_v20 = vadd.f32 %v6494_v38, %v6311_v59  ;;  %2411 = vst [vmem:[#allocation3 + $0x4c4] sm:$0xf] %v2341_v35  ;;  %v2276_v22 = vld [vmem:[#allocation2 + $0x162] sm:$0xff] }
 0x44c   : > { %6170 = vmatmul.bf16.gmra.mxu2 %v7821_v2  ;;  %6533 = vmatmul.bf16.gmra.mxu0 %v7793_v53  ;;  %v7857_v2 = vor.u32 %v9025_v16, %v7856_v18  ;;  %v7829_v53 = vor.u32 %v9017_v7, %v7828_v8  ;;  %v7864_v16 = vld [vmem:[#allocation3 + $0x458] sm:$0xf]  ;;  %v2342_v8 = vpack.c.bf16 %v2272_v54, %v2272_v54 }
 0x44d   : > { %v6654_v55 = vmax.f32 %v6495_v20, 0.0  ;;  %2413 = vst [vmem:[#allocation3 + $0x50c] sm:$0xf] %v2343_v13  ;;  %v7930_v13 = vld [vmem:[#allocation3 + $0x504] sm:$0xf0] }
 0x44e   : > { %v6312_v41 = vpop.f32.mrf.mxu3  ;;  %2412 = vst [vmem:[#allocation3 + $0x4e8] sm:$0xf] %v2342_v8 }
 0x44f   : > { %v6131_v11 = vpop.f32.mrf.mxu2  ;;  %v6313_v34 = vadd.f32 %v6312_v41, %v6129_v5 }
 0x450   : > { %v6132_v9 = vadd.f32 %v6131_v11, %v10445_v40  ;;  %v1925_v40 = vpack.c.bf16 %v1855_v57, %v1855_v57  ;;  %v2065_v11 = vld [vmem:[#allocation2 + $0x159] sm:$0xff]  ;;  %v1857_v57 = vld [vmem:[#allocation2 + $0x168] sm:$0xff] }
 0x451   : > { %v2135_v18 = vpack.c.bf16 %v2065_v11, %v2065_v11  ;;  %v2274_v11 = vld [vmem:[#allocation2 + $0x152] sm:$0xff] }
 0x452   : > { %v6496_v48 = vpop.f32.mrf.mxu0  ;;  %1995 = vst [vmem:[#allocation3 + $0x54c] sm:$0xf] %v1925_v40  ;;  %v2136_v40 = vpack.c.bf16 %v2066_v26, %v2066_v26  ;;  %v2069_v26 = vld [vmem:[#allocation2 + $0x179] sm:$0xff] }
 0x453   : > { %6354 = vmatmul.bf16.gmra.mxu3 %v7825_v12  ;;  %v6497_v1 = vadd.f32 %v6496_v48, %v6313_v34  ;;  %v7861_v12 = vor.u32 %v9021_v23, %v7858_v46  ;;  %v7865_v23 = vor.u32 %v9026_v56, %v7864_v16  ;;  %2205 = vst [vmem:[#allocation3 + $0x550] sm:$0xf] %v2135_v18 }
 0x454   : > { %v2345_v16 = vpack.c.bf16 %v2275_v0, %v2275_v0  ;;  %2206 = vst [vmem:[#allocation3 + $0x574] sm:$0xf] %v2136_v40  ;;  %v7964_v40 = vld [vmem:[#allocation3 + $0x528] sm:$0xf]  ;;  %v2139_v0 = vpack.c.bf16 %v2069_v26, %v2069_v26 }
 0x455   : > { %v6655_v36 = vmax.f32 %v6497_v1, 0.0 }
 0x456   : > { %v6315_v14 = vpop.f32.mrf.mxu3  ;;  %2415 = vst [vmem:[#allocation3 + $0x554] sm:$0xf] %v2345_v16 }
 0x457   : > { %v6719_v62 = vpack.c.bf16 %v6655_v36, %v6654_v55  ;;  %v6133_v25 = vpop.f32.mrf.mxu2  ;;  %v6316_v59 = vadd.f32 %v6315_v14, %v6132_v9  ;;  %v7892_v36 = vld [vmem:[#allocation3 + $0x498] sm:$0xf]  ;;  %v9034_v14 = vld [vmem:[#allocation3 + $0x4b8] sm:$0xf0]  ;;  %2209 = vst [vmem:[#allocation3 + $0x5e0] sm:$0xf] %v2139_v0 }
 0x458   : > { %v6134_v5 = vadd.f32 %v6133_v25, %v10448_v29  ;;  %v7893_v35 = vor.u32 %v9034_v14, %v7892_v36  ;;  %v9030_v25 = vld [vmem:[#allocation3 + $0x49c] sm:$0xf]  ;;  %v9035_v36 = vld [vmem:[#allocation3 + $0x4c0] sm:$0xf0]  ;;  %v2344_v14 = vpack.c.bf16 %v2274_v11, %v2274_v11 }
 0x459   : > { %8851 = vmatmul.msk.bf16.gmra.mxu1 %vm6769_vm0, %v6719_v62  ;;  %v9052_v11 = vld [vmem:[#allocation3 + $0x548] sm:$0xf0] }
 0x45a   : > { %v6499_v38 = vpop.f32.mrf.mxu0  ;;  %2414 = vst [vmem:[#allocation3 + $0x530] sm:$0xf] %v2344_v14  ;;  %v7965_v14 = vor.u32 %v9052_v11, %v7964_v40  ;;  %v7966_v16 = vld [vmem:[#allocation3 + $0x54c] sm:$0xf0] }
 0x45b   : > { %v6500_v48 = vadd.f32 %v6499_v38, %v6316_v59 }
 0x45c   : > { %6175 = vmatmul.bf16.gmra.mxu2 %v7857_v2  ;;  %6538 = vmatmul.bf16.gmra.mxu0 %v7829_v53  ;;  %v7894_v2 = vld [vmem:[#allocation3 + $0x4bc] sm:$0xf0] }
 0x45d   : > { %v6656_v29 = vmax.f32 %v6500_v48, 0.0  ;;  %v7897_v9 = vor.u32 %v9030_v25, %v7894_v2 }
 0x45e   : > { %v6317_v41 = vpop.f32.mrf.mxu3 }
 0x45f   : > { %v6136_v34 = vpop.f32.mrf.mxu2  ;;  %v6318_v20 = vadd.f32 %v6317_v41, %v6134_v5 }
 0x460   : > { %v6137_v53 = vadd.f32 %v6136_v34, %v10454_v37  ;;  %v1927_v37 = vpack.c.bf16 %v1857_v57, %v1857_v57  ;;  %v2067_v34 = vld [vmem:[#allocation2 + $0x169] sm:$0xff] }
 0x462   : > { %v6501_v1 = vpop.f32.mrf.mxu0  ;;  %1997 = vst [vmem:[#allocation3 + $0x594] sm:$0xf] %v1927_v37  ;;  %v2277_v37 = vld [vmem:[#allocation2 + $0x16a] sm:$0xff] }
 0x463   : > { %6359 = vmatmul.bf16.gmra.mxu3 %v7861_v12  ;;  %v6502_v27 = vadd.f32 %v6501_v1, %v6318_v20 }
 0x465   : > { %v6657_v55 = vmax.f32 %v6502_v27, 0.0 }
 0x466   : > { %v6320_v47 = vpop.f32.mrf.mxu3 }
 0x467   : > { %v6720_v7 = vpack.c.bf16 %v6657_v55, %v6656_v29  ;;  %v6138_v62 = vpop.f32.mrf.mxu2  ;;  %v6321_v12 = vadd.f32 %v6320_v47, %v6137_v53  ;;  %v9043_v47 = vld [vmem:[#allocation3 + $0x500] sm:$0xf0]  ;;  %v2137_v29 = vpack.c.bf16 %v2067_v34, %v2067_v34  ;;  %v7900_v55 = vld [vmem:[#allocation3 + $0x4a0] sm:$0xf]  ;;  %v10706_v53 = vpop.f32.mrf.mxu1 }
 0x468   : > { %v6139_v41 = vadd.f32 %v6138_v62, %v10460_v51  ;;  %v7929_v8 = vor.u32 %v9043_v47, %v7928_v10  ;;  %v7901_v62 = vor.u32 %v9035_v36, %v7900_v55  ;;  %v9044_v10 = vld [vmem:[#allocation3 + $0x508] sm:$0xf0]  ;;  %v2346_v47 = vpack.c.bf16 %v2276_v22, %v2276_v22  ;;  %v2279_v22 = vld [vmem:[#allocation2 + $0x17a] sm:$0xff] }
 0x469   : > { %8852 = vmatmul.msk.bf16.gmra.mxu1 %vm6769_vm0, %v6720_v7  ;;  %v9039_v7 = vld [vmem:[#allocation3 + $0x4e4] sm:$0xf]  ;;  %2207 = vst [vmem:[#allocation3 + $0x598] sm:$0xf] %v2137_v29  ;;  %v2347_v55 = vpack.c.bf16 %v2277_v37, %v2277_v37  ;;  %v9061_v40 = vld [vmem:[#allocation3 + $0x590] sm:$0xf0] }
 0x46a   : > { %v6504_v46 = vpop.f32.mrf.mxu0  ;;  %2416 = vst [vmem:[#allocation3 + $0x578] sm:$0xf] %v2346_v47 }
 0x46b   : > { %v6505_v20 = vadd.f32 %v6504_v46, %v6321_v12  ;;  %2417 = vst [vmem:[#allocation3 + $0x59c] sm:$0xf] %v2347_v55 }
 0x46c   : > { %6180 = vmatmul.bf16.gmra.mxu2 %v7893_v35  ;;  %6543 = vmatmul.bf16.gmra.mxu0 %v7865_v23  ;;  %v7933_v23 = vor.u32 %v9039_v7, %v7930_v13  ;;  %v10717_v13 = vld [vmem:[%s10923_s5] ss:$0 sm:$0xff] }
 0x46d   : > { %v6658_v51 = vmax.f32 %v6505_v20, 0.0 }
 0x46e   : > { %v6322_v38 = vpop.f32.mrf.mxu3 }
 0x46f   : > { %v6141_v5 = vpop.f32.mrf.mxu2  ;;  %v6323_v59 = vadd.f32 %v6322_v38, %v6139_v41 }
 0x470   : > { %v6142_v25 = vadd.f32 %v6141_v5, %v10466_v52  ;;  %v1859_v52 = vld [vmem:[#allocation2 + $0x178] sm:$0xff] }
 0x471   : > { %v2068_v5 = vld [vmem:[#allocation2 + $0x171] sm:$0xff]  ;;  %v1929_v57 = vpack.c.bf16 %v1859_v52, %v1859_v52  ;;  %v2070_v52 = vld [vmem:[#allocation2 + $0x181] sm:$0xff] }
 0x472   : > { %v6506_v48 = vpop.f32.mrf.mxu0  ;;  %v2140_v26 = vpack.c.bf16 %v2070_v52, %v2070_v52 }
 0x473   : > { %6364 = vmatmul.bf16.gmra.mxu3 %v7897_v9  ;;  %v6507_v27 = vadd.f32 %v6506_v48, %v6323_v59  ;;  %1999 = vst [vmem:[#allocation3 + $0x5dc] sm:$0xf] %v1929_v57  ;;  %v2071_v57 = vld [vmem:[#allocation2 + $0x189] sm:$0xff] }
 0x474   : > { %v2141_v11 = vpack.c.bf16 %v2071_v57, %v2071_v57  ;;  %2210 = vst [vmem:[#allocation3 + $0x604] sm:$0xf] %v2140_v26  ;;  %v2281_v57 = vld [vmem:[#allocation2 + $0x18a] sm:$0xff] }
 0x475   : > { %v6659_v54 = vmax.f32 %v6507_v27, 0.0  ;;  %v1858_v27 = vld [vmem:[#allocation2 + $0x170] sm:$0xff] }
 0x476   : > { %v6325_v1 = vpop.f32.mrf.mxu3  ;;  %v1928_v15 = vpack.c.bf16 %v1858_v27, %v1858_v27  ;;  %v1861_v27 = vld [vmem:[#allocation2 + $0x188] sm:$0xff]  ;;  %2211 = vst [vmem:[#allocation3 + $0x628] sm:$0xf] %v2141_v11  ;;  %v9062_v11 = vld [vmem:[#allocation3 + $0x598] sm:$0xf0] }
 0x477   : > { %v6721_v18 = vpack.c.bf16 %v6659_v54, %v6658_v51  ;;  %v6143_v56 = vpop.f32.mrf.mxu2  ;;  %v6326_v38 = vadd.f32 %v6325_v1, %v6142_v25  ;;  %v7936_v54 = vld [vmem:[#allocation3 + $0x4e8] sm:$0xf] }
 0x478   : > { %v6144_v46 = vadd.f32 %v6143_v56, %v10469_v39  ;;  %v2138_v39 = vpack.c.bf16 %v2068_v5, %v2068_v5  ;;  %1998 = vst [vmem:[#allocation3 + $0x5b8] sm:$0xf] %v1928_v15  ;;  %v7937_v56 = vor.u32 %v9044_v10, %v7936_v54  ;;  %v1931_v15 = vpack.c.bf16 %v1861_v27, %v1861_v27  ;;  %v9053_v54 = vld [vmem:[#allocation3 + $0x550] sm:$0xf0] }
 0x479   : > { %8853 = vmatmul.msk.bf16.gmra.mxu1 %vm6769_vm0, %v6721_v18  ;;  %v9048_v18 = vld [vmem:[#allocation3 + $0x52c] sm:$0xf] }
 0x47a   : > { %v6509_v35 = vpop.f32.mrf.mxu0  ;;  %2208 = vst [vmem:[#allocation3 + $0x5bc] sm:$0xf] %v2138_v39  ;;  %v2278_v39 = vld [vmem:[#allocation2 + $0x172] sm:$0xff] }
 0x47b   : > { %v6510_v12 = vadd.f32 %v6509_v35, %v6326_v38  ;;  %v7969_v35 = vor.u32 %v9048_v18, %v7966_v16  ;;  %v2348_v10 = vpack.c.bf16 %v2278_v39, %v2278_v39  ;;  %2001 = vst [vmem:[#allocation3 + $0x624] sm:$0xf] %v1931_v15  ;;  %v8002_v18 = vld [vmem:[#allocation3 + $0x594] sm:$0xf0] }
 0x47c   : > { %6185 = vmatmul.bf16.gmra.mxu2 %v7929_v8  ;;  %6548 = vmatmul.bf16.gmra.mxu0 %v7901_v62  ;;  %v2280_v15 = vld [vmem:[#allocation2 + $0x182] sm:$0xff] }
 0x47d   : > { %v6660_v1 = vmax.f32 %v6510_v12, 0.0  ;;  %2418 = vst [vmem:[#allocation3 + $0x5c0] sm:$0xf] %v2348_v10 }
 0x47e   : > { %v6327_v2 = vpop.f32.mrf.mxu3 }
 0x47f   : > { %v6146_v9 = vpop.f32.mrf.mxu2  ;;  %v6328_v41 = vadd.f32 %v6327_v2, %v6144_v46 }
 0x480   : > { %v6147_v7 = vadd.f32 %v6146_v9, %v10472_v61 }
 0x482   : > { %v6511_v59 = vpop.f32.mrf.mxu0 }
 0x483   : > { %6369 = vmatmul.bf16.gmra.mxu3 %v7933_v23  ;;  %v6512_v48 = vadd.f32 %v6511_v59, %v6328_v41 }
 0x485   : > { %v6661_v34 = vmax.f32 %v6512_v48, 0.0 }
 0x486   : > { %v6330_v20 = vpop.f32.mrf.mxu3  ;;  %v6884_v51 = vpop.f32.mrf.mxu1 }
 0x487   : > { %v6722_v29 = vpack.c.bf16 %v6661_v34, %v6660_v1  ;;  %v6148_v36 = vpop.f32.mrf.mxu2  ;;  %v6331_v23 = vadd.f32 %v6330_v20, %v6147_v7  ;;  %v6885_v46 = vadd.f32 %v10717_v13, %v6884_v51  ;;  %v1860_v20 = vld [vmem:[#allocation2 + $0x180] sm:$0xff]  ;;  %v8000_v34 = vld [vmem:[#allocation3 + $0x570] sm:$0xf] }
 0x488   : > { %v6149_v25 = vadd.f32 %v6148_v36, %v10475_v45  ;;  %v1930_v5 = vpack.c.bf16 %v1860_v20, %v1860_v20  ;;  %v7972_v51 = vld [vmem:[#allocation3 + $0x530] sm:$0xf]  ;;  %v8001_v36 = vor.u32 %v9061_v40, %v8000_v34  ;;  %v8008_v40 = vld [vmem:[#allocation3 + $0x578] sm:$0xf] }
 0x489   : > { %8854 = vmatmul.msk.bf16.gmra.mxu1 %vm6769_vm0, %v6722_v29  ;;  %v2349_v29 = vpack.c.bf16 %v2279_v22, %v2279_v22  ;;  %v7973_v16 = vor.u32 %v9053_v54, %v7972_v51  ;;  %v1863_v20 = vld [vmem:[#allocation2 + $0x198] sm:$0xff]  ;;  %v8036_v22 = vld [vmem:[#allocation3 + $0x5b8] sm:$0xf]  ;;  %v2351_v54 = vpack.c.bf16 %v2281_v57, %v2281_v57 }
 0x48a   : > { %v6514_v8 = vpop.f32.mrf.mxu0  ;;  %2000 = vst [vmem:[#allocation3 + $0x600] sm:$0xf] %v1930_v5  ;;  %v1933_v52 = vpack.c.bf16 %v1863_v20, %v1863_v20  ;;  %v2073_v5 = vld [vmem:[#allocation2 + $0x199] sm:$0xff]  ;;  %v2075_v20 = vld [vmem:[#allocation2 + $0x1a9] sm:$0xff] }
 0x48b   : > { %v6515_v41 = vadd.f32 %v6514_v8, %v6331_v23  ;;  %2419 = vst [vmem:[#allocation3 + $0x5e4] sm:$0xf] %v2349_v29  ;;  %v9066_v29 = vld [vmem:[#allocation3 + $0x5bc] sm:$0xf]  ;;  %v2145_v57 = vpack.c.bf16 %v2075_v20, %v2075_v20 }
 0x48c   : > { %6190 = vmatmul.bf16.gmra.mxu2 %v7965_v14  ;;  %6553 = vmatmul.bf16.gmra.mxu0 %v7937_v56  ;;  %v9057_v14 = vld [vmem:[#allocation3 + $0x574] sm:$0xf]  ;;  %2003 = vst [vmem:[#allocation3 + $0x66c] sm:$0xf] %v1933_v52 }
 0x48d   : > { %v6662_v37 = vmax.f32 %v6515_v41, 0.0  ;;  %2421 = vst [vmem:[#allocation3 + $0x62c] sm:$0xf] %v2351_v54 }
 0x48e   : > { %v6332_v62 = vpop.f32.mrf.mxu3  ;;  %v6886_v2 = vpop.f32.mrf.mxu1  ;;  %2215 = vst [vmem:[#allocation3 + $0x6b8] sm:$0xf] %v2145_v57 }
 0x48f   : > { %v6887_v38 = vadd.f32 %v10717_v13, %v6886_v2  ;;  %v6151_v61 = vpop.f32.mrf.mxu2  ;;  %v6333_v9 = vadd.f32 %v6332_v62, %v6149_v25  ;;  %v8005_v62 = vor.u32 %v9057_v14, %v8002_v18 }
 0x490   : > { %v6152_v8 = vadd.f32 %v6151_v61, %v10478_v31 }
 0x491   : > { %v9427_v45 = vpack.c.bf16 %v6887_v38, %v6885_v46 }
 0x492   : > { %v6516_v12 = vpop.f32.mrf.mxu0 }
 0x493   : > { %6374 = vmatmul.bf16.gmra.mxu3 %v7969_v35  ;;  %9428 = vst [vmem:[%s10725_s26] sm:$0xff] %v9427_v45   ;;  %v6517_v48 = vadd.f32 %v6516_v12, %v6333_v9  ;;  %v9088_v20 = vld [vmem:[#allocation3 + $0x668] sm:$0xf0] }
 0x495   : > { %v6663_v1 = vmax.f32 %v6517_v48, 0.0  ;;  %v1862_v48 = vld [vmem:[#allocation2 + $0x190] sm:$0xff] }
 0x496   : > { %v6335_v59 = vpop.f32.mrf.mxu3  ;;  %v6889_v0 = vpop.f32.mrf.mxu1  ;;  %v1932_v27 = vpack.c.bf16 %v1862_v48, %v1862_v48 }
 0x497   : > { %v6723_v47 = vpack.c.bf16 %v6663_v1, %v6662_v37  ;;  %v6153_v55 = vpop.f32.mrf.mxu2  ;;  %v6336_v2 = vadd.f32 %v6335_v59, %v6152_v8  ;;  %v6890_v23 = vadd.f32 %v10717_v13, %v6889_v0  ;;  %v9070_v37 = vld [vmem:[#allocation3 + $0x5d8] sm:$0xf0]  ;;  %v2143_v1 = vpack.c.bf16 %v2073_v5, %v2073_v5 }
 0x498   : > { %v6154_v35 = vadd.f32 %v6153_v55, %v10481_v60  ;;  %v2072_v60 = vld [vmem:[#allocation2 + $0x191] sm:$0xff]  ;;  %2002 = vst [vmem:[#allocation3 + $0x648] sm:$0xf] %v1932_v27  ;;  %v2350_v0 = vpack.c.bf16 %v2280_v15, %v2280_v15  ;;  %v8038_v55 = vld [vmem:[#allocation3 + $0x5dc] sm:$0xf0]  ;;  %v2283_v27 = vld [vmem:[#allocation2 + $0x19a] sm:$0xff] }
 0x499   : > { %8855 = vmatmul.msk.bf16.gmra.mxu1 %vm6769_vm0, %v6723_v47  ;;  %v2142_v59 = vpack.c.bf16 %v2072_v60, %v2072_v60  ;;  %v8037_v47 = vor.u32 %v9070_v37, %v8036_v22  ;;  %2213 = vst [vmem:[#allocation3 + $0x670] sm:$0xf] %v2143_v1  ;;  %v2282_v60 = vld [vmem:[#allocation2 + $0x192] sm:$0xff]  ;;  %v9079_v15 = vld [vmem:[#allocation3 + $0x620] sm:$0xf0] }
 0x49a   : > { %v6519_v56 = vpop.f32.mrf.mxu0  ;;  %2420 = vst [vmem:[#allocation3 + $0x608] sm:$0xf] %v2350_v0  ;;  %v9071_v22 = vld [vmem:[#allocation3 + $0x5e0] sm:$0xf0]  ;;  %v2352_v37 = vpack.c.bf16 %v2282_v60, %v2282_v60 }
 0x49b   : > { %v6520_v41 = vadd.f32 %v6519_v56, %v6336_v2  ;;  %2212 = vst [vmem:[#allocation3 + $0x64c] sm:$0xf] %v2142_v59  ;;  %v8041_v56 = vor.u32 %v9066_v29, %v8038_v55  ;;  %v8072_v59 = vld [vmem:[#allocation3 + $0x600] sm:$0xf]  ;;  %v9075_v0 = vld [vmem:[#allocation3 + $0x604] sm:$0xf] }
 0x49c   : > { %6195 = vmatmul.bf16.gmra.mxu2 %v8001_v36  ;;  %6558 = vmatmul.bf16.gmra.mxu0 %v7973_v16  ;;  %v8009_v36 = vor.u32 %v9062_v11, %v8008_v40  ;;  %v8073_v11 = vor.u32 %v9079_v15, %v8072_v59  ;;  %2422 = vst [vmem:[#allocation3 + $0x650] sm:$0xf] %v2352_v37 }
 0x49d   : > { %v6664_v26 = vmax.f32 %v6520_v41, 0.0 }
 0x49e   : > { %v6337_v7 = vpop.f32.mrf.mxu3  ;;  %v6891_v25 = vpop.f32.mrf.mxu1 }
 0x49f   : > { %v6892_v46 = vadd.f32 %v10717_v13, %v6891_v25  ;;  %v6156_v38 = vpop.f32.mrf.mxu2  ;;  %v6338_v9 = vadd.f32 %v6337_v7, %v6154_v35 }
 0x4a0   : > { %v6157_v18 = vadd.f32 %v6156_v38, %v10484_v50 }
 0x4a1   : > { %v9432_v45 = vpack.c.bf16 %v6892_v46, %v6890_v23 }
 0x4a2   : > { %v6521_v31 = vpop.f32.mrf.mxu0 }
 0x4a3   : > { %6379 = vmatmul.bf16.gmra.mxu3 %v8005_v62  ;;  %9635 = vst [vmem:[%s10725_s26 + $0x8] sm:$0xff] %v9432_v45   ;;  %v6522_v12 = vadd.f32 %v6521_v31, %v6338_v9  ;;  %v1864_v45 = vld [vmem:[#allocation2 + $0x1a0] sm:$0xff]  ;;  %v1865_v31 = vld [vmem:[#allocation2 + $0x1a8] sm:$0xff] }
 0x4a4   : > { %v1935_v48 = vpack.c.bf16 %v1865_v31, %v1865_v31  ;;  %v2285_v31 = vld [vmem:[#allocation2 + $0x1aa] sm:$0xff] }
 0x4a5   : > { %v6665_v39 = vmax.f32 %v6522_v12, 0.0  ;;  %v1934_v12 = vpack.c.bf16 %v1864_v45, %v1864_v45  ;;  %v2284_v45 = vld [vmem:[#allocation2 + $0x1a2] sm:$0xff]  ;;  %v2355_v15 = vpack.c.bf16 %v2285_v31, %v2285_v31 }
 0x4a6   : > { %v6340_v61 = vpop.f32.mrf.mxu3  ;;  %v6894_v34 = vpop.f32.mrf.mxu1  ;;  %2005 = vst [vmem:[#allocation3 + $0x6b4] sm:$0xf] %v1935_v48  ;;  %v8108_v48 = vld [vmem:[#allocation3 + $0x648] sm:$0xf] }
 0x4a7   : > { %v6724_v51 = vpack.c.bf16 %v6665_v39, %v6664_v26  ;;  %v6158_v10 = vpop.f32.mrf.mxu2  ;;  %v6341_v62 = vadd.f32 %v6340_v61, %v6157_v18  ;;  %v6895_v35 = vadd.f32 %v10717_v13, %v6894_v34  ;;  %v8044_v39 = vld [vmem:[#allocation3 + $0x5c0] sm:$0xf]  ;;  %2004 = vst [vmem:[#allocation3 + $0x690] sm:$0xf] %v1934_v12  ;;  %v2353_v34 = vpack.c.bf16 %v2283_v27, %v2283_v27  ;;  %v8080_v27 = vld [vmem:[#allocation3 + $0x608] sm:$0xf] }
 0x4a8   : > { %v6159_v8 = vadd.f32 %v6158_v10, %v10493_v44  ;;  %v2074_v44 = vld [vmem:[#allocation2 + $0x1a1] sm:$0xff]  ;;  %v8045_v54 = vor.u32 %v9071_v22, %v8044_v39  ;;  %v9084_v39 = vld [vmem:[#allocation3 + $0x64c] sm:$0xf]  ;;  %v8110_v22 = vld [vmem:[#allocation3 + $0x66c] sm:$0xf0] }
 0x4a9   : > { %8856 = vmatmul.msk.bf16.gmra.mxu1 %vm6769_vm0, %v6724_v51  ;;  %v2144_v61 = vpack.c.bf16 %v2074_v44, %v2074_v44  ;;  %v8074_v51 = vld [vmem:[#allocation3 + $0x624] sm:$0xf0]  ;;  %2423 = vst [vmem:[#allocation3 + $0x674] sm:$0xf] %v2353_v34 }
 0x4aa   : > { %v6524_v14 = vpop.f32.mrf.mxu0  ;;  %v8077_v55 = vor.u32 %v9075_v0, %v8074_v51  ;;  %2425 = vst [vmem:[#allocation3 + $0x6bc] sm:$0xf] %v2355_v15 }
 0x4ab   : > { %v6525_v46 = vadd.f32 %v6524_v14, %v6341_v62  ;;  %2214 = vst [vmem:[#allocation3 + $0x694] sm:$0xf] %v2144_v61 }
 0x4ac   : > { %6200 = vmatmul.bf16.gmra.mxu2 %v8037_v47  ;;  %6563 = vmatmul.bf16.gmra.mxu0 %v8009_v36 }
 0x4ad   : > { %v6666_v52 = vmax.f32 %v6525_v46, 0.0  ;;  %v1867_v46 = vld [vmem:[#allocation2 + $0x1b8] sm:$0xff] }
 0x4ae   : > { %v6342_v16 = vpop.f32.mrf.mxu3  ;;  %v6896_v7 = vpop.f32.mrf.mxu1 }
 0x4af   : > { %v6897_v25 = vadd.f32 %v10717_v13, %v6896_v7  ;;  %v6161_v2 = vpop.f32.mrf.mxu2  ;;  %v6343_v23 = vadd.f32 %v6342_v16, %v6159_v8 }
 0x4b0   : > { %v6162_v47 = vadd.f32 %v6161_v2, %v10499_v19 }
 0x4b1   : > { %v9437_v9 = vpack.c.bf16 %v6897_v25, %v6895_v35 }
 0x4b2   : > { %v6526_v50 = vpop.f32.mrf.mxu0 }
 0x4b3   : > { %6384 = vmatmul.bf16.gmra.mxu3 %v8041_v56  ;;  %9636 = vst [vmem:[%s10725_s26 + $0x10] sm:$0xff] %v9437_v9   ;;  %v6527_v41 = vadd.f32 %v6526_v50, %v6343_v23  ;;  %v1866_v23 = vld [vmem:[#allocation2 + $0x1b0] sm:$0xff]  ;;  %v1937_v50 = vpack.c.bf16 %v1867_v46, %v1867_v46 }
 0x4b4   : > { %v1936_v9 = vpack.c.bf16 %v1866_v23, %v1866_v23 }
 0x4b5   : > { %v6667_v5 = vmax.f32 %v6527_v41, 0.0  ;;  %v2077_v41 = vld [vmem:[#allocation2 + $0x1b9] sm:$0xff]  ;;  %2007 = vst [vmem:[#allocation3 + $0x6fc] sm:$0xf] %v1937_v50 }
 0x4b6   : > { %v6345_v38 = vpop.f32.mrf.mxu3  ;;  %v6899_v26 = vpop.f32.mrf.mxu1  ;;  %v2147_v61 = vpack.c.bf16 %v2077_v41, %v2077_v41  ;;  %2006 = vst [vmem:[#allocation3 + $0x6d8] sm:$0xf] %v1936_v9  ;;  %v9097_v9 = vld [vmem:[#allocation3 + $0x6b0] sm:$0xf0] }
 0x4b7   : > { %v6725_v1 = vpack.c.bf16 %v6667_v5, %v6666_v52  ;;  %v6163_v40 = vpop.f32.mrf.mxu2  ;;  %v6346_v18 = vadd.f32 %v6345_v38, %v6162_v47  ;;  %v6900_v16 = vadd.f32 %v10717_v13, %v6899_v26  ;;  %v9080_v52 = vld [vmem:[#allocation3 + $0x628] sm:$0xf0]  ;;  %v2354_v5 = vpack.c.bf16 %v2284_v45, %v2284_v45  ;;  %v9089_v45 = vld [vmem:[#allocation3 + $0x670] sm:$0xf0] }
 0x4b8   : > { %v6164_v36 = vadd.f32 %v6163_v40, %v10502_v6  ;;  %v2076_v6 = vld [vmem:[#allocation2 + $0x1b1] sm:$0xff]  ;;  %v8109_v26 = vor.u32 %v9088_v20, %v8108_v48  ;;  %v8081_v37 = vor.u32 %v9080_v52, %v8080_v27  ;;  %2217 = vst [vmem:[#allocation3 + $0x700] sm:$0xf] %v2147_v61  ;;  %v9093_v61 = vld [vmem:[#allocation3 + $0x694] sm:$0xf] }
 0x4b9   : > { %8857 = vmatmul.msk.bf16.gmra.mxu1 %vm6769_vm0, %v6725_v1  ;;  %v2146_v38 = vpack.c.bf16 %v2076_v6, %v2076_v6  ;;  %2424 = vst [vmem:[#allocation3 + $0x698] sm:$0xf] %v2354_v5  ;;  %v8144_v6 = vld [vmem:[#allocation3 + $0x690] sm:$0xf] }
 0x4ba   : > { %v6529_v10 = vpop.f32.mrf.mxu0  ;;  %v8145_v20 = vor.u32 %v9097_v9, %v8144_v6 }
 0x4bb   : > { %v6530_v62 = vadd.f32 %v6529_v10, %v6346_v18  ;;  %2216 = vst [vmem:[#allocation3 + $0x6dc] sm:$0xf] %v2146_v38  ;;  %v8116_v38 = vld [vmem:[#allocation3 + $0x650] sm:$0xf] }
 0x4bc   : > { %6205 = vmatmul.bf16.gmra.mxu2 %v8073_v11  ;;  %6568 = vmatmul.bf16.gmra.mxu0 %v8045_v54  ;;  %v8113_v11 = vor.u32 %v9084_v39, %v8110_v22  ;;  %v8117_v27 = vor.u32 %v9089_v45, %v8116_v38 }
 0x4bd   : > { %v6668_v44 = vmax.f32 %v6530_v62, 0.0 }
 0x4be   : > { %v6347_v29 = vpop.f32.mrf.mxu3  ;;  %v6901_v14 = vpop.f32.mrf.mxu1 }
 0x4bf   : > { %v6902_v56 = vadd.f32 %v10717_v13, %v6901_v14  ;;  %v6166_v8 = vpop.f32.mrf.mxu2  ;;  %v6348_v7 = vadd.f32 %v6347_v29, %v6164_v36  ;;  %v8182_v9 = vld [vmem:[#allocation3 + $0x6fc] sm:$0xf0] }
 0x4c0   : > { %v6167_v34 = vadd.f32 %v6166_v8, %v10505_v49  ;;  %v1869_v8 = vld [vmem:[#allocation2 + $0x1c8] sm:$0xff] }
 0x4c1   : > { %v9442_v35 = vpack.c.bf16 %v6902_v56, %v6900_v16  ;;  %v1868_v56 = vld [vmem:[#allocation2 + $0x1c0] sm:$0xff]  ;;  %v1939_v62 = vpack.c.bf16 %v1869_v8, %v1869_v8 }
 0x4c2   : > { %v6531_v19 = vpop.f32.mrf.mxu0  ;;  %v9106_v8 = vld [vmem:[#allocation3 + $0x6f8] sm:$0xf0] }
 0x4c3   : > { %6389 = vmatmul.bf16.gmra.mxu3 %v8077_v55  ;;  %9637 = vst [vmem:[%s10725_s26 + $0x18] sm:$0xff] %v9442_v35   ;;  %v6532_v2 = vadd.f32 %v6531_v19, %v6348_v7  ;;  %v1938_v7 = vpack.c.bf16 %v1868_v56, %v1868_v56  ;;  %v2079_v35 = vld [vmem:[#allocation2 + $0x1c9] sm:$0xff]  ;;  %v8180_v56 = vld [vmem:[#allocation3 + $0x6d8] sm:$0xf]  ;;  %v9102_v6 = vld [vmem:[#allocation3 + $0x6dc] sm:$0xf] }
 0x4c4   : > { %v2149_v50 = vpack.c.bf16 %v2079_v35, %v2079_v35  ;;  %2009 = vst [vmem:[#allocation3 + $0x744] sm:$0xf] %v1939_v62  ;;  %v8152_v62 = vld [vmem:[#allocation3 + $0x698] sm:$0xf]  ;;  %v9098_v35 = vld [vmem:[#allocation3 + $0x6b8] sm:$0xf0] }
 0x4c5   : > { %v6669_v12 = vmax.f32 %v6532_v2, 0.0  ;;  %v2287_v2 = vld [vmem:[#allocation2 + $0x1ba] sm:$0xff]  ;;  %2008 = vst [vmem:[#allocation3 + $0x720] sm:$0xf] %v1938_v7 }
 0x4c6   : > { %v6350_v25 = vpop.f32.mrf.mxu3  ;;  %v6904_v60 = vpop.f32.mrf.mxu1  ;;  %2219 = vst [vmem:[#allocation3 + $0x748] sm:$0xf] %v2149_v50  ;;  %v8153_v50 = vor.u32 %v9098_v35, %v8152_v62 }
 0x4c7   : > { %v6726_v59 = vpack.c.bf16 %v6669_v12, %v6668_v44  ;;  %v6168_v57 = vpop.f32.mrf.mxu2  ;;  %v6351_v54 = vadd.f32 %v6350_v25, %v6167_v34  ;;  %v6905_v10 = vadd.f32 %v10717_v13, %v6904_v60  ;;  %v2286_v25 = vld [vmem:[#allocation2 + $0x1b2] sm:$0xff]  ;;  %v2357_v12 = vpack.c.bf16 %v2287_v2, %v2287_v2  ;;  %v8146_v60 = vld [vmem:[#allocation3 + $0x6b4] sm:$0xf0] }
 0x4c8   : > { %v6169_v0 = vadd.f32 %v6168_v57, %v10508_v32  ;;  %v2078_v32 = vld [vmem:[#allocation2 + $0x1c1] sm:$0xff]  ;;  %v2356_v31 = vpack.c.bf16 %v2286_v25, %v2286_v25  ;;  %v8149_v15 = vor.u32 %v9093_v61, %v8146_v60 }
 0x4c9   : > { %8858 = vmatmul.msk.bf16.gmra.mxu1 %vm6769_vm0, %v6726_v59  ;;  %v2148_v19 = vpack.c.bf16 %v2078_v32, %v2078_v32  ;;  %2427 = vst [vmem:[#allocation3 + $0x704] sm:$0xf] %v2357_v12 }
 0x4ca   : > { %v6534_v1 = vpop.f32.mrf.mxu0  ;;  %2426 = vst [vmem:[#allocation3 + $0x6e0] sm:$0xf] %v2356_v31  ;;  %v8185_v31 = vor.u32 %v9102_v6, %v8182_v9 }
 0x4cb   : > { %v6535_v36 = vadd.f32 %v6534_v1, %v6351_v54  ;;  %2218 = vst [vmem:[#allocation3 + $0x724] sm:$0xf] %v2148_v19  ;;  %v1870_v54 = vld [vmem:[#allocation2 + $0x1d0] sm:$0xff] }
 0x4cc   : > { %6210 = vmatmul.bf16.gmra.mxu2 %v8109_v26  ;;  %6573 = vmatmul.bf16.gmra.mxu0 %v8081_v37 }
 0x4cd   : > { %v6670_v23 = vmax.f32 %v6535_v36, 0.0 }
 0x4ce   : > { %v6352_v40 = vpop.f32.mrf.mxu3  ;;  %v6906_v51 = vpop.f32.mrf.mxu1 }
 0x4cf   : > { %v6907_v47 = vadd.f32 %v10717_v13, %v6906_v51  ;;  %v6171_v29 = vpop.f32.mrf.mxu2  ;;  %v6353_v55 = vadd.f32 %v6352_v40, %v6169_v0 }
 0x4d0   : > { %v6172_v5 = vadd.f32 %v6171_v29, %v10511_v63 }
 0x4d1   : > { %v9447_v14 = vpack.c.bf16 %v6907_v47, %v6905_v10  ;;  %v1871_v10 = vld [vmem:[#allocation2 + $0x1d8] sm:$0xff]  ;;  %v1940_v47 = vpack.c.bf16 %v1870_v54, %v1870_v54 }
 0x4d2   : > { %v6536_v49 = vpop.f32.mrf.mxu0  ;;  %v1941_v29 = vpack.c.bf16 %v1871_v10, %v1871_v10 }
 0x4d3   : > { %6394 = vmatmul.bf16.gmra.mxu3 %v8113_v11  ;;  %9638 = vst [vmem:[%s10725_s26 + $0x20] sm:$0xff] %v9447_v14   ;;  %v6537_v16 = vadd.f32 %v6536_v49, %v6353_v55  ;;  %v2081_v55 = vld [vmem:[#allocation2 + $0x1d9] sm:$0xff]  ;;  %v2288_v14 = vld [vmem:[#allocation2 + $0x1c2] sm:$0xff]  ;;  %v2289_v49 = vld [vmem:[#allocation2 + $0x1ca] sm:$0xff] }
 0x4d4   : > { %v2151_v32 = vpack.c.bf16 %v2081_v55, %v2081_v55  ;;  %2010 = vst [vmem:[#allocation3 + $0x768] sm:$0xf] %v1940_v47  ;;  %v2358_v19 = vpack.c.bf16 %v2288_v14, %v2288_v14  ;;  %v2359_v2 = vpack.c.bf16 %v2289_v49, %v2289_v49  ;;  %v9107_v47 = vld [vmem:[#allocation3 + $0x700] sm:$0xf0] }
 0x4d5   : > { %v6671_v46 = vmax.f32 %v6537_v16, 0.0  ;;  %2011 = vst [vmem:[#allocation3 + $0x78c] sm:$0xf] %v1941_v29 }
 0x4d6   : > { %v6355_v18 = vpop.f32.mrf.mxu3  ;;  %v6909_v41 = vpop.f32.mrf.mxu1  ;;  %2221 = vst [vmem:[#allocation3 + $0x790] sm:$0xf] %v2151_v32 }
 0x4d7   : > { %v6727_v44 = vpack.c.bf16 %v6671_v46, %v6670_v23  ;;  %v6173_v48 = vpop.f32.mrf.mxu2  ;;  %v6356_v39 = vadd.f32 %v6355_v18, %v6172_v5  ;;  %v6910_v22 = vadd.f32 %v10717_v13, %v6909_v41  ;;  %v8181_v46 = vor.u32 %v9106_v8, %v8180_v56  ;;  %2428 = vst [vmem:[#allocation3 + $0x728] sm:$0xf] %v2358_v19 }
 0x4d8   : > { %v6174_v57 = vadd.f32 %v6173_v48, %v10514_v28  ;;  %v2080_v28 = vld [vmem:[#allocation2 + $0x1d1] sm:$0xff]  ;;  %2429 = vst [vmem:[#allocation3 + $0x74c] sm:$0xf] %v2359_v2 }
 0x4d9   : > { %8859 = vmatmul.msk.bf16.gmra.mxu1 %vm6769_vm0, %v6727_v44  ;;  %v2150_v36 = vpack.c.bf16 %v2080_v28, %v2080_v28  ;;  %v8188_v28 = vld [vmem:[#allocation3 + $0x6e0] sm:$0xf] }
 0x4da   : > { %v6539_v52 = vpop.f32.mrf.mxu0  ;;  %v8189_v56 = vor.u32 %v9107_v47, %v8188_v28 }
 0x4db   : > { %v6540_v40 = vadd.f32 %v6539_v52, %v6356_v39  ;;  %2220 = vst [vmem:[#allocation3 + $0x76c] sm:$0xf] %v2150_v36 }
 0x4dc   : > { %6215 = vmatmul.bf16.gmra.mxu2 %v8145_v20  ;;  %6578 = vmatmul.bf16.gmra.mxu0 %v8117_v27 }
 0x4dd   : > { %v6672_v18 = vmax.f32 %v6540_v40, 0.0  ;;  %v2291_v40 = vld [vmem:[#allocation2 + $0x1da] sm:$0xff] }
 0x4de   : > { %v6357_v59 = vpop.f32.mrf.mxu3  ;;  %v6911_v26 = vpop.f32.mrf.mxu1  ;;  %v2361_v36 = vpack.c.bf16 %v2291_v40, %v2291_v40  ;;  %v8254_v40 = vld [vmem:[#allocation3 + $0x78c] sm:$0xf0] }
 0x4df   : > { %v6912_v37 = vadd.f32 %v10717_v13, %v6911_v26  ;;  %v6176_v1 = vpop.f32.mrf.mxu2  ;;  %v6358_v34 = vadd.f32 %v6357_v59, %v6174_v57  ;;  %v1872_v57 = vld [vmem:[#allocation2 + $0x1e0] sm:$0xff]  ;;  %v1873_v26 = vld [vmem:[#allocation2 + $0x1e8] sm:$0xff] }
 0x4e0   : > { %v6177_v38 = vadd.f32 %v6176_v1, %v10517_v24  ;;  %v1942_v39 = vpack.c.bf16 %v1872_v57, %v1872_v57  ;;  %2431 = vst [vmem:[#allocation3 + $0x794] sm:$0xf] %v2361_v36  ;;  %v8224_v57 = vld [vmem:[#allocation3 + $0x728] sm:$0xf] }
 0x4e1   : > { %v9452_v11 = vpack.c.bf16 %v6912_v37, %v6910_v22  ;;  %v1943_v22 = vpack.c.bf16 %v1873_v26, %v1873_v26  ;;  %v2083_v37 = vld [vmem:[#allocation2 + $0x1e9] sm:$0xff]  ;;  %v9116_v26 = vld [vmem:[#allocation3 + $0x748] sm:$0xf0] }
 0x4e2   : > { %v6541_v63 = vpop.f32.mrf.mxu0  ;;  %v2153_v54 = vpack.c.bf16 %v2083_v37, %v2083_v37  ;;  %2012 = vst [vmem:[#allocation3 + $0x7b0] sm:$0xf] %v1942_v39 }
 0x4e3   : > { %6399 = vmatmul.bf16.gmra.mxu3 %v8149_v15  ;;  %9639 = vst [vmem:[%s10725_s26 + $0x28] sm:$0xff] %v9452_v11   ;;  %v6542_v51 = vadd.f32 %v6541_v63, %v6358_v34  ;;  %v2290_v34 = vld [vmem:[#allocation2 + $0x1d2] sm:$0xff] }
 0x4e4   : > { %v2360_v29 = vpack.c.bf16 %v2290_v34, %v2290_v34  ;;  %2013 = vst [vmem:[#allocation3 + $0x7d4] sm:$0xf] %v1943_v22  ;;  %v9120_v34 = vld [vmem:[#allocation3 + $0x76c] sm:$0xf] }
 0x4e5   : > { %v6673_v16 = vmax.f32 %v6542_v51, 0.0  ;;  %v9115_v51 = vld [vmem:[#allocation3 + $0x740] sm:$0xf0]  ;;  %2223 = vst [vmem:[#allocation3 + $0x7d8] sm:$0xf] %v2153_v54  ;;  %v8257_v54 = vor.u32 %v9120_v34, %v8254_v40 }
 0x4e6   : > { %v6360_v0 = vpop.f32.mrf.mxu3  ;;  %v6914_v7 = vpop.f32.mrf.mxu1  ;;  %2430 = vst [vmem:[#allocation3 + $0x770] sm:$0xf] %v2360_v29 }
 0x4e7   : > { %v6728_v25 = vpack.c.bf16 %v6673_v16, %v6672_v18  ;;  %v6178_v23 = vpop.f32.mrf.mxu2  ;;  %v6361_v48 = vadd.f32 %v6360_v0, %v6177_v38  ;;  %v6915_v20 = vadd.f32 %v10717_v13, %v6914_v7  ;;  %v8216_v0 = vld [vmem:[#allocation3 + $0x720] sm:$0xf]  ;;  %v9111_v18 = vld [vmem:[#allocation3 + $0x724] sm:$0xf]  ;;  %v8218_v16 = vld [vmem:[#allocation3 + $0x744] sm:$0xf0] }
 0x4e8   : > { %v6179_v44 = vadd.f32 %v6178_v23, %v10520_v42  ;;  %v2082_v42 = vld [vmem:[#allocation2 + $0x1e1] sm:$0xff]  ;;  %v8217_v49 = vor.u32 %v9115_v51, %v8216_v0  ;;  %v8221_v62 = vor.u32 %v9111_v18, %v8218_v16 }
 0x4e9   : > { %8860 = vmatmul.msk.bf16.gmra.mxu1 %vm6769_vm0, %v6728_v25  ;;  %v2152_v1 = vpack.c.bf16 %v2082_v42, %v2082_v42 }
 0x4ea   : > { %v6544_v41 = vpop.f32.mrf.mxu0 }
 0x4eb   : > { %v6545_v52 = vadd.f32 %v6544_v41, %v6361_v48  ;;  %2222 = vst [vmem:[#allocation3 + $0x7b4] sm:$0xf] %v2152_v1  ;;  %v2085_v48 = vld [vmem:[#allocation2 + $0x1f9] sm:$0xff] }
 0x4ec   : > { %6220 = vmatmul.bf16.gmra.mxu2 %v8181_v46  ;;  %6583 = vmatmul.bf16.gmra.mxu0 %v8153_v50 }
 0x4ed   : > { %v6674_v11 = vmax.f32 %v6545_v52, 0.0 }
 0x4ee   : > { %v6362_v45 = vpop.f32.mrf.mxu3  ;;  %v6916_v12 = vpop.f32.mrf.mxu1 }
 0x4ef   : > { %v6917_v61 = vadd.f32 %v10717_v13, %v6916_v12  ;;  %v6181_v60 = vpop.f32.mrf.mxu2  ;;  %v6363_v27 = vadd.f32 %v6362_v45, %v6179_v44  ;;  %v1874_v45 = vld [vmem:[#allocation2 + $0x1f0] sm:$0xff] }
 0x4f0   : > { %v6182_v32 = vadd.f32 %v6181_v60, %v10529_v43  ;;  %v1944_v44 = vpack.c.bf16 %v1874_v45, %v1874_v45  ;;  %v2293_v60 = vld [vmem:[#allocation2 + $0x1ea] sm:$0xff]  ;;  %v8260_v45 = vld [vmem:[#allocation3 + $0x770] sm:$0xf] }
 0x4f1   : > { %v9457_v5 = vpack.c.bf16 %v6917_v61, %v6915_v20  ;;  %v2292_v61 = vld [vmem:[#allocation2 + $0x1e2] sm:$0xff]  ;;  %v2363_v22 = vpack.c.bf16 %v2293_v60, %v2293_v60 }
 0x4f2   : > { %v6546_v24 = vpop.f32.mrf.mxu0  ;;  %2014 = vst [vmem:[#allocation3 + $0x7f8] sm:$0xf] %v1944_v44  ;;  %v2362_v42 = vpack.c.bf16 %v2292_v61, %v2292_v61  ;;  %v9129_v61 = vld [vmem:[#allocation3 + $0x7b4] sm:$0xf]  ;;  %v8290_v60 = vld [vmem:[#allocation3 + $0x7d4] sm:$0xf0] }
 0x4f3   : > { %6404 = vmatmul.bf16.gmra.mxu3 %v8185_v31  ;;  %9640 = vst [vmem:[%s10725_s26 + $0x30] sm:$0xff] %v9457_v5   ;;  %v6547_v15 = vadd.f32 %v6546_v24, %v6363_v27  ;;  %v1875_v31 = vld [vmem:[#allocation2 + $0x1f8] sm:$0xff]  ;;  %v8252_v5 = vld [vmem:[#allocation3 + $0x768] sm:$0xf]  ;;  %v9124_v24 = vld [vmem:[#allocation3 + $0x788] sm:$0xf0] }
 0x4f4   : > { %v1945_v12 = vpack.c.bf16 %v1875_v31, %v1875_v31  ;;  %v8253_v1 = vor.u32 %v9124_v24, %v8252_v5  ;;  %2432 = vst [vmem:[#allocation3 + $0x7b8] sm:$0xf] %v2362_v42  ;;  %v9125_v31 = vld [vmem:[#allocation3 + $0x790] sm:$0xf0]  ;;  %v11029_v5 = vld [vmem:[#allocation39_spill] sm:$0xff] }
 0x4f5   : > { %v6675_v63 = vmax.f32 %v6547_v15, 0.0  ;;  %2433 = vst [vmem:[#allocation3 + $0x7dc] sm:$0xf] %v2363_v22 }
 0x4f6   : > { %v6365_v59 = vpop.f32.mrf.mxu3  ;;  %v6919_v10 = vpop.f32.mrf.mxu1  ;;  %2015 = vst [vmem:[#allocation3 + $0x81c] sm:$0xf] %v1945_v12 }
 0x4f7   : > { %v6729_v55 = vpack.c.bf16 %v6675_v63, %v6674_v11  ;;  %v6183_v14 = vpop.f32.mrf.mxu2  ;;  %v6366_v25 = vadd.f32 %v6365_v59, %v6182_v32  ;;  %v6920_v2 = vadd.f32 %v10717_v13, %v6919_v10  ;;  %v2155_v59 = vpack.c.bf16 %v2085_v48, %v2085_v48  ;;  %v11028_v10 = vld [vmem:[#allocation38_spill] sm:$0xff] }
 0x4f8   : > { %v6184_v35 = vadd.f32 %v6183_v14, %v10538_v33  ;;  %v2084_v33 = vld [vmem:[#allocation2 + $0x1f1] sm:$0xff]  ;;  %v8225_v11 = vor.u32 %v9116_v26, %v8224_v57  ;;  %v1876_v32 = vld [vmem:[#allocation2 + $0x200] sm:$0xff] }
 0x4f9   : > { %8861 = vmatmul.msk.bf16.gmra.mxu1 %vm6769_vm0, %v6729_v55  ;;  %v2154_v20 = vpack.c.bf16 %v2084_v33, %v2084_v33  ;;  %2225 = vst [vmem:[#allocation3 + $0x820] sm:$0xf] %v2155_v59  ;;  %v11030_v57 = vld [vmem:[#allocation40_spill] sm:$0xff] }
 0x4fa   : > { %v6549_v8 = vpop.f32.mrf.mxu0 }
 0x4fb   : > { %v6550_v9 = vadd.f32 %v6549_v8, %v6366_v25  ;;  %2224 = vst [vmem:[#allocation3 + $0x7fc] sm:$0xf] %v2154_v20  ;;  %v2087_v25 = vld [vmem:[#allocation2 + $0x209] sm:$0xff] }
 0x4fc   : > { %6225 = vmatmul.bf16.gmra.mxu2 %v8217_v49  ;;  %6588 = vmatmul.bf16.gmra.mxu0 %v8189_v56 }
 0x4fd   : > { %v6676_v27 = vmax.f32 %v6550_v9, 0.0 }
 0x4fe   : > { %v6367_v7 = vpop.f32.mrf.mxu3  ;;  %v6921_v19 = vpop.f32.mrf.mxu1 }
 0x4ff   : > { %v6922_v23 = vadd.f32 %v10717_v13, %v6921_v19  ;;  %v6186_v46 = vpop.f32.mrf.mxu2  ;;  %v6368_v6 = vadd.f32 %v6367_v7, %v6184_v35  ;;  %v1877_v7 = vld [vmem:[#allocation2 + $0x208] sm:$0xff]  ;;  %v1946_v35 = vpack.c.bf16 %v1876_v32, %v1876_v32  ;;  %v8296_v32 = vld [vmem:[#allocation3 + $0x7b8] sm:$0xf] }
 0x500   : > { %v6187_v0 = vadd.f32 %v6186_v46, %v10541_v3  ;;  %v1947_v19 = vpack.c.bf16 %v1877_v7, %v1877_v7  ;;  %v2295_v46 = vld [vmem:[#allocation2 + $0x1fa] sm:$0xff]  ;;  %v9134_v7 = vld [vmem:[#allocation3 + $0x7d8] sm:$0xf0] }
 0x501   : > { %v9462_v50 = vpack.c.bf16 %v6922_v23, %v6920_v2  ;;  %v2294_v23 = vld [vmem:[#allocation2 + $0x1f2] sm:$0xff]  ;;  %2016 = vst [vmem:[#allocation3 + $0x840] sm:$0xf] %v1946_v35  ;;  %v2365_v12 = vpack.c.bf16 %v2295_v46, %v2295_v46  ;;  %v8326_v46 = vld [vmem:[#allocation3 + $0x81c] sm:$0xf0] }
 0x502   : > { %v6551_v43 = vpop.f32.mrf.mxu0  ;;  %v2364_v33 = vpack.c.bf16 %v2294_v23, %v2294_v23  ;;  %2017 = vst [vmem:[#allocation3 + $0x864] sm:$0xf] %v1947_v19  ;;  %v9138_v23 = vld [vmem:[#allocation3 + $0x7fc] sm:$0xf] }
 0x503   : > { %6409 = vmatmul.bf16.gmra.mxu3 %v8221_v62  ;;  %9641 = vst [vmem:[%s10725_s26 + $0x38] sm:$0xff] %v9462_v50   ;;  %v6552_v38 = vadd.f32 %v6551_v43, %v6368_v6  ;;  %v2086_v62 = vld [vmem:[#allocation2 + $0x201] sm:$0xff]  ;;  %v8288_v50 = vld [vmem:[#allocation3 + $0x7b0] sm:$0xf]  ;;  %v9133_v43 = vld [vmem:[#allocation3 + $0x7d0] sm:$0xf0] }
 0x504   : > { %v2156_v2 = vpack.c.bf16 %v2086_v62, %v2086_v62  ;;  %v8289_v20 = vor.u32 %v9133_v43, %v8288_v50  ;;  %2434 = vst [vmem:[#allocation3 + $0x800] sm:$0xf] %v2364_v33  ;;  %v11031_v50 = vld [vmem:[#allocation7_spill] sm:$0xff] }
 0x505   : > { %v6677_v52 = vmax.f32 %v6552_v38, 0.0  ;;  %2435 = vst [vmem:[#allocation3 + $0x824] sm:$0xf] %v2365_v12  ;;  %v10788_v12 = vld [vmem:[%s10923_s5] ss:$0 sm:$0xff] }
 0x506   : > { %v6370_v41 = vpop.f32.mrf.mxu3  ;;  %v6924_v15 = vpop.f32.mrf.mxu1  ;;  %2226 = vst [vmem:[#allocation3 + $0x844] sm:$0xf] %v2156_v2 }
 0x507   : > { %v6730_v39 = vpack.c.bf16 %v6677_v52, %v6676_v27  ;;  %v6188_v37 = vpop.f32.mrf.mxu2  ;;  %v6371_v29 = vadd.f32 %v6370_v41, %v6187_v0  ;;  %v6925_v55 = vadd.f32 %v10717_v13, %v6924_v15  ;;  %v2157_v41 = vpack.c.bf16 %v2087_v25, %v2087_v25 }
 0x508   : > { %v6189_v28 = vadd.f32 %v6188_v37, %v11028_v10  ;;  %v8261_v27 = vor.u32 %v9125_v31, %v8260_v45  ;;  %v8293_v15 = vor.u32 %v9129_v61, %v8290_v60  ;;  %v1879_v10 = vld [vmem:[#allocation2 + $0x218] sm:$0xff]  ;;  %v11032_v45 = vld [vmem:[#allocation8_spill] sm:$0xff] }
 0x509   : > { %8862 = vmatmul.msk.bf16.gmra.mxu1 %vm6769_vm0, %v6730_v39  ;;  %2227 = vst [vmem:[#allocation3 + $0x868] sm:$0xf] %v2157_v41 }
 0x50a   : > { %v6554_v63 = vpop.f32.mrf.mxu0 }
 0x50b   : > { %v6555_v18 = vadd.f32 %v6554_v63, %v6371_v29  ;;  %v1949_v29 = vpack.c.bf16 %v1879_v10, %v1879_v10  ;;  %v8332_v10 = vld [vmem:[#allocation3 + $0x800] sm:$0xf] }
 0x50c   : > { %6230 = vmatmul.bf16.gmra.mxu2 %v8253_v1  ;;  %6593 = vmatmul.bf16.gmra.mxu0 %v8225_v11 }
 0x50d   : > { %v6678_v6 = vmax.f32 %v6555_v18, 0.0  ;;  %2019 = vst [vmem:[#allocation3 + $0x8ac] sm:$0xf] %v1949_v29 }
 0x50e   : > { %v6372_v51 = vpop.f32.mrf.mxu3  ;;  %v6926_v47 = vpop.f32.mrf.mxu1 }
 0x50f   : > { %v6927_v36 = vadd.f32 %v10717_v13, %v6926_v47  ;;  %v6191_v14 = vpop.f32.mrf.mxu2  ;;  %v6373_v49 = vadd.f32 %v6372_v51, %v6189_v28  ;;  %v2088_v28 = vld [vmem:[#allocation2 + $0x211] sm:$0xff] }
 0x510   : > { %v6192_v24 = vadd.f32 %v6191_v14, %v11029_v5  ;;  %v2296_v14 = vld [vmem:[#allocation2 + $0x202] sm:$0xff] }
 0x511   : > { %v9467_v16 = vpack.c.bf16 %v6927_v36, %v6925_v55  ;;  %v2089_v55 = vld [vmem:[#allocation2 + $0x219] sm:$0xff]  ;;  %v2158_v36 = vpack.c.bf16 %v2088_v28, %v2088_v28  ;;  %v2366_v62 = vpack.c.bf16 %v2296_v14, %v2296_v14  ;;  %v9143_v28 = vld [vmem:[#allocation3 + $0x820] sm:$0xf0] }
 0x512   : > { %v6556_v3 = vpop.f32.mrf.mxu0 }
 0x513   : > { %6414 = vmatmul.bf16.gmra.mxu3 %v8257_v54  ;;  %9642 = vst [vmem:[%s10725_s26 + $0x40] sm:$0xff] %v9467_v16   ;;  %v6557_v8 = vadd.f32 %v6556_v3, %v6373_v49  ;;  %v1878_v54 = vld [vmem:[#allocation2 + $0x210] sm:$0xff]  ;;  %v8324_v16 = vld [vmem:[#allocation3 + $0x7f8] sm:$0xf]  ;;  %v9142_v3 = vld [vmem:[#allocation3 + $0x818] sm:$0xf0] }
 0x514   : > { %v1948_v47 = vpack.c.bf16 %v1878_v54, %v1878_v54  ;;  %v2297_v49 = vld [vmem:[#allocation2 + $0x20a] sm:$0xff]  ;;  %2228 = vst [vmem:[#allocation3 + $0x88c] sm:$0xf] %v2158_v36  ;;  %v8325_v2 = vor.u32 %v9142_v3, %v8324_v16  ;;  %v11033_v3 = vld [vmem:[#allocation9_spill] sm:$0xff] }
 0x515   : > { %v6679_v9 = vmax.f32 %v6557_v8, 0.0  ;;  %v2367_v19 = vpack.c.bf16 %v2297_v49, %v2297_v49  ;;  %2436 = vst [vmem:[#allocation3 + $0x848] sm:$0xf] %v2366_v62  ;;  %v9147_v49 = vld [vmem:[#allocation3 + $0x844] sm:$0xf] }
 0x516   : > { %v6375_v56 = vpop.f32.mrf.mxu3  ;;  %v6929_v38 = vpop.f32.mrf.mxu1  ;;  %2018 = vst [vmem:[#allocation3 + $0x888] sm:$0xf] %v1948_v47 }
 0x517   : > { %v6731_v44 = vpack.c.bf16 %v6679_v9, %v6678_v6  ;;  %v6193_v48 = vpop.f32.mrf.mxu2  ;;  %v6376_v39 = vadd.f32 %v6375_v56, %v6192_v24  ;;  %v6930_v22 = vadd.f32 %v10717_v13, %v6929_v38  ;;  %v2159_v56 = vpack.c.bf16 %v2089_v55, %v2089_v55  ;;  %2437 = vst [vmem:[#allocation3 + $0x86c] sm:$0xf] %v2367_v19 }
 0x518   : > { %v6194_v26 = vadd.f32 %v6193_v48, %v11030_v57  ;;  %v8297_v6 = vor.u32 %v9134_v7, %v8296_v32  ;;  %v8329_v38 = vor.u32 %v9138_v23, %v8326_v46  ;;  %v1881_v57 = vld [vmem:[#allocation2 + $0x228] sm:$0xff]  ;;  %v11034_v7 = vld [vmem:[#allocation10_spill] sm:$0xff] }
 0x519   : > { %8863 = vmatmul.msk.bf16.gmra.mxu1 %vm6769_vm0, %v6731_v44  ;;  %2229 = vst [vmem:[#allocation3 + $0x8b0] sm:$0xf] %v2159_v56 }
 0x51a   : > { %v6559_v52 = vpop.f32.mrf.mxu0 }
 0x51b   : > { %v6560_v40 = vadd.f32 %v6559_v52, %v6376_v39  ;;  %v1951_v39 = vpack.c.bf16 %v1881_v57, %v1881_v57 }
 0x51c   : > { %6235 = vmatmul.bf16.gmra.mxu2 %v8289_v20  ;;  %6598 = vmatmul.bf16.gmra.mxu0 %v8261_v27  ;;  %v8368_v57 = vld [vmem:[#allocation3 + $0x848] sm:$0xf] }
 0x51d   : > { %v6680_v18 = vmax.f32 %v6560_v40, 0.0  ;;  %2021 = vst [vmem:[#allocation3 + $0x8f4] sm:$0xf] %v1951_v39 }
 0x51e   : > { %v6377_v59 = vpop.f32.mrf.mxu3  ;;  %v6931_v42 = vpop.f32.mrf.mxu1 }
 0x51f   : > { %v6932_v37 = vadd.f32 %v10717_v13, %v6931_v42  ;;  %v6196_v1 = vpop.f32.mrf.mxu2  ;;  %v6378_v34 = vadd.f32 %v6377_v59, %v6194_v26  ;;  %v2090_v26 = vld [vmem:[#allocation2 + $0x221] sm:$0xff] }
 0x520   : > { %v6197_v43 = vadd.f32 %v6196_v1, %v11031_v50  ;;  %v2298_v1 = vld [vmem:[#allocation2 + $0x212] sm:$0xff] }
 0x521   : > { %v9472_v11 = vpack.c.bf16 %v6932_v37, %v6930_v22  ;;  %v2091_v22 = vld [vmem:[#allocation2 + $0x229] sm:$0xff]  ;;  %v2160_v37 = vpack.c.bf16 %v2090_v26, %v2090_v26  ;;  %v2368_v47 = vpack.c.bf16 %v2298_v1, %v2298_v1  ;;  %v9152_v26 = vld [vmem:[#allocation3 + $0x868] sm:$0xf0] }
 0x522   : > { %v6561_v63 = vpop.f32.mrf.mxu0  ;;  %v9156_v1 = vld [vmem:[#allocation3 + $0x88c] sm:$0xf] }
 0x523   : > { %6419 = vmatmul.bf16.gmra.mxu3 %v8293_v15  ;;  %9643 = vst [vmem:[%s10725_s26 + $0x48] sm:$0xff] %v9472_v11   ;;  %v6562_v51 = vadd.f32 %v6561_v63, %v6378_v34  ;;  %v1880_v15 = vld [vmem:[#allocation2 + $0x220] sm:$0xff]  ;;  %v8360_v63 = vld [vmem:[#allocation3 + $0x840] sm:$0xf] }
 0x524   : > { %v1950_v42 = vpack.c.bf16 %v1880_v15, %v1880_v15  ;;  %v2299_v34 = vld [vmem:[#allocation2 + $0x21a] sm:$0xff]  ;;  %2230 = vst [vmem:[#allocation3 + $0x8d4] sm:$0xf] %v2160_v37 }
 0x525   : > { %v6681_v13 = vmax.f32 %v6562_v51, 0.0  ;;  %v2161_v51 = vpack.c.bf16 %v2091_v22, %v2091_v22  ;;  %v2369_v55 = vpack.c.bf16 %v2299_v34, %v2299_v34  ;;  %2438 = vst [vmem:[#allocation3 + $0x890] sm:$0xf] %v2368_v47 }
 0x526   : > { %v6380_v0 = vpop.f32.mrf.mxu3  ;;  %v6934_v8 = vpop.f32.mrf.mxu1  ;;  %2020 = vst [vmem:[#allocation3 + $0x8d0] sm:$0xf] %v1950_v42 }
 0x527   : > { %v6732_v35 = vpack.c.bf16 %v6681_v13, %v6680_v18  ;;  %v6198_v25 = vpop.f32.mrf.mxu2  ;;  %v6381_v44 = vadd.f32 %v6380_v0, %v6197_v43  ;;  %v6935_v48 = vadd.f32 %v10788_v12, %v6934_v8  ;;  %v9151_v0 = vld [vmem:[#allocation3 + $0x860] sm:$0xf0]  ;;  %v8362_v18 = vld [vmem:[#allocation3 + $0x864] sm:$0xf0]  ;;  %v8333_v13 = vor.u32 %v9143_v28, %v8332_v10  ;;  %2231 = vst [vmem:[#allocation3 + $0x8f8] sm:$0xf] %v2161_v51 }
 0x528   : > { %v6199_v31 = vadd.f32 %v6198_v25, %v11032_v45  ;;  %v8361_v14 = vor.u32 %v9151_v0, %v8360_v63  ;;  %2439 = vst [vmem:[#allocation3 + $0x8b4] sm:$0xf] %v2369_v55  ;;  %v8365_v32 = vor.u32 %v9147_v49, %v8362_v18  ;;  %v1883_v45 = vld [vmem:[#allocation2 + $0x238] sm:$0xff]  ;;  %v9634_v63 = vld [vmem:[%s10169_s13 + $0x10] sm:$0xff]  }
 0x529   : > { %8864 = vmatmul.msk.bf16.gmra.mxu1 %vm6769_vm0, %v6732_v35  ;;  %v10801_v51 = vunpack.c.l.bf16 %v9634_v63 }
 0x52a   : > { %v6564_v9 = vpop.f32.mrf.mxu0 }
 0x52b   : > { %v6565_v27 = vadd.f32 %v6564_v9, %v6381_v44  ;;  %v1953_v44 = vpack.c.bf16 %v1883_v45, %v1883_v45  ;;  %555 = vst [vmem:[#allocation2 + $0x250] sm:$0xff] %v10801_v51 }
 0x52c   : > { %6240 = vmatmul.bf16.gmra.mxu2 %v8325_v2  ;;  %6603 = vmatmul.bf16.gmra.mxu0 %v8297_v6 }
 0x52d   : > { %v6682_v40 = vmax.f32 %v6565_v27, 0.0  ;;  %2023 = vst [vmem:[#allocation3 + $0x93c] sm:$0xf] %v1953_v44 }
 0x52e   : > { %v6382_v41 = vpop.f32.mrf.mxu3  ;;  %v6936_v33 = vpop.f32.mrf.mxu1 }
 0x52f   : > { %v6937_v20 = vadd.f32 %v10788_v12, %v6936_v33  ;;  %v6201_v61 = vpop.f32.mrf.mxu2  ;;  %v6383_v60 = vadd.f32 %v6382_v41, %v6199_v31  ;;  %v2092_v31 = vld [vmem:[#allocation2 + $0x231] sm:$0xff]  ;;  %v9161_v44 = vld [vmem:[#allocation3 + $0x8b0] sm:$0xf0] }
 0x530   : > { %v6202_v56 = vadd.f32 %v6201_v61, %v11033_v3  ;;  %v2300_v61 = vld [vmem:[#allocation2 + $0x222] sm:$0xff] }
 0x531   : > { %v9477_v52 = vpack.c.bf16 %v6937_v20, %v6935_v48  ;;  %v2093_v48 = vld [vmem:[#allocation2 + $0x239] sm:$0xff]  ;;  %v2162_v20 = vpack.c.bf16 %v2092_v31, %v2092_v31  ;;  %v2370_v42 = vpack.c.bf16 %v2300_v61, %v2300_v61 }
 0x532   : > { %v6566_v5 = vpop.f32.mrf.mxu0 }
 0x533   : > { %6424 = vmatmul.bf16.gmra.mxu3 %v8329_v38  ;;  %9644 = vst [vmem:[%s10725_s26 + $0x50] sm:$0xff] %v9477_v52   ;;  %v6567_v59 = vadd.f32 %v6566_v5, %v6383_v60  ;;  %v1882_v38 = vld [vmem:[#allocation2 + $0x230] sm:$0xff] }
 0x534   : > { %v1952_v33 = vpack.c.bf16 %v1882_v38, %v1882_v38  ;;  %v2301_v60 = vld [vmem:[#allocation2 + $0x22a] sm:$0xff]  ;;  %2232 = vst [vmem:[#allocation3 + $0x91c] sm:$0xf] %v2162_v20  ;;  %v9169_v38 = vld [vmem:[#allocation3 + $0x8f0] sm:$0xf0] }
 0x535   : > { %v6683_v11 = vmax.f32 %v6567_v59, 0.0  ;;  %v8396_v5 = vld [vmem:[#allocation3 + $0x888] sm:$0xf]  ;;  %v2163_v59 = vpack.c.bf16 %v2093_v48, %v2093_v48  ;;  %v2371_v22 = vpack.c.bf16 %v2301_v60, %v2301_v60  ;;  %2440 = vst [vmem:[#allocation3 + $0x8d8] sm:$0xf] %v2370_v42 }
 0x536   : > { %v6385_v24 = vpop.f32.mrf.mxu3  ;;  %v6939_v54 = vpop.f32.mrf.mxu1  ;;  %2022 = vst [vmem:[#allocation3 + $0x918] sm:$0xf] %v1952_v33  ;;  %v8404_v33 = vld [vmem:[#allocation3 + $0x890] sm:$0xf] }
 0x537   : > { %v6733_v29 = vpack.c.bf16 %v6683_v11, %v6682_v40  ;;  %v6203_v36 = vpop.f32.mrf.mxu2  ;;  %v6386_v19 = vadd.f32 %v6385_v24, %v6202_v56  ;;  %v6940_v25 = vadd.f32 %v10788_v12, %v6939_v54  ;;  %v9160_v24 = vld [vmem:[#allocation3 + $0x8a8] sm:$0xf0]  ;;  %v8398_v40 = vld [vmem:[#allocation3 + $0x8ac] sm:$0xf0]  ;;  %v8369_v11 = vor.u32 %v9152_v26, %v8368_v57  ;;  %2233 = vst [vmem:[#allocation3 + $0x940] sm:$0xf] %v2163_v59 }
 0x538   : > { %v6204_v62 = vadd.f32 %v6203_v36, %v11034_v7  ;;  %v8397_v34 = vor.u32 %v9160_v24, %v8396_v5  ;;  %v11035_v54 = vld [vmem:[#allocation11_spill] sm:$0xff]  ;;  %2441 = vst [vmem:[#allocation3 + $0x8fc] sm:$0xf] %v2371_v22  ;;  %v8401_v47 = vor.u32 %v9156_v1, %v8398_v40  ;;  %v8405_v24 = vor.u32 %v9161_v44, %v8404_v33  ;;  %v543_v59 = vld [vmem:[%s10169_s13 + $0x18] sm:$0xf] }
 0x539   : > { %8865 = vmatmul.msk.bf16.gmra.mxu1 %vm6769_vm0, %v6733_v29  ;;  %v11036_v29 = vld [vmem:[#allocation12_spill] sm:$0xff]  ;;  %v8434_v5 = vld [vmem:[#allocation3 + $0x8f4] sm:$0xf0]  ;;  %v9423_v57 = vunpack.c.h.bf16 %v9634_v63  ;;  %v550_v26 = vunpack.c.l.bf16 %v543_v59  ;;  %v11037_v42 = vld [vmem:[#allocation13_spill] sm:$0xff] }
 0x53a   : > { %v6569_v16 = vpop.f32.mrf.mxu0 }
 0x53b   : > { %v6570_v6 = vadd.f32 %v6569_v16, %v6386_v19  ;;  %v2094_v19 = vld [vmem:[#allocation2 + $0x241] sm:$0xff]  ;;  %556 = vst [vmem:[#allocation2 + $0x258] sm:$0xff] %v9423_v57 }
 0x53c   : > { %6245 = vmatmul.bf16.gmra.mxu2 %v8361_v14  ;;  %6608 = vmatmul.bf16.gmra.mxu0 %v8333_v13  ;;  %557 = vst [vmem:[#allocation2 + $0x260] sm:$0xff] %v550_v26 }
 0x53d   : > { %v6684_v27 = vmax.f32 %v6570_v6, 0.0  ;;  %v2302_v6 = vld [vmem:[#allocation2 + $0x232] sm:$0xff] }
 0x53e   : > { %v6387_v8 = vpop.f32.mrf.mxu3  ;;  %v6941_v35 = vpop.f32.mrf.mxu1  ;;  %v2372_v48 = vpack.c.bf16 %v2302_v6, %v2302_v6  ;;  %v9174_v6 = vld [vmem:[#allocation3 + $0x91c] sm:$0xf] }
 0x53f   : > { %v6942_v2 = vadd.f32 %v10788_v12, %v6941_v35  ;;  %v6206_v23 = vpop.f32.mrf.mxu2  ;;  %v6388_v46 = vadd.f32 %v6387_v8, %v6204_v62  ;;  %v1884_v62 = vld [vmem:[#allocation2 + $0x240] sm:$0xff]  ;;  %v1885_v35 = vld [vmem:[#allocation2 + $0x248] sm:$0xff] }
 0x540   : > { %v6207_v10 = vadd.f32 %v6206_v23, %v11035_v54  ;;  %v2095_v23 = vld [vmem:[#allocation2 + $0x249] sm:$0xff]  ;;  %2442 = vst [vmem:[#allocation3 + $0x920] sm:$0xf] %v2372_v48 }
 0x541   : > { %v9482_v9 = vpack.c.bf16 %v6942_v2, %v6940_v25  ;;  %v1954_v25 = vpack.c.bf16 %v1884_v62, %v1884_v62  ;;  %v1955_v2 = vpack.c.bf16 %v1885_v35, %v1885_v35  ;;  %v2165_v45 = vpack.c.bf16 %v2095_v23, %v2095_v23  ;;  %v8440_v35 = vld [vmem:[#allocation3 + $0x8d8] sm:$0xf] }
 0x542   : > { %v6571_v50 = vpop.f32.mrf.mxu0  ;;  %v2306_v26 = vld [vmem:[#allocation2 + $0x252] sm:$0xff] }
 0x543   : > { %6429 = vmatmul.bf16.gmra.mxu3 %v8365_v32  ;;  %9645 = vst [vmem:[%s10725_s26 + $0x58] sm:$0xff] %v9482_v9   ;;  %v6572_v41 = vadd.f32 %v6571_v50, %v6388_v46  ;;  %v2164_v46 = vpack.c.bf16 %v2094_v19, %v2094_v19  ;;  %v2303_v9 = vld [vmem:[#allocation2 + $0x23a] sm:$0xff]  ;;  %v9170_v19 = vld [vmem:[#allocation3 + $0x8f8] sm:$0xf0] }
 0x544   : > { %2024 = vst [vmem:[#allocation3 + $0x960] sm:$0xf] %v1954_v25  ;;  %v2373_v61 = vpack.c.bf16 %v2303_v9, %v2303_v9  ;;  %v8470_v9 = vld [vmem:[#allocation3 + $0x93c] sm:$0xf0] }
 0x545   : > { %v6685_v52 = vmax.f32 %v6572_v41, 0.0  ;;  %v8432_v41 = vld [vmem:[#allocation3 + $0x8d0] sm:$0xf]  ;;  %2025 = vst [vmem:[#allocation3 + $0x984] sm:$0xf] %v1955_v2  ;;  %v8473_v44 = vor.u32 %v9174_v6, %v8470_v9 }
 0x546   : > { %v6390_v43 = vpop.f32.mrf.mxu3  ;;  %v6944_v15 = vpop.f32.mrf.mxu1  ;;  %2234 = vst [vmem:[#allocation3 + $0x964] sm:$0xf] %v2164_v46 }
 0x547   : > { %v6734_v39 = vpack.c.bf16 %v6685_v52, %v6684_v27  ;;  %v6208_v37 = vpop.f32.mrf.mxu2  ;;  %v6391_v14 = vadd.f32 %v6390_v43, %v6207_v10  ;;  %v6945_v49 = vadd.f32 %v10788_v12, %v6944_v15  ;;  %v9165_v27 = vld [vmem:[#allocation3 + $0x8d4] sm:$0xf]  ;;  %v8433_v52 = vor.u32 %v9169_v38, %v8432_v41  ;;  %2235 = vst [vmem:[#allocation3 + $0x988] sm:$0xf] %v2165_v45  ;;  %v11038_v41 = vld [vmem:[#allocation15_spill] sm:$0xff] }
 0x548   : > { %v6209_v55 = vadd.f32 %v6208_v37, %v11036_v29  ;;  %2443 = vst [vmem:[#allocation3 + $0x944] sm:$0xf] %v2373_v61  ;;  %v8437_v37 = vor.u32 %v9165_v27, %v8434_v5  ;;  %v6035_v38 = vadd.f32 %v11038_v41, %v10591_v17  ;;  %v11039_v45 = vld [vmem:[#allocation14_spill] sm:$0xff] }
 0x549   : > { %8866 = vmatmul.msk.bf16.gmra.mxu1 %vm6769_vm0, %v6734_v39 }
 0x54a   : > { %v6574_v0 = vpop.f32.mrf.mxu0 }
 0x54b   : > { %v6575_v3 = vadd.f32 %v6574_v0, %v6391_v14  ;;  %v1956_v14 = vpack.c.bf16 %v10801_v51, %v10801_v51 }
 0x54c   : > { %6250 = vmatmul.bf16.gmra.mxu2 %v8397_v34  ;;  %6613 = vmatmul.bf16.gmra.mxu0 %v8369_v11 }
 0x54d   : > { %v6686_v50 = vmax.f32 %v6575_v3, 0.0  ;;  %2026 = vst [vmem:[#allocation3 + $0x9a8] sm:$0xf] %v1956_v14  ;;  %v11040_v14 = vld [vmem:[#allocation16_spill] sm:$0xff] }
 0x54e   : > { %v6392_v28 = vpop.f32.mrf.mxu3  ;;  %v6946_v36 = vpop.f32.mrf.mxu1 }
 0x54f   : > { %v6947_v18 = vadd.f32 %v10788_v12, %v6946_v36  ;;  %v6211_v13 = vpop.f32.mrf.mxu2  ;;  %v6393_v16 = vadd.f32 %v6392_v28, %v6209_v55  ;;  %v2096_v36 = vld [vmem:[#allocation2 + $0x251] sm:$0xff] }
 0x550   : > { %v6212_v39 = vadd.f32 %v6211_v13, %v11037_v42  ;;  %v2166_v13 = vpack.c.bf16 %v2096_v36, %v2096_v36  ;;  %v2307_v42 = vld [vmem:[#allocation2 + $0x25a] sm:$0xff] }
 0x551   : > { %v9487_v56 = vpack.c.bf16 %v6947_v18, %v6945_v49  ;;  %v1957_v49 = vpack.c.bf16 %v9423_v57, %v9423_v57  ;;  %v2097_v18 = vld [vmem:[#allocation2 + $0x259] sm:$0xff] }
 0x552   : > { %v6576_v8 = vpop.f32.mrf.mxu0  ;;  %2236 = vst [vmem:[#allocation3 + $0x9ac] sm:$0xf] %v2166_v13 }
 0x553   : > { %6434 = vmatmul.bf16.gmra.mxu3 %v8401_v47  ;;  %9646 = vst [vmem:[%s10725_s26 + $0x60] sm:$0xff] %v9487_v56   ;;  %v6577_v7 = vadd.f32 %v6576_v8, %v6393_v16  ;;  %v2305_v16 = vld [vmem:[#allocation2 + $0x24a] sm:$0xff]  ;;  %v8468_v8 = vld [vmem:[#allocation3 + $0x918] sm:$0xf] }
 0x554   : > { %2027 = vst [vmem:[#allocation3 + $0x9cc] sm:$0xf] %v1957_v49  ;;  %v2375_v23 = vpack.c.bf16 %v2305_v16, %v2305_v16 }
 0x555   : > { %v6687_v43 = vmax.f32 %v6577_v7, 0.0  ;;  %v2167_v7 = vpack.c.bf16 %v2097_v18, %v2097_v18 }
 0x556   : > { %v6395_v32 = vpop.f32.mrf.mxu3  ;;  %v6949_v31 = vpop.f32.mrf.mxu1  ;;  %2445 = vst [vmem:[#allocation3 + $0x98c] sm:$0xf] %v2375_v23 }
 0x557   : > { %v6735_v20 = vpack.c.bf16 %v6687_v43, %v6686_v50  ;;  %v6213_v60 = vpop.f32.mrf.mxu2  ;;  %v6396_v40 = vadd.f32 %v6395_v32, %v6212_v39  ;;  %v6950_v11 = vadd.f32 %v10788_v12, %v6949_v31  ;;  %v9178_v32 = vld [vmem:[#allocation3 + $0x938] sm:$0xf0]  ;;  %v8441_v50 = vor.u32 %v9170_v19, %v8440_v35  ;;  %2237 = vst [vmem:[#allocation3 + $0x9d0] sm:$0xf] %v2167_v7 }
 0x558   : > { %v6214_v1 = vadd.f32 %v6213_v60, %v10585_v30  ;;  %v2304_v30 = vld [vmem:[#allocation2 + $0x242] sm:$0xff]  ;;  %v8469_v51 = vor.u32 %v9178_v32, %v8468_v8  ;;  %v2376_v39 = vpack.c.bf16 %v2306_v26, %v2306_v26 }
 0x559   : > { %8867 = vmatmul.msk.bf16.gmra.mxu1 %vm6769_vm0, %v6735_v20  ;;  %v2374_v25 = vpack.c.bf16 %v2304_v30, %v2304_v30  ;;  %v6040_v30 = vadd.f32 %v10601_v4, %v10599_v21 }
 0x55a   : > { %v6579_v15 = vpop.f32.mrf.mxu0  ;;  %2446 = vst [vmem:[#allocation3 + $0x9b0] sm:$0xf] %v2376_v39 }
 0x55b   : > { %v6580_v10 = vadd.f32 %v6579_v15, %v6396_v40  ;;  %2444 = vst [vmem:[#allocation3 + $0x968] sm:$0xf] %v2374_v25  ;;  %v9187_v40 = vld [vmem:[#allocation3 + $0x980] sm:$0xf0]  ;;  %v9196_v6 = vld [vmem:[#allocation3 + $0x9c8] sm:$0xf0] }
 0x55c   : > { %6255 = vmatmul.bf16.gmra.mxu2 %v8433_v52  ;;  %6618 = vmatmul.bf16.gmra.mxu0 %v8405_v24 }
 0x55d   : > { %v6688_v3 = vmax.f32 %v6580_v10, 0.0 }
 0x55e   : > { %v6397_v22 = vpop.f32.mrf.mxu3  ;;  %v6951_v34 = vpop.f32.mrf.mxu1 }
 0x55f   : > { %v6952_v0 = vadd.f32 %v10788_v12, %v6951_v34  ;;  %v6216_v63 = vpop.f32.mrf.mxu2  ;;  %v6398_v54 = vadd.f32 %v6397_v22, %v6214_v1  ;;  %v2377_v22 = vpack.c.bf16 %v2307_v42, %v2307_v42  ;;  %v8504_v34 = vld [vmem:[#allocation3 + $0x960] sm:$0xf] }
 0x560   : > { %v6217_v31 = vadd.f32 %v6216_v63, %v11039_v45  ;;  %v9179_v63 = vld [vmem:[#allocation3 + $0x940] sm:$0xf0]  ;;  %v9192_v45 = vld [vmem:[#allocation3 + $0x9ac] sm:$0xf] }
 0x561   : > { %v9492_v28 = vpack.c.bf16 %v6952_v0, %v6950_v11  ;;  %v8476_v0 = vld [vmem:[#allocation3 + $0x920] sm:$0xf]  ;;  %2447 = vst [vmem:[#allocation3 + $0x9d4] sm:$0xf] %v2377_v22 }
 0x562   : > { %v6581_v47 = vpop.f32.mrf.mxu0  ;;  %v8512_v9 = vld [vmem:[#allocation3 + $0x968] sm:$0xf] }
 0x563   : > { %6439 = vmatmul.bf16.gmra.mxu3 %v8437_v37  ;;  %9647 = vst [vmem:[%s10725_s26 + $0x68] sm:$0xff] %v9492_v28   ;;  %v6582_v55 = vadd.f32 %v6581_v47, %v6398_v54  ;;  %v8505_v28 = vor.u32 %v9187_v40, %v8504_v34  ;;  %v9183_v47 = vld [vmem:[#allocation3 + $0x964] sm:$0xf] }
 0x565   : > { %v6689_v56 = vmax.f32 %v6582_v55, 0.0  ;;  %v8477_v55 = vor.u32 %v9179_v63, %v8476_v0  ;;  %v8548_v63 = vld [vmem:[#allocation3 + $0x9b0] sm:$0xf] }
 0x566   : > { %v6400_v29 = vpop.f32.mrf.mxu3  ;;  %v6954_v62 = vpop.f32.mrf.mxu1 }
 0x567   : > { %v6736_v2 = vpack.c.bf16 %v6689_v56, %v6688_v3  ;;  %v6218_v46 = vpop.f32.mrf.mxu2  ;;  %v6401_v61 = vadd.f32 %v6400_v29, %v6217_v31  ;;  %v6955_v60 = vadd.f32 %v10788_v12, %v6954_v62  ;;  %v8506_v29 = vld [vmem:[#allocation3 + $0x984] sm:$0xf0]  ;;  %v8542_v31 = vld [vmem:[#allocation3 + $0x9cc] sm:$0xf0] }
 0x568   : > { %v6219_v48 = vadd.f32 %v6218_v46, %v6035_v38  ;;  %v8509_v13 = vor.u32 %v9183_v47, %v8506_v29  ;;  %v8540_v46 = vld [vmem:[#allocation3 + $0x9a8] sm:$0xf] }
 0x569   : > { %8868 = vmatmul.msk.bf16.gmra.mxu1 %vm6769_vm0, %v6736_v2  ;;  %v8541_v38 = vor.u32 %v9196_v6, %v8540_v46 }
 0x56a   : > { %v6584_v43 = vpop.f32.mrf.mxu0 }
 0x56b   : > { %v6585_v24 = vadd.f32 %v6584_v43, %v6401_v61 }
 0x56c   : > { %6260 = vmatmul.bf16.gmra.mxu2 %v8469_v51  ;;  %6623 = vmatmul.bf16.gmra.mxu0 %v8441_v50  ;;  %v9188_v50 = vld [vmem:[#allocation3 + $0x988] sm:$0xf0] }
 0x56d   : > { %v6690_v37 = vmax.f32 %v6585_v24, 0.0 }
 0x56e   : > { %v6402_v33 = vpop.f32.mrf.mxu3  ;;  %v6956_v20 = vpop.f32.mrf.mxu1 }
 0x56f   : > { %v6957_v27 = vadd.f32 %v10788_v12, %v6956_v20  ;;  %v6221_v52 = vpop.f32.mrf.mxu2  ;;  %v6403_v5 = vadd.f32 %v6402_v33, %v6219_v48  ;;  %v8513_v33 = vor.u32 %v9188_v50, %v8512_v9  ;;  %v11041_v48 = vld [vmem:[#allocation18_spill] sm:$0xff]  ;;  %v11042_v20 = vld [vmem:[#allocation19_spill] sm:$0xff]  ;;  %v11047_v9 = vld [vmem:[#allocation24_spill] sm:$0xff] }
 0x570   : > { %v6222_v49 = vadd.f32 %v6221_v52, %v11040_v14  ;;  %v6045_v61 = vadd.f32 %v11042_v20, %v11041_v48  ;;  %v11046_v14 = vld [vmem:[#allocation20_spill] sm:$0xff]  ;;  %v11048_v50 = vld [vmem:[#allocation41_spill] sm:$0xff] }
 0x571   : > { %v9497_v17 = vpack.c.bf16 %v6957_v27, %v6955_v60  ;;  %v11043_v60 = vld [vmem:[#allocation17_spill] sm:$0xff] }
 0x572   : > { %v6586_v59 = vpop.f32.mrf.mxu0 }
 0x573   : > { %6444 = vmatmul.bf16.gmra.mxu3 %v8473_v44  ;;  %9648 = vst [vmem:[%s10725_s26 + $0x70] sm:$0xff] %v9497_v17   ;;  %v6587_v57 = vadd.f32 %v6586_v59, %v6403_v5  ;;  %v8545_v5 = vor.u32 %v9192_v45, %v8542_v31 }
 0x575   : > { %v6691_v1 = vmax.f32 %v6587_v57, 0.0 }
 0x576   : > { %v6405_v15 = vpop.f32.mrf.mxu3  ;;  %v6959_v11 = vpop.f32.mrf.mxu1 }
 0x577   : > { %v6737_v54 = vpack.c.bf16 %v6691_v1, %v6690_v37  ;;  %v6223_v10 = vpop.f32.mrf.mxu2  ;;  %v6406_v56 = vadd.f32 %v6405_v15, %v6222_v49  ;;  %v6960_v8 = vadd.f32 %v10788_v12, %v6959_v11 }
 0x578   : > { %v6224_v16 = vadd.f32 %v6223_v10, %v6040_v30 }
 0x579   : > { %8869 = vmatmul.msk.bf16.gmra.mxu1 %vm6769_vm0, %v6737_v54  ;;  %v9197_v54 = vld [vmem:[#allocation3 + $0x9d0] sm:$0xf0] }
 0x57a   : > { %v6589_v36 = vpop.f32.mrf.mxu0  ;;  %v8549_v47 = vor.u32 %v9197_v54, %v8548_v63 }
 0x57b   : > { %v6590_v35 = vadd.f32 %v6589_v36, %v6406_v56  ;;  %v11045_v36 = vld [vmem:[#allocation22_spill] sm:$0xff] }
 0x57c   : > { %6265 = vmatmul.bf16.gmra.mxu2 %v8505_v28  ;;  %6628 = vmatmul.bf16.gmra.mxu0 %v8477_v55  ;;  %v11044_v55 = vld [vmem:[#allocation21_spill] sm:$0xff] }
 0x57d   : > { %v6692_v2 = vmax.f32 %v6590_v35, 0.0  ;;  %v6050_v30 = vadd.f32 %v11045_v36, %v11044_v55 }
 0x57e   : > { %v6407_v18 = vpop.f32.mrf.mxu3  ;;  %v6961_v3 = vpop.f32.mrf.mxu1 }
 0x57f   : > { %v6962_v32 = vadd.f32 %v10788_v12, %v6961_v3  ;;  %v6226_v7 = vpop.f32.mrf.mxu2  ;;  %v6408_v62 = vadd.f32 %v6407_v18, %v6224_v16 }
 0x580   : > { %v6227_v27 = vadd.f32 %v6226_v7, %v11043_v60 }
 0x581   : > { %v9502_v19 = vpack.c.bf16 %v6962_v32, %v6960_v8 }
 0x582   : > { %v6591_v21 = vpop.f32.mrf.mxu0 }
 0x583   : > { %6449 = vmatmul.bf16.gmra.mxu3 %v8509_v13  ;;  %9649 = vst [vmem:[%s10725_s26 + $0x78] sm:$0xff] %v9502_v19   ;;  %v6592_v25 = vadd.f32 %v6591_v21, %v6408_v62 }
 0x585   : > { %v6693_v23 = vmax.f32 %v6592_v25, 0.0 }
 0x586   : > { %v6410_v4 = vpop.f32.mrf.mxu3  ;;  %v6964_v51 = vpop.f32.mrf.mxu1 }
 0x587   : > { %v6738_v43 = vpack.c.bf16 %v6693_v23, %v6692_v2  ;;  %v6228_v41 = vpop.f32.mrf.mxu2  ;;  %v6411_v59 = vadd.f32 %v6410_v4, %v6227_v27  ;;  %v6965_v15 = vadd.f32 %v10788_v12, %v6964_v51 }
 0x588   : > { %v6229_v24 = vadd.f32 %v6228_v41, %v6045_v61  ;;  %v11049_v41 = vld [vmem:[#allocation23_spill] sm:$0xff] }
 0x589   : > { %8870 = vmatmul.msk.bf16.gmra.mxu1 %vm6769_vm0, %v6738_v43  ;;  %v6055_v43 = vadd.f32 %v11048_v50, %v11047_v9 }
 0x58a   : > { %v6594_v44 = vpop.f32.mrf.mxu0 }
 0x58b   : > { %v6595_v39 = vadd.f32 %v6594_v44, %v6411_v59 }
 0x58c   : > { %6270 = vmatmul.bf16.gmra.mxu2 %v8541_v38  ;;  %6633 = vmatmul.bf16.gmra.mxu0 %v8513_v33 }
 0x58d   : > { %v6694_v40 = vmax.f32 %v6595_v39, 0.0 }
 0x58e   : > { %v6412_v52 = vpop.f32.mrf.mxu3  ;;  %v6966_v17 = vpop.f32.mrf.mxu1 }
 0x58f   : > { %v6967_v57 = vadd.f32 %v10788_v12, %v6966_v17  ;;  %v6231_v26 = vpop.f32.mrf.mxu2  ;;  %v6413_v42 = vadd.f32 %v6412_v52, %v6229_v24 }
 0x590   : > { %v6232_v49 = vadd.f32 %v6231_v26, %v11046_v14 }
 0x591   : > { %v9507_v22 = vpack.c.bf16 %v6967_v57, %v6965_v15 }
 0x592   : > { %v6596_v37 = vpop.f32.mrf.mxu0 }
 0x593   : > { %6454 = vmatmul.bf16.gmra.mxu3 %v8545_v5  ;;  %9650 = vst [vmem:[%s10725_s26 + $0x80] sm:$0xff] %v9507_v22   ;;  %v6597_v34 = vadd.f32 %v6596_v37, %v6413_v42  ;;  %v11050_v22 = vld [vmem:[#allocation26_spill] sm:$0xff] }
 0x594   : > { %v11051_v37 = vld [vmem:[#allocation42_spill] sm:$0xff] }
 0x595   : > { %v6695_v11 = vmax.f32 %v6597_v34, 0.0  ;;  %v11052_v34 = vld [vmem:[#allocation25_spill] sm:$0xff] }
 0x596   : > { %v6415_v1 = vpop.f32.mrf.mxu3  ;;  %v6969_v0 = vpop.f32.mrf.mxu1 }
 0x597   : > { %v6739_v10 = vpack.c.bf16 %v6695_v11, %v6694_v40  ;;  %v6233_v28 = vpop.f32.mrf.mxu2  ;;  %v6416_v3 = vadd.f32 %v6415_v1, %v6232_v49  ;;  %v6970_v56 = vadd.f32 %v10788_v12, %v6969_v0  ;;  %v6060_v1 = vadd.f32 %v11051_v37, %v11050_v22 }
 0x598   : > { %v6234_v13 = vadd.f32 %v6233_v28, %v6050_v30 }
 0x599   : > { %8871 = vmatmul.msk.bf16.gmra.mxu1 %vm6769_vm0, %v6739_v10 }
 0x59a   : > { %v6599_v29 = vpop.f32.mrf.mxu0 }
 0x59b   : > { %v6600_v62 = vadd.f32 %v6599_v29, %v6416_v3 }
 0x59c   : > { %6638 = vmatmul.bf16.gmra.mxu0 %v8549_v47 }
 0x59d   : > { %v6696_v25 = vmax.f32 %v6600_v62, 0.0 }
 0x59e   : > { %v6417_v18 = vpop.f32.mrf.mxu3  ;;  %v6971_v16 = vpop.f32.mrf.mxu1 }
 0x59f   : > { %v6972_v8 = vadd.f32 %v10788_v12, %v6971_v16  ;;  %v6236_v32 = vpop.f32.mrf.mxu2  ;;  %v6418_v7 = vadd.f32 %v6417_v18, %v6234_v13 }
 0x5a0   : > { %v6237_v38 = vadd.f32 %v6236_v32, %v11049_v41  ;;  %v11053_v32 = vld [vmem:[#allocation28_spill] sm:$0xff] }
 0x5a1   : > { %v9512_v35 = vpack.c.bf16 %v6972_v8, %v6970_v56 }
 0x5a2   : > { %v6601_v19 = vpop.f32.mrf.mxu0 }
 0x5a3   : > { %9651 = vst [vmem:[%s10725_s26 + $0x88] sm:$0xff] %v9512_v35   ;;  %v6602_v4 = vadd.f32 %v6601_v19, %v6418_v7  ;;  %v11054_v7 = vld [vmem:[#allocation43_spill] sm:$0xff] }
 0x5a4   : > { %v6065_v62 = vadd.f32 %v11054_v7, %v11053_v32  ;;  %v11055_v35 = vld [vmem:[#allocation27_spill] sm:$0xff] }
 0x5a5   : > { %v6697_v2 = vmax.f32 %v6602_v4, 0.0 }
 0x5a6   : > { %v6420_v21 = vpop.f32.mrf.mxu3  ;;  %v6974_v23 = vpop.f32.mrf.mxu1 }
 0x5a7   : > { %v6740_v46 = vpack.c.bf16 %v6697_v2, %v6696_v25  ;;  %v6238_v51 = vpop.f32.mrf.mxu2  ;;  %v6421_v44 = vadd.f32 %v6420_v21, %v6237_v38  ;;  %v6975_v48 = vadd.f32 %v10788_v12, %v6974_v23 }
 0x5a8   : > { %v6239_v31 = vadd.f32 %v6238_v51, %v6055_v43 }
 0x5a9   : > { %8872 = vmatmul.msk.bf16.gmra.mxu1 %vm6769_vm0, %v6740_v46 }
 0x5aa   : > { %v6604_v6 = vpop.f32.mrf.mxu0 }
 0x5ab   : > { %v6605_v27 = vadd.f32 %v6604_v6, %v6421_v44 }
 0x5ad   : > { %v6698_v59 = vmax.f32 %v6605_v27, 0.0 }
 0x5ae   : > { %v6422_v45 = vpop.f32.mrf.mxu3  ;;  %v6976_v33 = vpop.f32.mrf.mxu1 }
 0x5af   : > { %v6977_v20 = vadd.f32 %v10788_v12, %v6976_v33  ;;  %v6241_v61 = vpop.f32.mrf.mxu2  ;;  %v6423_v60 = vadd.f32 %v6422_v45, %v6239_v31 }
 0x5b0   : > { %v6242_v40 = vadd.f32 %v6241_v61, %v11052_v34  ;;  %v11056_v61 = vld [vmem:[#allocation30_spill] sm:$0xff] }
 0x5b1   : > { %v9517_v52 = vpack.c.bf16 %v6977_v20, %v6975_v48 }
 0x5b2   : > { %v6606_v5 = vpop.f32.mrf.mxu0 }
 0x5b3   : > { %9652 = vst [vmem:[%s10725_s26 + $0x90] sm:$0xff] %v9517_v52   ;;  %v6607_v17 = vadd.f32 %v6606_v5, %v6423_v60  ;;  %v11057_v60 = vld [vmem:[#allocation44_spill] sm:$0xff]  ;;  %v11058_v52 = vld [vmem:[#allocation29_spill] sm:$0xff] }
 0x5b4   : > { %v6070_v27 = vadd.f32 %v11057_v60, %v11056_v61 }
 0x5b5   : > { %v6699_v15 = vmax.f32 %v6607_v17, 0.0 }
 0x5b6   : > { %v6425_v24 = vpop.f32.mrf.mxu3  ;;  %v6979_v57 = vpop.f32.mrf.mxu1 }
 0x5b7   : > { %v6741_v26 = vpack.c.bf16 %v6699_v15, %v6698_v59  ;;  %v6243_v42 = vpop.f32.mrf.mxu2  ;;  %v6426_v54 = vadd.f32 %v6425_v24, %v6242_v40  ;;  %v6980_v10 = vadd.f32 %v10788_v12, %v6979_v57 }
 0x5b8   : > { %v6244_v0 = vadd.f32 %v6243_v42, %v6060_v1 }
 0x5b9   : > { %8873 = vmatmul.msk.bf16.gmra.mxu1 %vm6769_vm0, %v6741_v26 }
 0x5ba   : > { %v6609_v39 = vpop.f32.mrf.mxu0 }
 0x5bb   : > { %v6610_v55 = vadd.f32 %v6609_v39, %v6426_v54 }
 0x5bd   : > { %v6700_v18 = vmax.f32 %v6610_v55, 0.0 }
 0x5be   : > { %v6427_v11 = vpop.f32.mrf.mxu3  ;;  %v6981_v63 = vpop.f32.mrf.mxu1 }
 0x5bf   : > { %v6982_v28 = vadd.f32 %v10788_v12, %v6981_v63  ;;  %v6246_v47 = vpop.f32.mrf.mxu2  ;;  %v6428_v29 = vadd.f32 %v6427_v11, %v6244_v0 }
 0x5c0   : > { %v6247_v19 = vadd.f32 %v6246_v47, %v11055_v35  ;;  %v11059_v47 = vld [vmem:[#allocation32_spill] sm:$0xff] }
 0x5c1   : > { %v9522_v36 = vpack.c.bf16 %v6982_v28, %v6980_v10 }
 0x5c2   : > { %v6611_v30 = vpop.f32.mrf.mxu0 }
 0x5c3   : > { %9653 = vst [vmem:[%s10725_s26 + $0x98] sm:$0xff] %v9522_v36   ;;  %v6612_v49 = vadd.f32 %v6611_v30, %v6428_v29  ;;  %v11060_v29 = vld [vmem:[#allocation45_spill] sm:$0xff]  ;;  %v11061_v36 = vld [vmem:[#allocation31_spill] sm:$0xff] }
 0x5c4   : > { %v6075_v55 = vadd.f32 %v11060_v29, %v11059_v47 }
 0x5c5   : > { %v6701_v13 = vmax.f32 %v6612_v49, 0.0 }
 0x5c6   : > { %v6430_v14 = vpop.f32.mrf.mxu3  ;;  %v6984_v16 = vpop.f32.mrf.mxu1 }
 0x5c7   : > { %v6742_v3 = vpack.c.bf16 %v6701_v13, %v6700_v18  ;;  %v6248_v56 = vpop.f32.mrf.mxu2  ;;  %v6431_v2 = vadd.f32 %v6430_v14, %v6247_v19  ;;  %v6985_v23 = vadd.f32 %v10788_v12, %v6984_v16 }
 0x5c8   : > { %v6249_v4 = vadd.f32 %v6248_v56, %v6065_v62 }
 0x5c9   : > { %8874 = vmatmul.msk.bf16.gmra.mxu1 %vm6769_vm0, %v6742_v3 }
 0x5ca   : > { %v6614_v8 = vpop.f32.mrf.mxu0 }
 0x5cb   : > { %v6615_v9 = vadd.f32 %v6614_v8, %v6431_v2 }
 0x5cd   : > { %v6702_v45 = vmax.f32 %v6615_v9, 0.0 }
 0x5ce   : > { %v6432_v21 = vpop.f32.mrf.mxu3  ;;  %v6986_v25 = vpop.f32.mrf.mxu1 }
 0x5cf   : > { %v6987_v46 = vadd.f32 %v10788_v12, %v6986_v25  ;;  %v6251_v51 = vpop.f32.mrf.mxu2  ;;  %v6433_v6 = vadd.f32 %v6432_v21, %v6249_v4 }
 0x5d0   : > { %v6252_v5 = vadd.f32 %v6251_v51, %v11058_v52  ;;  %v11062_v51 = vld [vmem:[#allocation34_spill] sm:$0xff] }
 0x5d1   : > { %v9527_v50 = vpack.c.bf16 %v6987_v46, %v6985_v23 }
 0x5d2   : > { %v6616_v43 = vpop.f32.mrf.mxu0 }
 0x5d3   : > { %9654 = vst [vmem:[%s10725_s26 + $0xa0] sm:$0xff] %v9527_v50   ;;  %v6617_v38 = vadd.f32 %v6616_v43, %v6433_v6  ;;  %v11063_v6 = vld [vmem:[#allocation46_spill] sm:$0xff]  ;;  %v11064_v50 = vld [vmem:[#allocation33_spill] sm:$0xff] }
 0x5d4   : > { %v6080_v9 = vadd.f32 %v11063_v6, %v11062_v51 }
 0x5d5   : > { %v6703_v31 = vmax.f32 %v6617_v38, 0.0 }
 0x5d6   : > { %v6435_v41 = vpop.f32.mrf.mxu3  ;;  %v6989_v33 = vpop.f32.mrf.mxu1 }
 0x5d7   : > { %v6743_v44 = vpack.c.bf16 %v6703_v31, %v6702_v45  ;;  %v6253_v48 = vpop.f32.mrf.mxu2  ;;  %v6436_v15 = vadd.f32 %v6435_v41, %v6252_v5  ;;  %v6990_v57 = vadd.f32 %v10788_v12, %v6989_v33 }
 0x5d8   : > { %v6254_v17 = vadd.f32 %v6253_v48, %v6070_v27 }
 0x5d9   : > { %8875 = vmatmul.msk.bf16.gmra.mxu1 %vm6769_vm0, %v6743_v44 }
 0x5da   : > { %v6619_v20 = vpop.f32.mrf.mxu0 }
 0x5db   : > { %v6620_v22 = vadd.f32 %v6619_v20, %v6436_v15 }
 0x5dd   : > { %v6704_v11 = vmax.f32 %v6620_v22, 0.0 }
 0x5de   : > { %v6437_v24 = vpop.f32.mrf.mxu3  ;;  %v6991_v59 = vpop.f32.mrf.mxu1 }
 0x5df   : > { %v6992_v26 = vadd.f32 %v10788_v12, %v6991_v59  ;;  %v6256_v42 = vpop.f32.mrf.mxu2  ;;  %v6438_v39 = vadd.f32 %v6437_v24, %v6254_v17 }
 0x5e0   : > { %v6257_v30 = vadd.f32 %v6256_v42, %v11061_v36  ;;  %v11065_v42 = vld [vmem:[#allocation36_spill] sm:$0xff] }
 0x5e1   : > { %v9532_v37 = vpack.c.bf16 %v6992_v26, %v6990_v57 }
 0x5e2   : > { %v6621_v1 = vpop.f32.mrf.mxu0 }
 0x5e3   : > { %9655 = vst [vmem:[%s10725_s26 + $0xa8] sm:$0xff] %v9532_v37   ;;  %v6622_v40 = vadd.f32 %v6621_v1, %v6438_v39  ;;  %v11066_v39 = vld [vmem:[#allocation47_spill] sm:$0xff] }
 0x5e4   : > { %v6085_v22 = vadd.f32 %v11066_v39, %v11065_v42  ;;  %v11067_v37 = vld [vmem:[#allocation35_spill] sm:$0xff] }
 0x5e5   : > { %v6705_v0 = vmax.f32 %v6622_v40, 0.0 }
 0x5e6   : > { %v6440_v34 = vpop.f32.mrf.mxu3  ;;  %v6994_v63 = vpop.f32.mrf.mxu1 }
 0x5e7   : > { %v6744_v54 = vpack.c.bf16 %v6705_v0, %v6704_v11  ;;  %v6258_v10 = vpop.f32.mrf.mxu2  ;;  %v6441_v13 = vadd.f32 %v6440_v34, %v6257_v30  ;;  %v6995_v16 = vadd.f32 %v10788_v12, %v6994_v63 }
 0x5e8   : > { %v6259_v49 = vadd.f32 %v6258_v10, %v6075_v55 }
 0x5e9   : > { %8876 = vmatmul.msk.bf16.gmra.mxu1 %vm6769_vm0, %v6744_v54 }
 0x5ea   : > { %v6624_v28 = vpop.f32.mrf.mxu0 }
 0x5eb   : > { %v6625_v32 = vadd.f32 %v6624_v28, %v6441_v13 }
 0x5ed   : > { %v6706_v21 = vmax.f32 %v6625_v32, 0.0 }
 0x5ee   : > { %v6442_v14 = vpop.f32.mrf.mxu3  ;;  %v6996_v18 = vpop.f32.mrf.mxu1 }
 0x5ef   : > { %v6997_v3 = vadd.f32 %v10788_v12, %v6996_v18  ;;  %v6261_v56 = vpop.f32.mrf.mxu2  ;;  %v6443_v8 = vadd.f32 %v6442_v14, %v6259_v49 }
 0x5f0   : > { %v6262_v43 = vadd.f32 %v6261_v56, %v11064_v50  ;;  %v6090_v56 = vadd.f32 %v10706_v53, %v10678_v58 }
 0x5f1   : > { %v9537_v7 = vpack.c.bf16 %v6997_v3, %v6995_v16 }
 0x5f2   : > { %v6626_v62 = vpop.f32.mrf.mxu0 }
 0x5f3   : > { %9656 = vst [vmem:[%s10725_s26 + $0xb0] sm:$0xff] %v9537_v7   ;;  %v6627_v19 = vadd.f32 %v6626_v62, %v6443_v8  ;;  %v11068_v8 = vld [vmem:[#allocation37_spill] sm:$0xff] }
 0x5f5   : > { %v6707_v4 = vmax.f32 %v6627_v19, 0.0 }
 0x5f6   : > { %v6445_v35 = vpop.f32.mrf.mxu3  ;;  %v6999_v25 = vpop.f32.mrf.mxu1 }
 0x5f7   : > { %v6745_v2 = vpack.c.bf16 %v6707_v4, %v6706_v21  ;;  %v6263_v23 = vpop.f32.mrf.mxu2  ;;  %v6446_v31 = vadd.f32 %v6445_v35, %v6262_v43  ;;  %v7000_v33 = vadd.f32 %v10788_v12, %v6999_v25 }
 0x5f8   : > { %v6264_v38 = vadd.f32 %v6263_v23, %v6080_v9 }
 0x5f9   : > { %8877 = vmatmul.msk.bf16.gmra.mxu1 %vm6769_vm0, %v6745_v2 }
 0x5fa   : > { %v6629_v46 = vpop.f32.mrf.mxu0 }
 0x5fb   : > { %v6630_v61 = vadd.f32 %v6629_v46, %v6446_v31 }
 0x5fd   : > { %v6708_v24 = vmax.f32 %v6630_v61, 0.0 }
 0x5fe   : > { %v6447_v41 = vpop.f32.mrf.mxu3  ;;  %v7001_v45 = vpop.f32.mrf.mxu1 }
 0x5ff   : > { %v7002_v44 = vadd.f32 %v10788_v12, %v7001_v45  ;;  %v6266_v48 = vpop.f32.mrf.mxu2  ;;  %v6448_v20 = vadd.f32 %v6447_v41, %v6264_v38 }
 0x600   : > { %v6267_v1 = vadd.f32 %v6266_v48, %v11067_v37 }
 0x601   : > { %v9542_v60 = vpack.c.bf16 %v7002_v44, %v7000_v33 }
 0x602   : > { %v6631_v27 = vpop.f32.mrf.mxu0 }
 0x603   : > { %9657 = vst [vmem:[%s10725_s26 + $0xb8] sm:$0xff] %v9542_v60   ;;  %v6632_v5 = vadd.f32 %v6631_v27, %v6448_v20 }
 0x605   : > { %v6709_v17 = vmax.f32 %v6632_v5, 0.0 }
 0x606   : > { %v6450_v52 = vpop.f32.mrf.mxu3  ;;  %v7004_v59 = vpop.f32.mrf.mxu1 }
 0x607   : > { %v6746_v15 = vpack.c.bf16 %v6709_v17, %v6708_v24  ;;  %v6268_v57 = vpop.f32.mrf.mxu2  ;;  %v6451_v0 = vadd.f32 %v6450_v52, %v6267_v1  ;;  %v7005_v63 = vadd.f32 %v10788_v12, %v7004_v59 }
 0x608   : > { %v6269_v40 = vadd.f32 %v6268_v57, %v6085_v22 }
 0x609   : > { %8878 = vmatmul.msk.bf16.gmra.mxu1 %vm6769_vm0, %v6746_v15 }
 0x60a   : > { %v6634_v26 = vpop.f32.mrf.mxu0 }
 0x60b   : > { %v6635_v47 = vadd.f32 %v6634_v26, %v6451_v0 }
 0x60d   : > { %v6710_v30 = vmax.f32 %v6635_v47, 0.0 }
 0x60e   : > { %v6452_v34 = vpop.f32.mrf.mxu3  ;;  %v7006_v11 = vpop.f32.mrf.mxu1 }
 0x60f   : > { %v7007_v54 = vadd.f32 %v10788_v12, %v7006_v11  ;;  %v6271_v10 = vpop.f32.mrf.mxu2  ;;  %v6453_v28 = vadd.f32 %v6452_v34, %v6269_v40 }
 0x610   : > { %v6272_v32 = vadd.f32 %v6271_v10, %v11068_v8 }
 0x611   : > { %v9547_v29 = vpack.c.bf16 %v7007_v54, %v7005_v63 }
 0x612   : > { %v6636_v55 = vpop.f32.mrf.mxu0 }
 0x613   : > { %9658 = vst [vmem:[%s10725_s26 + $0xc0] sm:$0xff] %v9547_v29   ;;  %v6637_v36 = vadd.f32 %v6636_v55, %v6453_v28 }
 0x615   : > { %v6711_v14 = vmax.f32 %v6637_v36, 0.0 }
 0x616   : > { %v6455_v49 = vpop.f32.mrf.mxu3  ;;  %v7009_v18 = vpop.f32.mrf.mxu1 }
 0x617   : > { %v6747_v13 = vpack.c.bf16 %v6711_v14, %v6710_v30  ;;  %v6273_v16 = vpop.f32.mrf.mxu2  ;;  %v6456_v35 = vadd.f32 %v6455_v49, %v6272_v32  ;;  %v7010_v19 = vadd.f32 %v10788_v12, %v7009_v18 }
 0x618   : > { %v6274_v7 = vadd.f32 %v6273_v16, %v6090_v56 }
 0x619   : > { %8879 = vmatmul.msk.bf16.gmra.mxu1 %vm6769_vm0, %v6747_v13 }
 0x61a   : > { %v6639_v3 = vpop.f32.mrf.mxu0 }
 0x61b   : > { %v6640_v2 = vadd.f32 %v6639_v3, %v6456_v35 }
 0x61d   : > { %v6712_v6 = vmax.f32 %v6640_v2, 0.0 }
 0x61e   : > { %v7011_v62 = vpop.f32.mrf.mxu1  ;;  %v6457_v4 = vpop.f32.mrf.mxu3 }
 0x61f   : > { %v7012_v21 = vadd.f32 %v10788_v12, %v7011_v62  ;;  %v6458_v25 = vadd.f32 %v6457_v4, %v6274_v7  ;;  %v9710_v12 = vld [vmem:[%s10923_s5] ss:$0 sm:$0xff] }
 0x621   : > { %v9552_v23 = vpack.c.bf16 %v7012_v21, %v7010_v19 }
 0x622   : > { %v6641_v46 = vpop.f32.mrf.mxu0 }
 0x623   : > { %9659 = vst [vmem:[%s10725_s26 + $0xc8] sm:$0xff] %v9552_v23   ;;  %v6642_v51 = vadd.f32 %v6641_v46, %v6458_v25 }
 0x625   : > { %v6713_v58 = vmax.f32 %v6642_v51, 0.0 }
 0x626   : > { %v7014_v53 = vpop.f32.mrf.mxu1 }
 0x627   : > { %v6748_v9 = vpack.c.bf16 %v6713_v58, %v6712_v6  ;;  %v7015_v43 = vadd.f32 %v9710_v12, %v7014_v53 }
 0x629   : > { %8880 = vmatmul.msk.bf16.gmra.mxu1 %vm6769_vm0, %v6748_v9 }
 0x62e   : > { %v7016_v50 = vpop.f32.mrf.mxu1 }
 0x62f   : > { %v7017_v41 = vadd.f32 %v9710_v12, %v7016_v50 }
 0x631   : > { %v9557_v38 = vpack.c.bf16 %v7017_v41, %v7015_v43 }
 0x633   : > { %9660 = vst [vmem:[%s10725_s26 + $0xd0] sm:$0xff] %v9557_v38  }
 0x636   : > { %v7019_v45 = vpop.f32.mrf.mxu1 }
 0x637   : > { %v7020_v33 = vadd.f32 %v9710_v12, %v7019_v45 }
 0x63e   : > { %v7021_v31 = vpop.f32.mrf.mxu1 }
 0x63f   : > { %v7022_v44 = vadd.f32 %v9710_v12, %v7021_v31 }
 0x641   : > { %v9562_v48 = vpack.c.bf16 %v7022_v44, %v7020_v33 }
 0x643   : > { %9661 = vst [vmem:[%s10725_s26 + $0xd8] sm:$0xff] %v9562_v48  }
 0x646   : > { %v7024_v20 = vpop.f32.mrf.mxu1 }
 0x647   : > { %v7025_v60 = vadd.f32 %v9710_v12, %v7024_v20 }
 0x64e   : > { %v7026_v61 = vpop.f32.mrf.mxu1 }
 0x64f   : > { %v7027_v27 = vadd.f32 %v9710_v12, %v7026_v61 }
 0x651   : > { %v9567_v52 = vpack.c.bf16 %v7027_v27, %v7025_v60 }
 0x653   : > { %9662 = vst [vmem:[%s10725_s26 + $0xe0] sm:$0xff] %v9567_v52  }
 0x656   : > { %v7029_v5 = vpop.f32.mrf.mxu1 }
 0x657   : > { %v7030_v17 = vadd.f32 %v9710_v12, %v7029_v5 }
 0x65e   : > { %v7031_v24 = vpop.f32.mrf.mxu1 }
 0x65f   : > { %v7032_v59 = vadd.f32 %v9710_v12, %v7031_v24 }
 0x661   : > { %v9572_v15 = vpack.c.bf16 %v7032_v59, %v7030_v17 }
 0x663   : > { %9663 = vst [vmem:[%s10725_s26 + $0xe8] sm:$0xff] %v9572_v15  }
 0x666   : > { %v7034_v57 = vpop.f32.mrf.mxu1 }
 0x667   : > { %v7035_v42 = vadd.f32 %v9710_v12, %v7034_v57 }
 0x66e   : > { %v7036_v26 = vpop.f32.mrf.mxu1 }
 0x66f   : > { %v7037_v39 = vadd.f32 %v9710_v12, %v7036_v26 }
 0x671   : > { %v9577_v22 = vpack.c.bf16 %v7037_v39, %v7035_v42 }
 0x673   : > { %9664 = vst [vmem:[%s10725_s26 + $0xf0] sm:$0xff] %v9577_v22  }
 0x676   : > { %v7039_v37 = vpop.f32.mrf.mxu1 }
 0x677   : > { %v7040_v34 = vadd.f32 %v9710_v12, %v7039_v37 }
 0x67e   : > { %v7041_v1 = vpop.f32.mrf.mxu1 }
 0x67f   : > { %v7042_v40 = vadd.f32 %v9710_v12, %v7041_v1 }
 0x681   : > { %v9582_v11 = vpack.c.bf16 %v7042_v40, %v7040_v34 }
 0x683   : > { %9665 = vst [vmem:[%s10725_s26 + $0xf8] sm:$0xff] %v9582_v11  }
 0x686   : > { %v7044_v0 = vpop.f32.mrf.mxu1 }
 0x687   : > { %v7045_v54 = vadd.f32 %v9710_v12, %v7044_v0 }
 0x68e   : > { %v7046_v63 = vpop.f32.mrf.mxu1 }
 0x68f   : > { %v7047_v10 = vadd.f32 %v9710_v12, %v7046_v63 }
 0x691   : > { %v9587_v28 = vpack.c.bf16 %v7047_v10, %v7045_v54 }
 0x693   : > { %9666 = vst [vmem:[%s10725_s26 + $0x100] sm:$0xff] %v9587_v28  }
 0x696   : > { %v7049_v47 = vpop.f32.mrf.mxu1 }
 0x697   : > { %v7050_v55 = vadd.f32 %v9710_v12, %v7049_v47 }
 0x69e   : > { %v7051_v29 = vpop.f32.mrf.mxu1 }
 0x69f   : > { %v7052_v36 = vadd.f32 %v9710_v12, %v7051_v29 }
 0x6a1   : > { %v9592_v30 = vpack.c.bf16 %v7052_v36, %v7050_v55 }
 0x6a3   : > { %9667 = vst [vmem:[%s10725_s26 + $0x108] sm:$0xff] %v9592_v30  }
 0x6a6   : > { %v7054_v14 = vpop.f32.mrf.mxu1 }
 0x6a7   : > { %v7055_v18 = vadd.f32 %v9710_v12, %v7054_v14 }
 0x6ae   : > { %v7056_v49 = vpop.f32.mrf.mxu1 }
 0x6af   : > { %v7057_v13 = vadd.f32 %v9710_v12, %v7056_v49 }
 0x6b1   : > { %v9597_v16 = vpack.c.bf16 %v7057_v13, %v7055_v18 }
 0x6b3   : > { %9668 = vst [vmem:[%s10725_s26 + $0x110] sm:$0xff] %v9597_v16  }
 0x6b4 PF: > { %s17_s21 = sadd.s32 1, %s9751_s21  }
 0x6b5   : > { %p14_p9 = scmp.ge.s32.totalorder %s17_s21, 4  }
 0x6b7   :  { %16 = sbr.rel (!%p14_p9) target bundleno = 1 (0x1), region = 82 }
 0x6bc   :  { %7221 = vsyncpa [#allocation5], 1 }
 0x6bd   :  { %7223 = vsyncpa [#allocation5 + $0x1], 1 }

</bundles_post_ra>
